<compile_context>
chip_gen: v5e
topology: v5e:2x2
jax: 0.10.0
libtpu: 0.0.40
codegen_flags: <defaults>
</compile_context>

<pallas_src>
import functools
import math

import jax
import jax.numpy as jnp
from jax import lax
from jax.experimental import pallas as pl
from jax.experimental.pallas import tpu as pltpu

LN_EPS = 1e-5        # torch.nn.LayerNorm default
NEG_INF = -1e30      # finite mask value (no inf - inf -> NaN on fully masked rows)


# ----------------------------------------------------------------------------- kernel

def _build_kernel(n_head, d_head, scale, qlen, use_roll, ffn_chunks):
    """Builds the fused decoder-layer kernel for one batch element (grid=(B,))."""

    def kernel(x_ref, ctx_ref, bt_ref, bs_ref, ln_ref,
               wq_self_ref, wk_self_ref, wv_self_ref, wo_self_ref,
               rwb_ref, remb_ref, srb_ref, shift_ref,
               wq_src_ref, wk_src_ref, wv_src_ref, wo_src_ref,
               w1_ref, b1_ref, w2_ref, b2_ref,
               out_ref, cov_ref,
               res_ref, xn_ref, acc_ref):
        H, T = n_head, qlen

        def layer_norm(v, row):
            g = ln_ref[row:row + 1, :]
            b = ln_ref[row + 1:row + 2, :]
            mu = jnp.mean(v, axis=-1, keepdims=True)
            var = jnp.mean((v - mu) * (v - mu), axis=-1, keepdims=True)
            return (v - mu) * lax.rsqrt(var + LN_EPS) * g + b

        def bf(v):
            return v.astype(jnp.bfloat16)

        def mm(a, b):        # [M,K] @ [K,N]   bf16 operands on the MXU, f32 accumulate
            return jnp.dot(bf(a), bf(b), preferred_element_type=jnp.float32)

        def mm_t(a, b):      # [M,K] @ [N,K]^T bf16 operands on the MXU, f32 accumulate
            return lax.dot_general(bf(a), bf(b), (((1,), (1,)), ((), ())),
                                   preferred_element_type=jnp.float32)

        # residual basis held in f32 VMEM scratch (activations arrive as bf16)
        res_ref[...] = x_ref[0].astype(jnp.float32)

        # ---------- self attention: layernorm > learnable-relative attn > residual ---
        xn_ref[...] = layer_norm(res_ref[...], 0).astype(jnp.bfloat16)
        acc_ref[...] = jnp.zeros_like(acc_ref)
        bias_t = bt_ref[...]                              # [T, T] additive causal bias
        kp = remb_ref.shape[1]                            # 128 (roll) or T (fallback)
        for h in range(H):
            xn = xn_ref[...]
            q = mm(xn, wq_self_ref[h])                    # [T, dh] full tile
            k = mm(xn, wk_self_ref[h])
            v = mm(xn, wv_self_ref[h])
            ac = mm_t(q + rwb_ref[h], k)                  # (q + r_w_bias) . k^T  [T, T]
            c = mm_t(q, remb_ref[h])                      # q . r_emb^T          [T, kp]
            if use_roll:
                # relative shift on the XLU: row i rolled by (kp - T + i) lanes; the
                # padded r_emb layout puts r_emb[m] at column m+1, so rolled[i, j] ==
                # q_i . r_emb[T-1-i+j] exactly in the causal (j <= i) region.
                rolled = pltpu.roll(c, kp - T, axis=1, stride=1, stride_axis=0)
                bd = rolled[:, :T]
            else:
                # one-hot contraction fallback (exact, but VPU/XLU heavy)
                bd = jnp.sum(c[:, None, :] * shift_ref[...], axis=-1)
            s = (ac + bd + srb_ref[h]) * scale + bias_t
            s = s - jnp.max(s, axis=-1, keepdims=True)
            e = jnp.exp(s)
            p = e * pl.reciprocal(jnp.sum(e, axis=-1, keepdims=True), approx=True)
            acc_ref[...] += mm(mm(p, v), wo_self_ref[h])  # accumulate out-proj per head
        res_ref[...] = res_ref[...] + acc_ref[...]

        # ---------- source attention: layernorm > multi-head attn > residual ---------
        xn_ref[...] = layer_norm(res_ref[...], 2).astype(jnp.bfloat16)
        acc_ref[...] = jnp.zeros_like(acc_ref)
        ctx = ctx_ref[0]                                  # [S, D] bf16
        bias_s = bs_ref[0]                                # [1, S] additive padding bias
        for h in range(H):
            xn = xn_ref[...]
            q = mm(xn, wq_src_ref[h])                     # [T, dh]
            k = mm(ctx, wk_src_ref[h])                    # [S, dh]
            v = mm(ctx, wv_src_ref[h])
            s = mm_t(q, k) * scale + bias_s               # [T, S]
            s = s - jnp.max(s, axis=-1, keepdims=True)
            e = jnp.exp(s)
            p = e / jnp.sum(e, axis=-1, keepdims=True)    # exact: exported as coverage
            cov_ref[0, h] = p.astype(cov_ref.dtype)
            acc_ref[...] += mm(mm(p, v), wo_src_ref[h])
        res_ref[...] = res_ref[...] + acc_ref[...]

        # ---------- feed forward: layernorm > linear-relu-linear > residual ----------
        xn_ref[...] = layer_norm(res_ref[...], 4).astype(jnp.bfloat16)
        acc_ref[...] = jnp.zeros_like(acc_ref)
        dff = w1_ref.shape[1]
        chunk = dff // ffn_chunks
        for cix in range(ffn_chunks):
            sl = slice(cix * chunk, (cix + 1) * chunk)
            hidden = jnp.maximum(mm(xn_ref[...], w1_ref[:, sl]) + b1_ref[:, sl], 0.0)
            acc_ref[...] += mm(hidden, w2_ref[sl, :])
        out_ref[0] = (res_ref[...] + acc_ref[...] + b2_ref[...]).astype(out_ref.dtype)

    return kernel


# ----------------------------------------------------------------------------- probe

def _probe_roll_semantics():
    """Verify that pltpu.roll(x, s, axis=1, stride=1, stride_axis=0) rolls row i by
    s + i lanes toward higher indices (np.roll convention).  If the strided roll is
    unavailable or behaves differently, fall back to the one-hot rel-shift path."""
    try:
        rows, lanes, shift = 8, 128, 120

        def k(x_ref, o_ref):
            o_ref[...] = pltpu.roll(x_ref[...], shift, axis=1, stride=1, stride_axis=0)

        x = jnp.arange(rows * lanes, dtype=jnp.float32).reshape(rows, lanes)
        y = pl.pallas_call(
            k, out_shape=jax.ShapeDtypeStruct((rows, lanes), jnp.float32))(x)
        want = jnp.stack([jnp.roll(x[i], shift + i) for i in range(rows)])
        return bool(jnp.array_equal(y, want))
    except Exception:
        return False


# ----------------------------------------------------------------------------- wrapper

def decoder_layer_forward(params, inp_tbd, ctx_sbd, mask_tgt, mask_src, max_len=64,
                          use_roll=True, single_buffer=True):
    """Forward of DistanceTransformerDecoderLayer (inference).

    inp_tbd : [T, B, D]  target-side input (time major, ONMT convention)
    ctx_sbd : [S, B, D]  encoder context (time major)
    mask_tgt: [T, T]     nonzero == masked (future positions)
    mask_src: [B, 1, S]  nonzero == masked (source padding)
    returns (output [T, B, D], coverage [B, H, T, S] bf16, incremental_cache=None)
    """
    T, B, D = inp_tbd.shape
    S = ctx_sbd.shape[0]
    H = params['self_wq'].shape[0]
    dh = D // H
    DFF = params['ffn_w1'].shape[1]

    # ---- per-batch activations: bf16 (halves HBM traffic; matmuls are bf16 anyway) --
    x = jnp.transpose(inp_tbd, (1, 0, 2)).astype(jnp.bfloat16)      # [B, T, D]
    ctx = jnp.transpose(ctx_sbd, (1, 0, 2)).astype(jnp.bfloat16)    # [B, S, D]
    # masks as precomputed additive biases (no per-head compare+select in-kernel)
    bias_t = jnp.where(mask_tgt > 0.5, NEG_INF, 0.0).astype(jnp.float32)   # [T, T]
    bias_s = jnp.where(mask_src > 0.5, NEG_INF, 0.0).astype(jnp.float32)   # [B, 1, S]

    # ---- grid-invariant parameter glue (head-major, no reshapes needed) -------------
    bcast = lambda a: a.astype(jnp.bfloat16)
    ln = jnp.concatenate([params['ln1_g'], params['ln1_b'],
                          params['ln2_g'], params['ln2_b'],
                          params['ln3_g'], params['ln3_b']], axis=0)        # [6, D]
    wq_self, wk_self, wv_self = (bcast(params['self_wq']), bcast(params['self_wk']),
                                 bcast(params['self_wv']))                  # [H, D, dh]
    wo_self = bcast(params['self_wo'])                                      # [H, dh, D]
    wq_src, wk_src, wv_src = (bcast(params['src_wq']), bcast(params['src_wk']),
                              bcast(params['src_wv']))
    wo_src = bcast(params['src_wo'])
    rwb = params['r_w_bias'].reshape(H, 1, dh).astype(jnp.float32)          # [H, 1, dh]

    # Transformer-XL "learnable" tables, sliced to the last T rows (klen == qlen == T).
    r_emb_k = jnp.transpose(params['r_emb'][max_len - T:], (1, 0, 2))       # [H, T, dh]
    ii = jnp.arange(T)[:, None]
    jj = jnp.arange(T)[None, :]
    idx = jnp.clip(T - 1 - ii + jj, 0, T - 1)                               # [T, T]
    srb = jnp.transpose(params['r_bias'][max_len - T:][idx],
                        (2, 0, 1)).astype(jnp.float32)                      # [H, T, T]

    if use_roll and 2 * T > 128:
        use_roll = False                      # strided-roll layout needs 2*T <= 128
    if use_roll:
        kp = 128                              # lane-dense klen pad for the strided roll
        remb = jnp.zeros((H, kp, dh), jnp.bfloat16).at[:, 1:T + 1, :].set(bcast(r_emb_k))
        shift = jnp.zeros((1, 1, 1), jnp.float32)                 # unused dummy
    else:
        kp = T
        remb = bcast(r_emb_k)
        i3 = jnp.arange(T)[:, None, None]
        j3 = jnp.arange(T)[None, :, None]
        m3 = jnp.arange(T)[None, None, :]
        shift = (m3 == (T - 1 - i3 + j3)).astype(jnp.float32)     # [T, T, T] one-hot

    ffn_chunks = DFF // 512 if (DFF % 512 == 0 and DFF > 512) else 1

    # ---- BlockSpecs ------------------------------------------------------------------
    def const_spec(shape):                    # grid-invariant: single buffer
        nd = len(shape)
        if single_buffer:
            return pl.BlockSpec(shape, lambda b: (0,) * nd,
                                pipeline_mode=pl.Buffered(1))
        return pl.BlockSpec(shape, lambda b: (0,) * nd)

    in_specs = [
        pl.BlockSpec((1, T, D), lambda b: (b, 0, 0)),             # x (bf16)
        pl.BlockSpec((1, S, D), lambda b: (b, 0, 0)),             # encoder context
        const_spec((T, T)),                                       # causal mask bias
        pl.BlockSpec((1, 1, S), lambda b: (b, 0, 0)),             # src padding bias
        const_spec((6, D)),                                       # layernorm g/b x3
        const_spec((H, D, dh)), const_spec((H, D, dh)), const_spec((H, D, dh)),
        const_spec((H, dh, D)),                                   # self Wq/Wk/Wv/Wo
        const_spec((H, 1, dh)),                                   # r_w_bias
        const_spec((H, kp, dh)),                                  # r_emb (padded)
        const_spec((H, T, T)),                                    # shifted r_bias
        const_spec(tuple(shift.shape)),                           # one-hot (or dummy)
        const_spec((H, D, dh)), const_spec((H, D, dh)), const_spec((H, D, dh)),
        const_spec((H, dh, D)),                                   # src Wq/Wk/Wv/Wo
        const_spec((D, DFF)), const_spec((1, DFF)),               # ffn W1 / b1
        const_spec((DFF, D)), const_spec((1, D)),                 # ffn W2 / b2
    ]
    out_specs = (pl.BlockSpec((1, T, D), lambda b: (b, 0, 0)),
                 pl.BlockSpec((1, H, T, S), lambda b: (b, 0, 0, 0)))

    kern = _build_kernel(n_head=H, d_head=dh, scale=1.0 / math.sqrt(dh),
                         qlen=T, use_roll=use_roll, ffn_chunks=ffn_chunks)
    out, cov = pl.pallas_call(
        kern,
        out_shape=(jax.ShapeDtypeStruct((B, T, D), jnp.float32),
                   jax.ShapeDtypeStruct((B, H, T, S), jnp.bfloat16)),
        grid=(B,),
        in_specs=in_specs,
        out_specs=out_specs,
        scratch_shapes=[pltpu.VMEM((T, D), jnp.float32),      # residual basis
                        pltpu.VMEM((T, D), jnp.bfloat16),     # layernorm output
                        pltpu.VMEM((T, D), jnp.float32)],     # per-block accumulator
        compiler_params=pltpu.CompilerParams(
            dimension_semantics=("parallel",),                # batch axis -> megacore
            vmem_limit_bytes=48 * 1024 * 1024),
    )(x, ctx, bias_t, bias_s, ln,
      wq_self, wk_self, wv_self, wo_self, rwb, remb, srb, shift,
      wq_src, wk_src, wv_src, wo_src,
      bcast(params['ffn_w1']), params['ffn_b1'].astype(jnp.float32),
      bcast(params['ffn_w2']), params['ffn_b2'].astype(jnp.float32))

    return jnp.transpose(out, (1, 0, 2)), cov, None


# ----------------------------------------------------------------------------- reference

def reference_forward(params, inp_tbd, ctx_sbd, mask_tgt, mask_src, max_len=64):
    """Pure-JAX reference mirroring the kernel's bf16-matmul / f32-accumulate math."""
    T, B, D = inp_tbd.shape
    H = params['self_wq'].shape[0]
    dh = D // H
    scale = 1.0 / math.sqrt(dh)

    def bf(a):
        return a.astype(jnp.bfloat16)

    def mm(a, b):
        return jnp.dot(bf(a), bf(b), preferred_element_type=jnp.float32)

    def layer_norm(v, g, b):
        mu = jnp.mean(v, axis=-1, keepdims=True)
        var = jnp.mean((v - mu) * (v - mu), axis=-1, keepdims=True)
        return (v - mu) * lax.rsqrt(var + LN_EPS) * g + b

    def softmax(s):
        s = s - jnp.max(s, axis=-1, keepdims=True)
        e = jnp.exp(s)
        return e / jnp.sum(e, axis=-1, keepdims=True)

    x_all = jnp.transpose(inp_tbd, (1, 0, 2)).astype(jnp.bfloat16).astype(jnp.float32)
    ctx_all = jnp.transpose(ctx_sbd, (1, 0, 2)).astype(jnp.bfloat16).astype(jnp.float32)
    r_emb_k = params['r_emb'][max_len - T:]                    # [T, H, dh]
    r_bias_k = params['r_bias'][max_len - T:]                  # [T, H]
    ii = jnp.arange(T)[:, None]
    jj = jnp.arange(T)[None, :]
    idx = jnp.clip(T - 1 - ii + jj, 0, T - 1)

    outs, covs = [], []
    for b in range(B):
        x = x_all[b]
        ctx = ctx_all[b]
        # self attention
        xn = layer_norm(x, params['ln1_g'], params['ln1_b'])
        heads = []
        for h in range(H):
            q = mm(xn, params['self_wq'][h])
            k = mm(xn, params['self_wk'][h])
            v = mm(xn, params['self_wv'][h])
            ac = mm(q + params['r_w_bias'][h], k.T)
            c = mm(q, r_emb_k[:, h, :].T)
            bd = jnp.take_along_axis(c, idx, axis=1) + r_bias_k[idx, h]
            s = (ac + bd) * scale
            s = jnp.where(mask_tgt > 0.5, NEG_INF, s)
            heads.append(mm(softmax(s), v))
        x = x + mm(jnp.concatenate(heads, axis=1), params['self_wo'].reshape(H * dh, D))
        # source attention
        xn = layer_norm(x, params['ln2_g'], params['ln2_b'])
        heads, cov_h = [], []
        for h in range(H):
            q = mm(xn, params['src_wq'][h])
            k = mm(ctx, params['src_wk'][h])
            v = mm(ctx, params['src_wv'][h])
            s = mm(q, k.T) * scale
            s = jnp.where(mask_src[b] > 0.5, NEG_INF, s)
            p = softmax(s)
            cov_h.append(p)
            heads.append(mm(p, v))
        x = x + mm(jnp.concatenate(heads, axis=1), params['src_wo'].reshape(H * dh, D))
        covs.append(jnp.stack(cov_h, axis=0))
        # feed forward
        xn = layer_norm(x, params['ln3_g'], params['ln3_b'])
        hidden = jnp.maximum(mm(xn, params['ffn_w1']) + params['ffn_b1'], 0.0)
        x = x + mm(hidden, params['ffn_w2']) + params['ffn_b2']
        outs.append(x)

    out = jnp.transpose(jnp.stack(outs, axis=0), (1, 0, 2))    # [T, B, D]
    coverage = jnp.stack(covs, axis=0)                         # [B, H, T, S]
    return out, coverage


# ----------------------------------------------------------------------------- params

def init_params(key, h, d_model, d_ff, max_len):
    dh = d_model // h
    ks = jax.random.split(key, 16)
    nrm = lambda k, shape, s: jax.random.normal(k, shape, jnp.float32) * s
    return dict(
        ln1_g=1.0 + nrm(ks[13], (1, d_model), 0.1), ln1_b=nrm(ks[14], (1, d_model), 0.1),
        ln2_g=jnp.ones((1, d_model), jnp.float32), ln2_b=jnp.zeros((1, d_model), jnp.float32),
        ln3_g=jnp.ones((1, d_model), jnp.float32), ln3_b=jnp.zeros((1, d_model), jnp.float32),
        # LearnableRelMultiHeadAttn (per-head qkv/o projections, bias-free)
        self_wq=nrm(ks[0], (h, d_model, dh), 0.15),
        self_wk=nrm(ks[1], (h, d_model, dh), 0.15),
        self_wv=nrm(ks[2], (h, d_model, dh), 0.15),
        self_wo=nrm(ks[3], (h, dh, d_model), 0.15),
        r_w_bias=nrm(ks[4], (h, dh), 0.5),
        r_emb=nrm(ks[5], (max_len, h, dh), 0.5),
        r_bias=nrm(ks[6], (max_len, h), 0.5),
        # MultiHeadAttention (source attention, share=2)
        src_wq=nrm(ks[7], (h, d_model, dh), 0.15),
        src_wk=nrm(ks[8], (h, d_model, dh), 0.15),
        src_wv=nrm(ks[9], (h, d_model, dh), 0.15),
        src_wo=nrm(ks[10], (h, dh, d_model), 0.15),
        # FeedForward (linear_relu_linear), with biases
        ffn_w1=nrm(ks[11], (d_model, d_ff), 0.1),
        ffn_b1=nrm(ks[15], (1, d_ff), 0.1),
        ffn_w2=nrm(ks[12], (d_ff, d_model), 0.1),
        ffn_b2=jnp.zeros((1, d_model), jnp.float32),
    )


# ----------------------------------------------------------------------------- main

if __name__ == "__main__":
    H, D_MODEL, D_FF, MAX_LEN = 4, 32, 64, 64
    T, S, B = 8, 8, 2

    key = jax.random.PRNGKey(0)
    pkey, ikey, ckey = jax.random.split(key, 3)
    params = init_params(pkey, H, D_MODEL, D_FF, MAX_LEN)

    inp = jax.random.normal(ikey, (T, B, D_MODEL), jnp.float32)      # target [T, B, D]
    ctx = jax.random.normal(ckey, (S, B, D_MODEL), jnp.float32)      # context [S, B, D]
    mask_tgt = jnp.triu(jnp.ones((T, T), jnp.float32), k=1)          # 1 == masked
    mask_src = jnp.zeros((B, 1, S), jnp.float32).at[1, 0, S - 2:].set(1.0)

    use_roll = _probe_roll_semantics()       # verified strided-roll rel-shift (or fallback)

    def run(single_buffer):
        f = jax.jit(functools.partial(decoder_layer_forward, max_len=MAX_LEN,
                                      use_roll=use_roll, single_buffer=single_buffer))
        o, c, _ = f(params, inp, ctx, mask_tgt, mask_src)
        return jax.block_until_ready((o, c))

    try:
        out, coverage = run(True)
    except Exception:
        # TODO(synk): pipeline_mode=pl.Buffered(1) unsupported on this jax version;
        #             fall back to default double-buffered weight residency.
        out, coverage = run(False)

    assert out.shape == (T, B, D_MODEL)
    assert coverage.shape == (B, H, T, S)
    cov32 = coverage.astype(jnp.float32)
    assert bool(jnp.all(jnp.isfinite(out)))
    assert bool(jnp.all(jnp.isfinite(cov32)))
    # attention rows are valid probability distributions (bf16-quantized coverage)
    assert bool(jnp.allclose(jnp.sum(cov32, axis=-1), 1.0, atol=2e-2))

    # cross-check against a pure-JAX reference using the same bf16/f32 numerics
    ref_out, ref_cov = reference_forward(params, inp, ctx, mask_tgt, mask_src, MAX_LEN)
    assert float(jnp.max(jnp.abs(out - ref_out))) < 2e-2
    assert float(jnp.max(jnp.abs(cov32 - ref_cov))) < 2e-2

    print("KERNEL_OK")
</pallas_src>

<mosaic_0001>
module attributes {stable_mosaic.version = 11 : i64} {
  func.func @k(%arg0: memref<8x128xf32, #tpu.memory_space<vmem>>, %arg1: memref<8x128xf32, #tpu.memory_space<vmem>>) attributes {dimension_semantics = [], scalar_prefetch = 0 : i64, scratch_operands = 0 : i64, tpu.core_type = #tpu.core_type<tc>} {
    %c0 = arith.constant 0 : index
    %c0_0 = arith.constant 0 : index
    %0 = vector.load %arg0[%c0, %c0_0] : memref<8x128xf32, #tpu.memory_space<vmem>>, vector<8x128xf32>
    %c120_i32 = arith.constant 120 : i32
    %1 = tpu.dynamic_rotate %0 by %c120_i32 dim 1 {stride = 1 : si32, stride_dimension = 0 : si32} : vector<8x128xf32>, i32 -> vector<8x128xf32>
    %c0_1 = arith.constant 0 : index
    %c0_2 = arith.constant 0 : index
    %2 = vector.load %arg1[%c0_1, %c0_2] : memref<8x128xf32, #tpu.memory_space<vmem>>, vector<8x128xf32>
    tpu.vector_store %arg1[%c0_1, %c0_2], %1 {strides = array<i32>} : memref<8x128xf32, #tpu.memory_space<vmem>>, vector<8x128xf32>,
    return
  }
}

module attributes {stable_mosaic.version = 11 : i64} {
  func.func @kernel(%arg0: i32, %arg1: memref<1x8x32xbf16, #tpu.memory_space<vmem>>, %arg2: memref<1x8x32xbf16, #tpu.memory_space<vmem>>, %arg3: memref<8x8xf32, #tpu.memory_space<vmem>>, %arg4: memref<1x1x8xf32, #tpu.memory_space<vmem>>, %arg5: memref<6x32xf32, #tpu.memory_space<vmem>>, %arg6: memref<4x32x8xbf16, #tpu.memory_space<vmem>>, %arg7: memref<4x32x8xbf16, #tpu.memory_space<vmem>>, %arg8: memref<4x32x8xbf16, #tpu.memory_space<vmem>>, %arg9: memref<4x8x32xbf16, #tpu.memory_space<vmem>>, %arg10: memref<4x1x8xf32, #tpu.memory_space<vmem>>, %arg11: memref<4x8x8xbf16, #tpu.memory_space<vmem>>, %arg12: memref<4x8x8xf32, #tpu.memory_space<vmem>>, %arg13: memref<8x8x8xf32, #tpu.memory_space<vmem>>, %arg14: memref<4x32x8xbf16, #tpu.memory_space<vmem>>, %arg15: memref<4x32x8xbf16, #tpu.memory_space<vmem>>, %arg16: memref<4x32x8xbf16, #tpu.memory_space<vmem>>, %arg17: memref<4x8x32xbf16, #tpu.memory_space<vmem>>, %arg18: memref<32x64xbf16, #tpu.memory_space<vmem>>, %arg19: memref<1x64xf32, #tpu.memory_space<vmem>>, %arg20: memref<64x32xbf16, #tpu.memory_space<vmem>>, %arg21: memref<1x32xf32, #tpu.memory_space<vmem>>, %arg22: memref<1x8x32xf32, #tpu.memory_space<vmem>>, %arg23: memref<1x4x8x8xbf16, #tpu.memory_space<vmem>>, %arg24: memref<8x32xf32, #tpu.memory_space<vmem>>, %arg25: memref<8x32xbf16, #tpu.memory_space<vmem>>, %arg26: memref<8x32xf32, #tpu.memory_space<vmem>>) attributes {dimension_semantics = [#tpu.dimension_semantics<parallel>], iteration_bounds = array<i64: 2>, scalar_prefetch = 0 : i64, scratch_operands = 3 : i64, tpu.core_type = #tpu.core_type<tc>, window_params = [{transform_indices = @transform_0, window_bounds = array<i64: 1, 8, 32>}, {transform_indices = @transform_1, window_bounds = array<i64: 1, 8, 32>}, {pipeline_mode = #tpu.pipeline_mode<synchronous>, transform_indices = @transform_2, window_bounds = array<i64: 8, 8>}, {transform_indices = @transform_3, window_bounds = array<i64: 1, 1, 8>}, {pipeline_mode = #tpu.pipeline_mode<synchronous>, transform_indices = @transform_4, window_bounds = array<i64: 6, 32>}, {pipeline_mode = #tpu.pipeline_mode<synchronous>, transform_indices = @transform_5, window_bounds = array<i64: 4, 32, 8>}, {pipeline_mode = #tpu.pipeline_mode<synchronous>, transform_indices = @transform_6, window_bounds = array<i64: 4, 32, 8>}, {pipeline_mode = #tpu.pipeline_mode<synchronous>, transform_indices = @transform_7, window_bounds = array<i64: 4, 32, 8>}, {pipeline_mode = #tpu.pipeline_mode<synchronous>, transform_indices = @transform_8, window_bounds = array<i64: 4, 8, 32>}, {pipeline_mode = #tpu.pipeline_mode<synchronous>, transform_indices = @transform_9, window_bounds = array<i64: 4, 1, 8>}, {pipeline_mode = #tpu.pipeline_mode<synchronous>, transform_indices = @transform_10, window_bounds = array<i64: 4, 8, 8>}, {pipeline_mode = #tpu.pipeline_mode<synchronous>, transform_indices = @transform_11, window_bounds = array<i64: 4, 8, 8>}, {pipeline_mode = #tpu.pipeline_mode<synchronous>, transform_indices = @transform_12, window_bounds = array<i64: 8, 8, 8>}, {pipeline_mode = #tpu.pipeline_mode<synchronous>, transform_indices = @transform_13, window_bounds = array<i64: 4, 32, 8>}, {pipeline_mode = #tpu.pipeline_mode<synchronous>, transform_indices = @transform_14, window_bounds = array<i64: 4, 32, 8>}, {pipeline_mode = #tpu.pipeline_mode<synchronous>, transform_indices = @transform_15, window_bounds = array<i64: 4, 32, 8>}, {pipeline_mode = #tpu.pipeline_mode<synchronous>, transform_indices = @transform_16, window_bounds = array<i64: 4, 8, 32>}, {pipeline_mode = #tpu.pipeline_mode<synchronous>, transform_indices = @transform_17, window_bounds = array<i64: 32, 64>}, {pipeline_mode = #tpu.pipeline_mode<synchronous>, transform_indices = @transform_18, window_bounds = array<i64: 1, 64>}, {pipeline_mode = #tpu.pipeline_mode<synchronous>, transform_indices = @transform_19, window_bounds = array<i64: 64, 32>}, {pipeline_mode = #tpu.pipeline_mode<synchronous>, transform_indices = @transform_20, window_bounds = array<i64: 1, 32>}, {transform_indices = @transform_21, window_bounds = array<i64: 1, 8, 32>}, {transform_indices = @transform_22, window_bounds = array<i64: 1, 4, 8, 8>}]} {
    %c0 = arith.constant 0 : index
    %c0_0 = arith.constant 0 : index
    %c0_1 = arith.constant 0 : index
    %0 = vector.load %arg1[%c0, %c0_0, %c0_1] : memref<1x8x32xbf16, #tpu.memory_space<vmem>>, vector<1x8x32xbf16>
    %1 = vector.shape_cast %0 : vector<1x8x32xbf16> to vector<8x32xbf16>
    %2 = arith.extf %1 : vector<8x32xbf16> to vector<8x32xf32>
    %c0_2 = arith.constant 0 : index
    %c0_3 = arith.constant 0 : index
    %3 = vector.load %arg24[%c0_2, %c0_3] : memref<8x32xf32, #tpu.memory_space<vmem>>, vector<8x32xf32>
    tpu.vector_store %arg24[%c0_2, %c0_3], %2 {strides = array<i32>} : memref<8x32xf32, #tpu.memory_space<vmem>>, vector<8x32xf32>,
    %c0_4 = arith.constant 0 : index
    %c0_5 = arith.constant 0 : index
    %4 = vector.load %arg24[%c0_4, %c0_5] : memref<8x32xf32, #tpu.memory_space<vmem>>, vector<8x32xf32>
    %c0_6 = arith.constant 0 : index
    %c0_7 = arith.constant 0 : index
    %5 = vector.load %arg5[%c0_6, %c0_7] : memref<6x32xf32, #tpu.memory_space<vmem>>, vector<1x32xf32>
    %c1 = arith.constant 1 : index
    %c0_8 = arith.constant 0 : index
    %6 = vector.load %arg5[%c1, %c0_8] : memref<6x32xf32, #tpu.memory_space<vmem>>, vector<1x32xf32>
    %cst = arith.constant dense<0.000000e+00> : vector<8xf32>
    %7 = vector.multi_reduction <add>, %4, %cst [1] : vector<8x32xf32> to vector<8xf32>
    %8 = vector.shape_cast %7 : vector<8xf32> to vector<8x1xf32>
    %cst_9 = arith.constant 3.200000e+01 : f32
    %9 = vector.broadcast %cst_9 : f32 to vector<8x1xf32>
    %10 = arith.divf %8, %9 : vector<8x1xf32>
    %11 = vector.broadcast %10 : vector<8x1xf32> to vector<8x32xf32>
    %12 = arith.subf %4, %11 : vector<8x32xf32>
    %13 = vector.broadcast %10 : vector<8x1xf32> to vector<8x32xf32>
    %14 = arith.subf %4, %13 : vector<8x32xf32>
    %15 = arith.mulf %12, %14 : vector<8x32xf32>
    %cst_10 = arith.constant dense<0.000000e+00> : vector<8xf32>
    %16 = vector.multi_reduction <add>, %15, %cst_10 [1] : vector<8x32xf32> to vector<8xf32>
    %17 = vector.shape_cast %16 : vector<8xf32> to vector<8x1xf32>
    %cst_11 = arith.constant 3.200000e+01 : f32
    %18 = vector.broadcast %cst_11 : f32 to vector<8x1xf32>
    %19 = arith.divf %17, %18 : vector<8x1xf32>
    %20 = vector.broadcast %10 : vector<8x1xf32> to vector<8x32xf32>
    %21 = arith.subf %4, %20 : vector<8x32xf32>
    %cst_12 = arith.constant 9.99999974E-6 : f32
    %22 = vector.broadcast %cst_12 : f32 to vector<8x1xf32>
    %23 = arith.addf %19, %22 : vector<8x1xf32>
    %24 = math.rsqrt %23 : vector<8x1xf32>
    %25 = vector.broadcast %24 : vector<8x1xf32> to vector<8x32xf32>
    %26 = arith.mulf %21, %25 : vector<8x32xf32>
    %27 = vector.broadcast %5 : vector<1x32xf32> to vector<8x32xf32>
    %28 = arith.mulf %26, %27 : vector<8x32xf32>
    %29 = vector.broadcast %6 : vector<1x32xf32> to vector<8x32xf32>
    %30 = arith.addf %28, %29 : vector<8x32xf32>
    %31 = arith.truncf %30 : vector<8x32xf32> to vector<8x32xbf16>
    %c0_13 = arith.constant 0 : index
    %c0_14 = arith.constant 0 : index
    %32 = vector.load %arg25[%c0_13, %c0_14] : memref<8x32xbf16, #tpu.memory_space<vmem>>, vector<8x32xbf16>
    tpu.vector_store %arg25[%c0_13, %c0_14], %31 {strides = array<i32>} : memref<8x32xbf16, #tpu.memory_space<vmem>>, vector<8x32xbf16>,
    %cst_15 = arith.constant 0.000000e+00 : f32
    %33 = vector.broadcast %cst_15 : f32 to vector<8x32xf32>
    %c0_16 = arith.constant 0 : index
    %c0_17 = arith.constant 0 : index
    %34 = vector.load %arg26[%c0_16, %c0_17] : memref<8x32xf32, #tpu.memory_space<vmem>>, vector<8x32xf32>
    tpu.vector_store %arg26[%c0_16, %c0_17], %33 {strides = array<i32>} : memref<8x32xf32, #tpu.memory_space<vmem>>, vector<8x32xf32>,
    %c0_18 = arith.constant 0 : index
    %c0_19 = arith.constant 0 : index
    %35 = vector.load %arg3[%c0_18, %c0_19] : memref<8x8xf32, #tpu.memory_space<vmem>>, vector<8x8xf32>
    %c0_20 = arith.constant 0 : index
    %c0_21 = arith.constant 0 : index
    %36 = vector.load %arg25[%c0_20, %c0_21] : memref<8x32xbf16, #tpu.memory_space<vmem>>, vector<8x32xbf16>
    %c0_22 = arith.constant 0 : index
    %c0_23 = arith.constant 0 : index
    %c0_24 = arith.constant 0 : index
    %37 = vector.load %arg6[%c0_22, %c0_23, %c0_24] : memref<4x32x8xbf16, #tpu.memory_space<vmem>>, vector<1x32x8xbf16>
    %38 = vector.shape_cast %37 : vector<1x32x8xbf16> to vector<32x8xbf16>
    %cst_25 = arith.constant dense<0.000000e+00> : vector<8x8xf32>
    %39 = tpu.matmul %36, %38, %cst_25 {dimension_numbers = #tpu.dot_dimension_numbers<[1], [0], [0], [1], [0, 0, 1, 1], [], []>} : vector<8x32xbf16>, vector<32x8xbf16>, vector<8x8xf32> -> vector<8x8xf32>
    %c0_26 = arith.constant 0 : index
    %c0_27 = arith.constant 0 : index
    %c0_28 = arith.constant 0 : index
    %40 = vector.load %arg7[%c0_26, %c0_27, %c0_28] : memref<4x32x8xbf16, #tpu.memory_space<vmem>>, vector<1x32x8xbf16>
    %41 = vector.shape_cast %40 : vector<1x32x8xbf16> to vector<32x8xbf16>
    %cst_29 = arith.constant dense<0.000000e+00> : vector<8x8xf32>
    %42 = tpu.matmul %36, %41, %cst_29 {dimension_numbers = #tpu.dot_dimension_numbers<[1], [0], [0], [1], [0, 0, 1, 1], [], []>} : vector<8x32xbf16>, vector<32x8xbf16>, vector<8x8xf32> -> vector<8x8xf32>
    %c0_30 = arith.constant 0 : index
    %c0_31 = arith.constant 0 : index
    %c0_32 = arith.constant 0 : index
    %43 = vector.load %arg8[%c0_30, %c0_31, %c0_32] : memref<4x32x8xbf16, #tpu.memory_space<vmem>>, vector<1x32x8xbf16>
    %44 = vector.shape_cast %43 : vector<1x32x8xbf16> to vector<32x8xbf16>
    %cst_33 = arith.constant dense<0.000000e+00> : vector<8x8xf32>
    %45 = tpu.matmul %36, %44, %cst_33 {dimension_numbers = #tpu.dot_dimension_numbers<[1], [0], [0], [1], [0, 0, 1, 1], [], []>} : vector<8x32xbf16>, vector<32x8xbf16>, vector<8x8xf32> -> vector<8x8xf32>
    %c0_34 = arith.constant 0 : index
    %c0_35 = arith.constant 0 : index
    %c0_36 = arith.constant 0 : index
    %46 = vector.load %arg10[%c0_34, %c0_35, %c0_36] : memref<4x1x8xf32, #tpu.memory_space<vmem>>, vector<1x1x8xf32>
    %47 = vector.shape_cast %46 : vector<1x1x8xf32> to vector<1x8xf32>
    %48 = vector.broadcast %47 : vector<1x8xf32> to vector<8x8xf32>
    %49 = arith.addf %39, %48 : vector<8x8xf32>
    %50 = arith.truncf %49 : vector<8x8xf32> to vector<8x8xbf16>
    %51 = arith.truncf %42 : vector<8x8xf32> to vector<8x8xbf16>
    %cst_37 = arith.constant dense<0.000000e+00> : vector<8x8xf32>
    %52 = tpu.matmul %50, %51, %cst_37 {dimension_numbers = #tpu.dot_dimension_numbers<[1], [1], [0], [0], [0, 0, 1, 0], [], []>} : vector<8x8xbf16>, vector<8x8xbf16>, vector<8x8xf32> -> vector<8x8xf32>
    %c0_38 = arith.constant 0 : index
    %c0_39 = arith.constant 0 : index
    %c0_40 = arith.constant 0 : index
    %53 = vector.load %arg11[%c0_38, %c0_39, %c0_40] : memref<4x8x8xbf16, #tpu.memory_space<vmem>>, vector<1x8x8xbf16>
    %54 = vector.shape_cast %53 : vector<1x8x8xbf16> to vector<8x8xbf16>
    %55 = arith.truncf %39 : vector<8x8xf32> to vector<8x8xbf16>
    %cst_41 = arith.constant dense<0.000000e+00> : vector<8x8xf32>
    %56 = tpu.matmul %55, %54, %cst_41 {dimension_numbers = #tpu.dot_dimension_numbers<[1], [1], [0], [0], [0, 0, 1, 0], [], []>} : vector<8x8xbf16>, vector<8x8xbf16>, vector<8x8xf32> -> vector<8x8xf32>
    %57 = vector.shape_cast %56 : vector<8x8xf32> to vector<8x1x8xf32>
    %c0_42 = arith.constant 0 : index
    %c0_43 = arith.constant 0 : index
    %c0_44 = arith.constant 0 : index
    %58 = vector.load %arg13[%c0_42, %c0_43, %c0_44] : memref<8x8x8xf32, #tpu.memory_space<vmem>>, vector<8x8x8xf32>
    %59 = vector.broadcast %57 : vector<8x1x8xf32> to vector<8x8x8xf32>
    %60 = arith.mulf %59, %58 : vector<8x8x8xf32>
    %cst_45 = arith.constant dense<0.000000e+00> : vector<8x8xf32>
    %61 = vector.multi_reduction <add>, %60, %cst_45 [2] : vector<8x8x8xf32> to vector<8x8xf32>
    %62 = arith.addf %52, %61 : vector<8x8xf32>
    %c0_46 = arith.constant 0 : index
    %c0_47 = arith.constant 0 : index
    %c0_48 = arith.constant 0 : index
    %63 = vector.load %arg12[%c0_46, %c0_47, %c0_48] : memref<4x8x8xf32, #tpu.memory_space<vmem>>, vector<1x8x8xf32>
    %64 = vector.shape_cast %63 : vector<1x8x8xf32> to vector<8x8xf32>
    %65 = arith.addf %62, %64 : vector<8x8xf32>
    %cst_49 = arith.constant 0.353553385 : f32
    %66 = vector.broadcast %cst_49 : f32 to vector<8x8xf32>
    %67 = arith.mulf %65, %66 : vector<8x8xf32>
    %68 = arith.addf %67, %35 : vector<8x8xf32>
    %cst_50 = arith.constant dense<0xFF800000> : vector<8xf32>
    %69 = vector.multi_reduction <maximumf>, %68, %cst_50 [1] : vector<8x8xf32> to vector<8xf32>
    %70 = vector.shape_cast %69 : vector<8xf32> to vector<8x1xf32>
    %71 = vector.broadcast %70 : vector<8x1xf32> to vector<8x8xf32>
    %72 = arith.subf %68, %71 : vector<8x8xf32>
    %73 = math.exp %72 : vector<8x8xf32>
    %cst_51 = arith.constant dense<0.000000e+00> : vector<8xf32>
    %74 = vector.multi_reduction <add>, %73, %cst_51 [1] : vector<8x8xf32> to vector<8xf32>
    %75 = vector.shape_cast %74 : vector<8xf32> to vector<8x1xf32>
    %76 = tpu.reciprocal %75 {approx = true} : vector<8x1xf32> -> vector<8x1xf32>
    %77 = vector.broadcast %76 : vector<8x1xf32> to vector<8x8xf32>
    %78 = arith.mulf %73, %77 : vector<8x8xf32>
    %c0_52 = arith.constant 0 : index
    %c0_53 = arith.constant 0 : index
    %79 = vector.load %arg26[%c0_52, %c0_53] : memref<8x32xf32, #tpu.memory_space<vmem>>, vector<8x32xf32>
    %80 = arith.truncf %78 : vector<8x8xf32> to vector<8x8xbf16>
    %81 = arith.truncf %45 : vector<8x8xf32> to vector<8x8xbf16>
    %cst_54 = arith.constant dense<0.000000e+00> : vector<8x8xf32>
    %82 = tpu.matmul %80, %81, %cst_54 {dimension_numbers = #tpu.dot_dimension_numbers<[1], [0], [0], [1], [0, 0, 1, 1], [], []>} : vector<8x8xbf16>, vector<8x8xbf16>, vector<8x8xf32> -> vector<8x8xf32>
    %c0_55 = arith.constant 0 : index
    %c0_56 = arith.constant 0 : index
    %c0_57 = arith.constant 0 : index
    %83 = vector.load %arg9[%c0_55, %c0_56, %c0_57] : memref<4x8x32xbf16, #tpu.memory_space<vmem>>, vector<1x8x32xbf16>
    %84 = vector.shape_cast %83 : vector<1x8x32xbf16> to vector<8x32xbf16>
    %85 = arith.truncf %82 : vector<8x8xf32> to vector<8x8xbf16>
    %cst_58 = arith.constant dense<0.000000e+00> : vector<8x32xf32>
    %86 = tpu.matmul %85, %84, %cst_58 {dimension_numbers = #tpu.dot_dimension_numbers<[1], [0], [0], [1], [0, 0, 1, 1], [], []>} : vector<8x8xbf16>, vector<8x32xbf16>, vector<8x32xf32> -> vector<8x32xf32>
    %87 = arith.addf %79, %86 : vector<8x32xf32>
    %c0_59 = arith.constant 0 : index
    %c0_60 = arith.constant 0 : index
    %88 = vector.load %arg26[%c0_59, %c0_60] : memref<8x32xf32, #tpu.memory_space<vmem>>, vector<8x32xf32>
    tpu.vector_store %arg26[%c0_59, %c0_60], %87 {strides = array<i32>} : memref<8x32xf32, #tpu.memory_space<vmem>>, vector<8x32xf32>,
    %c0_61 = arith.constant 0 : index
    %c0_62 = arith.constant 0 : index
    %89 = vector.load %arg25[%c0_61, %c0_62] : memref<8x32xbf16, #tpu.memory_space<vmem>>, vector<8x32xbf16>
    %c1_63 = arith.constant 1 : index
    %c0_64 = arith.constant 0 : index
    %c0_65 = arith.constant 0 : index
    %90 = vector.load %arg6[%c1_63, %c0_64, %c0_65] : memref<4x32x8xbf16, #tpu.memory_space<vmem>>, vector<1x32x8xbf16>
    %91 = vector.shape_cast %90 : vector<1x32x8xbf16> to vector<32x8xbf16>
    %cst_66 = arith.constant dense<0.000000e+00> : vector<8x8xf32>
    %92 = tpu.matmul %89, %91, %cst_66 {dimension_numbers = #tpu.dot_dimension_numbers<[1], [0], [0], [1], [0, 0, 1, 1], [], []>} : vector<8x32xbf16>, vector<32x8xbf16>, vector<8x8xf32> -> vector<8x8xf32>
    %c1_67 = arith.constant 1 : index
    %c0_68 = arith.constant 0 : index
    %c0_69 = arith.constant 0 : index
    %93 = vector.load %arg7[%c1_67, %c0_68, %c0_69] : memref<4x32x8xbf16, #tpu.memory_space<vmem>>, vector<1x32x8xbf16>
    %94 = vector.shape_cast %93 : vector<1x32x8xbf16> to vector<32x8xbf16>
    %cst_70 = arith.constant dense<0.000000e+00> : vector<8x8xf32>
    %95 = tpu.matmul %89, %94, %cst_70 {dimension_numbers = #tpu.dot_dimension_numbers<[1], [0], [0], [1], [0, 0, 1, 1], [], []>} : vector<8x32xbf16>, vector<32x8xbf16>, vector<8x8xf32> -> vector<8x8xf32>
    %c1_71 = arith.constant 1 : index
    %c0_72 = arith.constant 0 : index
    %c0_73 = arith.constant 0 : index
    %96 = vector.load %arg8[%c1_71, %c0_72, %c0_73] : memref<4x32x8xbf16, #tpu.memory_space<vmem>>, vector<1x32x8xbf16>
    %97 = vector.shape_cast %96 : vector<1x32x8xbf16> to vector<32x8xbf16>
    %cst_74 = arith.constant dense<0.000000e+00> : vector<8x8xf32>
    %98 = tpu.matmul %89, %97, %cst_74 {dimension_numbers = #tpu.dot_dimension_numbers<[1], [0], [0], [1], [0, 0, 1, 1], [], []>} : vector<8x32xbf16>, vector<32x8xbf16>, vector<8x8xf32> -> vector<8x8xf32>
    %c1_75 = arith.constant 1 : index
    %c0_76 = arith.constant 0 : index
    %c0_77 = arith.constant 0 : index
    %99 = vector.load %arg10[%c1_75, %c0_76, %c0_77] : memref<4x1x8xf32, #tpu.memory_space<vmem>>, vector<1x1x8xf32>
    %100 = vector.shape_cast %99 : vector<1x1x8xf32> to vector<1x8xf32>
    %101 = vector.broadcast %100 : vector<1x8xf32> to vector<8x8xf32>
    %102 = arith.addf %92, %101 : vector<8x8xf32>
    %103 = arith.truncf %102 : vector<8x8xf32> to vector<8x8xbf16>
    %104 = arith.truncf %95 : vector<8x8xf32> to vector<8x8xbf16>
    %cst_78 = arith.constant dense<0.000000e+00> : vector<8x8xf32>
    %105 = tpu.matmul %103, %104, %cst_78 {dimension_numbers = #tpu.dot_dimension_numbers<[1], [1], [0], [0], [0, 0, 1, 0], [], []>} : vector<8x8xbf16>, vector<8x8xbf16>, vector<8x8xf32> -> vector<8x8xf32>
    %c1_79 = arith.constant 1 : index
    %c0_80 = arith.constant 0 : index
    %c0_81 = arith.constant 0 : index
    %106 = vector.load %arg11[%c1_79, %c0_80, %c0_81] : memref<4x8x8xbf16, #tpu.memory_space<vmem>>, vector<1x8x8xbf16>
    %107 = vector.shape_cast %106 : vector<1x8x8xbf16> to vector<8x8xbf16>
    %108 = arith.truncf %92 : vector<8x8xf32> to vector<8x8xbf16>
    %cst_82 = arith.constant dense<0.000000e+00> : vector<8x8xf32>
    %109 = tpu.matmul %108, %107, %cst_82 {dimension_numbers = #tpu.dot_dimension_numbers<[1], [1], [0], [0], [0, 0, 1, 0], [], []>} : vector<8x8xbf16>, vector<8x8xbf16>, vector<8x8xf32> -> vector<8x8xf32>
    %110 = vector.shape_cast %109 : vector<8x8xf32> to vector<8x1x8xf32>
    %c0_83 = arith.constant 0 : index
    %c0_84 = arith.constant 0 : index
    %c0_85 = arith.constant 0 : index
    %111 = vector.load %arg13[%c0_83, %c0_84, %c0_85] : memref<8x8x8xf32, #tpu.memory_space<vmem>>, vector<8x8x8xf32>
    %112 = vector.broadcast %110 : vector<8x1x8xf32> to vector<8x8x8xf32>
    %113 = arith.mulf %112, %111 : vector<8x8x8xf32>
    %cst_86 = arith.constant dense<0.000000e+00> : vector<8x8xf32>
    %114 = vector.multi_reduction <add>, %113, %cst_86 [2] : vector<8x8x8xf32> to vector<8x8xf32>
    %115 = arith.addf %105, %114 : vector<8x8xf32>
    %c1_87 = arith.constant 1 : index
    %c0_88 = arith.constant 0 : index
    %c0_89 = arith.constant 0 : index
    %116 = vector.load %arg12[%c1_87, %c0_88, %c0_89] : memref<4x8x8xf32, #tpu.memory_space<vmem>>, vector<1x8x8xf32>
    %117 = vector.shape_cast %116 : vector<1x8x8xf32> to vector<8x8xf32>
    %118 = arith.addf %115, %117 : vector<8x8xf32>
    %cst_90 = arith.constant 0.353553385 : f32
    %119 = vector.broadcast %cst_90 : f32 to vector<8x8xf32>
    %120 = arith.mulf %118, %119 : vector<8x8xf32>
    %121 = arith.addf %120, %35 : vector<8x8xf32>
    %cst_91 = arith.constant dense<0xFF800000> : vector<8xf32>
    %122 = vector.multi_reduction <maximumf>, %121, %cst_91 [1] : vector<8x8xf32> to vector<8xf32>
    %123 = vector.shape_cast %122 : vector<8xf32> to vector<8x1xf32>
    %124 = vector.broadcast %123 : vector<8x1xf32> to vector<8x8xf32>
    %125 = arith.subf %121, %124 : vector<8x8xf32>
    %126 = math.exp %125 : vector<8x8xf32>
    %cst_92 = arith.constant dense<0.000000e+00> : vector<8xf32>
    %127 = vector.multi_reduction <add>, %126, %cst_92 [1] : vector<8x8xf32> to vector<8xf32>
    %128 = vector.shape_cast %127 : vector<8xf32> to vector<8x1xf32>
    %129 = tpu.reciprocal %128 {approx = true} : vector<8x1xf32> -> vector<8x1xf32>
    %130 = vector.broadcast %129 : vector<8x1xf32> to vector<8x8xf32>
    %131 = arith.mulf %126, %130 : vector<8x8xf32>
    %c0_93 = arith.constant 0 : index
    %c0_94 = arith.constant 0 : index
    %132 = vector.load %arg26[%c0_93, %c0_94] : memref<8x32xf32, #tpu.memory_space<vmem>>, vector<8x32xf32>
    %133 = arith.truncf %131 : vector<8x8xf32> to vector<8x8xbf16>
    %134 = arith.truncf %98 : vector<8x8xf32> to vector<8x8xbf16>
    %cst_95 = arith.constant dense<0.000000e+00> : vector<8x8xf32>
    %135 = tpu.matmul %133, %134, %cst_95 {dimension_numbers = #tpu.dot_dimension_numbers<[1], [0], [0], [1], [0, 0, 1, 1], [], []>} : vector<8x8xbf16>, vector<8x8xbf16>, vector<8x8xf32> -> vector<8x8xf32>
    %c1_96 = arith.constant 1 : index
    %c0_97 = arith.constant 0 : index
    %c0_98 = arith.constant 0 : index
    %136 = vector.load %arg9[%c1_96, %c0_97, %c0_98] : memref<4x8x32xbf16, #tpu.memory_space<vmem>>, vector<1x8x32xbf16>
    %137 = vector.shape_cast %136 : vector<1x8x32xbf16> to vector<8x32xbf16>
    %138 = arith.truncf %135 : vector<8x8xf32> to vector<8x8xbf16>
    %cst_99 = arith.constant dense<0.000000e+00> : vector<8x32xf32>
    %139 = tpu.matmul %138, %137, %cst_99 {dimension_numbers = #tpu.dot_dimension_numbers<[1], [0], [0], [1], [0, 0, 1, 1], [], []>} : vector<8x8xbf16>, vector<8x32xbf16>, vector<8x32xf32> -> vector<8x32xf32>
    %140 = arith.addf %132, %139 : vector<8x32xf32>
    %c0_100 = arith.constant 0 : index
    %c0_101 = arith.constant 0 : index
    %141 = vector.load %arg26[%c0_100, %c0_101] : memref<8x32xf32, #tpu.memory_space<vmem>>, vector<8x32xf32>
    tpu.vector_store %arg26[%c0_100, %c0_101], %140 {strides = array<i32>} : memref<8x32xf32, #tpu.memory_space<vmem>>, vector<8x32xf32>,
    %c0_102 = arith.constant 0 : index
    %c0_103 = arith.constant 0 : index
    %142 = vector.load %arg25[%c0_102, %c0_103] : memref<8x32xbf16, #tpu.memory_space<vmem>>, vector<8x32xbf16>
    %c2 = arith.constant 2 : index
    %c0_104 = arith.constant 0 : index
    %c0_105 = arith.constant 0 : index
    %143 = vector.load %arg6[%c2, %c0_104, %c0_105] : memref<4x32x8xbf16, #tpu.memory_space<vmem>>, vector<1x32x8xbf16>
    %144 = vector.shape_cast %143 : vector<1x32x8xbf16> to vector<32x8xbf16>
    %cst_106 = arith.constant dense<0.000000e+00> : vector<8x8xf32>
    %145 = tpu.matmul %142, %144, %cst_106 {dimension_numbers = #tpu.dot_dimension_numbers<[1], [0], [0], [1], [0, 0, 1, 1], [], []>} : vector<8x32xbf16>, vector<32x8xbf16>, vector<8x8xf32> -> vector<8x8xf32>
    %c2_107 = arith.constant 2 : index
    %c0_108 = arith.constant 0 : index
    %c0_109 = arith.constant 0 : index
    %146 = vector.load %arg7[%c2_107, %c0_108, %c0_109] : memref<4x32x8xbf16, #tpu.memory_space<vmem>>, vector<1x32x8xbf16>
    %147 = vector.shape_cast %146 : vector<1x32x8xbf16> to vector<32x8xbf16>
    %cst_110 = arith.constant dense<0.000000e+00> : vector<8x8xf32>
    %148 = tpu.matmul %142, %147, %cst_110 {dimension_numbers = #tpu.dot_dimension_numbers<[1], [0], [0], [1], [0, 0, 1, 1], [], []>} : vector<8x32xbf16>, vector<32x8xbf16>, vector<8x8xf32> -> vector<8x8xf32>
    %c2_111 = arith.constant 2 : index
    %c0_112 = arith.constant 0 : index
    %c0_113 = arith.constant 0 : index
    %149 = vector.load %arg8[%c2_111, %c0_112, %c0_113] : memref<4x32x8xbf16, #tpu.memory_space<vmem>>, vector<1x32x8xbf16>
    %150 = vector.shape_cast %149 : vector<1x32x8xbf16> to vector<32x8xbf16>
    %cst_114 = arith.constant dense<0.000000e+00> : vector<8x8xf32>
    %151 = tpu.matmul %142, %150, %cst_114 {dimension_numbers = #tpu.dot_dimension_numbers<[1], [0], [0], [1], [0, 0, 1, 1], [], []>} : vector<8x32xbf16>, vector<32x8xbf16>, vector<8x8xf32> -> vector<8x8xf32>
    %c2_115 = arith.constant 2 : index
    %c0_116 = arith.constant 0 : index
    %c0_117 = arith.constant 0 : index
    %152 = vector.load %arg10[%c2_115, %c0_116, %c0_117] : memref<4x1x8xf32, #tpu.memory_space<vmem>>, vector<1x1x8xf32>
    %153 = vector.shape_cast %152 : vector<1x1x8xf32> to vector<1x8xf32>
    %154 = vector.broadcast %153 : vector<1x8xf32> to vector<8x8xf32>
    %155 = arith.addf %145, %154 : vector<8x8xf32>
    %156 = arith.truncf %155 : vector<8x8xf32> to vector<8x8xbf16>
    %157 = arith.truncf %148 : vector<8x8xf32> to vector<8x8xbf16>
    %cst_118 = arith.constant dense<0.000000e+00> : vector<8x8xf32>
    %158 = tpu.matmul %156, %157, %cst_118 {dimension_numbers = #tpu.dot_dimension_numbers<[1], [1], [0], [0], [0, 0, 1, 0], [], []>} : vector<8x8xbf16>, vector<8x8xbf16>, vector<8x8xf32> -> vector<8x8xf32>
    %c2_119 = arith.constant 2 : index
    %c0_120 = arith.constant 0 : index
    %c0_121 = arith.constant 0 : index
    %159 = vector.load %arg11[%c2_119, %c0_120, %c0_121] : memref<4x8x8xbf16, #tpu.memory_space<vmem>>, vector<1x8x8xbf16>
    %160 = vector.shape_cast %159 : vector<1x8x8xbf16> to vector<8x8xbf16>
    %161 = arith.truncf %145 : vector<8x8xf32> to vector<8x8xbf16>
    %cst_122 = arith.constant dense<0.000000e+00> : vector<8x8xf32>
    %162 = tpu.matmul %161, %160, %cst_122 {dimension_numbers = #tpu.dot_dimension_numbers<[1], [1], [0], [0], [0, 0, 1, 0], [], []>} : vector<8x8xbf16>, vector<8x8xbf16>, vector<8x8xf32> -> vector<8x8xf32>
    %163 = vector.shape_cast %162 : vector<8x8xf32> to vector<8x1x8xf32>
    %c0_123 = arith.constant 0 : index
    %c0_124 = arith.constant 0 : index
    %c0_125 = arith.constant 0 : index
    %164 = vector.load %arg13[%c0_123, %c0_124, %c0_125] : memref<8x8x8xf32, #tpu.memory_space<vmem>>, vector<8x8x8xf32>
    %165 = vector.broadcast %163 : vector<8x1x8xf32> to vector<8x8x8xf32>
    %166 = arith.mulf %165, %164 : vector<8x8x8xf32>
    %cst_126 = arith.constant dense<0.000000e+00> : vector<8x8xf32>
    %167 = vector.multi_reduction <add>, %166, %cst_126 [2] : vector<8x8x8xf32> to vector<8x8xf32>
    %168 = arith.addf %158, %167 : vector<8x8xf32>
    %c2_127 = arith.constant 2 : index
    %c0_128 = arith.constant 0 : index
    %c0_129 = arith.constant 0 : index
    %169 = vector.load %arg12[%c2_127, %c0_128, %c0_129] : memref<4x8x8xf32, #tpu.memory_space<vmem>>, vector<1x8x8xf32>
    %170 = vector.shape_cast %169 : vector<1x8x8xf32> to vector<8x8xf32>
    %171 = arith.addf %168, %170 : vector<8x8xf32>
    %cst_130 = arith.constant 0.353553385 : f32
    %172 = vector.broadcast %cst_130 : f32 to vector<8x8xf32>
    %173 = arith.mulf %171, %172 : vector<8x8xf32>
    %174 = arith.addf %173, %35 : vector<8x8xf32>
    %cst_131 = arith.constant dense<0xFF800000> : vector<8xf32>
    %175 = vector.multi_reduction <maximumf>, %174, %cst_131 [1] : vector<8x8xf32> to vector<8xf32>
    %176 = vector.shape_cast %175 : vector<8xf32> to vector<8x1xf32>
    %177 = vector.broadcast %176 : vector<8x1xf32> to vector<8x8xf32>
    %178 = arith.subf %174, %177 : vector<8x8xf32>
    %179 = math.exp %178 : vector<8x8xf32>
    %cst_132 = arith.constant dense<0.000000e+00> : vector<8xf32>
    %180 = vector.multi_reduction <add>, %179, %cst_132 [1] : vector<8x8xf32> to vector<8xf32>
    %181 = vector.shape_cast %180 : vector<8xf32> to vector<8x1xf32>
    %182 = tpu.reciprocal %181 {approx = true} : vector<8x1xf32> -> vector<8x1xf32>
    %183 = vector.broadcast %182 : vector<8x1xf32> to vector<8x8xf32>
    %184 = arith.mulf %179, %183 : vector<8x8xf32>
    %c0_133 = arith.constant 0 : index
    %c0_134 = arith.constant 0 : index
    %185 = vector.load %arg26[%c0_133, %c0_134] : memref<8x32xf32, #tpu.memory_space<vmem>>, vector<8x32xf32>
    %186 = arith.truncf %184 : vector<8x8xf32> to vector<8x8xbf16>
    %187 = arith.truncf %151 : vector<8x8xf32> to vector<8x8xbf16>
    %cst_135 = arith.constant dense<0.000000e+00> : vector<8x8xf32>
    %188 = tpu.matmul %186, %187, %cst_135 {dimension_numbers = #tpu.dot_dimension_numbers<[1], [0], [0], [1], [0, 0, 1, 1], [], []>} : vector<8x8xbf16>, vector<8x8xbf16>, vector<8x8xf32> -> vector<8x8xf32>
    %c2_136 = arith.constant 2 : index
    %c0_137 = arith.constant 0 : index
    %c0_138 = arith.constant 0 : index
    %189 = vector.load %arg9[%c2_136, %c0_137, %c0_138] : memref<4x8x32xbf16, #tpu.memory_space<vmem>>, vector<1x8x32xbf16>
    %190 = vector.shape_cast %189 : vector<1x8x32xbf16> to vector<8x32xbf16>
    %191 = arith.truncf %188 : vector<8x8xf32> to vector<8x8xbf16>
    %cst_139 = arith.constant dense<0.000000e+00> : vector<8x32xf32>
    %192 = tpu.matmul %191, %190, %cst_139 {dimension_numbers = #tpu.dot_dimension_numbers<[1], [0], [0], [1], [0, 0, 1, 1], [], []>} : vector<8x8xbf16>, vector<8x32xbf16>, vector<8x32xf32> -> vector<8x32xf32>
    %193 = arith.addf %185, %192 : vector<8x32xf32>
    %c0_140 = arith.constant 0 : index
    %c0_141 = arith.constant 0 : index
    %194 = vector.load %arg26[%c0_140, %c0_141] : memref<8x32xf32, #tpu.memory_space<vmem>>, vector<8x32xf32>
    tpu.vector_store %arg26[%c0_140, %c0_141], %193 {strides = array<i32>} : memref<8x32xf32, #tpu.memory_space<vmem>>, vector<8x32xf32>,
    %c0_142 = arith.constant 0 : index
    %c0_143 = arith.constant 0 : index
    %195 = vector.load %arg25[%c0_142, %c0_143] : memref<8x32xbf16, #tpu.memory_space<vmem>>, vector<8x32xbf16>
    %c3 = arith.constant 3 : index
    %c0_144 = arith.constant 0 : index
    %c0_145 = arith.constant 0 : index
    %196 = vector.load %arg6[%c3, %c0_144, %c0_145] : memref<4x32x8xbf16, #tpu.memory_space<vmem>>, vector<1x32x8xbf16>
    %197 = vector.shape_cast %196 : vector<1x32x8xbf16> to vector<32x8xbf16>
    %cst_146 = arith.constant dense<0.000000e+00> : vector<8x8xf32>
    %198 = tpu.matmul %195, %197, %cst_146 {dimension_numbers = #tpu.dot_dimension_numbers<[1], [0], [0], [1], [0, 0, 1, 1], [], []>} : vector<8x32xbf16>, vector<32x8xbf16>, vector<8x8xf32> -> vector<8x8xf32>
    %c3_147 = arith.constant 3 : index
    %c0_148 = arith.constant 0 : index
    %c0_149 = arith.constant 0 : index
    %199 = vector.load %arg7[%c3_147, %c0_148, %c0_149] : memref<4x32x8xbf16, #tpu.memory_space<vmem>>, vector<1x32x8xbf16>
    %200 = vector.shape_cast %199 : vector<1x32x8xbf16> to vector<32x8xbf16>
    %cst_150 = arith.constant dense<0.000000e+00> : vector<8x8xf32>
    %201 = tpu.matmul %195, %200, %cst_150 {dimension_numbers = #tpu.dot_dimension_numbers<[1], [0], [0], [1], [0, 0, 1, 1], [], []>} : vector<8x32xbf16>, vector<32x8xbf16>, vector<8x8xf32> -> vector<8x8xf32>
    %c3_151 = arith.constant 3 : index
    %c0_152 = arith.constant 0 : index
    %c0_153 = arith.constant 0 : index
    %202 = vector.load %arg8[%c3_151, %c0_152, %c0_153] : memref<4x32x8xbf16, #tpu.memory_space<vmem>>, vector<1x32x8xbf16>
    %203 = vector.shape_cast %202 : vector<1x32x8xbf16> to vector<32x8xbf16>
    %cst_154 = arith.constant dense<0.000000e+00> : vector<8x8xf32>
    %204 = tpu.matmul %195, %203, %cst_154 {dimension_numbers = #tpu.dot_dimension_numbers<[1], [0], [0], [1], [0, 0, 1, 1], [], []>} : vector<8x32xbf16>, vector<32x8xbf16>, vector<8x8xf32> -> vector<8x8xf32>
    %c3_155 = arith.constant 3 : index
    %c0_156 = arith.constant 0 : index
    %c0_157 = arith.constant 0 : index
    %205 = vector.load %arg10[%c3_155, %c0_156, %c0_157] : memref<4x1x8xf32, #tpu.memory_space<vmem>>, vector<1x1x8xf32>
    %206 = vector.shape_cast %205 : vector<1x1x8xf32> to vector<1x8xf32>
    %207 = vector.broadcast %206 : vector<1x8xf32> to vector<8x8xf32>
    %208 = arith.addf %198, %207 : vector<8x8xf32>
    %209 = arith.truncf %208 : vector<8x8xf32> to vector<8x8xbf16>
    %210 = arith.truncf %201 : vector<8x8xf32> to vector<8x8xbf16>
    %cst_158 = arith.constant dense<0.000000e+00> : vector<8x8xf32>
    %211 = tpu.matmul %209, %210, %cst_158 {dimension_numbers = #tpu.dot_dimension_numbers<[1], [1], [0], [0], [0, 0, 1, 0], [], []>} : vector<8x8xbf16>, vector<8x8xbf16>, vector<8x8xf32> -> vector<8x8xf32>
    %c3_159 = arith.constant 3 : index
    %c0_160 = arith.constant 0 : index
    %c0_161 = arith.constant 0 : index
    %212 = vector.load %arg11[%c3_159, %c0_160, %c0_161] : memref<4x8x8xbf16, #tpu.memory_space<vmem>>, vector<1x8x8xbf16>
    %213 = vector.shape_cast %212 : vector<1x8x8xbf16> to vector<8x8xbf16>
    %214 = arith.truncf %198 : vector<8x8xf32> to vector<8x8xbf16>
    %cst_162 = arith.constant dense<0.000000e+00> : vector<8x8xf32>
    %215 = tpu.matmul %214, %213, %cst_162 {dimension_numbers = #tpu.dot_dimension_numbers<[1], [1], [0], [0], [0, 0, 1, 0], [], []>} : vector<8x8xbf16>, vector<8x8xbf16>, vector<8x8xf32> -> vector<8x8xf32>
    %216 = vector.shape_cast %215 : vector<8x8xf32> to vector<8x1x8xf32>
    %c0_163 = arith.constant 0 : index
    %c0_164 = arith.constant 0 : index
    %c0_165 = arith.constant 0 : index
    %217 = vector.load %arg13[%c0_163, %c0_164, %c0_165] : memref<8x8x8xf32, #tpu.memory_space<vmem>>, vector<8x8x8xf32>
    %218 = vector.broadcast %216 : vector<8x1x8xf32> to vector<8x8x8xf32>
    %219 = arith.mulf %218, %217 : vector<8x8x8xf32>
    %cst_166 = arith.constant dense<0.000000e+00> : vector<8x8xf32>
    %220 = vector.multi_reduction <add>, %219, %cst_166 [2] : vector<8x8x8xf32> to vector<8x8xf32>
    %221 = arith.addf %211, %220 : vector<8x8xf32>
    %c3_167 = arith.constant 3 : index
    %c0_168 = arith.constant 0 : index
    %c0_169 = arith.constant 0 : index
    %222 = vector.load %arg12[%c3_167, %c0_168, %c0_169] : memref<4x8x8xf32, #tpu.memory_space<vmem>>, vector<1x8x8xf32>
    %223 = vector.shape_cast %222 : vector<1x8x8xf32> to vector<8x8xf32>
    %224 = arith.addf %221, %223 : vector<8x8xf32>
    %cst_170 = arith.constant 0.353553385 : f32
    %225 = vector.broadcast %cst_170 : f32 to vector<8x8xf32>
    %226 = arith.mulf %224, %225 : vector<8x8xf32>
    %227 = arith.addf %226, %35 : vector<8x8xf32>
    %cst_171 = arith.constant dense<0xFF800000> : vector<8xf32>
    %228 = vector.multi_reduction <maximumf>, %227, %cst_171 [1] : vector<8x8xf32> to vector<8xf32>
    %229 = vector.shape_cast %228 : vector<8xf32> to vector<8x1xf32>
    %230 = vector.broadcast %229 : vector<8x1xf32> to vector<8x8xf32>
    %231 = arith.subf %227, %230 : vector<8x8xf32>
    %232 = math.exp %231 : vector<8x8xf32>
    %cst_172 = arith.constant dense<0.000000e+00> : vector<8xf32>
    %233 = vector.multi_reduction <add>, %232, %cst_172 [1] : vector<8x8xf32> to vector<8xf32>
    %234 = vector.shape_cast %233 : vector<8xf32> to vector<8x1xf32>
    %235 = tpu.reciprocal %234 {approx = true} : vector<8x1xf32> -> vector<8x1xf32>
    %236 = vector.broadcast %235 : vector<8x1xf32> to vector<8x8xf32>
    %237 = arith.mulf %232, %236 : vector<8x8xf32>
    %c0_173 = arith.constant 0 : index
    %c0_174 = arith.constant 0 : index
    %238 = vector.load %arg26[%c0_173, %c0_174] : memref<8x32xf32, #tpu.memory_space<vmem>>, vector<8x32xf32>
    %239 = arith.truncf %237 : vector<8x8xf32> to vector<8x8xbf16>
    %240 = arith.truncf %204 : vector<8x8xf32> to vector<8x8xbf16>
    %cst_175 = arith.constant dense<0.000000e+00> : vector<8x8xf32>
    %241 = tpu.matmul %239, %240, %cst_175 {dimension_numbers = #tpu.dot_dimension_numbers<[1], [0], [0], [1], [0, 0, 1, 1], [], []>} : vector<8x8xbf16>, vector<8x8xbf16>, vector<8x8xf32> -> vector<8x8xf32>
    %c3_176 = arith.constant 3 : index
    %c0_177 = arith.constant 0 : index
    %c0_178 = arith.constant 0 : index
    %242 = vector.load %arg9[%c3_176, %c0_177, %c0_178] : memref<4x8x32xbf16, #tpu.memory_space<vmem>>, vector<1x8x32xbf16>
    %243 = vector.shape_cast %242 : vector<1x8x32xbf16> to vector<8x32xbf16>
    %244 = arith.truncf %241 : vector<8x8xf32> to vector<8x8xbf16>
    %cst_179 = arith.constant dense<0.000000e+00> : vector<8x32xf32>
    %245 = tpu.matmul %244, %243, %cst_179 {dimension_numbers = #tpu.dot_dimension_numbers<[1], [0], [0], [1], [0, 0, 1, 1], [], []>} : vector<8x8xbf16>, vector<8x32xbf16>, vector<8x32xf32> -> vector<8x32xf32>
    %246 = arith.addf %238, %245 : vector<8x32xf32>
    %c0_180 = arith.constant 0 : index
    %c0_181 = arith.constant 0 : index
    %247 = vector.load %arg26[%c0_180, %c0_181] : memref<8x32xf32, #tpu.memory_space<vmem>>, vector<8x32xf32>
    tpu.vector_store %arg26[%c0_180, %c0_181], %246 {strides = array<i32>} : memref<8x32xf32, #tpu.memory_space<vmem>>, vector<8x32xf32>,
    %c0_182 = arith.constant 0 : index
    %c0_183 = arith.constant 0 : index
    %248 = vector.load %arg24[%c0_182, %c0_183] : memref<8x32xf32, #tpu.memory_space<vmem>>, vector<8x32xf32>
    %c0_184 = arith.constant 0 : index
    %c0_185 = arith.constant 0 : index
    %249 = vector.load %arg26[%c0_184, %c0_185] : memref<8x32xf32, #tpu.memory_space<vmem>>, vector<8x32xf32>
    %250 = arith.addf %248, %249 : vector<8x32xf32>
    %c0_186 = arith.constant 0 : index
    %c0_187 = arith.constant 0 : index
    %251 = vector.load %arg24[%c0_186, %c0_187] : memref<8x32xf32, #tpu.memory_space<vmem>>, vector<8x32xf32>
    tpu.vector_store %arg24[%c0_186, %c0_187], %250 {strides = array<i32>} : memref<8x32xf32, #tpu.memory_space<vmem>>, vector<8x32xf32>,
    %c0_188 = arith.constant 0 : index
    %c0_189 = arith.constant 0 : index
    %252 = vector.load %arg24[%c0_188, %c0_189] : memref<8x32xf32, #tpu.memory_space<vmem>>, vector<8x32xf32>
    %c2_190 = arith.constant 2 : index
    %c0_191 = arith.constant 0 : index
    %253 = vector.load %arg5[%c2_190, %c0_191] : memref<6x32xf32, #tpu.memory_space<vmem>>, vector<1x32xf32>
    %c3_192 = arith.constant 3 : index
    %c0_193 = arith.constant 0 : index
    %254 = vector.load %arg5[%c3_192, %c0_193] : memref<6x32xf32, #tpu.memory_space<vmem>>, vector<1x32xf32>
    %cst_194 = arith.constant dense<0.000000e+00> : vector<8xf32>
    %255 = vector.multi_reduction <add>, %252, %cst_194 [1] : vector<8x32xf32> to vector<8xf32>
    %256 = vector.shape_cast %255 : vector<8xf32> to vector<8x1xf32>
    %cst_195 = arith.constant 3.200000e+01 : f32
    %257 = vector.broadcast %cst_195 : f32 to vector<8x1xf32>
    %258 = arith.divf %256, %257 : vector<8x1xf32>
    %259 = vector.broadcast %258 : vector<8x1xf32> to vector<8x32xf32>
    %260 = arith.subf %252, %259 : vector<8x32xf32>
    %261 = vector.broadcast %258 : vector<8x1xf32> to vector<8x32xf32>
    %262 = arith.subf %252, %261 : vector<8x32xf32>
    %263 = arith.mulf %260, %262 : vector<8x32xf32>
    %cst_196 = arith.constant dense<0.000000e+00> : vector<8xf32>
    %264 = vector.multi_reduction <add>, %263, %cst_196 [1] : vector<8x32xf32> to vector<8xf32>
    %265 = vector.shape_cast %264 : vector<8xf32> to vector<8x1xf32>
    %cst_197 = arith.constant 3.200000e+01 : f32
    %266 = vector.broadcast %cst_197 : f32 to vector<8x1xf32>
    %267 = arith.divf %265, %266 : vector<8x1xf32>
    %268 = vector.broadcast %258 : vector<8x1xf32> to vector<8x32xf32>
    %269 = arith.subf %252, %268 : vector<8x32xf32>
    %cst_198 = arith.constant 9.99999974E-6 : f32
    %270 = vector.broadcast %cst_198 : f32 to vector<8x1xf32>
    %271 = arith.addf %267, %270 : vector<8x1xf32>
    %272 = math.rsqrt %271 : vector<8x1xf32>
    %273 = vector.broadcast %272 : vector<8x1xf32> to vector<8x32xf32>
    %274 = arith.mulf %269, %273 : vector<8x32xf32>
    %275 = vector.broadcast %253 : vector<1x32xf32> to vector<8x32xf32>
    %276 = arith.mulf %274, %275 : vector<8x32xf32>
    %277 = vector.broadcast %254 : vector<1x32xf32> to vector<8x32xf32>
    %278 = arith.addf %276, %277 : vector<8x32xf32>
    %279 = arith.truncf %278 : vector<8x32xf32> to vector<8x32xbf16>
    %c0_199 = arith.constant 0 : index
    %c0_200 = arith.constant 0 : index
    %280 = vector.load %arg25[%c0_199, %c0_200] : memref<8x32xbf16, #tpu.memory_space<vmem>>, vector<8x32xbf16>
    tpu.vector_store %arg25[%c0_199, %c0_200], %279 {strides = array<i32>} : memref<8x32xbf16, #tpu.memory_space<vmem>>, vector<8x32xbf16>,
    %cst_201 = arith.constant 0.000000e+00 : f32
    %281 = vector.broadcast %cst_201 : f32 to vector<8x32xf32>
    %c0_202 = arith.constant 0 : index
    %c0_203 = arith.constant 0 : index
    %282 = vector.load %arg26[%c0_202, %c0_203] : memref<8x32xf32, #tpu.memory_space<vmem>>, vector<8x32xf32>
    tpu.vector_store %arg26[%c0_202, %c0_203], %281 {strides = array<i32>} : memref<8x32xf32, #tpu.memory_space<vmem>>, vector<8x32xf32>,
    %c0_204 = arith.constant 0 : index
    %c0_205 = arith.constant 0 : index
    %c0_206 = arith.constant 0 : index
    %283 = vector.load %arg2[%c0_204, %c0_205, %c0_206] : memref<1x8x32xbf16, #tpu.memory_space<vmem>>, vector<1x8x32xbf16>
    %284 = vector.shape_cast %283 : vector<1x8x32xbf16> to vector<8x32xbf16>
    %c0_207 = arith.constant 0 : index
    %c0_208 = arith.constant 0 : index
    %c0_209 = arith.constant 0 : index
    %285 = vector.load %arg4[%c0_207, %c0_208, %c0_209] : memref<1x1x8xf32, #tpu.memory_space<vmem>>, vector<1x1x8xf32>
    %286 = vector.shape_cast %285 : vector<1x1x8xf32> to vector<1x8xf32>
    %c0_210 = arith.constant 0 : index
    %c0_211 = arith.constant 0 : index
    %287 = vector.load %arg25[%c0_210, %c0_211] : memref<8x32xbf16, #tpu.memory_space<vmem>>, vector<8x32xbf16>
    %c0_212 = arith.constant 0 : index
    %c0_213 = arith.constant 0 : index
    %c0_214 = arith.constant 0 : index
    %288 = vector.load %arg14[%c0_212, %c0_213, %c0_214] : memref<4x32x8xbf16, #tpu.memory_space<vmem>>, vector<1x32x8xbf16>
    %289 = vector.shape_cast %288 : vector<1x32x8xbf16> to vector<32x8xbf16>
    %cst_215 = arith.constant dense<0.000000e+00> : vector<8x8xf32>
    %290 = tpu.matmul %287, %289, %cst_215 {dimension_numbers = #tpu.dot_dimension_numbers<[1], [0], [0], [1], [0, 0, 1, 1], [], []>} : vector<8x32xbf16>, vector<32x8xbf16>, vector<8x8xf32> -> vector<8x8xf32>
    %c0_216 = arith.constant 0 : index
    %c0_217 = arith.constant 0 : index
    %c0_218 = arith.constant 0 : index
    %291 = vector.load %arg15[%c0_216, %c0_217, %c0_218] : memref<4x32x8xbf16, #tpu.memory_space<vmem>>, vector<1x32x8xbf16>
    %292 = vector.shape_cast %291 : vector<1x32x8xbf16> to vector<32x8xbf16>
    %cst_219 = arith.constant dense<0.000000e+00> : vector<8x8xf32>
    %293 = tpu.matmul %284, %292, %cst_219 {dimension_numbers = #tpu.dot_dimension_numbers<[1], [0], [0], [1], [0, 0, 1, 1], [], []>} : vector<8x32xbf16>, vector<32x8xbf16>, vector<8x8xf32> -> vector<8x8xf32>
    %c0_220 = arith.constant 0 : index
    %c0_221 = arith.constant 0 : index
    %c0_222 = arith.constant 0 : index
    %294 = vector.load %arg16[%c0_220, %c0_221, %c0_222] : memref<4x32x8xbf16, #tpu.memory_space<vmem>>, vector<1x32x8xbf16>
    %295 = vector.shape_cast %294 : vector<1x32x8xbf16> to vector<32x8xbf16>
    %cst_223 = arith.constant dense<0.000000e+00> : vector<8x8xf32>
    %296 = tpu.matmul %284, %295, %cst_223 {dimension_numbers = #tpu.dot_dimension_numbers<[1], [0], [0], [1], [0, 0, 1, 1], [], []>} : vector<8x32xbf16>, vector<32x8xbf16>, vector<8x8xf32> -> vector<8x8xf32>
    %297 = arith.truncf %290 : vector<8x8xf32> to vector<8x8xbf16>
    %298 = arith.truncf %293 : vector<8x8xf32> to vector<8x8xbf16>
    %cst_224 = arith.constant dense<0.000000e+00> : vector<8x8xf32>
    %299 = tpu.matmul %297, %298, %cst_224 {dimension_numbers = #tpu.dot_dimension_numbers<[1], [1], [0], [0], [0, 0, 1, 0], [], []>} : vector<8x8xbf16>, vector<8x8xbf16>, vector<8x8xf32> -> vector<8x8xf32>
    %cst_225 = arith.constant 0.353553385 : f32
    %300 = vector.broadcast %cst_225 : f32 to vector<8x8xf32>
    %301 = arith.mulf %299, %300 : vector<8x8xf32>
    %302 = vector.broadcast %286 : vector<1x8xf32> to vector<8x8xf32>
    %303 = arith.addf %301, %302 : vector<8x8xf32>
    %cst_226 = arith.constant dense<0xFF800000> : vector<8xf32>
    %304 = vector.multi_reduction <maximumf>, %303, %cst_226 [1] : vector<8x8xf32> to vector<8xf32>
    %305 = vector.shape_cast %304 : vector<8xf32> to vector<8x1xf32>
    %306 = vector.broadcast %305 : vector<8x1xf32> to vector<8x8xf32>
    %307 = arith.subf %303, %306 : vector<8x8xf32>
    %308 = math.exp %307 : vector<8x8xf32>
    %cst_227 = arith.constant dense<0.000000e+00> : vector<8xf32>
    %309 = vector.multi_reduction <add>, %308, %cst_227 [1] : vector<8x8xf32> to vector<8xf32>
    %310 = vector.shape_cast %309 : vector<8xf32> to vector<8x1xf32>
    %311 = vector.broadcast %310 : vector<8x1xf32> to vector<8x8xf32>
    %312 = arith.divf %308, %311 : vector<8x8xf32>
    %313 = arith.truncf %312 : vector<8x8xf32> to vector<8x8xbf16>
    %c0_228 = arith.constant 0 : index
    %c0_229 = arith.constant 0 : index
    %c0_230 = arith.constant 0 : index
    %c0_231 = arith.constant 0 : index
    %314 = vector.load %arg23[%c0_228, %c0_229, %c0_230, %c0_231] : memref<1x4x8x8xbf16, #tpu.memory_space<vmem>>, vector<1x1x8x8xbf16>
    %315 = vector.shape_cast %314 : vector<1x1x8x8xbf16> to vector<8x8xbf16>
    %316 = vector.shape_cast %313 : vector<8x8xbf16> to vector<1x1x8x8xbf16>
    tpu.vector_store %arg23[%c0_228, %c0_229, %c0_230, %c0_231], %316 {strides = array<i32>} : memref<1x4x8x8xbf16, #tpu.memory_space<vmem>>, vector<1x1x8x8xbf16>,
    %c0_232 = arith.constant 0 : index
    %c0_233 = arith.constant 0 : index
    %317 = vector.load %arg26[%c0_232, %c0_233] : memref<8x32xf32, #tpu.memory_space<vmem>>, vector<8x32xf32>
    %318 = arith.truncf %312 : vector<8x8xf32> to vector<8x8xbf16>
    %319 = arith.truncf %296 : vector<8x8xf32> to vector<8x8xbf16>
    %cst_234 = arith.constant dense<0.000000e+00> : vector<8x8xf32>
    %320 = tpu.matmul %318, %319, %cst_234 {dimension_numbers = #tpu.dot_dimension_numbers<[1], [0], [0], [1], [0, 0, 1, 1], [], []>} : vector<8x8xbf16>, vector<8x8xbf16>, vector<8x8xf32> -> vector<8x8xf32>
    %c0_235 = arith.constant 0 : index
    %c0_236 = arith.constant 0 : index
    %c0_237 = arith.constant 0 : index
    %321 = vector.load %arg17[%c0_235, %c0_236, %c0_237] : memref<4x8x32xbf16, #tpu.memory_space<vmem>>, vector<1x8x32xbf16>
    %322 = vector.shape_cast %321 : vector<1x8x32xbf16> to vector<8x32xbf16>
    %323 = arith.truncf %320 : vector<8x8xf32> to vector<8x8xbf16>
    %cst_238 = arith.constant dense<0.000000e+00> : vector<8x32xf32>
    %324 = tpu.matmul %323, %322, %cst_238 {dimension_numbers = #tpu.dot_dimension_numbers<[1], [0], [0], [1], [0, 0, 1, 1], [], []>} : vector<8x8xbf16>, vector<8x32xbf16>, vector<8x32xf32> -> vector<8x32xf32>
    %325 = arith.addf %317, %324 : vector<8x32xf32>
    %c0_239 = arith.constant 0 : index
    %c0_240 = arith.constant 0 : index
    %326 = vector.load %arg26[%c0_239, %c0_240] : memref<8x32xf32, #tpu.memory_space<vmem>>, vector<8x32xf32>
    tpu.vector_store %arg26[%c0_239, %c0_240], %325 {strides = array<i32>} : memref<8x32xf32, #tpu.memory_space<vmem>>, vector<8x32xf32>,
    %c0_241 = arith.constant 0 : index
    %c0_242 = arith.constant 0 : index
    %327 = vector.load %arg25[%c0_241, %c0_242] : memref<8x32xbf16, #tpu.memory_space<vmem>>, vector<8x32xbf16>
    %c1_243 = arith.constant 1 : index
    %c0_244 = arith.constant 0 : index
    %c0_245 = arith.constant 0 : index
    %328 = vector.load %arg14[%c1_243, %c0_244, %c0_245] : memref<4x32x8xbf16, #tpu.memory_space<vmem>>, vector<1x32x8xbf16>
    %329 = vector.shape_cast %328 : vector<1x32x8xbf16> to vector<32x8xbf16>
    %cst_246 = arith.constant dense<0.000000e+00> : vector<8x8xf32>
    %330 = tpu.matmul %327, %329, %cst_246 {dimension_numbers = #tpu.dot_dimension_numbers<[1], [0], [0], [1], [0, 0, 1, 1], [], []>} : vector<8x32xbf16>, vector<32x8xbf16>, vector<8x8xf32> -> vector<8x8xf32>
    %c1_247 = arith.constant 1 : index
    %c0_248 = arith.constant 0 : index
    %c0_249 = arith.constant 0 : index
    %331 = vector.load %arg15[%c1_247, %c0_248, %c0_249] : memref<4x32x8xbf16, #tpu.memory_space<vmem>>, vector<1x32x8xbf16>
    %332 = vector.shape_cast %331 : vector<1x32x8xbf16> to vector<32x8xbf16>
    %cst_250 = arith.constant dense<0.000000e+00> : vector<8x8xf32>
    %333 = tpu.matmul %284, %332, %cst_250 {dimension_numbers = #tpu.dot_dimension_numbers<[1], [0], [0], [1], [0, 0, 1, 1], [], []>} : vector<8x32xbf16>, vector<32x8xbf16>, vector<8x8xf32> -> vector<8x8xf32>
    %c1_251 = arith.constant 1 : index
    %c0_252 = arith.constant 0 : index
    %c0_253 = arith.constant 0 : index
    %334 = vector.load %arg16[%c1_251, %c0_252, %c0_253] : memref<4x32x8xbf16, #tpu.memory_space<vmem>>, vector<1x32x8xbf16>
    %335 = vector.shape_cast %334 : vector<1x32x8xbf16> to vector<32x8xbf16>
    %cst_254 = arith.constant dense<0.000000e+00> : vector<8x8xf32>
    %336 = tpu.matmul %284, %335, %cst_254 {dimension_numbers = #tpu.dot_dimension_numbers<[1], [0], [0], [1], [0, 0, 1, 1], [], []>} : vector<8x32xbf16>, vector<32x8xbf16>, vector<8x8xf32> -> vector<8x8xf32>
    %337 = arith.truncf %330 : vector<8x8xf32> to vector<8x8xbf16>
    %338 = arith.truncf %333 : vector<8x8xf32> to vector<8x8xbf16>
    %cst_255 = arith.constant dense<0.000000e+00> : vector<8x8xf32>
    %339 = tpu.matmul %337, %338, %cst_255 {dimension_numbers = #tpu.dot_dimension_numbers<[1], [1], [0], [0], [0, 0, 1, 0], [], []>} : vector<8x8xbf16>, vector<8x8xbf16>, vector<8x8xf32> -> vector<8x8xf32>
    %cst_256 = arith.constant 0.353553385 : f32
    %340 = vector.broadcast %cst_256 : f32 to vector<8x8xf32>
    %341 = arith.mulf %339, %340 : vector<8x8xf32>
    %342 = vector.broadcast %286 : vector<1x8xf32> to vector<8x8xf32>
    %343 = arith.addf %341, %342 : vector<8x8xf32>
    %cst_257 = arith.constant dense<0xFF800000> : vector<8xf32>
    %344 = vector.multi_reduction <maximumf>, %343, %cst_257 [1] : vector<8x8xf32> to vector<8xf32>
    %345 = vector.shape_cast %344 : vector<8xf32> to vector<8x1xf32>
    %346 = vector.broadcast %345 : vector<8x1xf32> to vector<8x8xf32>
    %347 = arith.subf %343, %346 : vector<8x8xf32>
    %348 = math.exp %347 : vector<8x8xf32>
    %cst_258 = arith.constant dense<0.000000e+00> : vector<8xf32>
    %349 = vector.multi_reduction <add>, %348, %cst_258 [1] : vector<8x8xf32> to vector<8xf32>
    %350 = vector.shape_cast %349 : vector<8xf32> to vector<8x1xf32>
    %351 = vector.broadcast %350 : vector<8x1xf32> to vector<8x8xf32>
    %352 = arith.divf %348, %351 : vector<8x8xf32>
    %353 = arith.truncf %352 : vector<8x8xf32> to vector<8x8xbf16>
    %c0_259 = arith.constant 0 : index
    %c1_260 = arith.constant 1 : index
    %c0_261 = arith.constant 0 : index
    %c0_262 = arith.constant 0 : index
    %354 = vector.load %arg23[%c0_259, %c1_260, %c0_261, %c0_262] : memref<1x4x8x8xbf16, #tpu.memory_space<vmem>>, vector<1x1x8x8xbf16>
    %355 = vector.shape_cast %354 : vector<1x1x8x8xbf16> to vector<8x8xbf16>
    %356 = vector.shape_cast %353 : vector<8x8xbf16> to vector<1x1x8x8xbf16>
    tpu.vector_store %arg23[%c0_259, %c1_260, %c0_261, %c0_262], %356 {strides = array<i32>} : memref<1x4x8x8xbf16, #tpu.memory_space<vmem>>, vector<1x1x8x8xbf16>,
    %c0_263 = arith.constant 0 : index
    %c0_264 = arith.constant 0 : index
    %357 = vector.load %arg26[%c0_263, %c0_264] : memref<8x32xf32, #tpu.memory_space<vmem>>, vector<8x32xf32>
    %358 = arith.truncf %352 : vector<8x8xf32> to vector<8x8xbf16>
    %359 = arith.truncf %336 : vector<8x8xf32> to vector<8x8xbf16>
    %cst_265 = arith.constant dense<0.000000e+00> : vector<8x8xf32>
    %360 = tpu.matmul %358, %359, %cst_265 {dimension_numbers = #tpu.dot_dimension_numbers<[1], [0], [0], [1], [0, 0, 1, 1], [], []>} : vector<8x8xbf16>, vector<8x8xbf16>, vector<8x8xf32> -> vector<8x8xf32>
    %c1_266 = arith.constant 1 : index
    %c0_267 = arith.constant 0 : index
    %c0_268 = arith.constant 0 : index
    %361 = vector.load %arg17[%c1_266, %c0_267, %c0_268] : memref<4x8x32xbf16, #tpu.memory_space<vmem>>, vector<1x8x32xbf16>
    %362 = vector.shape_cast %361 : vector<1x8x32xbf16> to vector<8x32xbf16>
    %363 = arith.truncf %360 : vector<8x8xf32> to vector<8x8xbf16>
    %cst_269 = arith.constant dense<0.000000e+00> : vector<8x32xf32>
    %364 = tpu.matmul %363, %362, %cst_269 {dimension_numbers = #tpu.dot_dimension_numbers<[1], [0], [0], [1], [0, 0, 1, 1], [], []>} : vector<8x8xbf16>, vector<8x32xbf16>, vector<8x32xf32> -> vector<8x32xf32>
    %365 = arith.addf %357, %364 : vector<8x32xf32>
    %c0_270 = arith.constant 0 : index
    %c0_271 = arith.constant 0 : index
    %366 = vector.load %arg26[%c0_270, %c0_271] : memref<8x32xf32, #tpu.memory_space<vmem>>, vector<8x32xf32>
    tpu.vector_store %arg26[%c0_270, %c0_271], %365 {strides = array<i32>} : memref<8x32xf32, #tpu.memory_space<vmem>>, vector<8x32xf32>,
    %c0_272 = arith.constant 0 : index
    %c0_273 = arith.constant 0 : index
    %367 = vector.load %arg25[%c0_272, %c0_273] : memref<8x32xbf16, #tpu.memory_space<vmem>>, vector<8x32xbf16>
    %c2_274 = arith.constant 2 : index
    %c0_275 = arith.constant 0 : index
    %c0_276 = arith.constant 0 : index
    %368 = vector.load %arg14[%c2_274, %c0_275, %c0_276] : memref<4x32x8xbf16, #tpu.memory_space<vmem>>, vector<1x32x8xbf16>
    %369 = vector.shape_cast %368 : vector<1x32x8xbf16> to vector<32x8xbf16>
    %cst_277 = arith.constant dense<0.000000e+00> : vector<8x8xf32>
    %370 = tpu.matmul %367, %369, %cst_277 {dimension_numbers = #tpu.dot_dimension_numbers<[1], [0], [0], [1], [0, 0, 1, 1], [], []>} : vector<8x32xbf16>, vector<32x8xbf16>, vector<8x8xf32> -> vector<8x8xf32>
    %c2_278 = arith.constant 2 : index
    %c0_279 = arith.constant 0 : index
    %c0_280 = arith.constant 0 : index
    %371 = vector.load %arg15[%c2_278, %c0_279, %c0_280] : memref<4x32x8xbf16, #tpu.memory_space<vmem>>, vector<1x32x8xbf16>
    %372 = vector.shape_cast %371 : vector<1x32x8xbf16> to vector<32x8xbf16>
    %cst_281 = arith.constant dense<0.000000e+00> : vector<8x8xf32>
    %373 = tpu.matmul %284, %372, %cst_281 {dimension_numbers = #tpu.dot_dimension_numbers<[1], [0], [0], [1], [0, 0, 1, 1], [], []>} : vector<8x32xbf16>, vector<32x8xbf16>, vector<8x8xf32> -> vector<8x8xf32>
    %c2_282 = arith.constant 2 : index
    %c0_283 = arith.constant 0 : index
    %c0_284 = arith.constant 0 : index
    %374 = vector.load %arg16[%c2_282, %c0_283, %c0_284] : memref<4x32x8xbf16, #tpu.memory_space<vmem>>, vector<1x32x8xbf16>
    %375 = vector.shape_cast %374 : vector<1x32x8xbf16> to vector<32x8xbf16>
    %cst_285 = arith.constant dense<0.000000e+00> : vector<8x8xf32>
    %376 = tpu.matmul %284, %375, %cst_285 {dimension_numbers = #tpu.dot_dimension_numbers<[1], [0], [0], [1], [0, 0, 1, 1], [], []>} : vector<8x32xbf16>, vector<32x8xbf16>, vector<8x8xf32> -> vector<8x8xf32>
    %377 = arith.truncf %370 : vector<8x8xf32> to vector<8x8xbf16>
    %378 = arith.truncf %373 : vector<8x8xf32> to vector<8x8xbf16>
    %cst_286 = arith.constant dense<0.000000e+00> : vector<8x8xf32>
    %379 = tpu.matmul %377, %378, %cst_286 {dimension_numbers = #tpu.dot_dimension_numbers<[1], [1], [0], [0], [0, 0, 1, 0], [], []>} : vector<8x8xbf16>, vector<8x8xbf16>, vector<8x8xf32> -> vector<8x8xf32>
    %cst_287 = arith.constant 0.353553385 : f32
    %380 = vector.broadcast %cst_287 : f32 to vector<8x8xf32>
    %381 = arith.mulf %379, %380 : vector<8x8xf32>
    %382 = vector.broadcast %286 : vector<1x8xf32> to vector<8x8xf32>
    %383 = arith.addf %381, %382 : vector<8x8xf32>
    %cst_288 = arith.constant dense<0xFF800000> : vector<8xf32>
    %384 = vector.multi_reduction <maximumf>, %383, %cst_288 [1] : vector<8x8xf32> to vector<8xf32>
    %385 = vector.shape_cast %384 : vector<8xf32> to vector<8x1xf32>
    %386 = vector.broadcast %385 : vector<8x1xf32> to vector<8x8xf32>
    %387 = arith.subf %383, %386 : vector<8x8xf32>
    %388 = math.exp %387 : vector<8x8xf32>
    %cst_289 = arith.constant dense<0.000000e+00> : vector<8xf32>
    %389 = vector.multi_reduction <add>, %388, %cst_289 [1] : vector<8x8xf32> to vector<8xf32>
    %390 = vector.shape_cast %389 : vector<8xf32> to vector<8x1xf32>
    %391 = vector.broadcast %390 : vector<8x1xf32> to vector<8x8xf32>
    %392 = arith.divf %388, %391 : vector<8x8xf32>
    %393 = arith.truncf %392 : vector<8x8xf32> to vector<8x8xbf16>
    %c0_290 = arith.constant 0 : index
    %c2_291 = arith.constant 2 : index
    %c0_292 = arith.constant 0 : index
    %c0_293 = arith.constant 0 : index
    %394 = vector.load %arg23[%c0_290, %c2_291, %c0_292, %c0_293] : memref<1x4x8x8xbf16, #tpu.memory_space<vmem>>, vector<1x1x8x8xbf16>
    %395 = vector.shape_cast %394 : vector<1x1x8x8xbf16> to vector<8x8xbf16>
    %396 = vector.shape_cast %393 : vector<8x8xbf16> to vector<1x1x8x8xbf16>
    tpu.vector_store %arg23[%c0_290, %c2_291, %c0_292, %c0_293], %396 {strides = array<i32>} : memref<1x4x8x8xbf16, #tpu.memory_space<vmem>>, vector<1x1x8x8xbf16>,
    %c0_294 = arith.constant 0 : index
    %c0_295 = arith.constant 0 : index
    %397 = vector.load %arg26[%c0_294, %c0_295] : memref<8x32xf32, #tpu.memory_space<vmem>>, vector<8x32xf32>
    %398 = arith.truncf %392 : vector<8x8xf32> to vector<8x8xbf16>
    %399 = arith.truncf %376 : vector<8x8xf32> to vector<8x8xbf16>
    %cst_296 = arith.constant dense<0.000000e+00> : vector<8x8xf32>
    %400 = tpu.matmul %398, %399, %cst_296 {dimension_numbers = #tpu.dot_dimension_numbers<[1], [0], [0], [1], [0, 0, 1, 1], [], []>} : vector<8x8xbf16>, vector<8x8xbf16>, vector<8x8xf32> -> vector<8x8xf32>
    %c2_297 = arith.constant 2 : index
    %c0_298 = arith.constant 0 : index
    %c0_299 = arith.constant 0 : index
    %401 = vector.load %arg17[%c2_297, %c0_298, %c0_299] : memref<4x8x32xbf16, #tpu.memory_space<vmem>>, vector<1x8x32xbf16>
    %402 = vector.shape_cast %401 : vector<1x8x32xbf16> to vector<8x32xbf16>
    %403 = arith.truncf %400 : vector<8x8xf32> to vector<8x8xbf16>
    %cst_300 = arith.constant dense<0.000000e+00> : vector<8x32xf32>
    %404 = tpu.matmul %403, %402, %cst_300 {dimension_numbers = #tpu.dot_dimension_numbers<[1], [0], [0], [1], [0, 0, 1, 1], [], []>} : vector<8x8xbf16>, vector<8x32xbf16>, vector<8x32xf32> -> vector<8x32xf32>
    %405 = arith.addf %397, %404 : vector<8x32xf32>
    %c0_301 = arith.constant 0 : index
    %c0_302 = arith.constant 0 : index
    %406 = vector.load %arg26[%c0_301, %c0_302] : memref<8x32xf32, #tpu.memory_space<vmem>>, vector<8x32xf32>
    tpu.vector_store %arg26[%c0_301, %c0_302], %405 {strides = array<i32>} : memref<8x32xf32, #tpu.memory_space<vmem>>, vector<8x32xf32>,
    %c0_303 = arith.constant 0 : index
    %c0_304 = arith.constant 0 : index
    %407 = vector.load %arg25[%c0_303, %c0_304] : memref<8x32xbf16, #tpu.memory_space<vmem>>, vector<8x32xbf16>
    %c3_305 = arith.constant 3 : index
    %c0_306 = arith.constant 0 : index
    %c0_307 = arith.constant 0 : index
    %408 = vector.load %arg14[%c3_305, %c0_306, %c0_307] : memref<4x32x8xbf16, #tpu.memory_space<vmem>>, vector<1x32x8xbf16>
    %409 = vector.shape_cast %408 : vector<1x32x8xbf16> to vector<32x8xbf16>
    %cst_308 = arith.constant dense<0.000000e+00> : vector<8x8xf32>
    %410 = tpu.matmul %407, %409, %cst_308 {dimension_numbers = #tpu.dot_dimension_numbers<[1], [0], [0], [1], [0, 0, 1, 1], [], []>} : vector<8x32xbf16>, vector<32x8xbf16>, vector<8x8xf32> -> vector<8x8xf32>
    %c3_309 = arith.constant 3 : index
    %c0_310 = arith.constant 0 : index
    %c0_311 = arith.constant 0 : index
    %411 = vector.load %arg15[%c3_309, %c0_310, %c0_311] : memref<4x32x8xbf16, #tpu.memory_space<vmem>>, vector<1x32x8xbf16>
    %412 = vector.shape_cast %411 : vector<1x32x8xbf16> to vector<32x8xbf16>
    %cst_312 = arith.constant dense<0.000000e+00> : vector<8x8xf32>
    %413 = tpu.matmul %284, %412, %cst_312 {dimension_numbers = #tpu.dot_dimension_numbers<[1], [0], [0], [1], [0, 0, 1, 1], [], []>} : vector<8x32xbf16>, vector<32x8xbf16>, vector<8x8xf32> -> vector<8x8xf32>
    %c3_313 = arith.constant 3 : index
    %c0_314 = arith.constant 0 : index
    %c0_315 = arith.constant 0 : index
    %414 = vector.load %arg16[%c3_313, %c0_314, %c0_315] : memref<4x32x8xbf16, #tpu.memory_space<vmem>>, vector<1x32x8xbf16>
    %415 = vector.shape_cast %414 : vector<1x32x8xbf16> to vector<32x8xbf16>
    %cst_316 = arith.constant dense<0.000000e+00> : vector<8x8xf32>
    %416 = tpu.matmul %284, %415, %cst_316 {dimension_numbers = #tpu.dot_dimension_numbers<[1], [0], [0], [1], [0, 0, 1, 1], [], []>} : vector<8x32xbf16>, vector<32x8xbf16>, vector<8x8xf32> -> vector<8x8xf32>
    %417 = arith.truncf %410 : vector<8x8xf32> to vector<8x8xbf16>
    %418 = arith.truncf %413 : vector<8x8xf32> to vector<8x8xbf16>
    %cst_317 = arith.constant dense<0.000000e+00> : vector<8x8xf32>
    %419 = tpu.matmul %417, %418, %cst_317 {dimension_numbers = #tpu.dot_dimension_numbers<[1], [1], [0], [0], [0, 0, 1, 0], [], []>} : vector<8x8xbf16>, vector<8x8xbf16>, vector<8x8xf32> -> vector<8x8xf32>
    %cst_318 = arith.constant 0.353553385 : f32
    %420 = vector.broadcast %cst_318 : f32 to vector<8x8xf32>
    %421 = arith.mulf %419, %420 : vector<8x8xf32>
    %422 = vector.broadcast %286 : vector<1x8xf32> to vector<8x8xf32>
    %423 = arith.addf %421, %422 : vector<8x8xf32>
    %cst_319 = arith.constant dense<0xFF800000> : vector<8xf32>
    %424 = vector.multi_reduction <maximumf>, %423, %cst_319 [1] : vector<8x8xf32> to vector<8xf32>
    %425 = vector.shape_cast %424 : vector<8xf32> to vector<8x1xf32>
    %426 = vector.broadcast %425 : vector<8x1xf32> to vector<8x8xf32>
    %427 = arith.subf %423, %426 : vector<8x8xf32>
    %428 = math.exp %427 : vector<8x8xf32>
    %cst_320 = arith.constant dense<0.000000e+00> : vector<8xf32>
    %429 = vector.multi_reduction <add>, %428, %cst_320 [1] : vector<8x8xf32> to vector<8xf32>
    %430 = vector.shape_cast %429 : vector<8xf32> to vector<8x1xf32>
    %431 = vector.broadcast %430 : vector<8x1xf32> to vector<8x8xf32>
    %432 = arith.divf %428, %431 : vector<8x8xf32>
    %433 = arith.truncf %432 : vector<8x8xf32> to vector<8x8xbf16>
    %c0_321 = arith.constant 0 : index
    %c3_322 = arith.constant 3 : index
    %c0_323 = arith.constant 0 : index
    %c0_324 = arith.constant 0 : index
    %434 = vector.load %arg23[%c0_321, %c3_322, %c0_323, %c0_324] : memref<1x4x8x8xbf16, #tpu.memory_space<vmem>>, vector<1x1x8x8xbf16>
    %435 = vector.shape_cast %434 : vector<1x1x8x8xbf16> to vector<8x8xbf16>
    %436 = vector.shape_cast %433 : vector<8x8xbf16> to vector<1x1x8x8xbf16>
    tpu.vector_store %arg23[%c0_321, %c3_322, %c0_323, %c0_324], %436 {strides = array<i32>} : memref<1x4x8x8xbf16, #tpu.memory_space<vmem>>, vector<1x1x8x8xbf16>,
    %c0_325 = arith.constant 0 : index
    %c0_326 = arith.constant 0 : index
    %437 = vector.load %arg26[%c0_325, %c0_326] : memref<8x32xf32, #tpu.memory_space<vmem>>, vector<8x32xf32>
    %438 = arith.truncf %432 : vector<8x8xf32> to vector<8x8xbf16>
    %439 = arith.truncf %416 : vector<8x8xf32> to vector<8x8xbf16>
    %cst_327 = arith.constant dense<0.000000e+00> : vector<8x8xf32>
    %440 = tpu.matmul %438, %439, %cst_327 {dimension_numbers = #tpu.dot_dimension_numbers<[1], [0], [0], [1], [0, 0, 1, 1], [], []>} : vector<8x8xbf16>, vector<8x8xbf16>, vector<8x8xf32> -> vector<8x8xf32>
    %c3_328 = arith.constant 3 : index
    %c0_329 = arith.constant 0 : index
    %c0_330 = arith.constant 0 : index
    %441 = vector.load %arg17[%c3_328, %c0_329, %c0_330] : memref<4x8x32xbf16, #tpu.memory_space<vmem>>, vector<1x8x32xbf16>
    %442 = vector.shape_cast %441 : vector<1x8x32xbf16> to vector<8x32xbf16>
    %443 = arith.truncf %440 : vector<8x8xf32> to vector<8x8xbf16>
    %cst_331 = arith.constant dense<0.000000e+00> : vector<8x32xf32>
    %444 = tpu.matmul %443, %442, %cst_331 {dimension_numbers = #tpu.dot_dimension_numbers<[1], [0], [0], [1], [0, 0, 1, 1], [], []>} : vector<8x8xbf16>, vector<8x32xbf16>, vector<8x32xf32> -> vector<8x32xf32>
    %445 = arith.addf %437, %444 : vector<8x32xf32>
    %c0_332 = arith.constant 0 : index
    %c0_333 = arith.constant 0 : index
    %446 = vector.load %arg26[%c0_332, %c0_333] : memref<8x32xf32, #tpu.memory_space<vmem>>, vector<8x32xf32>
    tpu.vector_store %arg26[%c0_332, %c0_333], %445 {strides = array<i32>} : memref<8x32xf32, #tpu.memory_space<vmem>>, vector<8x32xf32>,
    %c0_334 = arith.constant 0 : index
    %c0_335 = arith.constant 0 : index
    %447 = vector.load %arg24[%c0_334, %c0_335] : memref<8x32xf32, #tpu.memory_space<vmem>>, vector<8x32xf32>
    %c0_336 = arith.constant 0 : index
    %c0_337 = arith.constant 0 : index
    %448 = vector.load %arg26[%c0_336, %c0_337] : memref<8x32xf32, #tpu.memory_space<vmem>>, vector<8x32xf32>
    %449 = arith.addf %447, %448 : vector<8x32xf32>
    %c0_338 = arith.constant 0 : index
    %c0_339 = arith.constant 0 : index
    %450 = vector.load %arg24[%c0_338, %c0_339] : memref<8x32xf32, #tpu.memory_space<vmem>>, vector<8x32xf32>
    tpu.vector_store %arg24[%c0_338, %c0_339], %449 {strides = array<i32>} : memref<8x32xf32, #tpu.memory_space<vmem>>, vector<8x32xf32>,
    %c0_340 = arith.constant 0 : index
    %c0_341 = arith.constant 0 : index
    %451 = vector.load %arg24[%c0_340, %c0_341] : memref<8x32xf32, #tpu.memory_space<vmem>>, vector<8x32xf32>
    %c4 = arith.constant 4 : index
    %c0_342 = arith.constant 0 : index
    %452 = vector.load %arg5[%c4, %c0_342] : memref<6x32xf32, #tpu.memory_space<vmem>>, vector<1x32xf32>
    %c5 = arith.constant 5 : index
    %c0_343 = arith.constant 0 : index
    %453 = vector.load %arg5[%c5, %c0_343] : memref<6x32xf32, #tpu.memory_space<vmem>>, vector<1x32xf32>
    %cst_344 = arith.constant dense<0.000000e+00> : vector<8xf32>
    %454 = vector.multi_reduction <add>, %451, %cst_344 [1] : vector<8x32xf32> to vector<8xf32>
    %455 = vector.shape_cast %454 : vector<8xf32> to vector<8x1xf32>
    %cst_345 = arith.constant 3.200000e+01 : f32
    %456 = vector.broadcast %cst_345 : f32 to vector<8x1xf32>
    %457 = arith.divf %455, %456 : vector<8x1xf32>
    %458 = vector.broadcast %457 : vector<8x1xf32> to vector<8x32xf32>
    %459 = arith.subf %451, %458 : vector<8x32xf32>
    %460 = vector.broadcast %457 : vector<8x1xf32> to vector<8x32xf32>
    %461 = arith.subf %451, %460 : vector<8x32xf32>
    %462 = arith.mulf %459, %461 : vector<8x32xf32>
    %cst_346 = arith.constant dense<0.000000e+00> : vector<8xf32>
    %463 = vector.multi_reduction <add>, %462, %cst_346 [1] : vector<8x32xf32> to vector<8xf32>
    %464 = vector.shape_cast %463 : vector<8xf32> to vector<8x1xf32>
    %cst_347 = arith.constant 3.200000e+01 : f32
    %465 = vector.broadcast %cst_347 : f32 to vector<8x1xf32>
    %466 = arith.divf %464, %465 : vector<8x1xf32>
    %467 = vector.broadcast %457 : vector<8x1xf32> to vector<8x32xf32>
    %468 = arith.subf %451, %467 : vector<8x32xf32>
    %cst_348 = arith.constant 9.99999974E-6 : f32
    %469 = vector.broadcast %cst_348 : f32 to vector<8x1xf32>
    %470 = arith.addf %466, %469 : vector<8x1xf32>
    %471 = math.rsqrt %470 : vector<8x1xf32>
    %472 = vector.broadcast %471 : vector<8x1xf32> to vector<8x32xf32>
    %473 = arith.mulf %468, %472 : vector<8x32xf32>
    %474 = vector.broadcast %452 : vector<1x32xf32> to vector<8x32xf32>
    %475 = arith.mulf %473, %474 : vector<8x32xf32>
    %476 = vector.broadcast %453 : vector<1x32xf32> to vector<8x32xf32>
    %477 = arith.addf %475, %476 : vector<8x32xf32>
    %478 = arith.truncf %477 : vector<8x32xf32> to vector<8x32xbf16>
    %c0_349 = arith.constant 0 : index
    %c0_350 = arith.constant 0 : index
    %479 = vector.load %arg25[%c0_349, %c0_350] : memref<8x32xbf16, #tpu.memory_space<vmem>>, vector<8x32xbf16>
    tpu.vector_store %arg25[%c0_349, %c0_350], %478 {strides = array<i32>} : memref<8x32xbf16, #tpu.memory_space<vmem>>, vector<8x32xbf16>,
    %cst_351 = arith.constant 0.000000e+00 : f32
    %480 = vector.broadcast %cst_351 : f32 to vector<8x32xf32>
    %c0_352 = arith.constant 0 : index
    %c0_353 = arith.constant 0 : index
    %481 = vector.load %arg26[%c0_352, %c0_353] : memref<8x32xf32, #tpu.memory_space<vmem>>, vector<8x32xf32>
    tpu.vector_store %arg26[%c0_352, %c0_353], %480 {strides = array<i32>} : memref<8x32xf32, #tpu.memory_space<vmem>>, vector<8x32xf32>,
    %c0_354 = arith.constant 0 : index
    %c0_355 = arith.constant 0 : index
    %482 = vector.load %arg25[%c0_354, %c0_355] : memref<8x32xbf16, #tpu.memory_space<vmem>>, vector<8x32xbf16>
    %c0_356 = arith.constant 0 : index
    %c0_357 = arith.constant 0 : index
    %483 = vector.load %arg18[%c0_356, %c0_357] : memref<32x64xbf16, #tpu.memory_space<vmem>>, vector<32x64xbf16>
    %cst_358 = arith.constant dense<0.000000e+00> : vector<8x64xf32>
    %484 = tpu.matmul %482, %483, %cst_358 {dimension_numbers = #tpu.dot_dimension_numbers<[1], [0], [0], [1], [0, 0, 1, 1], [], []>} : vector<8x32xbf16>, vector<32x64xbf16>, vector<8x64xf32> -> vector<8x64xf32>
    %c0_359 = arith.constant 0 : index
    %c0_360 = arith.constant 0 : index
    %485 = vector.load %arg19[%c0_359, %c0_360] : memref<1x64xf32, #tpu.memory_space<vmem>>, vector<1x64xf32>
    %486 = vector.broadcast %485 : vector<1x64xf32> to vector<8x64xf32>
    %487 = arith.addf %484, %486 : vector<8x64xf32>
    %cst_361 = arith.constant 0.000000e+00 : f32
    %488 = vector.broadcast %cst_361 : f32 to vector<8x64xf32>
    %489 = arith.maximumf %487, %488 : vector<8x64xf32>
    %c0_362 = arith.constant 0 : index
    %c0_363 = arith.constant 0 : index
    %490 = vector.load %arg26[%c0_362, %c0_363] : memref<8x32xf32, #tpu.memory_space<vmem>>, vector<8x32xf32>
    %c0_364 = arith.constant 0 : index
    %c0_365 = arith.constant 0 : index
    %491 = vector.load %arg20[%c0_364, %c0_365] : memref<64x32xbf16, #tpu.memory_space<vmem>>, vector<64x32xbf16>
    %492 = arith.truncf %489 : vector<8x64xf32> to vector<8x64xbf16>
    %cst_366 = arith.constant dense<0.000000e+00> : vector<8x32xf32>
    %493 = tpu.matmul %492, %491, %cst_366 {dimension_numbers = #tpu.dot_dimension_numbers<[1], [0], [0], [1], [0, 0, 1, 1], [], []>} : vector<8x64xbf16>, vector<64x32xbf16>, vector<8x32xf32> -> vector<8x32xf32>
    %494 = arith.addf %490, %493 : vector<8x32xf32>
    %c0_367 = arith.constant 0 : index
    %c0_368 = arith.constant 0 : index
    %495 = vector.load %arg26[%c0_367, %c0_368] : memref<8x32xf32, #tpu.memory_space<vmem>>, vector<8x32xf32>
    tpu.vector_store %arg26[%c0_367, %c0_368], %494 {strides = array<i32>} : memref<8x32xf32, #tpu.memory_space<vmem>>, vector<8x32xf32>,
    %c0_369 = arith.constant 0 : index
    %c0_370 = arith.constant 0 : index
    %496 = vector.load %arg24[%c0_369, %c0_370] : memref<8x32xf32, #tpu.memory_space<vmem>>, vector<8x32xf32>
    %c0_371 = arith.constant 0 : index
    %c0_372 = arith.constant 0 : index
    %497 = vector.load %arg26[%c0_371, %c0_372] : memref<8x32xf32, #tpu.memory_space<vmem>>, vector<8x32xf32>
    %498 = arith.addf %496, %497 : vector<8x32xf32>
    %c0_373 = arith.constant 0 : index
    %c0_374 = arith.constant 0 : index
    %499 = vector.load %arg21[%c0_373, %c0_374] : memref<1x32xf32, #tpu.memory_space<vmem>>, vector<1x32xf32>
    %500 = vector.broadcast %499 : vector<1x32xf32> to vector<8x32xf32>
    %501 = arith.addf %498, %500 : vector<8x32xf32>
    %c0_375 = arith.constant 0 : index
    %c0_376 = arith.constant 0 : index
    %c0_377 = arith.constant 0 : index
    %502 = vector.load %arg22[%c0_375, %c0_376, %c0_377] : memref<1x8x32xf32, #tpu.memory_space<vmem>>, vector<1x8x32xf32>
    %503 = vector.shape_cast %502 : vector<1x8x32xf32> to vector<8x32xf32>
    %504 = vector.shape_cast %501 : vector<8x32xf32> to vector<1x8x32xf32>
    tpu.vector_store %arg22[%c0_375, %c0_376, %c0_377], %504 {strides = array<i32>} : memref<1x8x32xf32, #tpu.memory_space<vmem>>, vector<1x8x32xf32>,
    return
  }
  func.func @transform_0(%arg0: i32) -> (i32, i32, i32) {
    %c0_i32 = arith.constant 0 : i32
    %c0_i32_0 = arith.constant 0 : i32
    %c0_i32_1 = arith.constant 0 : i32
    return %arg0, %c0_i32, %c0_i32_0 : i32, i32, i32
  }
  func.func @transform_1(%arg0: i32) -> (i32, i32, i32) {
    %c0_i32 = arith.constant 0 : i32
    %c0_i32_0 = arith.constant 0 : i32
    %c0_i32_1 = arith.constant 0 : i32
    return %arg0, %c0_i32, %c0_i32_0 : i32, i32, i32
  }
  func.func @transform_2(%arg0: i32) -> (i32, i32) {
    %c0_i32 = arith.constant 0 : i32
    %c0_i32_0 = arith.constant 0 : i32
    %c0_i32_1 = arith.constant 0 : i32
    return %c0_i32, %c0_i32_0 : i32, i32
  }
  func.func @transform_3(%arg0: i32) -> (i32, i32, i32) {
    %c0_i32 = arith.constant 0 : i32
    %c0_i32_0 = arith.constant 0 : i32
    %c0_i32_1 = arith.constant 0 : i32
    return %arg0, %c0_i32, %c0_i32_0 : i32, i32, i32
  }
  func.func @transform_4(%arg0: i32) -> (i32, i32) {
    %c0_i32 = arith.constant 0 : i32
    %c0_i32_0 = arith.constant 0 : i32
    %c0_i32_1 = arith.constant 0 : i32
    return %c0_i32, %c0_i32_0 : i32, i32
  }
  func.func @transform_5(%arg0: i32) -> (i32, i32, i32) {
    %c0_i32 = arith.constant 0 : i32
    %c0_i32_0 = arith.constant 0 : i32
    %c0_i32_1 = arith.constant 0 : i32
    %c0_i32_2 = arith.constant 0 : i32
    return %c0_i32, %c0_i32_0, %c0_i32_1 : i32, i32, i32
  }
  func.func @transform_6(%arg0: i32) -> (i32, i32, i32) {
    %c0_i32 = arith.constant 0 : i32
    %c0_i32_0 = arith.constant 0 : i32
    %c0_i32_1 = arith.constant 0 : i32
    %c0_i32_2 = arith.constant 0 : i32
    return %c0_i32, %c0_i32_0, %c0_i32_1 : i32, i32, i32
  }
  func.func @transform_7(%arg0: i32) -> (i32, i32, i32) {
    %c0_i32 = arith.constant 0 : i32
    %c0_i32_0 = arith.constant 0 : i32
    %c0_i32_1 = arith.constant 0 : i32
    %c0_i32_2 = arith.constant 0 : i32
    return %c0_i32, %c0_i32_0, %c0_i32_1 : i32, i32, i32
  }
  func.func @transform_8(%arg0: i32) -> (i32, i32, i32) {
    %c0_i32 = arith.constant 0 : i32
    %c0_i32_0 = arith.constant 0 : i32
    %c0_i32_1 = arith.constant 0 : i32
    %c0_i32_2 = arith.constant 0 : i32
    return %c0_i32, %c0_i32_0, %c0_i32_1 : i32, i32, i32
  }
  func.func @transform_9(%arg0: i32) -> (i32, i32, i32) {
    %c0_i32 = arith.constant 0 : i32
    %c0_i32_0 = arith.constant 0 : i32
    %c0_i32_1 = arith.constant 0 : i32
    %c0_i32_2 = arith.constant 0 : i32
    return %c0_i32, %c0_i32_0, %c0_i32_1 : i32, i32, i32
  }
  func.func @transform_10(%arg0: i32) -> (i32, i32, i32) {
    %c0_i32 = arith.constant 0 : i32
    %c0_i32_0 = arith.constant 0 : i32
    %c0_i32_1 = arith.constant 0 : i32
    %c0_i32_2 = arith.constant 0 : i32
    return %c0_i32, %c0_i32_0, %c0_i32_1 : i32, i32, i32
  }
  func.func @transform_11(%arg0: i32) -> (i32, i32, i32) {
    %c0_i32 = arith.constant 0 : i32
    %c0_i32_0 = arith.constant 0 : i32
    %c0_i32_1 = arith.constant 0 : i32
    %c0_i32_2 = arith.constant 0 : i32
    return %c0_i32, %c0_i32_0, %c0_i32_1 : i32, i32, i32
  }
  func.func @transform_12(%arg0: i32) -> (i32, i32, i32) {
    %c0_i32 = arith.constant 0 : i32
    %c0_i32_0 = arith.constant 0 : i32
    %c0_i32_1 = arith.constant 0 : i32
    %c0_i32_2 = arith.constant 0 : i32
    return %c0_i32, %c0_i32_0, %c0_i32_1 : i32, i32, i32
  }
  func.func @transform_13(%arg0: i32) -> (i32, i32, i32) {
    %c0_i32 = arith.constant 0 : i32
    %c0_i32_0 = arith.constant 0 : i32
    %c0_i32_1 = arith.constant 0 : i32
    %c0_i32_2 = arith.constant 0 : i32
    return %c0_i32, %c0_i32_0, %c0_i32_1 : i32, i32, i32
  }
  func.func @transform_14(%arg0: i32) -> (i32, i32, i32) {
    %c0_i32 = arith.constant 0 : i32
    %c0_i32_0 = arith.constant 0 : i32
    %c0_i32_1 = arith.constant 0 : i32
    %c0_i32_2 = arith.constant 0 : i32
    return %c0_i32, %c0_i32_0, %c0_i32_1 : i32, i32, i32
  }
  func.func @transform_15(%arg0: i32) -> (i32, i32, i32) {
    %c0_i32 = arith.constant 0 : i32
    %c0_i32_0 = arith.constant 0 : i32
    %c0_i32_1 = arith.constant 0 : i32
    %c0_i32_2 = arith.constant 0 : i32
    return %c0_i32, %c0_i32_0, %c0_i32_1 : i32, i32, i32
  }
  func.func @transform_16(%arg0: i32) -> (i32, i32, i32) {
    %c0_i32 = arith.constant 0 : i32
    %c0_i32_0 = arith.constant 0 : i32
    %c0_i32_1 = arith.constant 0 : i32
    %c0_i32_2 = arith.constant 0 : i32
    return %c0_i32, %c0_i32_0, %c0_i32_1 : i32, i32, i32
  }
  func.func @transform_17(%arg0: i32) -> (i32, i32) {
    %c0_i32 = arith.constant 0 : i32
    %c0_i32_0 = arith.constant 0 : i32
    %c0_i32_1 = arith.constant 0 : i32
    return %c0_i32, %c0_i32_0 : i32, i32
  }
  func.func @transform_18(%arg0: i32) -> (i32, i32) {
    %c0_i32 = arith.constant 0 : i32
    %c0_i32_0 = arith.constant 0 : i32
    %c0_i32_1 = arith.constant 0 : i32
    return %c0_i32, %c0_i32_0 : i32, i32
  }
  func.func @transform_19(%arg0: i32) -> (i32, i32) {
    %c0_i32 = arith.constant 0 : i32
    %c0_i32_0 = arith.constant 0 : i32
    %c0_i32_1 = arith.constant 0 : i32
    return %c0_i32, %c0_i32_0 : i32, i32
  }
  func.func @transform_20(%arg0: i32) -> (i32, i32) {
    %c0_i32 = arith.constant 0 : i32
    %c0_i32_0 = arith.constant 0 : i32
    %c0_i32_1 = arith.constant 0 : i32
    return %c0_i32, %c0_i32_0 : i32, i32
  }
  func.func @transform_21(%arg0: i32) -> (i32, i32, i32) {
    %c0_i32 = arith.constant 0 : i32
    %c0_i32_0 = arith.constant 0 : i32
    %c0_i32_1 = arith.constant 0 : i32
    return %arg0, %c0_i32, %c0_i32_0 : i32, i32, i32
  }
  func.func @transform_22(%arg0: i32) -> (i32, i32, i32, i32) {
    %c0_i32 = arith.constant 0 : i32
    %c0_i32_0 = arith.constant 0 : i32
    %c0_i32_1 = arith.constant 0 : i32
    %c0_i32_2 = arith.constant 0 : i32
    return %arg0, %c0_i32, %c0_i32_0, %c0_i32_1 : i32, i32, i32, i32
  }
}

module attributes {stable_mosaic.version = 11 : i64} {
  func.func @kernel(%arg0: i32, %arg1: memref<1x8x32xbf16, #tpu.memory_space<vmem>>, %arg2: memref<1x8x32xbf16, #tpu.memory_space<vmem>>, %arg3: memref<8x8xf32, #tpu.memory_space<vmem>>, %arg4: memref<1x1x8xf32, #tpu.memory_space<vmem>>, %arg5: memref<6x32xf32, #tpu.memory_space<vmem>>, %arg6: memref<4x32x8xbf16, #tpu.memory_space<vmem>>, %arg7: memref<4x32x8xbf16, #tpu.memory_space<vmem>>, %arg8: memref<4x32x8xbf16, #tpu.memory_space<vmem>>, %arg9: memref<4x8x32xbf16, #tpu.memory_space<vmem>>, %arg10: memref<4x1x8xf32, #tpu.memory_space<vmem>>, %arg11: memref<4x8x8xbf16, #tpu.memory_space<vmem>>, %arg12: memref<4x8x8xf32, #tpu.memory_space<vmem>>, %arg13: memref<8x8x8xf32, #tpu.memory_space<vmem>>, %arg14: memref<4x32x8xbf16, #tpu.memory_space<vmem>>, %arg15: memref<4x32x8xbf16, #tpu.memory_space<vmem>>, %arg16: memref<4x32x8xbf16, #tpu.memory_space<vmem>>, %arg17: memref<4x8x32xbf16, #tpu.memory_space<vmem>>, %arg18: memref<32x64xbf16, #tpu.memory_space<vmem>>, %arg19: memref<1x64xf32, #tpu.memory_space<vmem>>, %arg20: memref<64x32xbf16, #tpu.memory_space<vmem>>, %arg21: memref<1x32xf32, #tpu.memory_space<vmem>>, %arg22: memref<1x8x32xf32, #tpu.memory_space<vmem>>, %arg23: memref<1x4x8x8xbf16, #tpu.memory_space<vmem>>, %arg24: memref<8x32xf32, #tpu.memory_space<vmem>>, %arg25: memref<8x32xbf16, #tpu.memory_space<vmem>>, %arg26: memref<8x32xf32, #tpu.memory_space<vmem>>) attributes {dimension_semantics = [#tpu.dimension_semantics<parallel>], iteration_bounds = array<i64: 2>, scalar_prefetch = 0 : i64, scratch_operands = 3 : i64, tpu.core_type = #tpu.core_type<tc>, window_params = [{transform_indices = @transform_0, window_bounds = array<i64: 1, 8, 32>}, {transform_indices = @transform_1, window_bounds = array<i64: 1, 8, 32>}, {pipeline_mode = #tpu.pipeline_mode<synchronous>, transform_indices = @transform_2, window_bounds = array<i64: 8, 8>}, {transform_indices = @transform_3, window_bounds = array<i64: 1, 1, 8>}, {pipeline_mode = #tpu.pipeline_mode<synchronous>, transform_indices = @transform_4, window_bounds = array<i64: 6, 32>}, {pipeline_mode = #tpu.pipeline_mode<synchronous>, transform_indices = @transform_5, window_bounds = array<i64: 4, 32, 8>}, {pipeline_mode = #tpu.pipeline_mode<synchronous>, transform_indices = @transform_6, window_bounds = array<i64: 4, 32, 8>}, {pipeline_mode = #tpu.pipeline_mode<synchronous>, transform_indices = @transform_7, window_bounds = array<i64: 4, 32, 8>}, {pipeline_mode = #tpu.pipeline_mode<synchronous>, transform_indices = @transform_8, window_bounds = array<i64: 4, 8, 32>}, {pipeline_mode = #tpu.pipeline_mode<synchronous>, transform_indices = @transform_9, window_bounds = array<i64: 4, 1, 8>}, {pipeline_mode = #tpu.pipeline_mode<synchronous>, transform_indices = @transform_10, window_bounds = array<i64: 4, 8, 8>}, {pipeline_mode = #tpu.pipeline_mode<synchronous>, transform_indices = @transform_11, window_bounds = array<i64: 4, 8, 8>}, {pipeline_mode = #tpu.pipeline_mode<synchronous>, transform_indices = @transform_12, window_bounds = array<i64: 8, 8, 8>}, {pipeline_mode = #tpu.pipeline_mode<synchronous>, transform_indices = @transform_13, window_bounds = array<i64: 4, 32, 8>}, {pipeline_mode = #tpu.pipeline_mode<synchronous>, transform_indices = @transform_14, window_bounds = array<i64: 4, 32, 8>}, {pipeline_mode = #tpu.pipeline_mode<synchronous>, transform_indices = @transform_15, window_bounds = array<i64: 4, 32, 8>}, {pipeline_mode = #tpu.pipeline_mode<synchronous>, transform_indices = @transform_16, window_bounds = array<i64: 4, 8, 32>}, {pipeline_mode = #tpu.pipeline_mode<synchronous>, transform_indices = @transform_17, window_bounds = array<i64: 32, 64>}, {pipeline_mode = #tpu.pipeline_mode<synchronous>, transform_indices = @transform_18, window_bounds = array<i64: 1, 64>}, {pipeline_mode = #tpu.pipeline_mode<synchronous>, transform_indices = @transform_19, window_bounds = array<i64: 64, 32>}, {pipeline_mode = #tpu.pipeline_mode<synchronous>, transform_indices = @transform_20, window_bounds = array<i64: 1, 32>}, {transform_indices = @transform_21, window_bounds = array<i64: 1, 8, 32>}, {transform_indices = @transform_22, window_bounds = array<i64: 1, 4, 8, 8>}]} {
    %c0 = arith.constant 0 : index
    %c0_0 = arith.constant 0 : index
    %c0_1 = arith.constant 0 : index
    %0 = vector.load %arg1[%c0, %c0_0, %c0_1] : memref<1x8x32xbf16, #tpu.memory_space<vmem>>, vector<1x8x32xbf16>
    %1 = vector.shape_cast %0 : vector<1x8x32xbf16> to vector<8x32xbf16>
    %2 = arith.extf %1 : vector<8x32xbf16> to vector<8x32xf32>
    %c0_2 = arith.constant 0 : index
    %c0_3 = arith.constant 0 : index
    %3 = vector.load %arg24[%c0_2, %c0_3] : memref<8x32xf32, #tpu.memory_space<vmem>>, vector<8x32xf32>
    tpu.vector_store %arg24[%c0_2, %c0_3], %2 {strides = array<i32>} : memref<8x32xf32, #tpu.memory_space<vmem>>, vector<8x32xf32>,
    %c0_4 = arith.constant 0 : index
    %c0_5 = arith.constant 0 : index
    %4 = vector.load %arg24[%c0_4, %c0_5] : memref<8x32xf32, #tpu.memory_space<vmem>>, vector<8x32xf32>
    %c0_6 = arith.constant 0 : index
    %c0_7 = arith.constant 0 : index
    %5 = vector.load %arg5[%c0_6, %c0_7] : memref<6x32xf32, #tpu.memory_space<vmem>>, vector<1x32xf32>
    %c1 = arith.constant 1 : index
    %c0_8 = arith.constant 0 : index
    %6 = vector.load %arg5[%c1, %c0_8] : memref<6x32xf32, #tpu.memory_space<vmem>>, vector<1x32xf32>
    %cst = arith.constant dense<0.000000e+00> : vector<8xf32>
    %7 = vector.multi_reduction <add>, %4, %cst [1] : vector<8x32xf32> to vector<8xf32>
    %8 = vector.shape_cast %7 : vector<8xf32> to vector<8x1xf32>
    %cst_9 = arith.constant 3.200000e+01 : f32
    %9 = vector.broadcast %cst_9 : f32 to vector<8x1xf32>
    %10 = arith.divf %8, %9 : vector<8x1xf32>
    %11 = vector.broadcast %10 : vector<8x1xf32> to vector<8x32xf32>
    %12 = arith.subf %4, %11 : vector<8x32xf32>
    %13 = vector.broadcast %10 : vector<8x1xf32> to vector<8x32xf32>
    %14 = arith.subf %4, %13 : vector<8x32xf32>
    %15 = arith.mulf %12, %14 : vector<8x32xf32>
    %cst_10 = arith.constant dense<0.000000e+00> : vector<8xf32>
    %16 = vector.multi_reduction <add>, %15, %cst_10 [1] : vector<8x32xf32> to vector<8xf32>
    %17 = vector.shape_cast %16 : vector<8xf32> to vector<8x1xf32>
    %cst_11 = arith.constant 3.200000e+01 : f32
    %18 = vector.broadcast %cst_11 : f32 to vector<8x1xf32>
    %19 = arith.divf %17, %18 : vector<8x1xf32>
    %20 = vector.broadcast %10 : vector<8x1xf32> to vector<8x32xf32>
    %21 = arith.subf %4, %20 : vector<8x32xf32>
    %cst_12 = arith.constant 9.99999974E-6 : f32
    %22 = vector.broadcast %cst_12 : f32 to vector<8x1xf32>
    %23 = arith.addf %19, %22 : vector<8x1xf32>
    %24 = math.rsqrt %23 : vector<8x1xf32>
    %25 = vector.broadcast %24 : vector<8x1xf32> to vector<8x32xf32>
    %26 = arith.mulf %21, %25 : vector<8x32xf32>
    %27 = vector.broadcast %5 : vector<1x32xf32> to vector<8x32xf32>
    %28 = arith.mulf %26, %27 : vector<8x32xf32>
    %29 = vector.broadcast %6 : vector<1x32xf32> to vector<8x32xf32>
    %30 = arith.addf %28, %29 : vector<8x32xf32>
    %31 = arith.truncf %30 : vector<8x32xf32> to vector<8x32xbf16>
    %c0_13 = arith.constant 0 : index
    %c0_14 = arith.constant 0 : index
    %32 = vector.load %arg25[%c0_13, %c0_14] : memref<8x32xbf16, #tpu.memory_space<vmem>>, vector<8x32xbf16>
    tpu.vector_store %arg25[%c0_13, %c0_14], %31 {strides = array<i32>} : memref<8x32xbf16, #tpu.memory_space<vmem>>, vector<8x32xbf16>,
    %cst_15 = arith.constant 0.000000e+00 : f32
    %33 = vector.broadcast %cst_15 : f32 to vector<8x32xf32>
    %c0_16 = arith.constant 0 : index
    %c0_17 = arith.constant 0 : index
    %34 = vector.load %arg26[%c0_16, %c0_17] : memref<8x32xf32, #tpu.memory_space<vmem>>, vector<8x32xf32>
    tpu.vector_store %arg26[%c0_16, %c0_17], %33 {strides = array<i32>} : memref<8x32xf32, #tpu.memory_space<vmem>>, vector<8x32xf32>,
    %c0_18 = arith.constant 0 : index
    %c0_19 = arith.constant 0 : index
    %35 = vector.load %arg3[%c0_18, %c0_19] : memref<8x8xf32, #tpu.memory_space<vmem>>, vector<8x8xf32>
    %c0_20 = arith.constant 0 : index
    %c0_21 = arith.constant 0 : index
    %36 = vector.load %arg25[%c0_20, %c0_21] : memref<8x32xbf16, #tpu.memory_space<vmem>>, vector<8x32xbf16>
    %c0_22 = arith.constant 0 : index
    %c0_23 = arith.constant 0 : index
    %c0_24 = arith.constant 0 : index
    %37 = vector.load %arg6[%c0_22, %c0_23, %c0_24] : memref<4x32x8xbf16, #tpu.memory_space<vmem>>, vector<1x32x8xbf16>
    %38 = vector.shape_cast %37 : vector<1x32x8xbf16> to vector<32x8xbf16>
    %cst_25 = arith.constant dense<0.000000e+00> : vector<8x8xf32>
    %39 = tpu.matmul %36, %38, %cst_25 {dimension_numbers = #tpu.dot_dimension_numbers<[1], [0], [0], [1], [0, 0, 1, 1], [], []>} : vector<8x32xbf16>, vector<32x8xbf16>, vector<8x8xf32> -> vector<8x8xf32>
    %c0_26 = arith.constant 0 : index
    %c0_27 = arith.constant 0 : index
    %c0_28 = arith.constant 0 : index
    %40 = vector.load %arg7[%c0_26, %c0_27, %c0_28] : memref<4x32x8xbf16, #tpu.memory_space<vmem>>, vector<1x32x8xbf16>
    %41 = vector.shape_cast %40 : vector<1x32x8xbf16> to vector<32x8xbf16>
    %cst_29 = arith.constant dense<0.000000e+00> : vector<8x8xf32>
    %42 = tpu.matmul %36, %41, %cst_29 {dimension_numbers = #tpu.dot_dimension_numbers<[1], [0], [0], [1], [0, 0, 1, 1], [], []>} : vector<8x32xbf16>, vector<32x8xbf16>, vector<8x8xf32> -> vector<8x8xf32>
    %c0_30 = arith.constant 0 : index
    %c0_31 = arith.constant 0 : index
    %c0_32 = arith.constant 0 : index
    %43 = vector.load %arg8[%c0_30, %c0_31, %c0_32] : memref<4x32x8xbf16, #tpu.memory_space<vmem>>, vector<1x32x8xbf16>
    %44 = vector.shape_cast %43 : vector<1x32x8xbf16> to vector<32x8xbf16>
    %cst_33 = arith.constant dense<0.000000e+00> : vector<8x8xf32>
    %45 = tpu.matmul %36, %44, %cst_33 {dimension_numbers = #tpu.dot_dimension_numbers<[1], [0], [0], [1], [0, 0, 1, 1], [], []>} : vector<8x32xbf16>, vector<32x8xbf16>, vector<8x8xf32> -> vector<8x8xf32>
    %c0_34 = arith.constant 0 : index
    %c0_35 = arith.constant 0 : index
    %c0_36 = arith.constant 0 : index
    %46 = vector.load %arg10[%c0_34, %c0_35, %c0_36] : memref<4x1x8xf32, #tpu.memory_space<vmem>>, vector<1x1x8xf32>
    %47 = vector.shape_cast %46 : vector<1x1x8xf32> to vector<1x8xf32>
    %48 = vector.broadcast %47 : vector<1x8xf32> to vector<8x8xf32>
    %49 = arith.addf %39, %48 : vector<8x8xf32>
    %50 = arith.truncf %49 : vector<8x8xf32> to vector<8x8xbf16>
    %51 = arith.truncf %42 : vector<8x8xf32> to vector<8x8xbf16>
    %cst_37 = arith.constant dense<0.000000e+00> : vector<8x8xf32>
    %52 = tpu.matmul %50, %51, %cst_37 {dimension_numbers = #tpu.dot_dimension_numbers<[1], [1], [0], [0], [0, 0, 1, 0], [], []>} : vector<8x8xbf16>, vector<8x8xbf16>, vector<8x8xf32> -> vector<8x8xf32>
    %c0_38 = arith.constant 0 : index
    %c0_39 = arith.constant 0 : index
    %c0_40 = arith.constant 0 : index
    %53 = vector.load %arg11[%c0_38, %c0_39, %c0_40] : memref<4x8x8xbf16, #tpu.memory_space<vmem>>, vector<1x8x8xbf16>
    %54 = vector.shape_cast %53 : vector<1x8x8xbf16> to vector<8x8xbf16>
    %55 = arith.truncf %39 : vector<8x8xf32> to vector<8x8xbf16>
    %cst_41 = arith.constant dense<0.000000e+00> : vector<8x8xf32>
    %56 = tpu.matmul %55, %54, %cst_41 {dimension_numbers = #tpu.dot_dimension_numbers<[1], [1], [0], [0], [0, 0, 1, 0], [], []>} : vector<8x8xbf16>, vector<8x8xbf16>, vector<8x8xf32> -> vector<8x8xf32>
    %57 = vector.shape_cast %56 : vector<8x8xf32> to vector<8x1x8xf32>
    %c0_42 = arith.constant 0 : index
    %c0_43 = arith.constant 0 : index
    %c0_44 = arith.constant 0 : index
    %58 = vector.load %arg13[%c0_42, %c0_43, %c0_44] : memref<8x8x8xf32, #tpu.memory_space<vmem>>, vector<8x8x8xf32>
    %59 = vector.broadcast %57 : vector<8x1x8xf32> to vector<8x8x8xf32>
    %60 = arith.mulf %59, %58 : vector<8x8x8xf32>
    %cst_45 = arith.constant dense<0.000000e+00> : vector<8x8xf32>
    %61 = vector.multi_reduction <add>, %60, %cst_45 [2] : vector<8x8x8xf32> to vector<8x8xf32>
    %62 = arith.addf %52, %61 : vector<8x8xf32>
    %c0_46 = arith.constant 0 : index
    %c0_47 = arith.constant 0 : index
    %c0_48 = arith.constant 0 : index
    %63 = vector.load %arg12[%c0_46, %c0_47, %c0_48] : memref<4x8x8xf32, #tpu.memory_space<vmem>>, vector<1x8x8xf32>
    %64 = vector.shape_cast %63 : vector<1x8x8xf32> to vector<8x8xf32>
    %65 = arith.addf %62, %64 : vector<8x8xf32>
    %cst_49 = arith.constant 0.353553385 : f32
    %66 = vector.broadcast %cst_49 : f32 to vector<8x8xf32>
    %67 = arith.mulf %65, %66 : vector<8x8xf32>
    %68 = arith.addf %67, %35 : vector<8x8xf32>
    %cst_50 = arith.constant dense<0xFF800000> : vector<8xf32>
    %69 = vector.multi_reduction <maximumf>, %68, %cst_50 [1] : vector<8x8xf32> to vector<8xf32>
    %70 = vector.shape_cast %69 : vector<8xf32> to vector<8x1xf32>
    %71 = vector.broadcast %70 : vector<8x1xf32> to vector<8x8xf32>
    %72 = arith.subf %68, %71 : vector<8x8xf32>
    %73 = math.exp %72 : vector<8x8xf32>
    %cst_51 = arith.constant dense<0.000000e+00> : vector<8xf32>
    %74 = vector.multi_reduction <add>, %73, %cst_51 [1] : vector<8x8xf32> to vector<8xf32>
    %75 = vector.shape_cast %74 : vector<8xf32> to vector<8x1xf32>
    %76 = tpu.reciprocal %75 {approx = true} : vector<8x1xf32> -> vector<8x1xf32>
    %77 = vector.broadcast %76 : vector<8x1xf32> to vector<8x8xf32>
    %78 = arith.mulf %73, %77 : vector<8x8xf32>
    %c0_52 = arith.constant 0 : index
    %c0_53 = arith.constant 0 : index
    %79 = vector.load %arg26[%c0_52, %c0_53] : memref<8x32xf32, #tpu.memory_space<vmem>>, vector<8x32xf32>
    %80 = arith.truncf %78 : vector<8x8xf32> to vector<8x8xbf16>
    %81 = arith.truncf %45 : vector<8x8xf32> to vector<8x8xbf16>
    %cst_54 = arith.constant dense<0.000000e+00> : vector<8x8xf32>
    %82 = tpu.matmul %80, %81, %cst_54 {dimension_numbers = #tpu.dot_dimension_numbers<[1], [0], [0], [1], [0, 0, 1, 1], [], []>} : vector<8x8xbf16>, vector<8x8xbf16>, vector<8x8xf32> -> vector<8x8xf32>
    %c0_55 = arith.constant 0 : index
    %c0_56 = arith.constant 0 : index
    %c0_57 = arith.constant 0 : index
    %83 = vector.load %arg9[%c0_55, %c0_56, %c0_57] : memref<4x8x32xbf16, #tpu.memory_space<vmem>>, vector<1x8x32xbf16>
    %84 = vector.shape_cast %83 : vector<1x8x32xbf16> to vector<8x32xbf16>
    %85 = arith.truncf %82 : vector<8x8xf32> to vector<8x8xbf16>
    %cst_58 = arith.constant dense<0.000000e+00> : vector<8x32xf32>
    %86 = tpu.matmul %85, %84, %cst_58 {dimension_numbers = #tpu.dot_dimension_numbers<[1], [0], [0], [1], [0, 0, 1, 1], [], []>} : vector<8x8xbf16>, vector<8x32xbf16>, vector<8x32xf32> -> vector<8x32xf32>
    %87 = arith.addf %79, %86 : vector<8x32xf32>
    %c0_59 = arith.constant 0 : index
    %c0_60 = arith.constant 0 : index
    %88 = vector.load %arg26[%c0_59, %c0_60] : memref<8x32xf32, #tpu.memory_space<vmem>>, vector<8x32xf32>
    tpu.vector_store %arg26[%c0_59, %c0_60], %87 {strides = array<i32>} : memref<8x32xf32, #tpu.memory_space<vmem>>, vector<8x32xf32>,
    %c0_61 = arith.constant 0 : index
    %c0_62 = arith.constant 0 : index
    %89 = vector.load %arg25[%c0_61, %c0_62] : memref<8x32xbf16, #tpu.memory_space<vmem>>, vector<8x32xbf16>
    %c1_63 = arith.constant 1 : index
    %c0_64 = arith.constant 0 : index
    %c0_65 = arith.constant 0 : index
    %90 = vector.load %arg6[%c1_63, %c0_64, %c0_65] : memref<4x32x8xbf16, #tpu.memory_space<vmem>>, vector<1x32x8xbf16>
    %91 = vector.shape_cast %90 : vector<1x32x8xbf16> to vector<32x8xbf16>
    %cst_66 = arith.constant dense<0.000000e+00> : vector<8x8xf32>
    %92 = tpu.matmul %89, %91, %cst_66 {dimension_numbers = #tpu.dot_dimension_numbers<[1], [0], [0], [1], [0, 0, 1, 1], [], []>} : vector<8x32xbf16>, vector<32x8xbf16>, vector<8x8xf32> -> vector<8x8xf32>
    %c1_67 = arith.constant 1 : index
    %c0_68 = arith.constant 0 : index
    %c0_69 = arith.constant 0 : index
    %93 = vector.load %arg7[%c1_67, %c0_68, %c0_69] : memref<4x32x8xbf16, #tpu.memory_space<vmem>>, vector<1x32x8xbf16>
    %94 = vector.shape_cast %93 : vector<1x32x8xbf16> to vector<32x8xbf16>
    %cst_70 = arith.constant dense<0.000000e+00> : vector<8x8xf32>
    %95 = tpu.matmul %89, %94, %cst_70 {dimension_numbers = #tpu.dot_dimension_numbers<[1], [0], [0], [1], [0, 0, 1, 1], [], []>} : vector<8x32xbf16>, vector<32x8xbf16>, vector<8x8xf32> -> vector<8x8xf32>
    %c1_71 = arith.constant 1 : index
    %c0_72 = arith.constant 0 : index
    %c0_73 = arith.constant 0 : index
    %96 = vector.load %arg8[%c1_71, %c0_72, %c0_73] : memref<4x32x8xbf16, #tpu.memory_space<vmem>>, vector<1x32x8xbf16>
    %97 = vector.shape_cast %96 : vector<1x32x8xbf16> to vector<32x8xbf16>
    %cst_74 = arith.constant dense<0.000000e+00> : vector<8x8xf32>
    %98 = tpu.matmul %89, %97, %cst_74 {dimension_numbers = #tpu.dot_dimension_numbers<[1], [0], [0], [1], [0, 0, 1, 1], [], []>} : vector<8x32xbf16>, vector<32x8xbf16>, vector<8x8xf32> -> vector<8x8xf32>
    %c1_75 = arith.constant 1 : index
    %c0_76 = arith.constant 0 : index
    %c0_77 = arith.constant 0 : index
    %99 = vector.load %arg10[%c1_75, %c0_76, %c0_77] : memref<4x1x8xf32, #tpu.memory_space<vmem>>, vector<1x1x8xf32>
    %100 = vector.shape_cast %99 : vector<1x1x8xf32> to vector<1x8xf32>
    %101 = vector.broadcast %100 : vector<1x8xf32> to vector<8x8xf32>
    %102 = arith.addf %92, %101 : vector<8x8xf32>
    %103 = arith.truncf %102 : vector<8x8xf32> to vector<8x8xbf16>
    %104 = arith.truncf %95 : vector<8x8xf32> to vector<8x8xbf16>
    %cst_78 = arith.constant dense<0.000000e+00> : vector<8x8xf32>
    %105 = tpu.matmul %103, %104, %cst_78 {dimension_numbers = #tpu.dot_dimension_numbers<[1], [1], [0], [0], [0, 0, 1, 0], [], []>} : vector<8x8xbf16>, vector<8x8xbf16>, vector<8x8xf32> -> vector<8x8xf32>
    %c1_79 = arith.constant 1 : index
    %c0_80 = arith.constant 0 : index
    %c0_81 = arith.constant 0 : index
    %106 = vector.load %arg11[%c1_79, %c0_80, %c0_81] : memref<4x8x8xbf16, #tpu.memory_space<vmem>>, vector<1x8x8xbf16>
    %107 = vector.shape_cast %106 : vector<1x8x8xbf16> to vector<8x8xbf16>
    %108 = arith.truncf %92 : vector<8x8xf32> to vector<8x8xbf16>
    %cst_82 = arith.constant dense<0.000000e+00> : vector<8x8xf32>
    %109 = tpu.matmul %108, %107, %cst_82 {dimension_numbers = #tpu.dot_dimension_numbers<[1], [1], [0], [0], [0, 0, 1, 0], [], []>} : vector<8x8xbf16>, vector<8x8xbf16>, vector<8x8xf32> -> vector<8x8xf32>
    %110 = vector.shape_cast %109 : vector<8x8xf32> to vector<8x1x8xf32>
    %c0_83 = arith.constant 0 : index
    %c0_84 = arith.constant 0 : index
    %c0_85 = arith.constant 0 : index
    %111 = vector.load %arg13[%c0_83, %c0_84, %c0_85] : memref<8x8x8xf32, #tpu.memory_space<vmem>>, vector<8x8x8xf32>
    %112 = vector.broadcast %110 : vector<8x1x8xf32> to vector<8x8x8xf32>
    %113 = arith.mulf %112, %111 : vector<8x8x8xf32>
    %cst_86 = arith.constant dense<0.000000e+00> : vector<8x8xf32>
    %114 = vector.multi_reduction <add>, %113, %cst_86 [2] : vector<8x8x8xf32> to vector<8x8xf32>
    %115 = arith.addf %105, %114 : vector<8x8xf32>
    %c1_87 = arith.constant 1 : index
    %c0_88 = arith.constant 0 : index
    %c0_89 = arith.constant 0 : index
    %116 = vector.load %arg12[%c1_87, %c0_88, %c0_89] : memref<4x8x8xf32, #tpu.memory_space<vmem>>, vector<1x8x8xf32>
    %117 = vector.shape_cast %116 : vector<1x8x8xf32> to vector<8x8xf32>
    %118 = arith.addf %115, %117 : vector<8x8xf32>
    %cst_90 = arith.constant 0.353553385 : f32
    %119 = vector.broadcast %cst_90 : f32 to vector<8x8xf32>
    %120 = arith.mulf %118, %119 : vector<8x8xf32>
    %121 = arith.addf %120, %35 : vector<8x8xf32>
    %cst_91 = arith.constant dense<0xFF800000> : vector<8xf32>
    %122 = vector.multi_reduction <maximumf>, %121, %cst_91 [1] : vector<8x8xf32> to vector<8xf32>
    %123 = vector.shape_cast %122 : vector<8xf32> to vector<8x1xf32>
    %124 = vector.broadcast %123 : vector<8x1xf32> to vector<8x8xf32>
    %125 = arith.subf %121, %124 : vector<8x8xf32>
    %126 = math.exp %125 : vector<8x8xf32>
    %cst_92 = arith.constant dense<0.000000e+00> : vector<8xf32>
    %127 = vector.multi_reduction <add>, %126, %cst_92 [1] : vector<8x8xf32> to vector<8xf32>
    %128 = vector.shape_cast %127 : vector<8xf32> to vector<8x1xf32>
    %129 = tpu.reciprocal %128 {approx = true} : vector<8x1xf32> -> vector<8x1xf32>
    %130 = vector.broadcast %129 : vector<8x1xf32> to vector<8x8xf32>
    %131 = arith.mulf %126, %130 : vector<8x8xf32>
    %c0_93 = arith.constant 0 : index
    %c0_94 = arith.constant 0 : index
    %132 = vector.load %arg26[%c0_93, %c0_94] : memref<8x32xf32, #tpu.memory_space<vmem>>, vector<8x32xf32>
    %133 = arith.truncf %131 : vector<8x8xf32> to vector<8x8xbf16>
    %134 = arith.truncf %98 : vector<8x8xf32> to vector<8x8xbf16>
    %cst_95 = arith.constant dense<0.000000e+00> : vector<8x8xf32>
    %135 = tpu.matmul %133, %134, %cst_95 {dimension_numbers = #tpu.dot_dimension_numbers<[1], [0], [0], [1], [0, 0, 1, 1], [], []>} : vector<8x8xbf16>, vector<8x8xbf16>, vector<8x8xf32> -> vector<8x8xf32>
    %c1_96 = arith.constant 1 : index
    %c0_97 = arith.constant 0 : index
    %c0_98 = arith.constant 0 : index
    %136 = vector.load %arg9[%c1_96, %c0_97, %c0_98] : memref<4x8x32xbf16, #tpu.memory_space<vmem>>, vector<1x8x32xbf16>
    %137 = vector.shape_cast %136 : vector<1x8x32xbf16> to vector<8x32xbf16>
    %138 = arith.truncf %135 : vector<8x8xf32> to vector<8x8xbf16>
    %cst_99 = arith.constant dense<0.000000e+00> : vector<8x32xf32>
    %139 = tpu.matmul %138, %137, %cst_99 {dimension_numbers = #tpu.dot_dimension_numbers<[1], [0], [0], [1], [0, 0, 1, 1], [], []>} : vector<8x8xbf16>, vector<8x32xbf16>, vector<8x32xf32> -> vector<8x32xf32>
    %140 = arith.addf %132, %139 : vector<8x32xf32>
    %c0_100 = arith.constant 0 : index
    %c0_101 = arith.constant 0 : index
    %141 = vector.load %arg26[%c0_100, %c0_101] : memref<8x32xf32, #tpu.memory_space<vmem>>, vector<8x32xf32>
    tpu.vector_store %arg26[%c0_100, %c0_101], %140 {strides = array<i32>} : memref<8x32xf32, #tpu.memory_space<vmem>>, vector<8x32xf32>,
    %c0_102 = arith.constant 0 : index
    %c0_103 = arith.constant 0 : index
    %142 = vector.load %arg25[%c0_102, %c0_103] : memref<8x32xbf16, #tpu.memory_space<vmem>>, vector<8x32xbf16>
    %c2 = arith.constant 2 : index
    %c0_104 = arith.constant 0 : index
    %c0_105 = arith.constant 0 : index
    %143 = vector.load %arg6[%c2, %c0_104, %c0_105] : memref<4x32x8xbf16, #tpu.memory_space<vmem>>, vector<1x32x8xbf16>
    %144 = vector.shape_cast %143 : vector<1x32x8xbf16> to vector<32x8xbf16>
    %cst_106 = arith.constant dense<0.000000e+00> : vector<8x8xf32>
    %145 = tpu.matmul %142, %144, %cst_106 {dimension_numbers = #tpu.dot_dimension_numbers<[1], [0], [0], [1], [0, 0, 1, 1], [], []>} : vector<8x32xbf16>, vector<32x8xbf16>, vector<8x8xf32> -> vector<8x8xf32>
    %c2_107 = arith.constant 2 : index
    %c0_108 = arith.constant 0 : index
    %c0_109 = arith.constant 0 : index
    %146 = vector.load %arg7[%c2_107, %c0_108, %c0_109] : memref<4x32x8xbf16, #tpu.memory_space<vmem>>, vector<1x32x8xbf16>
    %147 = vector.shape_cast %146 : vector<1x32x8xbf16> to vector<32x8xbf16>
    %cst_110 = arith.constant dense<0.000000e+00> : vector<8x8xf32>
    %148 = tpu.matmul %142, %147, %cst_110 {dimension_numbers = #tpu.dot_dimension_numbers<[1], [0], [0], [1], [0, 0, 1, 1], [], []>} : vector<8x32xbf16>, vector<32x8xbf16>, vector<8x8xf32> -> vector<8x8xf32>
    %c2_111 = arith.constant 2 : index
    %c0_112 = arith.constant 0 : index
    %c0_113 = arith.constant 0 : index
    %149 = vector.load %arg8[%c2_111, %c0_112, %c0_113] : memref<4x32x8xbf16, #tpu.memory_space<vmem>>, vector<1x32x8xbf16>
    %150 = vector.shape_cast %149 : vector<1x32x8xbf16> to vector<32x8xbf16>
    %cst_114 = arith.constant dense<0.000000e+00> : vector<8x8xf32>
    %151 = tpu.matmul %142, %150, %cst_114 {dimension_numbers = #tpu.dot_dimension_numbers<[1], [0], [0], [1], [0, 0, 1, 1], [], []>} : vector<8x32xbf16>, vector<32x8xbf16>, vector<8x8xf32> -> vector<8x8xf32>
    %c2_115 = arith.constant 2 : index
    %c0_116 = arith.constant 0 : index
    %c0_117 = arith.constant 0 : index
    %152 = vector.load %arg10[%c2_115, %c0_116, %c0_117] : memref<4x1x8xf32, #tpu.memory_space<vmem>>, vector<1x1x8xf32>
    %153 = vector.shape_cast %152 : vector<1x1x8xf32> to vector<1x8xf32>
    %154 = vector.broadcast %153 : vector<1x8xf32> to vector<8x8xf32>
    %155 = arith.addf %145, %154 : vector<8x8xf32>
    %156 = arith.truncf %155 : vector<8x8xf32> to vector<8x8xbf16>
    %157 = arith.truncf %148 : vector<8x8xf32> to vector<8x8xbf16>
    %cst_118 = arith.constant dense<0.000000e+00> : vector<8x8xf32>
    %158 = tpu.matmul %156, %157, %cst_118 {dimension_numbers = #tpu.dot_dimension_numbers<[1], [1], [0], [0], [0, 0, 1, 0], [], []>} : vector<8x8xbf16>, vector<8x8xbf16>, vector<8x8xf32> -> vector<8x8xf32>
    %c2_119 = arith.constant 2 : index
    %c0_120 = arith.constant 0 : index
    %c0_121 = arith.constant 0 : index
    %159 = vector.load %arg11[%c2_119, %c0_120, %c0_121] : memref<4x8x8xbf16, #tpu.memory_space<vmem>>, vector<1x8x8xbf16>
    %160 = vector.shape_cast %159 : vector<1x8x8xbf16> to vector<8x8xbf16>
    %161 = arith.truncf %145 : vector<8x8xf32> to vector<8x8xbf16>
    %cst_122 = arith.constant dense<0.000000e+00> : vector<8x8xf32>
    %162 = tpu.matmul %161, %160, %cst_122 {dimension_numbers = #tpu.dot_dimension_numbers<[1], [1], [0], [0], [0, 0, 1, 0], [], []>} : vector<8x8xbf16>, vector<8x8xbf16>, vector<8x8xf32> -> vector<8x8xf32>
    %163 = vector.shape_cast %162 : vector<8x8xf32> to vector<8x1x8xf32>
    %c0_123 = arith.constant 0 : index
    %c0_124 = arith.constant 0 : index
    %c0_125 = arith.constant 0 : index
    %164 = vector.load %arg13[%c0_123, %c0_124, %c0_125] : memref<8x8x8xf32, #tpu.memory_space<vmem>>, vector<8x8x8xf32>
    %165 = vector.broadcast %163 : vector<8x1x8xf32> to vector<8x8x8xf32>
    %166 = arith.mulf %165, %164 : vector<8x8x8xf32>
    %cst_126 = arith.constant dense<0.000000e+00> : vector<8x8xf32>
    %167 = vector.multi_reduction <add>, %166, %cst_126 [2] : vector<8x8x8xf32> to vector<8x8xf32>
    %168 = arith.addf %158, %167 : vector<8x8xf32>
    %c2_127 = arith.constant 2 : index
    %c0_128 = arith.constant 0 : index
    %c0_129 = arith.constant 0 : index
    %169 = vector.load %arg12[%c2_127, %c0_128, %c0_129] : memref<4x8x8xf32, #tpu.memory_space<vmem>>, vector<1x8x8xf32>
    %170 = vector.shape_cast %169 : vector<1x8x8xf32> to vector<8x8xf32>
    %171 = arith.addf %168, %170 : vector<8x8xf32>
    %cst_130 = arith.constant 0.353553385 : f32
    %172 = vector.broadcast %cst_130 : f32 to vector<8x8xf32>
    %173 = arith.mulf %171, %172 : vector<8x8xf32>
    %174 = arith.addf %173, %35 : vector<8x8xf32>
    %cst_131 = arith.constant dense<0xFF800000> : vector<8xf32>
    %175 = vector.multi_reduction <maximumf>, %174, %cst_131 [1] : vector<8x8xf32> to vector<8xf32>
    %176 = vector.shape_cast %175 : vector<8xf32> to vector<8x1xf32>
    %177 = vector.broadcast %176 : vector<8x1xf32> to vector<8x8xf32>
    %178 = arith.subf %174, %177 : vector<8x8xf32>
    %179 = math.exp %178 : vector<8x8xf32>
    %cst_132 = arith.constant dense<0.000000e+00> : vector<8xf32>
    %180 = vector.multi_reduction <add>, %179, %cst_132 [1] : vector<8x8xf32> to vector<8xf32>
    %181 = vector.shape_cast %180 : vector<8xf32> to vector<8x1xf32>
    %182 = tpu.reciprocal %181 {approx = true} : vector<8x1xf32> -> vector<8x1xf32>
    %183 = vector.broadcast %182 : vector<8x1xf32> to vector<8x8xf32>
    %184 = arith.mulf %179, %183 : vector<8x8xf32>
    %c0_133 = arith.constant 0 : index
    %c0_134 = arith.constant 0 : index
    %185 = vector.load %arg26[%c0_133, %c0_134] : memref<8x32xf32, #tpu.memory_space<vmem>>, vector<8x32xf32>
    %186 = arith.truncf %184 : vector<8x8xf32> to vector<8x8xbf16>
    %187 = arith.truncf %151 : vector<8x8xf32> to vector<8x8xbf16>
    %cst_135 = arith.constant dense<0.000000e+00> : vector<8x8xf32>
    %188 = tpu.matmul %186, %187, %cst_135 {dimension_numbers = #tpu.dot_dimension_numbers<[1], [0], [0], [1], [0, 0, 1, 1], [], []>} : vector<8x8xbf16>, vector<8x8xbf16>, vector<8x8xf32> -> vector<8x8xf32>
    %c2_136 = arith.constant 2 : index
    %c0_137 = arith.constant 0 : index
    %c0_138 = arith.constant 0 : index
    %189 = vector.load %arg9[%c2_136, %c0_137, %c0_138] : memref<4x8x32xbf16, #tpu.memory_space<vmem>>, vector<1x8x32xbf16>
    %190 = vector.shape_cast %189 : vector<1x8x32xbf16> to vector<8x32xbf16>
    %191 = arith.truncf %188 : vector<8x8xf32> to vector<8x8xbf16>
    %cst_139 = arith.constant dense<0.000000e+00> : vector<8x32xf32>
    %192 = tpu.matmul %191, %190, %cst_139 {dimension_numbers = #tpu.dot_dimension_numbers<[1], [0], [0], [1], [0, 0, 1, 1], [], []>} : vector<8x8xbf16>, vector<8x32xbf16>, vector<8x32xf32> -> vector<8x32xf32>
    %193 = arith.addf %185, %192 : vector<8x32xf32>
    %c0_140 = arith.constant 0 : index
    %c0_141 = arith.constant 0 : index
    %194 = vector.load %arg26[%c0_140, %c0_141] : memref<8x32xf32, #tpu.memory_space<vmem>>, vector<8x32xf32>
    tpu.vector_store %arg26[%c0_140, %c0_141], %193 {strides = array<i32>} : memref<8x32xf32, #tpu.memory_space<vmem>>, vector<8x32xf32>,
    %c0_142 = arith.constant 0 : index
    %c0_143 = arith.constant 0 : index
    %195 = vector.load %arg25[%c0_142, %c0_143] : memref<8x32xbf16, #tpu.memory_space<vmem>>, vector<8x32xbf16>
    %c3 = arith.constant 3 : index
    %c0_144 = arith.constant 0 : index
    %c0_145 = arith.constant 0 : index
    %196 = vector.load %arg6[%c3, %c0_144, %c0_145] : memref<4x32x8xbf16, #tpu.memory_space<vmem>>, vector<1x32x8xbf16>
    %197 = vector.shape_cast %196 : vector<1x32x8xbf16> to vector<32x8xbf16>
    %cst_146 = arith.constant dense<0.000000e+00> : vector<8x8xf32>
    %198 = tpu.matmul %195, %197, %cst_146 {dimension_numbers = #tpu.dot_dimension_numbers<[1], [0], [0], [1], [0, 0, 1, 1], [], []>} : vector<8x32xbf16>, vector<32x8xbf16>, vector<8x8xf32> -> vector<8x8xf32>
    %c3_147 = arith.constant 3 : index
    %c0_148 = arith.constant 0 : index
    %c0_149 = arith.constant 0 : index
    %199 = vector.load %arg7[%c3_147, %c0_148, %c0_149] : memref<4x32x8xbf16, #tpu.memory_space<vmem>>, vector<1x32x8xbf16>
    %200 = vector.shape_cast %199 : vector<1x32x8xbf16> to vector<32x8xbf16>
    %cst_150 = arith.constant dense<0.000000e+00> : vector<8x8xf32>
    %201 = tpu.matmul %195, %200, %cst_150 {dimension_numbers = #tpu.dot_dimension_numbers<[1], [0], [0], [1], [0, 0, 1, 1], [], []>} : vector<8x32xbf16>, vector<32x8xbf16>, vector<8x8xf32> -> vector<8x8xf32>
    %c3_151 = arith.constant 3 : index
    %c0_152 = arith.constant 0 : index
    %c0_153 = arith.constant 0 : index
    %202 = vector.load %arg8[%c3_151, %c0_152, %c0_153] : memref<4x32x8xbf16, #tpu.memory_space<vmem>>, vector<1x32x8xbf16>
    %203 = vector.shape_cast %202 : vector<1x32x8xbf16> to vector<32x8xbf16>
    %cst_154 = arith.constant dense<0.000000e+00> : vector<8x8xf32>
    %204 = tpu.matmul %195, %203, %cst_154 {dimension_numbers = #tpu.dot_dimension_numbers<[1], [0], [0], [1], [0, 0, 1, 1], [], []>} : vector<8x32xbf16>, vector<32x8xbf16>, vector<8x8xf32> -> vector<8x8xf32>
    %c3_155 = arith.constant 3 : index
    %c0_156 = arith.constant 0 : index
    %c0_157 = arith.constant 0 : index
    %205 = vector.load %arg10[%c3_155, %c0_156, %c0_157] : memref<4x1x8xf32, #tpu.memory_space<vmem>>, vector<1x1x8xf32>
    %206 = vector.shape_cast %205 : vector<1x1x8xf32> to vector<1x8xf32>
    %207 = vector.broadcast %206 : vector<1x8xf32> to vector<8x8xf32>
    %208 = arith.addf %198, %207 : vector<8x8xf32>
    %209 = arith.truncf %208 : vector<8x8xf32> to vector<8x8xbf16>
    %210 = arith.truncf %201 : vector<8x8xf32> to vector<8x8xbf16>
    %cst_158 = arith.constant dense<0.000000e+00> : vector<8x8xf32>
    %211 = tpu.matmul %209, %210, %cst_158 {dimension_numbers = #tpu.dot_dimension_numbers<[1], [1], [0], [0], [0, 0, 1, 0], [], []>} : vector<8x8xbf16>, vector<8x8xbf16>, vector<8x8xf32> -> vector<8x8xf32>
    %c3_159 = arith.constant 3 : index
    %c0_160 = arith.constant 0 : index
    %c0_161 = arith.constant 0 : index
    %212 = vector.load %arg11[%c3_159, %c0_160, %c0_161] : memref<4x8x8xbf16, #tpu.memory_space<vmem>>, vector<1x8x8xbf16>
    %213 = vector.shape_cast %212 : vector<1x8x8xbf16> to vector<8x8xbf16>
    %214 = arith.truncf %198 : vector<8x8xf32> to vector<8x8xbf16>
    %cst_162 = arith.constant dense<0.000000e+00> : vector<8x8xf32>
    %215 = tpu.matmul %214, %213, %cst_162 {dimension_numbers = #tpu.dot_dimension_numbers<[1], [1], [0], [0], [0, 0, 1, 0], [], []>} : vector<8x8xbf16>, vector<8x8xbf16>, vector<8x8xf32> -> vector<8x8xf32>
    %216 = vector.shape_cast %215 : vector<8x8xf32> to vector<8x1x8xf32>
    %c0_163 = arith.constant 0 : index
    %c0_164 = arith.constant 0 : index
    %c0_165 = arith.constant 0 : index
    %217 = vector.load %arg13[%c0_163, %c0_164, %c0_165] : memref<8x8x8xf32, #tpu.memory_space<vmem>>, vector<8x8x8xf32>
    %218 = vector.broadcast %216 : vector<8x1x8xf32> to vector<8x8x8xf32>
    %219 = arith.mulf %218, %217 : vector<8x8x8xf32>
    %cst_166 = arith.constant dense<0.000000e+00> : vector<8x8xf32>
    %220 = vector.multi_reduction <add>, %219, %cst_166 [2] : vector<8x8x8xf32> to vector<8x8xf32>
    %221 = arith.addf %211, %220 : vector<8x8xf32>
    %c3_167 = arith.constant 3 : index
    %c0_168 = arith.constant 0 : index
    %c0_169 = arith.constant 0 : index
    %222 = vector.load %arg12[%c3_167, %c0_168, %c0_169] : memref<4x8x8xf32, #tpu.memory_space<vmem>>, vector<1x8x8xf32>
    %223 = vector.shape_cast %222 : vector<1x8x8xf32> to vector<8x8xf32>
    %224 = arith.addf %221, %223 : vector<8x8xf32>
    %cst_170 = arith.constant 0.353553385 : f32
    %225 = vector.broadcast %cst_170 : f32 to vector<8x8xf32>
    %226 = arith.mulf %224, %225 : vector<8x8xf32>
    %227 = arith.addf %226, %35 : vector<8x8xf32>
    %cst_171 = arith.constant dense<0xFF800000> : vector<8xf32>
    %228 = vector.multi_reduction <maximumf>, %227, %cst_171 [1] : vector<8x8xf32> to vector<8xf32>
    %229 = vector.shape_cast %228 : vector<8xf32> to vector<8x1xf32>
    %230 = vector.broadcast %229 : vector<8x1xf32> to vector<8x8xf32>
    %231 = arith.subf %227, %230 : vector<8x8xf32>
    %232 = math.exp %231 : vector<8x8xf32>
    %cst_172 = arith.constant dense<0.000000e+00> : vector<8xf32>
    %233 = vector.multi_reduction <add>, %232, %cst_172 [1] : vector<8x8xf32> to vector<8xf32>
    %234 = vector.shape_cast %233 : vector<8xf32> to vector<8x1xf32>
    %235 = tpu.reciprocal %234 {approx = true} : vector<8x1xf32> -> vector<8x1xf32>
    %236 = vector.broadcast %235 : vector<8x1xf32> to vector<8x8xf32>
    %237 = arith.mulf %232, %236 : vector<8x8xf32>
    %c0_173 = arith.constant 0 : index
    %c0_174 = arith.constant 0 : index
    %238 = vector.load %arg26[%c0_173, %c0_174] : memref<8x32xf32, #tpu.memory_space<vmem>>, vector<8x32xf32>
    %239 = arith.truncf %237 : vector<8x8xf32> to vector<8x8xbf16>
    %240 = arith.truncf %204 : vector<8x8xf32> to vector<8x8xbf16>
    %cst_175 = arith.constant dense<0.000000e+00> : vector<8x8xf32>
    %241 = tpu.matmul %239, %240, %cst_175 {dimension_numbers = #tpu.dot_dimension_numbers<[1], [0], [0], [1], [0, 0, 1, 1], [], []>} : vector<8x8xbf16>, vector<8x8xbf16>, vector<8x8xf32> -> vector<8x8xf32>
    %c3_176 = arith.constant 3 : index
    %c0_177 = arith.constant 0 : index
    %c0_178 = arith.constant 0 : index
    %242 = vector.load %arg9[%c3_176, %c0_177, %c0_178] : memref<4x8x32xbf16, #tpu.memory_space<vmem>>, vector<1x8x32xbf16>
    %243 = vector.shape_cast %242 : vector<1x8x32xbf16> to vector<8x32xbf16>
    %244 = arith.truncf %241 : vector<8x8xf32> to vector<8x8xbf16>
    %cst_179 = arith.constant dense<0.000000e+00> : vector<8x32xf32>
    %245 = tpu.matmul %244, %243, %cst_179 {dimension_numbers = #tpu.dot_dimension_numbers<[1], [0], [0], [1], [0, 0, 1, 1], [], []>} : vector<8x8xbf16>, vector<8x32xbf16>, vector<8x32xf32> -> vector<8x32xf32>
    %246 = arith.addf %238, %245 : vector<8x32xf32>
    %c0_180 = arith.constant 0 : index
    %c0_181 = arith.constant 0 : index
    %247 = vector.load %arg26[%c0_180, %c0_181] : memref<8x32xf32, #tpu.memory_space<vmem>>, vector<8x32xf32>
    tpu.vector_store %arg26[%c0_180, %c0_181], %246 {strides = array<i32>} : memref<8x32xf32, #tpu.memory_space<vmem>>, vector<8x32xf32>,
    %c0_182 = arith.constant 0 : index
    %c0_183 = arith.constant 0 : index
    %248 = vector.load %arg24[%c0_182, %c0_183] : memref<8x32xf32, #tpu.memory_space<vmem>>, vector<8x32xf32>
    %c0_184 = arith.constant 0 : index
    %c0_185 = arith.constant 0 : index
    %249 = vector.load %arg26[%c0_184, %c0_185] : memref<8x32xf32, #tpu.memory_space<vmem>>, vector<8x32xf32>
    %250 = arith.addf %248, %249 : vector<8x32xf32>
    %c0_186 = arith.constant 0 : index
    %c0_187 = arith.constant 0 : index
    %251 = vector.load %arg24[%c0_186, %c0_187] : memref<8x32xf32, #tpu.memory_space<vmem>>, vector<8x32xf32>
    tpu.vector_store %arg24[%c0_186, %c0_187], %250 {strides = array<i32>} : memref<8x32xf32, #tpu.memory_space<vmem>>, vector<8x32xf32>,
    %c0_188 = arith.constant 0 : index
    %c0_189 = arith.constant 0 : index
    %252 = vector.load %arg24[%c0_188, %c0_189] : memref<8x32xf32, #tpu.memory_space<vmem>>, vector<8x32xf32>
    %c2_190 = arith.constant 2 : index
    %c0_191 = arith.constant 0 : index
    %253 = vector.load %arg5[%c2_190, %c0_191] : memref<6x32xf32, #tpu.memory_space<vmem>>, vector<1x32xf32>
    %c3_192 = arith.constant 3 : index
    %c0_193 = arith.constant 0 : index
    %254 = vector.load %arg5[%c3_192, %c0_193] : memref<6x32xf32, #tpu.memory_space<vmem>>, vector<1x32xf32>
    %cst_194 = arith.constant dense<0.000000e+00> : vector<8xf32>
    %255 = vector.multi_reduction <add>, %252, %cst_194 [1] : vector<8x32xf32> to vector<8xf32>
    %256 = vector.shape_cast %255 : vector<8xf32> to vector<8x1xf32>
    %cst_195 = arith.constant 3.200000e+01 : f32
    %257 = vector.broadcast %cst_195 : f32 to vector<8x1xf32>
    %258 = arith.divf %256, %257 : vector<8x1xf32>
    %259 = vector.broadcast %258 : vector<8x1xf32> to vector<8x32xf32>
    %260 = arith.subf %252, %259 : vector<8x32xf32>
    %261 = vector.broadcast %258 : vector<8x1xf32> to vector<8x32xf32>
    %262 = arith.subf %252, %261 : vector<8x32xf32>
    %263 = arith.mulf %260, %262 : vector<8x32xf32>
    %cst_196 = arith.constant dense<0.000000e+00> : vector<8xf32>
    %264 = vector.multi_reduction <add>, %263, %cst_196 [1] : vector<8x32xf32> to vector<8xf32>
    %265 = vector.shape_cast %264 : vector<8xf32> to vector<8x1xf32>
    %cst_197 = arith.constant 3.200000e+01 : f32
    %266 = vector.broadcast %cst_197 : f32 to vector<8x1xf32>
    %267 = arith.divf %265, %266 : vector<8x1xf32>
    %268 = vector.broadcast %258 : vector<8x1xf32> to vector<8x32xf32>
    %269 = arith.subf %252, %268 : vector<8x32xf32>
    %cst_198 = arith.constant 9.99999974E-6 : f32
    %270 = vector.broadcast %cst_198 : f32 to vector<8x1xf32>
    %271 = arith.addf %267, %270 : vector<8x1xf32>
    %272 = math.rsqrt %271 : vector<8x1xf32>
    %273 = vector.broadcast %272 : vector<8x1xf32> to vector<8x32xf32>
    %274 = arith.mulf %269, %273 : vector<8x32xf32>
    %275 = vector.broadcast %253 : vector<1x32xf32> to vector<8x32xf32>
    %276 = arith.mulf %274, %275 : vector<8x32xf32>
    %277 = vector.broadcast %254 : vector<1x32xf32> to vector<8x32xf32>
    %278 = arith.addf %276, %277 : vector<8x32xf32>
    %279 = arith.truncf %278 : vector<8x32xf32> to vector<8x32xbf16>
    %c0_199 = arith.constant 0 : index
    %c0_200 = arith.constant 0 : index
    %280 = vector.load %arg25[%c0_199, %c0_200] : memref<8x32xbf16, #tpu.memory_space<vmem>>, vector<8x32xbf16>
    tpu.vector_store %arg25[%c0_199, %c0_200], %279 {strides = array<i32>} : memref<8x32xbf16, #tpu.memory_space<vmem>>, vector<8x32xbf16>,
    %cst_201 = arith.constant 0.000000e+00 : f32
    %281 = vector.broadcast %cst_201 : f32 to vector<8x32xf32>
    %c0_202 = arith.constant 0 : index
    %c0_203 = arith.constant 0 : index
    %282 = vector.load %arg26[%c0_202, %c0_203] : memref<8x32xf32, #tpu.memory_space<vmem>>, vector<8x32xf32>
    tpu.vector_store %arg26[%c0_202, %c0_203], %281 {strides = array<i32>} : memref<8x32xf32, #tpu.memory_space<vmem>>, vector<8x32xf32>,
    %c0_204 = arith.constant 0 : index
    %c0_205 = arith.constant 0 : index
    %c0_206 = arith.constant 0 : index
    %283 = vector.load %arg2[%c0_204, %c0_205, %c0_206] : memref<1x8x32xbf16, #tpu.memory_space<vmem>>, vector<1x8x32xbf16>
    %284 = vector.shape_cast %283 : vector<1x8x32xbf16> to vector<8x32xbf16>
    %c0_207 = arith.constant 0 : index
    %c0_208 = arith.constant 0 : index
    %c0_209 = arith.constant 0 : index
    %285 = vector.load %arg4[%c0_207, %c0_208, %c0_209] : memref<1x1x8xf32, #tpu.memory_space<vmem>>, vector<1x1x8xf32>
    %286 = vector.shape_cast %285 : vector<1x1x8xf32> to vector<1x8xf32>
    %c0_210 = arith.constant 0 : index
    %c0_211 = arith.constant 0 : index
    %287 = vector.load %arg25[%c0_210, %c0_211] : memref<8x32xbf16, #tpu.memory_space<vmem>>, vector<8x32xbf16>
    %c0_212 = arith.constant 0 : index
    %c0_213 = arith.constant 0 : index
    %c0_214 = arith.constant 0 : index
    %288 = vector.load %arg14[%c0_212, %c0_213, %c0_214] : memref<4x32x8xbf16, #tpu.memory_space<vmem>>, vector<1x32x8xbf16>
    %289 = vector.shape_cast %288 : vector<1x32x8xbf16> to vector<32x8xbf16>
    %cst_215 = arith.constant dense<0.000000e+00> : vector<8x8xf32>
    %290 = tpu.matmul %287, %289, %cst_215 {dimension_numbers = #tpu.dot_dimension_numbers<[1], [0], [0], [1], [0, 0, 1, 1], [], []>} : vector<8x32xbf16>, vector<32x8xbf16>, vector<8x8xf32> -> vector<8x8xf32>
    %c0_216 = arith.constant 0 : index
    %c0_217 = arith.constant 0 : index
    %c0_218 = arith.constant 0 : index
    %291 = vector.load %arg15[%c0_216, %c0_217, %c0_218] : memref<4x32x8xbf16, #tpu.memory_space<vmem>>, vector<1x32x8xbf16>
    %292 = vector.shape_cast %291 : vector<1x32x8xbf16> to vector<32x8xbf16>
    %cst_219 = arith.constant dense<0.000000e+00> : vector<8x8xf32>
    %293 = tpu.matmul %284, %292, %cst_219 {dimension_numbers = #tpu.dot_dimension_numbers<[1], [0], [0], [1], [0, 0, 1, 1], [], []>} : vector<8x32xbf16>, vector<32x8xbf16>, vector<8x8xf32> -> vector<8x8xf32>
    %c0_220 = arith.constant 0 : index
    %c0_221 = arith.constant 0 : index
    %c0_222 = arith.constant 0 : index
    %294 = vector.load %arg16[%c0_220, %c0_221, %c0_222] : memref<4x32x8xbf16, #tpu.memory_space<vmem>>, vector<1x32x8xbf16>
    %295 = vector.shape_cast %294 : vector<1x32x8xbf16> to vector<32x8xbf16>
    %cst_223 = arith.constant dense<0.000000e+00> : vector<8x8xf32>
    %296 = tpu.matmul %284, %295, %cst_223 {dimension_numbers = #tpu.dot_dimension_numbers<[1], [0], [0], [1], [0, 0, 1, 1], [], []>} : vector<8x32xbf16>, vector<32x8xbf16>, vector<8x8xf32> -> vector<8x8xf32>
    %297 = arith.truncf %290 : vector<8x8xf32> to vector<8x8xbf16>
    %298 = arith.truncf %293 : vector<8x8xf32> to vector<8x8xbf16>
    %cst_224 = arith.constant dense<0.000000e+00> : vector<8x8xf32>
    %299 = tpu.matmul %297, %298, %cst_224 {dimension_numbers = #tpu.dot_dimension_numbers<[1], [1], [0], [0], [0, 0, 1, 0], [], []>} : vector<8x8xbf16>, vector<8x8xbf16>, vector<8x8xf32> -> vector<8x8xf32>
    %cst_225 = arith.constant 0.353553385 : f32
    %300 = vector.broadcast %cst_225 : f32 to vector<8x8xf32>
    %301 = arith.mulf %299, %300 : vector<8x8xf32>
    %302 = vector.broadcast %286 : vector<1x8xf32> to vector<8x8xf32>
    %303 = arith.addf %301, %302 : vector<8x8xf32>
    %cst_226 = arith.constant dense<0xFF800000> : vector<8xf32>
    %304 = vector.multi_reduction <maximumf>, %303, %cst_226 [1] : vector<8x8xf32> to vector<8xf32>
    %305 = vector.shape_cast %304 : vector<8xf32> to vector<8x1xf32>
    %306 = vector.broadcast %305 : vector<8x1xf32> to vector<8x8xf32>
    %307 = arith.subf %303, %306 : vector<8x8xf32>
    %308 = math.exp %307 : vector<8x8xf32>
    %cst_227 = arith.constant dense<0.000000e+00> : vector<8xf32>
    %309 = vector.multi_reduction <add>, %308, %cst_227 [1] : vector<8x8xf32> to vector<8xf32>
    %310 = vector.shape_cast %309 : vector<8xf32> to vector<8x1xf32>
    %311 = vector.broadcast %310 : vector<8x1xf32> to vector<8x8xf32>
    %312 = arith.divf %308, %311 : vector<8x8xf32>
    %313 = arith.truncf %312 : vector<8x8xf32> to vector<8x8xbf16>
    %c0_228 = arith.constant 0 : index
    %c0_229 = arith.constant 0 : index
    %c0_230 = arith.constant 0 : index
    %c0_231 = arith.constant 0 : index
    %314 = vector.load %arg23[%c0_228, %c0_229, %c0_230, %c0_231] : memref<1x4x8x8xbf16, #tpu.memory_space<vmem>>, vector<1x1x8x8xbf16>
    %315 = vector.shape_cast %314 : vector<1x1x8x8xbf16> to vector<8x8xbf16>
    %316 = vector.shape_cast %313 : vector<8x8xbf16> to vector<1x1x8x8xbf16>
    tpu.vector_store %arg23[%c0_228, %c0_229, %c0_230, %c0_231], %316 {strides = array<i32>} : memref<1x4x8x8xbf16, #tpu.memory_space<vmem>>, vector<1x1x8x8xbf16>,
    %c0_232 = arith.constant 0 : index
    %c0_233 = arith.constant 0 : index
    %317 = vector.load %arg26[%c0_232, %c0_233] : memref<8x32xf32, #tpu.memory_space<vmem>>, vector<8x32xf32>
    %318 = arith.truncf %312 : vector<8x8xf32> to vector<8x8xbf16>
    %319 = arith.truncf %296 : vector<8x8xf32> to vector<8x8xbf16>
    %cst_234 = arith.constant dense<0.000000e+00> : vector<8x8xf32>
    %320 = tpu.matmul %318, %319, %cst_234 {dimension_numbers = #tpu.dot_dimension_numbers<[1], [0], [0], [1], [0, 0, 1, 1], [], []>} : vector<8x8xbf16>, vector<8x8xbf16>, vector<8x8xf32> -> vector<8x8xf32>
    %c0_235 = arith.constant 0 : index
    %c0_236 = arith.constant 0 : index
    %c0_237 = arith.constant 0 : index
    %321 = vector.load %arg17[%c0_235, %c0_236, %c0_237] : memref<4x8x32xbf16, #tpu.memory_space<vmem>>, vector<1x8x32xbf16>
    %322 = vector.shape_cast %321 : vector<1x8x32xbf16> to vector<8x32xbf16>
    %323 = arith.truncf %320 : vector<8x8xf32> to vector<8x8xbf16>
    %cst_238 = arith.constant dense<0.000000e+00> : vector<8x32xf32>
    %324 = tpu.matmul %323, %322, %cst_238 {dimension_numbers = #tpu.dot_dimension_numbers<[1], [0], [0], [1], [0, 0, 1, 1], [], []>} : vector<8x8xbf16>, vector<8x32xbf16>, vector<8x32xf32> -> vector<8x32xf32>
    %325 = arith.addf %317, %324 : vector<8x32xf32>
    %c0_239 = arith.constant 0 : index
    %c0_240 = arith.constant 0 : index
    %326 = vector.load %arg26[%c0_239, %c0_240] : memref<8x32xf32, #tpu.memory_space<vmem>>, vector<8x32xf32>
    tpu.vector_store %arg26[%c0_239, %c0_240], %325 {strides = array<i32>} : memref<8x32xf32, #tpu.memory_space<vmem>>, vector<8x32xf32>,
    %c0_241 = arith.constant 0 : index
    %c0_242 = arith.constant 0 : index
    %327 = vector.load %arg25[%c0_241, %c0_242] : memref<8x32xbf16, #tpu.memory_space<vmem>>, vector<8x32xbf16>
    %c1_243 = arith.constant 1 : index
    %c0_244 = arith.constant 0 : index
    %c0_245 = arith.constant 0 : index
    %328 = vector.load %arg14[%c1_243, %c0_244, %c0_245] : memref<4x32x8xbf16, #tpu.memory_space<vmem>>, vector<1x32x8xbf16>
    %329 = vector.shape_cast %328 : vector<1x32x8xbf16> to vector<32x8xbf16>
    %cst_246 = arith.constant dense<0.000000e+00> : vector<8x8xf32>
    %330 = tpu.matmul %327, %329, %cst_246 {dimension_numbers = #tpu.dot_dimension_numbers<[1], [0], [0], [1], [0, 0, 1, 1], [], []>} : vector<8x32xbf16>, vector<32x8xbf16>, vector<8x8xf32> -> vector<8x8xf32>
    %c1_247 = arith.constant 1 : index
    %c0_248 = arith.constant 0 : index
    %c0_249 = arith.constant 0 : index
    %331 = vector.load %arg15[%c1_247, %c0_248, %c0_249] : memref<4x32x8xbf16, #tpu.memory_space<vmem>>, vector<1x32x8xbf16>
    %332 = vector.shape_cast %331 : vector<1x32x8xbf16> to vector<32x8xbf16>
    %cst_250 = arith.constant dense<0.000000e+00> : vector<8x8xf32>
    %333 = tpu.matmul %284, %332, %cst_250 {dimension_numbers = #tpu.dot_dimension_numbers<[1], [0], [0], [1], [0, 0, 1, 1], [], []>} : vector<8x32xbf16>, vector<32x8xbf16>, vector<8x8xf32> -> vector<8x8xf32>
    %c1_251 = arith.constant 1 : index
    %c0_252 = arith.constant 0 : index
    %c0_253 = arith.constant 0 : index
    %334 = vector.load %arg16[%c1_251, %c0_252, %c0_253] : memref<4x32x8xbf16, #tpu.memory_space<vmem>>, vector<1x32x8xbf16>
    %335 = vector.shape_cast %334 : vector<1x32x8xbf16> to vector<32x8xbf16>
    %cst_254 = arith.constant dense<0.000000e+00> : vector<8x8xf32>
    %336 = tpu.matmul %284, %335, %cst_254 {dimension_numbers = #tpu.dot_dimension_numbers<[1], [0], [0], [1], [0, 0, 1, 1], [], []>} : vector<8x32xbf16>, vector<32x8xbf16>, vector<8x8xf32> -> vector<8x8xf32>
    %337 = arith.truncf %330 : vector<8x8xf32> to vector<8x8xbf16>
    %338 = arith.truncf %333 : vector<8x8xf32> to vector<8x8xbf16>
    %cst_255 = arith.constant dense<0.000000e+00> : vector<8x8xf32>
    %339 = tpu.matmul %337, %338, %cst_255 {dimension_numbers = #tpu.dot_dimension_numbers<[1], [1], [0], [0], [0, 0, 1, 0], [], []>} : vector<8x8xbf16>, vector<8x8xbf16>, vector<8x8xf32> -> vector<8x8xf32>
    %cst_256 = arith.constant 0.353553385 : f32
    %340 = vector.broadcast %cst_256 : f32 to vector<8x8xf32>
    %341 = arith.mulf %339, %340 : vector<8x8xf32>
    %342 = vector.broadcast %286 : vector<1x8xf32> to vector<8x8xf32>
    %343 = arith.addf %341, %342 : vector<8x8xf32>
    %cst_257 = arith.constant dense<0xFF800000> : vector<8xf32>
    %344 = vector.multi_reduction <maximumf>, %343, %cst_257 [1] : vector<8x8xf32> to vector<8xf32>
    %345 = vector.shape_cast %344 : vector<8xf32> to vector<8x1xf32>
    %346 = vector.broadcast %345 : vector<8x1xf32> to vector<8x8xf32>
    %347 = arith.subf %343, %346 : vector<8x8xf32>
    %348 = math.exp %347 : vector<8x8xf32>
    %cst_258 = arith.constant dense<0.000000e+00> : vector<8xf32>
    %349 = vector.multi_reduction <add>, %348, %cst_258 [1] : vector<8x8xf32> to vector<8xf32>
    %350 = vector.shape_cast %349 : vector<8xf32> to vector<8x1xf32>
    %351 = vector.broadcast %350 : vector<8x1xf32> to vector<8x8xf32>
    %352 = arith.divf %348, %351 : vector<8x8xf32>
    %353 = arith.truncf %352 : vector<8x8xf32> to vector<8x8xbf16>
    %c0_259 = arith.constant 0 : index
    %c1_260 = arith.constant 1 : index
    %c0_261 = arith.constant 0 : index
    %c0_262 = arith.constant 0 : index
    %354 = vector.load %arg23[%c0_259, %c1_260, %c0_261, %c0_262] : memref<1x4x8x8xbf16, #tpu.memory_space<vmem>>, vector<1x1x8x8xbf16>
    %355 = vector.shape_cast %354 : vector<1x1x8x8xbf16> to vector<8x8xbf16>
    %356 = vector.shape_cast %353 : vector<8x8xbf16> to vector<1x1x8x8xbf16>
    tpu.vector_store %arg23[%c0_259, %c1_260, %c0_261, %c0_262], %356 {strides = array<i32>} : memref<1x4x8x8xbf16, #tpu.memory_space<vmem>>, vector<1x1x8x8xbf16>,
    %c0_263 = arith.constant 0 : index
    %c0_264 = arith.constant 0 : index
    %357 = vector.load %arg26[%c0_263, %c0_264] : memref<8x32xf32, #tpu.memory_space<vmem>>, vector<8x32xf32>
    %358 = arith.truncf %352 : vector<8x8xf32> to vector<8x8xbf16>
    %359 = arith.truncf %336 : vector<8x8xf32> to vector<8x8xbf16>
    %cst_265 = arith.constant dense<0.000000e+00> : vector<8x8xf32>
    %360 = tpu.matmul %358, %359, %cst_265 {dimension_numbers = #tpu.dot_dimension_numbers<[1], [0], [0], [1], [0, 0, 1, 1], [], []>} : vector<8x8xbf16>, vector<8x8xbf16>, vector<8x8xf32> -> vector<8x8xf32>
    %c1_266 = arith.constant 1 : index
    %c0_267 = arith.constant 0 : index
    %c0_268 = arith.constant 0 : index
    %361 = vector.load %arg17[%c1_266, %c0_267, %c0_268] : memref<4x8x32xbf16, #tpu.memory_space<vmem>>, vector<1x8x32xbf16>
    %362 = vector.shape_cast %361 : vector<1x8x32xbf16> to vector<8x32xbf16>
    %363 = arith.truncf %360 : vector<8x8xf32> to vector<8x8xbf16>
    %cst_269 = arith.constant dense<0.000000e+00> : vector<8x32xf32>
    %364 = tpu.matmul %363, %362, %cst_269 {dimension_numbers = #tpu.dot_dimension_numbers<[1], [0], [0], [1], [0, 0, 1, 1], [], []>} : vector<8x8xbf16>, vector<8x32xbf16>, vector<8x32xf32> -> vector<8x32xf32>
    %365 = arith.addf %357, %364 : vector<8x32xf32>
    %c0_270 = arith.constant 0 : index
    %c0_271 = arith.constant 0 : index
    %366 = vector.load %arg26[%c0_270, %c0_271] : memref<8x32xf32, #tpu.memory_space<vmem>>, vector<8x32xf32>
    tpu.vector_store %arg26[%c0_270, %c0_271], %365 {strides = array<i32>} : memref<8x32xf32, #tpu.memory_space<vmem>>, vector<8x32xf32>,
    %c0_272 = arith.constant 0 : index
    %c0_273 = arith.constant 0 : index
    %367 = vector.load %arg25[%c0_272, %c0_273] : memref<8x32xbf16, #tpu.memory_space<vmem>>, vector<8x32xbf16>
    %c2_274 = arith.constant 2 : index
    %c0_275 = arith.constant 0 : index
    %c0_276 = arith.constant 0 : index
    %368 = vector.load %arg14[%c2_274, %c0_275, %c0_276] : memref<4x32x8xbf16, #tpu.memory_space<vmem>>, vector<1x32x8xbf16>
    %369 = vector.shape_cast %368 : vector<1x32x8xbf16> to vector<32x8xbf16>
    %cst_277 = arith.constant dense<0.000000e+00> : vector<8x8xf32>
    %370 = tpu.matmul %367, %369, %cst_277 {dimension_numbers = #tpu.dot_dimension_numbers<[1], [0], [0], [1], [0, 0, 1, 1], [], []>} : vector<8x32xbf16>, vector<32x8xbf16>, vector<8x8xf32> -> vector<8x8xf32>
    %c2_278 = arith.constant 2 : index
    %c0_279 = arith.constant 0 : index
    %c0_280 = arith.constant 0 : index
    %371 = vector.load %arg15[%c2_278, %c0_279, %c0_280] : memref<4x32x8xbf16, #tpu.memory_space<vmem>>, vector<1x32x8xbf16>
    %372 = vector.shape_cast %371 : vector<1x32x8xbf16> to vector<32x8xbf16>
    %cst_281 = arith.constant dense<0.000000e+00> : vector<8x8xf32>
    %373 = tpu.matmul %284, %372, %cst_281 {dimension_numbers = #tpu.dot_dimension_numbers<[1], [0], [0], [1], [0, 0, 1, 1], [], []>} : vector<8x32xbf16>, vector<32x8xbf16>, vector<8x8xf32> -> vector<8x8xf32>
    %c2_282 = arith.constant 2 : index
    %c0_283 = arith.constant 0 : index
    %c0_284 = arith.constant 0 : index
    %374 = vector.load %arg16[%c2_282, %c0_283, %c0_284] : memref<4x32x8xbf16, #tpu.memory_space<vmem>>, vector<1x32x8xbf16>
    %375 = vector.shape_cast %374 : vector<1x32x8xbf16> to vector<32x8xbf16>
    %cst_285 = arith.constant dense<0.000000e+00> : vector<8x8xf32>
    %376 = tpu.matmul %284, %375, %cst_285 {dimension_numbers = #tpu.dot_dimension_numbers<[1], [0], [0], [1], [0, 0, 1, 1], [], []>} : vector<8x32xbf16>, vector<32x8xbf16>, vector<8x8xf32> -> vector<8x8xf32>
    %377 = arith.truncf %370 : vector<8x8xf32> to vector<8x8xbf16>
    %378 = arith.truncf %373 : vector<8x8xf32> to vector<8x8xbf16>
    %cst_286 = arith.constant dense<0.000000e+00> : vector<8x8xf32>
    %379 = tpu.matmul %377, %378, %cst_286 {dimension_numbers = #tpu.dot_dimension_numbers<[1], [1], [0], [0], [0, 0, 1, 0], [], []>} : vector<8x8xbf16>, vector<8x8xbf16>, vector<8x8xf32> -> vector<8x8xf32>
    %cst_287 = arith.constant 0.353553385 : f32
    %380 = vector.broadcast %cst_287 : f32 to vector<8x8xf32>
    %381 = arith.mulf %379, %380 : vector<8x8xf32>
    %382 = vector.broadcast %286 : vector<1x8xf32> to vector<8x8xf32>
    %383 = arith.addf %381, %382 : vector<8x8xf32>
    %cst_288 = arith.constant dense<0xFF800000> : vector<8xf32>
    %384 = vector.multi_reduction <maximumf>, %383, %cst_288 [1] : vector<8x8xf32> to vector<8xf32>
    %385 = vector.shape_cast %384 : vector<8xf32> to vector<8x1xf32>
    %386 = vector.broadcast %385 : vector<8x1xf32> to vector<8x8xf32>
    %387 = arith.subf %383, %386 : vector<8x8xf32>
    %388 = math.exp %387 : vector<8x8xf32>
    %cst_289 = arith.constant dense<0.000000e+00> : vector<8xf32>
    %389 = vector.multi_reduction <add>, %388, %cst_289 [1] : vector<8x8xf32> to vector<8xf32>
    %390 = vector.shape_cast %389 : vector<8xf32> to vector<8x1xf32>
    %391 = vector.broadcast %390 : vector<8x1xf32> to vector<8x8xf32>
    %392 = arith.divf %388, %391 : vector<8x8xf32>
    %393 = arith.truncf %392 : vector<8x8xf32> to vector<8x8xbf16>
    %c0_290 = arith.constant 0 : index
    %c2_291 = arith.constant 2 : index
    %c0_292 = arith.constant 0 : index
    %c0_293 = arith.constant 0 : index
    %394 = vector.load %arg23[%c0_290, %c2_291, %c0_292, %c0_293] : memref<1x4x8x8xbf16, #tpu.memory_space<vmem>>, vector<1x1x8x8xbf16>
    %395 = vector.shape_cast %394 : vector<1x1x8x8xbf16> to vector<8x8xbf16>
    %396 = vector.shape_cast %393 : vector<8x8xbf16> to vector<1x1x8x8xbf16>
    tpu.vector_store %arg23[%c0_290, %c2_291, %c0_292, %c0_293], %396 {strides = array<i32>} : memref<1x4x8x8xbf16, #tpu.memory_space<vmem>>, vector<1x1x8x8xbf16>,
    %c0_294 = arith.constant 0 : index
    %c0_295 = arith.constant 0 : index
    %397 = vector.load %arg26[%c0_294, %c0_295] : memref<8x32xf32, #tpu.memory_space<vmem>>, vector<8x32xf32>
    %398 = arith.truncf %392 : vector<8x8xf32> to vector<8x8xbf16>
    %399 = arith.truncf %376 : vector<8x8xf32> to vector<8x8xbf16>
    %cst_296 = arith.constant dense<0.000000e+00> : vector<8x8xf32>
    %400 = tpu.matmul %398, %399, %cst_296 {dimension_numbers = #tpu.dot_dimension_numbers<[1], [0], [0], [1], [0, 0, 1, 1], [], []>} : vector<8x8xbf16>, vector<8x8xbf16>, vector<8x8xf32> -> vector<8x8xf32>
    %c2_297 = arith.constant 2 : index
    %c0_298 = arith.constant 0 : index
    %c0_299 = arith.constant 0 : index
    %401 = vector.load %arg17[%c2_297, %c0_298, %c0_299] : memref<4x8x32xbf16, #tpu.memory_space<vmem>>, vector<1x8x32xbf16>
    %402 = vector.shape_cast %401 : vector<1x8x32xbf16> to vector<8x32xbf16>
    %403 = arith.truncf %400 : vector<8x8xf32> to vector<8x8xbf16>
    %cst_300 = arith.constant dense<0.000000e+00> : vector<8x32xf32>
    %404 = tpu.matmul %403, %402, %cst_300 {dimension_numbers = #tpu.dot_dimension_numbers<[1], [0], [0], [1], [0, 0, 1, 1], [], []>} : vector<8x8xbf16>, vector<8x32xbf16>, vector<8x32xf32> -> vector<8x32xf32>
    %405 = arith.addf %397, %404 : vector<8x32xf32>
    %c0_301 = arith.constant 0 : index
    %c0_302 = arith.constant 0 : index
    %406 = vector.load %arg26[%c0_301, %c0_302] : memref<8x32xf32, #tpu.memory_space<vmem>>, vector<8x32xf32>
    tpu.vector_store %arg26[%c0_301, %c0_302], %405 {strides = array<i32>} : memref<8x32xf32, #tpu.memory_space<vmem>>, vector<8x32xf32>,
    %c0_303 = arith.constant 0 : index
    %c0_304 = arith.constant 0 : index
    %407 = vector.load %arg25[%c0_303, %c0_304] : memref<8x32xbf16, #tpu.memory_space<vmem>>, vector<8x32xbf16>
    %c3_305 = arith.constant 3 : index
    %c0_306 = arith.constant 0 : index
    %c0_307 = arith.constant 0 : index
    %408 = vector.load %arg14[%c3_305, %c0_306, %c0_307] : memref<4x32x8xbf16, #tpu.memory_space<vmem>>, vector<1x32x8xbf16>
    %409 = vector.shape_cast %408 : vector<1x32x8xbf16> to vector<32x8xbf16>
    %cst_308 = arith.constant dense<0.000000e+00> : vector<8x8xf32>
    %410 = tpu.matmul %407, %409, %cst_308 {dimension_numbers = #tpu.dot_dimension_numbers<[1], [0], [0], [1], [0, 0, 1, 1], [], []>} : vector<8x32xbf16>, vector<32x8xbf16>, vector<8x8xf32> -> vector<8x8xf32>
    %c3_309 = arith.constant 3 : index
    %c0_310 = arith.constant 0 : index
    %c0_311 = arith.constant 0 : index
    %411 = vector.load %arg15[%c3_309, %c0_310, %c0_311] : memref<4x32x8xbf16, #tpu.memory_space<vmem>>, vector<1x32x8xbf16>
    %412 = vector.shape_cast %411 : vector<1x32x8xbf16> to vector<32x8xbf16>
    %cst_312 = arith.constant dense<0.000000e+00> : vector<8x8xf32>
    %413 = tpu.matmul %284, %412, %cst_312 {dimension_numbers = #tpu.dot_dimension_numbers<[1], [0], [0], [1], [0, 0, 1, 1], [], []>} : vector<8x32xbf16>, vector<32x8xbf16>, vector<8x8xf32> -> vector<8x8xf32>
    %c3_313 = arith.constant 3 : index
    %c0_314 = arith.constant 0 : index
    %c0_315 = arith.constant 0 : index
    %414 = vector.load %arg16[%c3_313, %c0_314, %c0_315] : memref<4x32x8xbf16, #tpu.memory_space<vmem>>, vector<1x32x8xbf16>
    %415 = vector.shape_cast %414 : vector<1x32x8xbf16> to vector<32x8xbf16>
    %cst_316 = arith.constant dense<0.000000e+00> : vector<8x8xf32>
    %416 = tpu.matmul %284, %415, %cst_316 {dimension_numbers = #tpu.dot_dimension_numbers<[1], [0], [0], [1], [0, 0, 1, 1], [], []>} : vector<8x32xbf16>, vector<32x8xbf16>, vector<8x8xf32> -> vector<8x8xf32>
    %417 = arith.truncf %410 : vector<8x8xf32> to vector<8x8xbf16>
    %418 = arith.truncf %413 : vector<8x8xf32> to vector<8x8xbf16>
    %cst_317 = arith.constant dense<0.000000e+00> : vector<8x8xf32>
    %419 = tpu.matmul %417, %418, %cst_317 {dimension_numbers = #tpu.dot_dimension_numbers<[1], [1], [0], [0], [0, 0, 1, 0], [], []>} : vector<8x8xbf16>, vector<8x8xbf16>, vector<8x8xf32> -> vector<8x8xf32>
    %cst_318 = arith.constant 0.353553385 : f32
    %420 = vector.broadcast %cst_318 : f32 to vector<8x8xf32>
    %421 = arith.mulf %419, %420 : vector<8x8xf32>
    %422 = vector.broadcast %286 : vector<1x8xf32> to vector<8x8xf32>
    %423 = arith.addf %421, %422 : vector<8x8xf32>
    %cst_319 = arith.constant dense<0xFF800000> : vector<8xf32>
    %424 = vector.multi_reduction <maximumf>, %423, %cst_319 [1] : vector<8x8xf32> to vector<8xf32>
    %425 = vector.shape_cast %424 : vector<8xf32> to vector<8x1xf32>
    %426 = vector.broadcast %425 : vector<8x1xf32> to vector<8x8xf32>
    %427 = arith.subf %423, %426 : vector<8x8xf32>
    %428 = math.exp %427 : vector<8x8xf32>
    %cst_320 = arith.constant dense<0.000000e+00> : vector<8xf32>
    %429 = vector.multi_reduction <add>, %428, %cst_320 [1] : vector<8x8xf32> to vector<8xf32>
    %430 = vector.shape_cast %429 : vector<8xf32> to vector<8x1xf32>
    %431 = vector.broadcast %430 : vector<8x1xf32> to vector<8x8xf32>
    %432 = arith.divf %428, %431 : vector<8x8xf32>
    %433 = arith.truncf %432 : vector<8x8xf32> to vector<8x8xbf16>
    %c0_321 = arith.constant 0 : index
    %c3_322 = arith.constant 3 : index
    %c0_323 = arith.constant 0 : index
    %c0_324 = arith.constant 0 : index
    %434 = vector.load %arg23[%c0_321, %c3_322, %c0_323, %c0_324] : memref<1x4x8x8xbf16, #tpu.memory_space<vmem>>, vector<1x1x8x8xbf16>
    %435 = vector.shape_cast %434 : vector<1x1x8x8xbf16> to vector<8x8xbf16>
    %436 = vector.shape_cast %433 : vector<8x8xbf16> to vector<1x1x8x8xbf16>
    tpu.vector_store %arg23[%c0_321, %c3_322, %c0_323, %c0_324], %436 {strides = array<i32>} : memref<1x4x8x8xbf16, #tpu.memory_space<vmem>>, vector<1x1x8x8xbf16>,
    %c0_325 = arith.constant 0 : index
    %c0_326 = arith.constant 0 : index
    %437 = vector.load %arg26[%c0_325, %c0_326] : memref<8x32xf32, #tpu.memory_space<vmem>>, vector<8x32xf32>
    %438 = arith.truncf %432 : vector<8x8xf32> to vector<8x8xbf16>
    %439 = arith.truncf %416 : vector<8x8xf32> to vector<8x8xbf16>
    %cst_327 = arith.constant dense<0.000000e+00> : vector<8x8xf32>
    %440 = tpu.matmul %438, %439, %cst_327 {dimension_numbers = #tpu.dot_dimension_numbers<[1], [0], [0], [1], [0, 0, 1, 1], [], []>} : vector<8x8xbf16>, vector<8x8xbf16>, vector<8x8xf32> -> vector<8x8xf32>
    %c3_328 = arith.constant 3 : index
    %c0_329 = arith.constant 0 : index
    %c0_330 = arith.constant 0 : index
    %441 = vector.load %arg17[%c3_328, %c0_329, %c0_330] : memref<4x8x32xbf16, #tpu.memory_space<vmem>>, vector<1x8x32xbf16>
    %442 = vector.shape_cast %441 : vector<1x8x32xbf16> to vector<8x32xbf16>
    %443 = arith.truncf %440 : vector<8x8xf32> to vector<8x8xbf16>
    %cst_331 = arith.constant dense<0.000000e+00> : vector<8x32xf32>
    %444 = tpu.matmul %443, %442, %cst_331 {dimension_numbers = #tpu.dot_dimension_numbers<[1], [0], [0], [1], [0, 0, 1, 1], [], []>} : vector<8x8xbf16>, vector<8x32xbf16>, vector<8x32xf32> -> vector<8x32xf32>
    %445 = arith.addf %437, %444 : vector<8x32xf32>
    %c0_332 = arith.constant 0 : index
    %c0_333 = arith.constant 0 : index
    %446 = vector.load %arg26[%c0_332, %c0_333] : memref<8x32xf32, #tpu.memory_space<vmem>>, vector<8x32xf32>
    tpu.vector_store %arg26[%c0_332, %c0_333], %445 {strides = array<i32>} : memref<8x32xf32, #tpu.memory_space<vmem>>, vector<8x32xf32>,
    %c0_334 = arith.constant 0 : index
    %c0_335 = arith.constant 0 : index
    %447 = vector.load %arg24[%c0_334, %c0_335] : memref<8x32xf32, #tpu.memory_space<vmem>>, vector<8x32xf32>
    %c0_336 = arith.constant 0 : index
    %c0_337 = arith.constant 0 : index
    %448 = vector.load %arg26[%c0_336, %c0_337] : memref<8x32xf32, #tpu.memory_space<vmem>>, vector<8x32xf32>
    %449 = arith.addf %447, %448 : vector<8x32xf32>
    %c0_338 = arith.constant 0 : index
    %c0_339 = arith.constant 0 : index
    %450 = vector.load %arg24[%c0_338, %c0_339] : memref<8x32xf32, #tpu.memory_space<vmem>>, vector<8x32xf32>
    tpu.vector_store %arg24[%c0_338, %c0_339], %449 {strides = array<i32>} : memref<8x32xf32, #tpu.memory_space<vmem>>, vector<8x32xf32>,
    %c0_340 = arith.constant 0 : index
    %c0_341 = arith.constant 0 : index
    %451 = vector.load %arg24[%c0_340, %c0_341] : memref<8x32xf32, #tpu.memory_space<vmem>>, vector<8x32xf32>
    %c4 = arith.constant 4 : index
    %c0_342 = arith.constant 0 : index
    %452 = vector.load %arg5[%c4, %c0_342] : memref<6x32xf32, #tpu.memory_space<vmem>>, vector<1x32xf32>
    %c5 = arith.constant 5 : index
    %c0_343 = arith.constant 0 : index
    %453 = vector.load %arg5[%c5, %c0_343] : memref<6x32xf32, #tpu.memory_space<vmem>>, vector<1x32xf32>
    %cst_344 = arith.constant dense<0.000000e+00> : vector<8xf32>
    %454 = vector.multi_reduction <add>, %451, %cst_344 [1] : vector<8x32xf32> to vector<8xf32>
    %455 = vector.shape_cast %454 : vector<8xf32> to vector<8x1xf32>
    %cst_345 = arith.constant 3.200000e+01 : f32
    %456 = vector.broadcast %cst_345 : f32 to vector<8x1xf32>
    %457 = arith.divf %455, %456 : vector<8x1xf32>
    %458 = vector.broadcast %457 : vector<8x1xf32> to vector<8x32xf32>
    %459 = arith.subf %451, %458 : vector<8x32xf32>
    %460 = vector.broadcast %457 : vector<8x1xf32> to vector<8x32xf32>
    %461 = arith.subf %451, %460 : vector<8x32xf32>
    %462 = arith.mulf %459, %461 : vector<8x32xf32>
    %cst_346 = arith.constant dense<0.000000e+00> : vector<8xf32>
    %463 = vector.multi_reduction <add>, %462, %cst_346 [1] : vector<8x32xf32> to vector<8xf32>
    %464 = vector.shape_cast %463 : vector<8xf32> to vector<8x1xf32>
    %cst_347 = arith.constant 3.200000e+01 : f32
    %465 = vector.broadcast %cst_347 : f32 to vector<8x1xf32>
    %466 = arith.divf %464, %465 : vector<8x1xf32>
    %467 = vector.broadcast %457 : vector<8x1xf32> to vector<8x32xf32>
    %468 = arith.subf %451, %467 : vector<8x32xf32>
    %cst_348 = arith.constant 9.99999974E-6 : f32
    %469 = vector.broadcast %cst_348 : f32 to vector<8x1xf32>
    %470 = arith.addf %466, %469 : vector<8x1xf32>
    %471 = math.rsqrt %470 : vector<8x1xf32>
    %472 = vector.broadcast %471 : vector<8x1xf32> to vector<8x32xf32>
    %473 = arith.mulf %468, %472 : vector<8x32xf32>
    %474 = vector.broadcast %452 : vector<1x32xf32> to vector<8x32xf32>
    %475 = arith.mulf %473, %474 : vector<8x32xf32>
    %476 = vector.broadcast %453 : vector<1x32xf32> to vector<8x32xf32>
    %477 = arith.addf %475, %476 : vector<8x32xf32>
    %478 = arith.truncf %477 : vector<8x32xf32> to vector<8x32xbf16>
    %c0_349 = arith.constant 0 : index
    %c0_350 = arith.constant 0 : index
    %479 = vector.load %arg25[%c0_349, %c0_350] : memref<8x32xbf16, #tpu.memory_space<vmem>>, vector<8x32xbf16>
    tpu.vector_store %arg25[%c0_349, %c0_350], %478 {strides = array<i32>} : memref<8x32xbf16, #tpu.memory_space<vmem>>, vector<8x32xbf16>,
    %cst_351 = arith.constant 0.000000e+00 : f32
    %480 = vector.broadcast %cst_351 : f32 to vector<8x32xf32>
    %c0_352 = arith.constant 0 : index
    %c0_353 = arith.constant 0 : index
    %481 = vector.load %arg26[%c0_352, %c0_353] : memref<8x32xf32, #tpu.memory_space<vmem>>, vector<8x32xf32>
    tpu.vector_store %arg26[%c0_352, %c0_353], %480 {strides = array<i32>} : memref<8x32xf32, #tpu.memory_space<vmem>>, vector<8x32xf32>,
    %c0_354 = arith.constant 0 : index
    %c0_355 = arith.constant 0 : index
    %482 = vector.load %arg25[%c0_354, %c0_355] : memref<8x32xbf16, #tpu.memory_space<vmem>>, vector<8x32xbf16>
    %c0_356 = arith.constant 0 : index
    %c0_357 = arith.constant 0 : index
    %483 = vector.load %arg18[%c0_356, %c0_357] : memref<32x64xbf16, #tpu.memory_space<vmem>>, vector<32x64xbf16>
    %cst_358 = arith.constant dense<0.000000e+00> : vector<8x64xf32>
    %484 = tpu.matmul %482, %483, %cst_358 {dimension_numbers = #tpu.dot_dimension_numbers<[1], [0], [0], [1], [0, 0, 1, 1], [], []>} : vector<8x32xbf16>, vector<32x64xbf16>, vector<8x64xf32> -> vector<8x64xf32>
    %c0_359 = arith.constant 0 : index
    %c0_360 = arith.constant 0 : index
    %485 = vector.load %arg19[%c0_359, %c0_360] : memref<1x64xf32, #tpu.memory_space<vmem>>, vector<1x64xf32>
    %486 = vector.broadcast %485 : vector<1x64xf32> to vector<8x64xf32>
    %487 = arith.addf %484, %486 : vector<8x64xf32>
    %cst_361 = arith.constant 0.000000e+00 : f32
    %488 = vector.broadcast %cst_361 : f32 to vector<8x64xf32>
    %489 = arith.maximumf %487, %488 : vector<8x64xf32>
    %c0_362 = arith.constant 0 : index
    %c0_363 = arith.constant 0 : index
    %490 = vector.load %arg26[%c0_362, %c0_363] : memref<8x32xf32, #tpu.memory_space<vmem>>, vector<8x32xf32>
    %c0_364 = arith.constant 0 : index
    %c0_365 = arith.constant 0 : index
    %491 = vector.load %arg20[%c0_364, %c0_365] : memref<64x32xbf16, #tpu.memory_space<vmem>>, vector<64x32xbf16>
    %492 = arith.truncf %489 : vector<8x64xf32> to vector<8x64xbf16>
    %cst_366 = arith.constant dense<0.000000e+00> : vector<8x32xf32>
    %493 = tpu.matmul %492, %491, %cst_366 {dimension_numbers = #tpu.dot_dimension_numbers<[1], [0], [0], [1], [0, 0, 1, 1], [], []>} : vector<8x64xbf16>, vector<64x32xbf16>, vector<8x32xf32> -> vector<8x32xf32>
    %494 = arith.addf %490, %493 : vector<8x32xf32>
    %c0_367 = arith.constant 0 : index
    %c0_368 = arith.constant 0 : index
    %495 = vector.load %arg26[%c0_367, %c0_368] : memref<8x32xf32, #tpu.memory_space<vmem>>, vector<8x32xf32>
    tpu.vector_store %arg26[%c0_367, %c0_368], %494 {strides = array<i32>} : memref<8x32xf32, #tpu.memory_space<vmem>>, vector<8x32xf32>,
    %c0_369 = arith.constant 0 : index
    %c0_370 = arith.constant 0 : index
    %496 = vector.load %arg24[%c0_369, %c0_370] : memref<8x32xf32, #tpu.memory_space<vmem>>, vector<8x32xf32>
    %c0_371 = arith.constant 0 : index
    %c0_372 = arith.constant 0 : index
    %497 = vector.load %arg26[%c0_371, %c0_372] : memref<8x32xf32, #tpu.memory_space<vmem>>, vector<8x32xf32>
    %498 = arith.addf %496, %497 : vector<8x32xf32>
    %c0_373 = arith.constant 0 : index
    %c0_374 = arith.constant 0 : index
    %499 = vector.load %arg21[%c0_373, %c0_374] : memref<1x32xf32, #tpu.memory_space<vmem>>, vector<1x32xf32>
    %500 = vector.broadcast %499 : vector<1x32xf32> to vector<8x32xf32>
    %501 = arith.addf %498, %500 : vector<8x32xf32>
    %c0_375 = arith.constant 0 : index
    %c0_376 = arith.constant 0 : index
    %c0_377 = arith.constant 0 : index
    %502 = vector.load %arg22[%c0_375, %c0_376, %c0_377] : memref<1x8x32xf32, #tpu.memory_space<vmem>>, vector<1x8x32xf32>
    %503 = vector.shape_cast %502 : vector<1x8x32xf32> to vector<8x32xf32>
    %504 = vector.shape_cast %501 : vector<8x32xf32> to vector<1x8x32xf32>
    tpu.vector_store %arg22[%c0_375, %c0_376, %c0_377], %504 {strides = array<i32>} : memref<1x8x32xf32, #tpu.memory_space<vmem>>, vector<1x8x32xf32>,
    return
  }
  func.func @transform_0(%arg0: i32) -> (i32, i32, i32) {
    %c0_i32 = arith.constant 0 : i32
    %c0_i32_0 = arith.constant 0 : i32
    %c0_i32_1 = arith.constant 0 : i32
    return %arg0, %c0_i32, %c0_i32_0 : i32, i32, i32
  }
  func.func @transform_1(%arg0: i32) -> (i32, i32, i32) {
    %c0_i32 = arith.constant 0 : i32
    %c0_i32_0 = arith.constant 0 : i32
    %c0_i32_1 = arith.constant 0 : i32
    return %arg0, %c0_i32, %c0_i32_0 : i32, i32, i32
  }
  func.func @transform_2(%arg0: i32) -> (i32, i32) {
    %c0_i32 = arith.constant 0 : i32
    %c0_i32_0 = arith.constant 0 : i32
    %c0_i32_1 = arith.constant 0 : i32
    return %c0_i32, %c0_i32_0 : i32, i32
  }
  func.func @transform_3(%arg0: i32) -> (i32, i32, i32) {
    %c0_i32 = arith.constant 0 : i32
    %c0_i32_0 = arith.constant 0 : i32
    %c0_i32_1 = arith.constant 0 : i32
    return %arg0, %c0_i32, %c0_i32_0 : i32, i32, i32
  }
  func.func @transform_4(%arg0: i32) -> (i32, i32) {
    %c0_i32 = arith.constant 0 : i32
    %c0_i32_0 = arith.constant 0 : i32
    %c0_i32_1 = arith.constant 0 : i32
    return %c0_i32, %c0_i32_0 : i32, i32
  }
  func.func @transform_5(%arg0: i32) -> (i32, i32, i32) {
    %c0_i32 = arith.constant 0 : i32
    %c0_i32_0 = arith.constant 0 : i32
    %c0_i32_1 = arith.constant 0 : i32
    %c0_i32_2 = arith.constant 0 : i32
    return %c0_i32, %c0_i32_0, %c0_i32_1 : i32, i32, i32
  }
  func.func @transform_6(%arg0: i32) -> (i32, i32, i32) {
    %c0_i32 = arith.constant 0 : i32
    %c0_i32_0 = arith.constant 0 : i32
    %c0_i32_1 = arith.constant 0 : i32
    %c0_i32_2 = arith.constant 0 : i32
    return %c0_i32, %c0_i32_0, %c0_i32_1 : i32, i32, i32
  }
  func.func @transform_7(%arg0: i32) -> (i32, i32, i32) {
    %c0_i32 = arith.constant 0 : i32
    %c0_i32_0 = arith.constant 0 : i32
    %c0_i32_1 = arith.constant 0 : i32
    %c0_i32_2 = arith.constant 0 : i32
    return %c0_i32, %c0_i32_0, %c0_i32_1 : i32, i32, i32
  }
  func.func @transform_8(%arg0: i32) -> (i32, i32, i32) {
    %c0_i32 = arith.constant 0 : i32
    %c0_i32_0 = arith.constant 0 : i32
    %c0_i32_1 = arith.constant 0 : i32
    %c0_i32_2 = arith.constant 0 : i32
    return %c0_i32, %c0_i32_0, %c0_i32_1 : i32, i32, i32
  }
  func.func @transform_9(%arg0: i32) -> (i32, i32, i32) {
    %c0_i32 = arith.constant 0 : i32
    %c0_i32_0 = arith.constant 0 : i32
    %c0_i32_1 = arith.constant 0 : i32
    %c0_i32_2 = arith.constant 0 : i32
    return %c0_i32, %c0_i32_0, %c0_i32_1 : i32, i32, i32
  }
  func.func @transform_10(%arg0: i32) -> (i32, i32, i32) {
    %c0_i32 = arith.constant 0 : i32
    %c0_i32_0 = arith.constant 0 : i32
    %c0_i32_1 = arith.constant 0 : i32
    %c0_i32_2 = arith.constant 0 : i32
    return %c0_i32, %c0_i32_0, %c0_i32_1 : i32, i32, i32
  }
  func.func @transform_11(%arg0: i32) -> (i32, i32, i32) {
    %c0_i32 = arith.constant 0 : i32
    %c0_i32_0 = arith.constant 0 : i32
    %c0_i32_1 = arith.constant 0 : i32
    %c0_i32_2 = arith.constant 0 : i32
    return %c0_i32, %c0_i32_0, %c0_i32_1 : i32, i32, i32
  }
  func.func @transform_12(%arg0: i32) -> (i32, i32, i32) {
    %c0_i32 = arith.constant 0 : i32
    %c0_i32_0 = arith.constant 0 : i32
    %c0_i32_1 = arith.constant 0 : i32
    %c0_i32_2 = arith.constant 0 : i32
    return %c0_i32, %c0_i32_0, %c0_i32_1 : i32, i32, i32
  }
  func.func @transform_13(%arg0: i32) -> (i32, i32, i32) {
    %c0_i32 = arith.constant 0 : i32
    %c0_i32_0 = arith.constant 0 : i32
    %c0_i32_1 = arith.constant 0 : i32
    %c0_i32_2 = arith.constant 0 : i32
    return %c0_i32, %c0_i32_0, %c0_i32_1 : i32, i32, i32
  }
  func.func @transform_14(%arg0: i32) -> (i32, i32, i32) {
    %c0_i32 = arith.constant 0 : i32
    %c0_i32_0 = arith.constant 0 : i32
    %c0_i32_1 = arith.constant 0 : i32
    %c0_i32_2 = arith.constant 0 : i32
    return %c0_i32, %c0_i32_0, %c0_i32_1 : i32, i32, i32
  }
  func.func @transform_15(%arg0: i32) -> (i32, i32, i32) {
    %c0_i32 = arith.constant 0 : i32
    %c0_i32_0 = arith.constant 0 : i32
    %c0_i32_1 = arith.constant 0 : i32
    %c0_i32_2 = arith.constant 0 : i32
    return %c0_i32, %c0_i32_0, %c0_i32_1 : i32, i32, i32
  }
  func.func @transform_16(%arg0: i32) -> (i32, i32, i32) {
    %c0_i32 = arith.constant 0 : i32
    %c0_i32_0 = arith.constant 0 : i32
    %c0_i32_1 = arith.constant 0 : i32
    %c0_i32_2 = arith.constant 0 : i32
    return %c0_i32, %c0_i32_0, %c0_i32_1 : i32, i32, i32
  }
  func.func @transform_17(%arg0: i32) -> (i32, i32) {
    %c0_i32 = arith.constant 0 : i32
    %c0_i32_0 = arith.constant 0 : i32
    %c0_i32_1 = arith.constant 0 : i32
    return %c0_i32, %c0_i32_0 : i32, i32
  }
  func.func @transform_18(%arg0: i32) -> (i32, i32) {
    %c0_i32 = arith.constant 0 : i32
    %c0_i32_0 = arith.constant 0 : i32
    %c0_i32_1 = arith.constant 0 : i32
    return %c0_i32, %c0_i32_0 : i32, i32
  }
  func.func @transform_19(%arg0: i32) -> (i32, i32) {
    %c0_i32 = arith.constant 0 : i32
    %c0_i32_0 = arith.constant 0 : i32
    %c0_i32_1 = arith.constant 0 : i32
    return %c0_i32, %c0_i32_0 : i32, i32
  }
  func.func @transform_20(%arg0: i32) -> (i32, i32) {
    %c0_i32 = arith.constant 0 : i32
    %c0_i32_0 = arith.constant 0 : i32
    %c0_i32_1 = arith.constant 0 : i32
    return %c0_i32, %c0_i32_0 : i32, i32
  }
  func.func @transform_21(%arg0: i32) -> (i32, i32, i32) {
    %c0_i32 = arith.constant 0 : i32
    %c0_i32_0 = arith.constant 0 : i32
    %c0_i32_1 = arith.constant 0 : i32
    return %arg0, %c0_i32, %c0_i32_0 : i32, i32, i32
  }
  func.func @transform_22(%arg0: i32) -> (i32, i32, i32, i32) {
    %c0_i32 = arith.constant 0 : i32
    %c0_i32_0 = arith.constant 0 : i32
    %c0_i32_1 = arith.constant 0 : i32
    %c0_i32_2 = arith.constant 0 : i32
    return %arg0, %c0_i32, %c0_i32_0, %c0_i32_1 : i32, i32, i32, i32
  }
}

</mosaic_0001>

<bundles_post_ra>
// kernel: tpu_custom_call.1
= control target key start
LH: loop header
LB: loop body
LE: loop exit
PB: predicated region body
PF: predicated region fallthrough
CT: control target
= control target key end

     0   :  { %6 = vsyncpa [#allocation3], 0  ;;  %s120_s0 = inlined_call_operand.hbm [shape: f32[8,128], index: 0, kind: input, shape index: {}]   ;;  %s121_s1 = inlined_call_operand.hbm [shape: f32[8,128], index: 1, kind: output, shape index: {}]  }
   0x1   :  { %7 = vsyncpa [#allocation4], 0  ;;  %s13_s8 = sshll.u32 %s120_s0, 4  ;;  %s101_s9 = smov [#allocation2]   ;;  %s14_s8 = int_to_ptr.hbm [resolvable:$true] %s13_s8 }
   0x2   :  { %s15_s10 = sshll.u32 %s101_s9, 4  ;;  %s16_s10 = int_to_ptr.vmem [resolvable:$true] %s15_s10 }
   0x3   :  { %18 = dma.hbm_to_vmem [thread:$0]  %s14_s8, 128, %s16_s10, [#allocation3]  }
   0x4   :  { %97 = dma.done.wait [#allocation3], 128  }
   0x5   :  { %98 = vsyncadd [#allocation3], 4294967168  ;;  %v23_v0 = vld [vmem:[#allocation2] sm:$0xff]  ;;  %s102_s11 = smov 376   ;;  %s103_s12 = smov [#allocation5]  }
   0x6   :  { %26 = vrot.lane.b32.xlu0 %v23_v0, %s102_s11  ;;  %s34_s13 = sshll.u32 %s103_s12, 4  ;;  %s36_s16 = sshll.u32 %s121_s1, 4  ;;  %s35_s13 = int_to_ptr.vmem [resolvable:$true] %s34_s13  ;;  %s37_s16 = int_to_ptr.hbm [resolvable:$true] %s36_s16 }
  0x78   :  { %v27_v1 = vpop.permute.xlu0 %26 }
  0x79   :  { %28 = vst [vmem:[#allocation5] sm:$0xff] %v27_v1 }
  0x7a   :  { %39 = dma.vmem_to_hbm [thread:$0]  %s35_s13, 128, %s37_s16, [#allocation4]  }
  0x7b   :  { %99 = dma.done.wait [#allocation4], 128  }
  0x7c   :  { %100 = vsyncadd [#allocation4], 4294967168 }
  0x7d   :  { %44 = vsyncpa [#allocation3], 1 }
  0x7e   :  { %45 = vsyncpa [#allocation4], 1 }

// kernel: decoder_layer_forward.1
= control target key start
LH: loop header
LB: loop body
LE: loop exit
PB: predicated region body
PF: predicated region fallthrough
CT: control target
= control target key end

     0   :  { %s4460_s0 = inlined_call_operand.vmem [shape: bf16[2,8,32], index: 0, kind: input, shape index: {}]   ;;  %s4461_s1 = inlined_call_operand.vmem [shape: bf16[2,8,32], index: 1, kind: input, shape index: {}]   ;;  %s4462_s2 = inlined_call_operand.vmem [shape: f32[8,8], index: 2, kind: input, shape index: {}]   ;;  %s4463_s3 = inlined_call_operand.vmem [shape: f32[2,1,8], index: 3, kind: input, shape index: {}]   ;;  %s4464_s4 = inlined_call_operand.vmem [shape: f32[6,32], index: 4, kind: input, shape index: {}]   ;;  %s4465_s5 = inlined_call_operand.vmem [shape: bf16[4,32,8], index: 5, kind: input, shape index: {}]   ;;  %s4466_s6 = inlined_call_operand.vmem [shape: bf16[4,32,8], index: 6, kind: input, shape index: {}]   ;;  %s4467_s7 = inlined_call_operand.vmem [shape: bf16[4,32,8], index: 7, kind: input, shape index: {}]   ;;  %s4468_s8 = inlined_call_operand.vmem [shape: bf16[4,8,32], index: 8, kind: input, shape index: {}]   ;;  %s4469_s9 = inlined_call_operand.vmem [shape: f32[4,1,8], index: 9, kind: input, shape index: {}]   ;;  %s4470_s10 = inlined_call_operand.vmem [shape: bf16[4,8,8], index: 10, kind: input, shape index: {}]   ;;  %s4471_s11 = inlined_call_operand.vmem [shape: f32[4,8,8], index: 11, kind: input, shape index: {}]   ;;  %s4472_s12 = inlined_call_operand.vmem [shape: f32[8,8,8], index: 12, kind: input, shape index: {}]   ;;  %s4473_s13 = inlined_call_operand.vmem [shape: bf16[4,32,8], index: 13, kind: input, shape index: {}]   ;;  %s4474_s14 = inlined_call_operand.vmem [shape: bf16[4,32,8], index: 14, kind: input, shape index: {}]   ;;  %s4475_s15 = inlined_call_operand.vmem [shape: bf16[4,32,8], index: 15, kind: input, shape index: {}]   ;;  %s4476_s16 = inlined_call_operand.vmem [shape: bf16[4,8,32], index: 16, kind: input, shape index: {}]   ;;  %s4477_s17 = inlined_call_operand.vmem [shape: bf16[32,64], index: 17, kind: input, shape index: {}]   ;;  %s4478_s18 = inlined_call_operand.vmem [shape: f32[1,64], index: 18, kind: input, shape index: {}]   ;;  %s4479_s19 = inlined_call_operand.vmem [shape: bf16[64,32], index: 19, kind: input, shape index: {}]   ;;  %s4480_s20 = inlined_call_operand.vmem [shape: f32[1,32], index: 20, kind: input, shape index: {}]   ;;  %s4481_s21 = inlined_call_operand.vmem [shape: f32[2,8,32], index: 21, kind: output, shape index: {0}]   ;;  %s4482_s22 = inlined_call_operand.hbm [shape: bf16[2,4,8,8], index: 22, kind: output, shape index: {1}]  }
   0x1   :  { %4494 = sst [smem:[#allocation14_spill]] %s4460_s0 }
   0x2   :  { %4495 = sst [smem:[#allocation15_spill]] %s4461_s1 }
   0x3   :  { %4496 = sst [smem:[#allocation16_spill]] %s4462_s2 }
   0x4   :  { %4497 = sst [smem:[#allocation17_spill]] %s4463_s3 }
   0x5   :  { %4498 = sst [smem:[#allocation18_spill]] %s4464_s4 }
   0x6   :  { %4499 = sst [smem:[#allocation19_spill]] %s4465_s5 }
   0x7   :  { %4500 = sst [smem:[#allocation20_spill]] %s4466_s6 }
   0x8   :  { %4501 = sst [smem:[#allocation21_spill]] %s4467_s7 }
   0x9   :  { %4502 = sst [smem:[#allocation22_spill]] %s4468_s8 }
   0xa   :  { %4503 = sst [smem:[#allocation23_spill]] %s4469_s9 }
   0xb   :  { %4504 = sst [smem:[#allocation24_spill]] %s4470_s10 }
   0xc   :  { %4505 = sst [smem:[#allocation25_spill]] %s4481_s21 }
   0xd   :  { %28 = vsyncpa [#allocation6], 0 }
   0xe   :  { %30 = vsyncpa [#allocation6 + $0x1], 0  ;;  %s3712_s3 = smov 0   ;;  %s3714_s28 = smov 0  }
   0xf   :  { %s3716_s29 = smov 0   ;;  %s3718_s30 = smov 0  }
  0x10 LB: > { %4506 = sst [smem:[#allocation8_spill]] %s3579_s3  ;;  %s3733_s4 = sadd.s32 4294967295, %s3591_s30   ;;  %s3591_s30 = sphi %s3718_s30, %s4531_s30   ;;  %s3587_s29 = sphi %s3716_s29, %s4533_s29   ;;  %s3583_s28 = sphi %s3714_s28, %s4535_s28   ;;  %s3579_s3 = sphi %s3712_s3, %s4534_s3  }
  0x11   : > { %4507 = sst [smem:[#allocation9_spill]] %s3587_s29  ;;  %s3005_s0 = sadd.s32 4294967294, %s3591_s30  }
  0x12   : > { %4508 = sst [smem:[#allocation10_spill]] %s3591_s30  ;;  %s3737_s23 = sadd.s32 1, %s3591_s30  }
  0x13   : > { %4509 = sst [smem:[#allocation11_spill]] %s3737_s23  ;;  %s525_s1 = sadd.s32 1, %s3587_s29 }
  0x14   : > { %s522_s5 = ssub.s32 %s3591_s30, %s3737_s23  ;;  %p535_p0 = scmp.ne.s32.totalorder %s3587_s29, %s3583_s28 }
  0x15   : > { %p523_p1 = scmp.eq.s32.totalorder %s522_s5, 0  ;;  %p536_p2 = scmp.eq.s32.totalorder %s3733_s4, 1 }
  0x16   : > { %p541_p3 = scmp.ne.s32.totalorder %s3583_s28, %s3579_s3  ;;  %p542_p4 = scmp.eq.s32.totalorder %s3005_s0, 1 }
  0x17   : > { %s3748_s24 = scalar_select %p523_p1, %s3587_s29, %s525_s1  }
  0x18   : > { %p3750_p5 = por %p536_p2, %p535_p0  ;;  %p3754_p6 = por %p542_p4, %p541_p3 }
  0x19   : > { %4510 = sst [smem:[#allocation12_spill]] %s3748_s24  ;;  %p3008_p7 = scmp.ge.s32.totalorder %s3591_s30, 1 }
  0x1a   : > { %s4512_s25 = scalar_select %p3754_p6, 1, 0 }
  0x1b   : > { %p634_p8 = scmp.lt.s32.totalorder %s3591_s30, 3 }
  0x1c   : > { %4513 = sst [smem:[#allocation13_spill]] %s4512_s25 }
  0x1d   : > { %p635_p9 = pnand %p3008_p7, %p634_p8 }
  0x1e   : > { %p706_p10 = scmp.lt.s32.totalorder (!%p635_p9), %s3733_s4, 1  ;;  %s4514_s1 = sld [smem:[#allocation14_spill]] (!%p635_p9) }
  0x1f   : > { %638 = sbr.rel (%p635_p9) target bundleno = 6599 (0x19c7), region = 104  ;;  %s4516_s24 = sld [smem:[#allocation20_spill]] (!%p635_p9) }
  0x20   : > { %s4517_s7 = sld [smem:[#allocation21_spill]] (!%p635_p9)  ;;  %s703_s3 = sand.u32 (!%p635_p9), 1, %s3583_s28  }
  0x21   : > { %s4518_s10 = sld [smem:[#allocation24_spill]] (!%p635_p9)  ;;  %s2880_s29 = scalar_lea.sflag (!%p635_p9), [#allocation6], %s703_s3 }
  0x22   : > { %s4519_s30 = sld [smem:[#allocation18_spill]] (!%p635_p9) }
  0x23   : > { %s4521_s9 = sld [smem:[#allocation23_spill]] (!%p635_p9) }
  0x24   : > { %s3762_s26 = scalar_select %p706_p10, %s3733_s4, 1  ;;  %vm724_vm0 = vcmask 261120   ;;  %v3593_v4 = vmov 32.0   ;;  %vm867_vm2 = vcmask 64512   ;;  %vm763_vm6 = vcmask 257024   ;;  %v3837_v61 = vld [vmem:[%s4472_s12] sm:$0xff] }
  0x25   : > { %3489 = vrcp.f32 %v3593_v4  ;;  %v3381_v17 = vld [vmem:[%s4516_s24 + $0x8] sm:$0xff]  ;;  %v3380_v21 = vld [vmem:[%s4516_s24] sm:$0xff]  ;;  %v3387_v48 = vld [vmem:[%s4516_s24 + $0x18] sm:$0xff]  ;;  %vm1024_vm7 = vcmask 1043456   ;;  %vm969_vm8 = vcmask 1041409   ;;  %vm971_vm9 = vcmask 1042434  }
  0x26   : > { %s4486_s2 = sshll.u32 %s3762_s26, 2  ;;  %v3383_v18 = vld [vmem:[%s4517_s7 + $0x8] sm:$0xff]  ;;  %822 = vmatpush.bf16.msra.mxu1 %v3381_v17  ;;  %v3382_v23 = vld [vmem:[%s4517_s7] sm:$0xff]  ;;  %v3386_v51 = vld [vmem:[%s4516_s24 + $0x10] sm:$0xff]  ;;  %vm973_vm10 = vcmask 1043459   ;;  %vm975_vm11 = vcmask 1044484  }
  0x27   : > { %s709_s5 = scalar_lea.vmem %s4514_s1, %s4486_s2  ;;  %s4515_s1 = sld [smem:[#allocation19_spill]]  ;;  %851 = vmatpush.bf16.msra.mxu2 %v3383_v18  ;;  %v865_v25 = vld [vmem:[%s4518_s10] sm:$0xf]  ;;  %v3849_v4 = vld [vmem:[%s4472_s12 + $0x10] sm:$0xff]  ;;  %vm977_vm12 = vcmask 1045509   ;;  %vm979_vm13 = vcmask 1046534  }
  0x28   : > { %v722_v0 = vld [vmem:[%s709_s5] sm:$0xf]  ;;  %v872_v26 = vsel %vm867_vm2, %v865_v25, 0  ;;  %s4520_s25 = smov %s4519_s30  ;;  %vm981_vm14 = vcmask 1047559   ;;  %s4522_s2 = sld [smem:[#allocation16_spill]] }
  0x29   : > { %v723_v1 = vunpack.c.l.bf16 %v722_v0  ;;  %881 = vmatpush.bf16.xpose.msra.mxu3 %v872_v26  ;;  %v3476_v33 = vld [vmem:[%s4519_s30] ss:$0 sm:$0xff]  ;;  %v3477_v35 = vld [vmem:[%s4520_s25 + $0x1] ss:$0 sm:$0xff]  ;;  %s4523_s8 = sld [smem:[#allocation22_spill]]  ;;  %s4524_s23 = sshll.u32 %s3762_s26, 2 }
  0x2a   : > { %823 = vmatpush.bf16.msra.mxu1 %v3380_v21  ;;  %v3478_v45 = vld [vmem:[%s4521_s9] ss:$0 sm:$0xff]  ;;  %v3865_v21 = vld [vmem:[%s4472_s12 + $0x38] sm:$0xff]  ;;  %s4526_s0 = sld [smem:[#allocation17_spill]]  ;;  %s3009_s30 = sshll.u32 %s703_s3, 4 }
  0x2b   : > { %725 = vst.msk [vmem:[#allocation2] sm:$0xff] %vm724_vm0, %v723_v1  ;;  %v3490_v5 = vpop.eup %3489  ;;  %852 = vmatpush.bf16.msra.mxu2 %v3382_v23 }
  0x2c   : > { %v733_v6 = vmul.f32 32.0, %v3490_v5  ;;  %vm737_vm1 = vweird.f32 %v3490_v5 }
  0x2d   : > { %v3379_v16 = vld [vmem:[%s4515_s1 + $0x8] sm:$0xff]  ;;  %v3378_v20 = vld [vmem:[%s4515_s1] sm:$0xff]  ;;  %v3385_v41 = vld [vmem:[%s4515_s1 + $0x18] sm:$0xff] }
  0x2e   : > { %v734_v7 = vsub.f32 1.0, %v733_v6  ;;  %793 = vmatpush.bf16.msra.mxu0 %v3379_v16  ;;  %v3384_v42 = vld [vmem:[%s4515_s1 + $0x10] sm:$0xff] }
  0x30   : > { %v735_v8 = vmul.f32 %v3490_v5, %v734_v7  ;;  %s716_s5 = scalar_lea.vmem %s4526_s0, %s3762_s26  ;;  %s3432_s0 = sshll.u32 %s3733_s4, 4 }
  0x31   : > { %1091 = vmatpush.bf16.msrb.mxu3 %v3385_v41  ;;  %s3549_s4 = scalar_lea.hbm %s4482_s22, 32 }
  0x32   : > { %v726_v2 = vld [vmem:[#allocation2] sm:$0xff]  ;;  %v736_v9 = vadd.f32 %v3490_v5, %v735_v8  ;;  %794 = vmatpush.bf16.msra.mxu0 %v3378_v20 }
  0x33   : > { %v729_v3 = vsel %vm724_vm0, %v726_v2, 0.0 }
  0x34   : > { %730 = vadd.xlane.f32.xlu0 %v729_v3  ;;  %v3772_v10 = vsel %vm737_vm1, %v3490_v5, %v736_v9  ;;  %v3844_v3 = vld [vmem:[%s4472_s12 + $0x20] sm:$0xff] }
  0x35   : > { %1092 = vmatpush.bf16.msrb.mxu3 %v3384_v42  ;;  %v3393_v42 = vld [vmem:[%s4516_s24 + $0x28] sm:$0xff] }
  0xa7   : > { %v731_v11 = vpop.xlane.xlu0 %730 }
  0xa8   : > { %v739_v12 = vmul.f32 %v3772_v10, %v731_v11 }
  0xaa   : > { %v740_v13 = vsub.f32 %v726_v2, %v739_v12 }
  0xac   : > { %v741_v14 = vmul.f32 %v740_v13, %v740_v13 }
  0xae   : > { %v742_v15 = vsel %vm724_vm0, %v741_v14, 0.0 }
  0xaf   : > { %743 = vadd.xlane.f32.xlu0 %v742_v15  ;;  %v3858_v15 = vld [vmem:[%s4472_s12 + $0x8] sm:$0xff] }
 0x122   : > { %v744_v19 = vpop.xlane.xlu0 %743 }
 0x123   : > { %v745_v22 = vmul.f32 %v744_v19, %v3772_v10 }
 0x125   : > { %v746_v24 = vadd.f32 1e-05, %v745_v22  ;;  %v3870_v22 = vld [vmem:[%s4472_s12 + $0x18] sm:$0xff] }
 0x127   : > { %3491 = vrsqrt.f32 %v746_v24  ;;  %vm753_vm4 = vweird.f32 %v746_v24 }
 0x12d   : > { %v3492_v27 = vpop.eup %3491 }
 0x12e   : > { %v748_v28 = vmul.f32 %v3492_v27, %v746_v24  ;;  %vm754_vm3 = vweird.f32 %v3492_v27 }
 0x12f   : > { %vm755_vm5 = vmor %vm753_vm4, %vm754_vm3 }
 0x130   : > { %v749_v29 = vmul.f32 %v3492_v27, %v748_v28 }
 0x132   : > { %v750_v30 = vmul.f32 0.5, %v749_v29 }
 0x134   : > { %v751_v31 = vsub.f32 1.5, %v750_v30 }
 0x136   : > { %v752_v32 = vmul.f32 %v3492_v27, %v751_v31  ;;  %v3879_v31 = vld [vmem:[%s4472_s12 + $0x28] sm:$0xff] }
 0x138   : > { %v756_v34 = vsel %vm755_vm5, %v3492_v27, %v752_v32 }
 0x139   : > { %v757_v36 = vmul.f32 %v756_v34, %v740_v13 }
 0x13b   : > { %v759_v37 = vmul.f32 %v3476_v33, %v757_v36  ;;  %v3888_v36 = vld [vmem:[%s4472_s12 + $0x30] sm:$0xff] }
 0x13d   : > { %v761_v38 = vadd.f32 %v3477_v35, %v759_v37 }
 0x13f   : > { %v762_v39 = vpack.c.bf16 %v761_v38, %v761_v38 }
 0x141   : > { %764 = vst.msk [vmem:[#allocation3] sm:$0xf] %vm763_vm6, %v762_v39  ;;  %v3479_v39 = vld [vmem:[%s4521_s9 + $0x1] ss:$0 sm:$0xff] }
 0x148   : > { %v767_v40 = vld [vmem:[#allocation3] sm:$0xf] }
 0x149   : > { %3021 = vmatmul.msk.bf16.vlgmr.msra.gmra.mxu0 %vm724_vm0, %v767_v40  ;;  %3030 = vmatmul.msk.bf16.vlgmr.msra.gmra.mxu1 %vm724_vm0, %v767_v40  ;;  %v3828_v59 = vld [vmem:[#allocation3] sm:$0xf] }
 0x14a   : > { %3039 = vmatmul.msk.bf16.vlgmr.msra.gmra.mxu2 %vm724_vm0, %v767_v40 }
 0x1c6   : > { %v796_v43 = vpop.f32.mrf.mxu0  ;;  %v825_v44 = vpop.f32.mrf.mxu1 }
 0x1c7   : > { %v866_v46 = vpack.c.bf16 %v796_v43, %v796_v43  ;;  %v864_v47 = vpack.c.bf16 %v825_v44, %v825_v44  ;;  %v862_v50 = vadd.f32 %v3478_v45, %v796_v43 }
 0x1c9   : > { %3040 = vmatmul.msk.bf16.vlgmr.msra.gmra.mxu3 %vm867_vm2, %v866_v46  ;;  %v988_v49 = vsel %vm867_vm2, %v864_v47, 0  ;;  %v863_v56 = vpack.c.bf16 %v862_v50, %v862_v50  ;;  %v3392_v47 = vld [vmem:[%s4516_s24 + $0x20] sm:$0xff] }
 0x1ca   : > { %997 = vmatpush.bf16.xpose.msrb.mxu0 %v988_v49 }
 0x1cd   : > { %v854_v52 = vpop.f32.mrf.mxu2 }
 0x1ce   : > { %v1020_v53 = vpack.c.bf16 %v854_v52, %v854_v52  ;;  %v798_v54 = vpop.f32.mrf.mxu0  ;;  %v827_v55 = vpop.f32.mrf.mxu1 }
 0x1d0   : > { %v1026_v57 = vsel %vm1024_vm7, %v1020_v53, 0  ;;  %v959_v53 = vlaneseq }
 0x1d1   : > { %1035 = vmatpush.bf16.msrb.mxu1 %v1026_v57  ;;  %3041 = vmatmul.msk.bf16.vlgmr.msrb.gmra.mxu0 %vm867_vm2, %v863_v56 }
 0x1d2   : > { %1121 = vmatpush.bf16.msra.mxu0 %v3387_v48  ;;  %v3910_v55 = vand.u32 127, %v959_v53 }
 0x1d5   : > { %v856_v58 = vpop.f32.mrf.mxu2 }
 0x1d6   : > { %1122 = vmatpush.bf16.msra.mxu0 %v3386_v51  ;;  %v3906_v51 = vld [vmem:[#allocation3] sm:$0xf] }
 0x1d9   : > { %3056 = vmatmul.msk.bf16.vlgmr.msrb.gmra.mxu3 %vm724_vm0, %v3828_v59 }
 0x1e1   : > { %3069 = vmatmul.msk.bf16.vlgmr.msra.gmra.mxu0 %vm724_vm0, %v3828_v59 }
 0x24c   : > { %v883_v60 = vpop.f32.mrf.mxu3 }
 0x24d   : > { %v903_v62 = vperm.slane %v883_v60, 0  ;;  %v891_v63 = vrot.slane %v883_v60, 4  ;;  %v889_v0 = vrot.slane %v883_v60, 2  ;;  %v888_v1 = vrot.slane %v883_v60, 1 }
 0x24e   : > { %v3839_v2 = vpop.f32.mrf.mxu0  ;;  %v894_v5 = vrot.slane %v883_v60, 7  ;;  %v890_v9 = vrot.slane %v883_v60, 3  ;;  %v892_v24 = vrot.slane %v883_v60, 5  ;;  %v893_v28 = vrot.slane %v883_v60, 6 }
 0x24f   : > { %v919_v6 = vmul.f32 %v903_v62, %v3837_v61  ;;  %v907_v7 = vperm.slane %v891_v63, 0  ;;  %v905_v8 = vperm.slane %v889_v0, 0  ;;  %v904_v14 = vperm.slane %v888_v1, 0 }
 0x250   : > { %v910_v18 = vperm.slane %v894_v5, 0  ;;  %v906_v19 = vperm.slane %v890_v9, 0  ;;  %v908_v30 = vperm.slane %v892_v24, 0  ;;  %v909_v34 = vperm.slane %v893_v28, 0 }
 0x251   : > { %v927_v11 = vsel %vm867_vm2, %v919_v6, 0.0  ;;  %v923_v12 = vmul.f32 %v907_v7, %v3844_v3  ;;  %v921_v13 = vmul.f32 %v905_v8, %v3849_v4  ;;  %v920_v23 = vmul.f32 %v904_v14, %v3858_v15 }
 0x252   : > { %928 = vadd.xlane.f32.xlu1 %v927_v11  ;;  %v926_v26 = vmul.f32 %v910_v18, %v3865_v21  ;;  %v922_v27 = vmul.f32 %v906_v19, %v3870_v22  ;;  %v924_v37 = vmul.f32 %v908_v30, %v3879_v31  ;;  %v925_v41 = vmul.f32 %v909_v34, %v3888_v36 }
 0x253   : > { %v939_v16 = vsel %vm867_vm2, %v923_v12, 0.0  ;;  %v933_v17 = vsel %vm867_vm2, %v921_v13, 0.0  ;;  %v930_v29 = vsel %vm867_vm2, %v920_v23, 0.0 }
 0x254   : > { %940 = vadd.xlane.f32.xlu0 %v939_v16  ;;  %934 = vadd.xlane.f32.xlu2 %v933_v17  ;;  %v885_v20 = vpop.f32.mrf.mxu3  ;;  %v948_v32 = vsel %vm867_vm2, %v926_v26, 0.0  ;;  %v936_v33 = vsel %vm867_vm2, %v922_v27, 0.0  ;;  %v942_v44 = vsel %vm867_vm2, %v924_v37, 0.0  ;;  %v945_v46 = vsel %vm867_vm2, %v925_v41, 0.0  ;;  %v3388_v41 = vld [vmem:[%s4517_s7 + $0x10] sm:$0xff] }
 0x255   : > { %v1003_v20 = vld [vmem:[%s4471_s11] sm:$0xff] }
 0x256   : > { %v1001_v25 = vpop.f32.mrf.mxu0 }
 0x257   : > { %v3934_v25 = vld [vmem:[%s4522_s2] sm:$0xff] }
 0x25a   : > { %931 = vadd.xlane.f32.xlu1 %v930_v29 }
 0x25c   : > { %949 = vadd.xlane.f32.xlu0 %v948_v32  ;;  %937 = vadd.xlane.f32.xlu2 %v936_v33  ;;  %v3883_v35 = vpop.f32.mrf.mxu3 }
 0x25d   : > { %v1163_v45 = vadd.f32 %v3479_v39, %v3883_v35 }
 0x25e   : > { %v1124_v38 = vpop.f32.mrf.mxu0 }
 0x25f   : > { %v1165_v40 = vpack.c.bf16 %v1124_v38, %v1124_v38  ;;  %v1164_v50 = vpack.c.bf16 %v1163_v45, %v1163_v45 }
 0x261   : > { %v1280_v43 = vsel %vm867_vm2, %v1165_v40, 0  ;;  %v3389_v40 = vld [vmem:[%s4517_s7 + $0x18] sm:$0xff] }
 0x262   : > { %943 = vadd.xlane.f32.xlu1 %v942_v44  ;;  %1289 = vmatpush.bf16.xpose.msra.mxu3 %v1280_v43 }
 0x263   : > { %1151 = vmatpush.bf16.msra.mxu1 %v3389_v40 }
 0x264   : > { %946 = vadd.xlane.f32.xlu2 %v945_v46  ;;  %v1096_v48 = vpop.f32.mrf.mxu3 }
 0x265   : > { %v3084_v48 = vld [vmem:[%s4518_s10 + $0x4] sm:$0xf] }
 0x266   : > { %v1126_v49 = vpop.f32.mrf.mxu0 }
 0x267   : > { %1152 = vmatpush.bf16.msra.mxu1 %v3388_v41  ;;  %v1173_v49 = vsel %vm867_vm2, %v3084_v48, 0 }
 0x269   : > { %3086 = vmatmul.msk.bf16.vlgmr.msra.gmra.mxu3 %vm867_vm2, %v1164_v50 }
 0x26a   : > { %1414 = vmatpush.bf16.msrb.mxu3 %v3393_v42  ;;  %v1041_v42 = vld [vmem:[%s4523_s8] sm:$0xf] }
 0x26b   : > { %v1047_v43 = vsel %vm1024_vm7, %v1041_v42, 0 }
 0x26c   : > { %1056 = vmatpush.bf16.msrb.mxu2 %v1047_v43  ;;  %v3480_v43 = vld [vmem:[%s4521_s9 + $0x2] ss:$0 sm:$0xff] }
 0x26e   : > { %1415 = vmatpush.bf16.msrb.mxu3 %v3392_v47 }
 0x270   : > { %1182 = vmatpush.bf16.xpose.msra.mxu2 %v1173_v49 }
 0x279   : > { %3116 = vmatmul.msk.bf16.vlgmr.msrb.gmra.mxu3 %vm724_vm0, %v3906_v51 }
 0x2c5   : > { %v929_v52 = vpop.xlane.xlu1 %928 }
 0x2c6   : > { %v961_v58 = vperm.slane %v929_v52, %v3910_v55  ;;  %v3391_v52 = vld [vmem:[%s4515_s1 + $0x28] sm:$0xff] }
 0x2c7   : > { %v935_v54 = vpop.xlane.xlu2 %934  ;;  %v941_v56 = vpop.xlane.xlu0 %940 }
 0x2c8   : > { %v963_v62 = vperm.slane %v935_v54, %v3910_v55  ;;  %v965_v7 = vperm.slane %v941_v56, %v3910_v55  ;;  %v3594_v54 = vmov 0.0  }
 0x2c9   : > { %765 = vst.msk [vmem:[#allocation4] sm:$0xff] %vm724_vm0, %v3594_v54 }
 0x2cd   : > { %v932_v57 = vpop.xlane.xlu1 %931 }
 0x2ce   : > { %v962_v60 = vperm.slane %v932_v57, %v3910_v55 }
 0x2cf   : > { %v938_v63 = vpop.xlane.xlu2 %937  ;;  %v950_v9 = vpop.xlane.xlu0 %949 }
 0x2d0   : > { %v970_v0 = vsel %vm969_vm8, %v962_v60, %v961_v58  ;;  %v964_v1 = vperm.slane %v938_v63, %v3910_v55  ;;  %v968_v17 = vperm.slane %v950_v9, %v3910_v55  ;;  %v1168_v60 = vpack.c.bf16 %v3883_v35, %v3883_v35  ;;  %v3399_v35 = vld [vmem:[%s4516_s24 + $0x38] sm:$0xff]  ;;  %v3398_v9 = vld [vmem:[%s4516_s24 + $0x30] sm:$0xff] }
 0x2d1   : > { %v972_v5 = vsel %vm971_vm9, %v963_v62, %v970_v0 }
 0x2d2   : > { %v974_v6 = vsel %vm973_vm10, %v964_v1, %v972_v5  ;;  %v1018_v5 = vld [vmem:[#allocation4] sm:$0xff] }
 0x2d3   : > { %v976_v12 = vsel %vm975_vm11, %v965_v7, %v974_v6 }
 0x2d5   : > { %v944_v8 = vpop.xlane.xlu1 %943 }
 0x2d6   : > { %v966_v11 = vperm.slane %v944_v8, %v3910_v55 }
 0x2d7   : > { %v947_v13 = vpop.xlane.xlu2 %946 }
 0x2d8   : > { %v978_v14 = vsel %vm977_vm12, %v966_v11, %v976_v12  ;;  %v967_v16 = vperm.slane %v947_v13, %v3910_v55 }
 0x2da   : > { %v980_v18 = vsel %vm979_vm13, %v967_v16, %v978_v14 }
 0x2db   : > { %v982_v19 = vsel %vm981_vm14, %v968_v17, %v980_v18 }
 0x2dc   : > { %v1000_v23 = vadd.f32 %v3839_v2, %v982_v19 }
 0x2de   : > { %v1004_v24 = vadd.f32 %v1003_v20, %v1000_v23 }
 0x2e0   : > { %v1005_v26 = vmul.f32 0.35355338, %v1004_v24 }
 0x2e2   : > { %v1006_v27 = vadd.f32 %v1005_v26, %v3934_v25 }
 0x2e4   : > { %v1007_v28 = vsel %vm867_vm2, %v1006_v27, -inf }
 0x2e5   : > { %1008 = vmax.xlane.f32.xlu1 %v1007_v28 }
 0x2ec   : > { %v3938_v29 = vpop.f32.mrf.mxu3 }
 0x2f4   : > { %v1293_v30 = vpop.f32.mrf.mxu3 }
 0x2fc   : > { %v1417_v32 = vpop.f32.mrf.mxu3 }
 0x2fd   : > { %v1458_v57 = vpack.c.bf16 %v1417_v32, %v1417_v32 }
 0x2ff   : > { %v1573_v63 = vsel %vm867_vm2, %v1458_v57, 0 }
 0x304   : > { %v1419_v33 = vpop.f32.mrf.mxu3 }
 0x358   : > { %v1009_v34 = vpop.xlane.xlu1 %1008 }
 0x359   : > { %v1010_v37 = vsub.f32 %v1006_v27, %v1009_v34 }
 0x35b   : > { %v1011_v2 = vmul.f32 1.442695, %v1010_v37 }
 0x35d   : > { %3493 = vpow2.f32 %v1011_v2 }
 0x363   : > { %v3494_v38 = vpop.eup %3493 }
 0x364   : > { %v1013_v39 = vsel %vm867_vm2, %v3494_v38, 0.0 }
 0x365   : > { %1014 = vadd.xlane.f32.xlu2 %v1013_v39 }
 0x3d8   : > { %v1015_v44 = vpop.xlane.xlu2 %1014 }
 0x3d9   : > { %3495 = vrcp.f32 %v1015_v44 }
 0x3df   : > { %v3496_v45 = vpop.eup %3495 }
 0x3e0   : > { %v1017_v46 = vmul.f32 %v3496_v45, %v3494_v38 }
 0x3e2   : > { %v1019_v47 = vpack.c.bf16 %v1017_v46, %v1017_v46 }
 0x3e4   : > { %3042 = vmatmul.msk.bf16.vlgmr.msrb.gmra.mxu1 %vm867_vm2, %v1019_v47 }
 0x3f4   : > { %3082 = vmatmul.msk.bf16.vlgmr.msra.gmra.mxu1 %vm724_vm0, %v3828_v59  ;;  %v3390_v59 = vld [vmem:[%s4515_s1 + $0x20] sm:$0xff] }
 0x461   : > { %v1037_v50 = vpop.f32.mrf.mxu1 }
 0x462   : > { %v1042_v53 = vpack.c.bf16 %v1037_v50, %v1037_v50 }
 0x464   : > { %3043 = vmatmul.msk.bf16.vlgmr.msrb.gmra.mxu2 %vm867_vm2, %v1042_v53 }
 0x465   : > { %1384 = vmatpush.bf16.msrb.mxu2 %v3391_v52 }
 0x469   : > { %v1039_v56 = vpop.f32.mrf.mxu1  ;;  %1385 = vmatpush.bf16.msrb.mxu2 %v3390_v59 }
 0x471   : > { %v1154_v58 = vpop.f32.mrf.mxu1 }
 0x472   : > { %v1313_v62 = vpack.c.bf16 %v1154_v58, %v1154_v58  ;;  %v4004_v58 = vld [vmem:[#allocation3] sm:$0xf] }
 0x474   : > { %v1318_v0 = vsel %vm1024_vm7, %v1313_v62, 0  ;;  %3085 = vmatmul.msk.bf16.vlgmr.msra.gmra.mxu2 %vm867_vm2, %v1168_v60 }
 0x475   : > { %1582 = vmatpush.bf16.xpose.msra.mxu2 %v1573_v63  ;;  %1327 = vmatpush.bf16.msrb.mxu0 %v1318_v0 }
 0x479   : > { %v1156_v1 = vpop.f32.mrf.mxu1 }
 0x484   : > { %3103 = vmatmul.msk.bf16.vlgmr.msrb.gmra.mxu2 %vm724_vm0, %v3906_v51 }
 0x485   : > { %1707 = vmatpush.bf16.msrb.mxu2 %v3399_v35 }
 0x489   : > { %1708 = vmatpush.bf16.msrb.mxu2 %v3398_v9 }
 0x4e7   : > { %v1058_v6 = vpop.f32.mrf.mxu2 }
 0x4e8   : > { %v1062_v7 = vadd.f32 %v1058_v6, %v1018_v5 }
 0x4ea   : > { %1063 = vst.msk [vmem:[#allocation4] sm:$0xff] %vm724_vm0, %v1062_v7 }
 0x4ef   : > { %v1060_v8 = vpop.f32.mrf.mxu2 }
 0x4f7   : > { %v1184_v11 = vpop.f32.mrf.mxu2 }
 0x4f8   : > { %v1204_v12 = vperm.slane %v1184_v11, 0  ;;  %v1190_v13 = vrot.slane %v1184_v11, 2  ;;  %v1189_v14 = vrot.slane %v1184_v11, 1  ;;  %v1191_v16 = vrot.slane %v1184_v11, 3 }
 0x4f9   : > { %v1193_v17 = vrot.slane %v1184_v11, 5  ;;  %v1192_v23 = vrot.slane %v1184_v11, 4  ;;  %v1194_v38 = vrot.slane %v1184_v11, 6  ;;  %v1195_v41 = vrot.slane %v1184_v11, 7 }
 0x4fa   : > { %v1220_v18 = vmul.f32 %v1204_v12, %v3837_v61  ;;  %v1206_v19 = vperm.slane %v1190_v13, 0  ;;  %v1205_v20 = vperm.slane %v1189_v14, 0  ;;  %v1207_v28 = vperm.slane %v1191_v16, 0 }
 0x4fb   : > { %v1209_v33 = vperm.slane %v1193_v17, 0  ;;  %v1208_v34 = vperm.slane %v1192_v23, 0  ;;  %v1210_v44 = vperm.slane %v1194_v38, 0  ;;  %v1211_v47 = vperm.slane %v1195_v41, 0 }
 0x4fc   : > { %v1228_v24 = vsel %vm867_vm2, %v1220_v18, 0.0  ;;  %v1222_v26 = vmul.f32 %v1206_v19, %v3849_v4  ;;  %v1221_v27 = vmul.f32 %v1205_v20, %v3858_v15  ;;  %v1223_v2 = vmul.f32 %v1207_v28, %v3870_v22 }
 0x4fd   : > { %1229 = vadd.xlane.f32.xlu0 %v1228_v24  ;;  %v1225_v39 = vmul.f32 %v1209_v33, %v3879_v31  ;;  %v1224_v40 = vmul.f32 %v1208_v34, %v3844_v3  ;;  %v1226_v50 = vmul.f32 %v1210_v44, %v3888_v36  ;;  %v1227_v53 = vmul.f32 %v1211_v47, %v3865_v21 }
 0x4fe   : > { %v1234_v30 = vsel %vm867_vm2, %v1222_v26, 0.0  ;;  %v1231_v32 = vsel %vm867_vm2, %v1221_v27, 0.0  ;;  %v1237_v42 = vsel %vm867_vm2, %v1223_v2, 0.0  ;;  %v3087_v27 = vld [vmem:[%s4471_s11 + $0x8] sm:$0xff] }
 0x4ff   : > { %1235 = vadd.xlane.f32.xlu2 %v1234_v30  ;;  %1232 = vadd.xlane.f32.xlu1 %v1231_v32  ;;  %v1186_v37 = vpop.f32.mrf.mxu2  ;;  %v1243_v45 = vsel %vm867_vm2, %v1225_v39, 0.0  ;;  %v1240_v46 = vsel %vm867_vm2, %v1224_v40, 0.0  ;;  %v1246_v59 = vsel %vm867_vm2, %v1226_v50, 0.0  ;;  %v1249_v56 = vsel %vm867_vm2, %v1227_v53, 0.0 }
 0x505   : > { %1238 = vadd.xlane.f32.xlu0 %v1237_v42 }
 0x507   : > { %1244 = vadd.xlane.f32.xlu2 %v1243_v45  ;;  %1241 = vadd.xlane.f32.xlu1 %v1240_v46  ;;  %v3996_v48 = vpop.f32.mrf.mxu2  ;;  %v3394_v45 = vld [vmem:[%s4517_s7 + $0x20] sm:$0xff] }
 0x508   : > { %v1456_v49 = vadd.f32 %v3480_v43, %v3996_v48  ;;  %v3089_v46 = vld [vmem:[%s4523_s8 + $0x4] sm:$0xf] }
 0x509   : > { %v1340_v47 = vsel %vm1024_vm7, %v3089_v46, 0 }
 0x50a   : > { %v1457_v52 = vpack.c.bf16 %v1456_v49, %v1456_v49  ;;  %1349 = vmatpush.bf16.msrb.mxu1 %v1340_v47 }
 0x50c   : > { %3133 = vmatmul.msk.bf16.vlgmr.msra.gmra.mxu2 %vm867_vm2, %v1457_v52 }
 0x50d   : > { %1247 = vadd.xlane.f32.xlu0 %v1246_v59  ;;  %v3131_v59 = vld [vmem:[%s4518_s10 + $0x8] sm:$0xf] }
 0x50f   : > { %1250 = vadd.xlane.f32.xlu1 %v1249_v56  ;;  %v1389_v57 = vpop.f32.mrf.mxu2  ;;  %v1466_v56 = vsel %vm867_vm2, %v3131_v59, 0 }
 0x510   : > { %1475 = vmatpush.bf16.xpose.msra.mxu1 %v1466_v56 }
 0x51c   : > { %3163 = vmatmul.msk.bf16.vlgmr.msrb.gmra.mxu2 %vm724_vm0, %v4004_v58 }
 0x570   : > { %v1230_v60 = vpop.xlane.xlu0 %1229 }
 0x571   : > { %v1260_v1 = vperm.slane %v1230_v60, %v3910_v55  ;;  %v3397_v60 = vld [vmem:[%s4515_s1 + $0x38] sm:$0xff] }
 0x572   : > { %v1236_v62 = vpop.xlane.xlu2 %1235  ;;  %v1233_v63 = vpop.xlane.xlu1 %1232 }
 0x573   : > { %v1261_v0 = vperm.slane %v1233_v63, %v3910_v55  ;;  %v1262_v5 = vperm.slane %v1236_v62, %v3910_v55 }
 0x575   : > { %v1268_v6 = vsel %vm969_vm8, %v1261_v0, %v1260_v1 }
 0x576   : > { %v1269_v9 = vsel %vm971_vm9, %v1262_v5, %v1268_v6  ;;  %v1461_v5 = vpack.c.bf16 %v3996_v48, %v3996_v48 }
 0x578   : > { %v1239_v7 = vpop.xlane.xlu0 %1238 }
 0x579   : > { %v1263_v8 = vperm.slane %v1239_v7, %v3910_v55 }
 0x57a   : > { %v1242_v35 = vpop.xlane.xlu1 %1241  ;;  %v1245_v11 = vpop.xlane.xlu2 %1244 }
 0x57b   : > { %v1264_v12 = vperm.slane %v1242_v35, %v3910_v55  ;;  %v1270_v13 = vsel %vm973_vm10, %v1263_v8, %v1269_v9  ;;  %v1265_v14 = vperm.slane %v1245_v11, %v3910_v55  ;;  %v1311_v9 = vld [vmem:[#allocation4] sm:$0xff] }
 0x57d   : > { %v1271_v16 = vsel %vm975_vm11, %v1264_v12, %v1270_v13 }
 0x57e   : > { %v1272_v19 = vsel %vm977_vm12, %v1265_v14, %v1271_v16 }
 0x580   : > { %v1248_v17 = vpop.xlane.xlu0 %1247 }
 0x581   : > { %v1266_v18 = vperm.slane %v1248_v17, %v3910_v55 }
 0x582   : > { %v1251_v20 = vpop.xlane.xlu1 %1250 }
 0x583   : > { %v1273_v23 = vsel %vm979_vm13, %v1266_v18, %v1272_v19  ;;  %v1267_v24 = vperm.slane %v1251_v20, %v3910_v55 }
 0x585   : > { %v1274_v26 = vsel %vm981_vm14, %v1267_v24, %v1273_v23 }
 0x586   : > { %v1292_v28 = vadd.f32 %v3938_v29, %v1274_v26  ;;  %v3395_v29 = vld [vmem:[%s4517_s7 + $0x28] sm:$0xff] }
 0x587   : > { %1444 = vmatpush.bf16.msra.mxu0 %v3395_v29 }
 0x588   : > { %v1297_v30 = vadd.f32 %v3087_v27, %v1292_v28 }
 0x58a   : > { %v1298_v32 = vmul.f32 0.35355338, %v1297_v30 }
 0x58b   : > { %1445 = vmatpush.bf16.msra.mxu0 %v3394_v45  ;;  %v3481_v45 = vld [vmem:[%s4521_s9 + $0x3] ss:$0 sm:$0xff] }
 0x58c   : > { %v1299_v33 = vadd.f32 %v1298_v32, %v3934_v25 }
 0x58e   : > { %v1300_v34 = vsel %vm867_vm2, %v1299_v33, -inf }
 0x58f   : > { %1301 = vmax.xlane.f32.xlu2 %v1300_v34  ;;  %v4029_v37 = vpop.f32.mrf.mxu2 }
 0x597   : > { %v1586_v2 = vpop.f32.mrf.mxu2 }
 0x59f   : > { %v1710_v38 = vpop.f32.mrf.mxu2 }
 0x5a0   : > { %v1751_v0 = vpack.c.bf16 %v1710_v38, %v1710_v38 }
 0x5a2   : > { %v1866_v7 = vsel %vm867_vm2, %v1751_v0, 0 }
 0x5a7   : > { %v1712_v39 = vpop.f32.mrf.mxu2 }
 0x602   : > { %v1302_v40 = vpop.xlane.xlu2 %1301 }
 0x603   : > { %v1303_v41 = vsub.f32 %v1299_v33, %v1302_v40 }
 0x605   : > { %v1304_v42 = vmul.f32 1.442695, %v1303_v41 }
 0x607   : > { %3497 = vpow2.f32 %v1304_v42 }
 0x60d   : > { %v3498_v43 = vpop.eup %3497 }
 0x60e   : > { %v1306_v44 = vsel %vm867_vm2, %v3498_v43, 0.0 }
 0x60f   : > { %1307 = vadd.xlane.f32.xlu0 %v1306_v44 }
 0x682   : > { %v1308_v49 = vpop.xlane.xlu0 %1307 }
 0x683   : > { %3499 = vrcp.f32 %v1308_v49 }
 0x689   : > { %v3500_v50 = vpop.eup %3499 }
 0x68a   : > { %v1310_v52 = vmul.f32 %v3500_v50, %v3498_v43 }
 0x68c   : > { %v1312_v53 = vpack.c.bf16 %v1310_v52, %v1310_v52 }
 0x68e   : > { %3088 = vmatmul.msk.bf16.vlgmr.msrb.gmra.mxu0 %vm867_vm2, %v1312_v53 }
 0x69e   : > { %3129 = vmatmul.msk.bf16.vlgmr.msra.gmra.mxu0 %vm724_vm0, %v3906_v51  ;;  %v3396_v51 = vld [vmem:[%s4515_s1 + $0x30] sm:$0xff]  ;;  %s2894_s1 = scalar_lea.hbm %s4482_s22, %s3432_s0 }
 0x69f   : > { %s2897_s27 = sshll.u32 %s2894_s1, 4  ;;  %s2898_s27 = int_to_ptr.hbm [resolvable:$true] %s2897_s27 }
 0x70b   : > { %v1329_v57 = vpop.f32.mrf.mxu0 }
 0x70c   : > { %v1335_v62 = vpack.c.bf16 %v1329_v57, %v1329_v57 }
 0x70e   : > { %3090 = vmatmul.msk.bf16.vlgmr.msrb.gmra.mxu1 %vm867_vm2, %v1335_v62 }
 0x70f   : > { %1677 = vmatpush.bf16.msrb.mxu1 %v3397_v60 }
 0x713   : > { %v1331_v63 = vpop.f32.mrf.mxu0  ;;  %1678 = vmatpush.bf16.msrb.mxu1 %v3396_v51 }
 0x71b   : > { %v1447_v1 = vpop.f32.mrf.mxu0 }
 0x71c   : > { %v1606_v6 = vpack.c.bf16 %v1447_v1, %v1447_v1 }
 0x71e   : > { %v1611_v8 = vsel %vm1024_vm7, %v1606_v6, 0  ;;  %3132 = vmatmul.msk.bf16.vlgmr.msra.gmra.mxu1 %vm867_vm2, %v1461_v5 }
 0x71f   : > { %1875 = vmatpush.bf16.xpose.msra.mxu1 %v1866_v7  ;;  %1620 = vmatpush.bf16.msra.mxu3 %v1611_v8 }
 0x723   : > { %v1449_v35 = vpop.f32.mrf.mxu0 }
 0x72e   : > { %3150 = vmatmul.msk.bf16.vlgmr.msrb.gmra.mxu1 %vm724_vm0, %v4004_v58 }
 0x78b   : > { %v1351_v11 = vpop.f32.mrf.mxu1 }
 0x78c   : > { %v1355_v12 = vadd.f32 %v1351_v11, %v1311_v9 }
 0x78e   : > { %1356 = vst.msk [vmem:[#allocation4] sm:$0xff] %vm724_vm0, %v1355_v12 }
 0x793   : > { %v1353_v13 = vpop.f32.mrf.mxu1 }
 0x79b   : > { %v1477_v48 = vpop.f32.mrf.mxu1 }
 0x79c   : > { %v1497_v14 = vperm.slane %v1477_v48, 0  ;;  %v1483_v16 = vrot.slane %v1477_v48, 2  ;;  %v1482_v17 = vrot.slane %v1477_v48, 1  ;;  %v1484_v18 = vrot.slane %v1477_v48, 3 }
 0x79d   : > { %v1486_v19 = vrot.slane %v1477_v48, 5  ;;  %v1485_v26 = vrot.slane %v1477_v48, 4  ;;  %v1487_v41 = vrot.slane %v1477_v48, 6  ;;  %v1488_v44 = vrot.slane %v1477_v48, 7 }
 0x79e   : > { %v1513_v20 = vmul.f32 %v1497_v14, %v3837_v61  ;;  %v1499_v23 = vperm.slane %v1483_v16, 0  ;;  %v1498_v24 = vperm.slane %v1482_v17, 0  ;;  %v1500_v32 = vperm.slane %v1484_v18, 0 }
 0x79f   : > { %v1502_v2 = vperm.slane %v1486_v19, 0  ;;  %v1501_v38 = vperm.slane %v1485_v26, 0  ;;  %v1503_v46 = vperm.slane %v1487_v41, 0  ;;  %v1504_v50 = vperm.slane %v1488_v44, 0 }
 0x7a0   : > { %v1521_v27 = vsel %vm867_vm2, %v1513_v20, 0.0  ;;  %v1515_v28 = vmul.f32 %v1499_v23, %v3849_v4  ;;  %v1514_v30 = vmul.f32 %v1498_v24, %v3858_v15  ;;  %v1516_v40 = vmul.f32 %v1500_v32, %v3870_v22 }
 0x7a1   : > { %1522 = vadd.xlane.f32.xlu1 %v1521_v27  ;;  %v1518_v42 = vmul.f32 %v1502_v2, %v3879_v31  ;;  %v1517_v43 = vmul.f32 %v1501_v38, %v3844_v3  ;;  %v1519_v59 = vmul.f32 %v1503_v46, %v3888_v36  ;;  %v1520_v57 = vmul.f32 %v1504_v50, %v3865_v21 }
 0x7a2   : > { %v1527_v33 = vsel %vm867_vm2, %v1515_v28, 0.0  ;;  %v1524_v34 = vsel %vm867_vm2, %v1514_v30, 0.0  ;;  %v1530_v29 = vsel %vm867_vm2, %v1516_v40, 0.0  ;;  %v3134_v28 = vld [vmem:[%s4471_s11 + $0x10] sm:$0xff] }
 0x7a3   : > { %1528 = vadd.xlane.f32.xlu0 %v1527_v33  ;;  %1525 = vadd.xlane.f32.xlu2 %v1524_v34  ;;  %v1479_v39 = vpop.f32.mrf.mxu1  ;;  %v1536_v47 = vsel %vm867_vm2, %v1518_v42, 0.0  ;;  %v1533_v49 = vsel %vm867_vm2, %v1517_v43, 0.0  ;;  %v1539_v60 = vsel %vm867_vm2, %v1519_v59, 0.0  ;;  %v1542_v62 = vsel %vm867_vm2, %v1520_v57, 0.0  ;;  %v3178_v59 = vld [vmem:[%s4518_s10 + $0xc] sm:$0xf] }
 0x7a9   : > { %1531 = vadd.xlane.f32.xlu1 %v1530_v29  ;;  %v3400_v29 = vld [vmem:[%s4517_s7 + $0x30] sm:$0xff] }
 0x7ab   : > { %1537 = vadd.xlane.f32.xlu0 %v1536_v47  ;;  %1534 = vadd.xlane.f32.xlu2 %v1533_v49  ;;  %v4079_v52 = vpop.f32.mrf.mxu1 }
 0x7ac   : > { %v1749_v53 = vadd.f32 %v3481_v45, %v4079_v52  ;;  %v3136_v45 = vld [vmem:[%s4523_s8 + $0x8] sm:$0xf] }
 0x7ad   : > { %v1633_v46 = vsel %vm1024_vm7, %v3136_v45, 0 }
 0x7ae   : > { %v1750_v56 = vpack.c.bf16 %v1749_v53, %v1749_v53  ;;  %1642 = vmatpush.bf16.msrb.mxu0 %v1633_v46 }
 0x7b0   : > { %3180 = vmatmul.msk.bf16.vlgmr.msra.gmra.mxu1 %vm867_vm2, %v1750_v56  ;;  %v1759_v56 = vsel %vm867_vm2, %v3178_v59, 0 }
 0x7b1   : > { %1540 = vadd.xlane.f32.xlu1 %v1539_v60 }
 0x7b2   : > { %1768 = vmatpush.bf16.xpose.msra.mxu0 %v1759_v56 }
 0x7b3   : > { %1543 = vadd.xlane.f32.xlu2 %v1542_v62  ;;  %v1682_v51 = vpop.f32.mrf.mxu1 }
 0x814   : > { %v1523_v63 = vpop.xlane.xlu1 %1522 }
 0x815   : > { %v1553_v6 = vperm.slane %v1523_v63, %v3910_v55  ;;  %v1754_v63 = vpack.c.bf16 %v4079_v52, %v4079_v52 }
 0x816   : > { %v1529_v0 = vpop.xlane.xlu0 %1528  ;;  %v1526_v1 = vpop.xlane.xlu2 %1525 }
 0x817   : > { %v1554_v5 = vperm.slane %v1526_v1, %v3910_v55  ;;  %v1555_v7 = vperm.slane %v1529_v0, %v3910_v55 }
 0x819   : > { %v1561_v8 = vsel %vm969_vm8, %v1554_v5, %v1553_v6  ;;  %v1604_v5 = vld [vmem:[#allocation4] sm:$0xff] }
 0x81a   : > { %v1562_v12 = vsel %vm971_vm9, %v1555_v7, %v1561_v8 }
 0x81c   : > { %v1532_v35 = vpop.xlane.xlu1 %1531 }
 0x81d   : > { %v1556_v9 = vperm.slane %v1532_v35, %v3910_v55 }
 0x81e   : > { %v1535_v11 = vpop.xlane.xlu2 %1534  ;;  %v1538_v13 = vpop.xlane.xlu0 %1537 }
 0x81f   : > { %v1557_v48 = vperm.slane %v1535_v11, %v3910_v55  ;;  %v1563_v14 = vsel %vm973_vm10, %v1556_v9, %v1562_v12  ;;  %v1558_v16 = vperm.slane %v1538_v13, %v3910_v55 }
 0x821   : > { %v1564_v17 = vsel %vm975_vm11, %v1557_v48, %v1563_v14 }
 0x822   : > { %v1565_v20 = vsel %vm977_vm12, %v1558_v16, %v1564_v17 }
 0x824   : > { %v1541_v18 = vpop.xlane.xlu1 %1540 }
 0x825   : > { %v1559_v19 = vperm.slane %v1541_v18, %v3910_v55 }
 0x826   : > { %v1544_v23 = vpop.xlane.xlu2 %1543 }
 0x827   : > { %v1566_v24 = vsel %vm979_vm13, %v1559_v19, %v1565_v20  ;;  %v1560_v26 = vperm.slane %v1544_v23, %v3910_v55 }
 0x829   : > { %v1567_v27 = vsel %vm981_vm14, %v1560_v26, %v1566_v24 }
 0x82a   : > { %v1585_v30 = vadd.f32 %v4029_v37, %v1567_v27  ;;  %v3401_v37 = vld [vmem:[%s4517_s7 + $0x38] sm:$0xff]  ;;  %s4268_s7 = scalar_lea.vmem [#allocation5], %s3009_s30 }
 0x82b   : > { %1737 = vmatpush.bf16.msrb.mxu3 %v3401_v37  ;;  %s2895_s2 = sshll.u32 %s4268_s7, 4  ;;  %s2896_s2 = int_to_ptr.vmem [resolvable:$true] %s2895_s2 }
 0x82c   : > { %v1590_v32 = vadd.f32 %v3134_v28, %v1585_v30 }
 0x82d   : > { %v4106_v33 = vpop.f32.mrf.mxu1 }
 0x82e   : > { %v1591_v34 = vmul.f32 0.35355338, %v1590_v32 }
 0x82f   : > { %1738 = vmatpush.bf16.msrb.mxu3 %v3400_v29 }
 0x830   : > { %v1592_v2 = vadd.f32 %v1591_v34, %v3934_v25 }
 0x832   : > { %v1593_v38 = vsel %vm867_vm2, %v1592_v2, -inf }
 0x833   : > { %1594 = vmax.xlane.f32.xlu0 %v1593_v38 }
 0x835   : > { %v1879_v39 = vpop.f32.mrf.mxu1 }
 0x8a6   : > { %v1595_v40 = vpop.xlane.xlu0 %1594 }
 0x8a7   : > { %v1596_v41 = vsub.f32 %v1592_v2, %v1595_v40 }
 0x8a9   : > { %v1597_v42 = vmul.f32 1.442695, %v1596_v41 }
 0x8ab   : > { %3501 = vpow2.f32 %v1597_v42 }
 0x8b1   : > { %v3502_v43 = vpop.eup %3501 }
 0x8b2   : > { %v1599_v44 = vsel %vm867_vm2, %v3502_v43, 0.0 }
 0x8b3   : > { %1600 = vadd.xlane.f32.xlu1 %v1599_v44 }
 0x926   : > { %v1601_v47 = vpop.xlane.xlu1 %1600 }
 0x927   : > { %3503 = vrcp.f32 %v1601_v47 }
 0x92d   : > { %v3504_v49 = vpop.eup %3503 }
 0x92e   : > { %v1603_v50 = vmul.f32 %v3504_v49, %v3502_v43 }
 0x930   : > { %v1605_v53 = vpack.c.bf16 %v1603_v50, %v1603_v50 }
 0x932   : > { %3135 = vmatmul.msk.bf16.vlgmr.msra.gmra.mxu3 %vm867_vm2, %v1605_v53 }
 0x942   : > { %3176 = vmatmul.msk.bf16.vlgmr.msrb.gmra.mxu3 %vm724_vm0, %v4004_v58 }
 0x9b5   : > { %v1622_v57 = vpop.f32.mrf.mxu3 }
 0x9b6   : > { %v1628_v60 = vpack.c.bf16 %v1622_v57, %v1622_v57 }
 0x9b8   : > { %3137 = vmatmul.msk.bf16.vlgmr.msrb.gmra.mxu0 %vm867_vm2, %v1628_v60 }
 0x9bd   : > { %v1624_v62 = vpop.f32.mrf.mxu3 }
 0x9c5   : > { %v1740_v51 = vpop.f32.mrf.mxu3 }
 0x9c6   : > { %v1899_v0 = vpack.c.bf16 %v1740_v51, %v1740_v51 }
 0x9c8   : > { %v1904_v1 = vsel %vm1024_vm7, %v1899_v0, 0  ;;  %3179 = vmatmul.msk.bf16.vlgmr.msra.gmra.mxu0 %vm867_vm2, %v1754_v63 }
 0x9c9   : > { %1913 = vmatpush.bf16.msra.mxu2 %v1904_v1 }
 0x9cd   : > { %v1742_v58 = vpop.f32.mrf.mxu3 }
 0xa35   : > { %v1644_v6 = vpop.f32.mrf.mxu0 }
 0xa36   : > { %v1648_v7 = vadd.f32 %v1644_v6, %v1604_v5  ;;  %v3181_v6 = vld [vmem:[%s4471_s11 + $0x18] sm:$0xff] }
 0xa38   : > { %1649 = vst.msk [vmem:[#allocation4] sm:$0xff] %vm724_vm0, %v1648_v7 }
 0xa3d   : > { %v1646_v8 = vpop.f32.mrf.mxu0 }
 0xa45   : > { %v1770_v35 = vpop.f32.mrf.mxu0 }
 0xa46   : > { %v1790_v9 = vperm.slane %v1770_v35, 0  ;;  %v1776_v11 = vrot.slane %v1770_v35, 2  ;;  %v1775_v12 = vrot.slane %v1770_v35, 1  ;;  %v1777_v13 = vrot.slane %v1770_v35, 3 }
 0xa47   : > { %v1779_v48 = vrot.slane %v1770_v35, 5  ;;  %v1778_v17 = vrot.slane %v1770_v35, 4  ;;  %v1780_v32 = vrot.slane %v1770_v35, 6  ;;  %v1781_v2 = vrot.slane %v1770_v35, 7 }
 0xa48   : > { %v1806_v52 = vmul.f32 %v1790_v9, %v3837_v61  ;;  %v1792_v14 = vperm.slane %v1776_v11, 0  ;;  %v1791_v16 = vperm.slane %v1775_v12, 0  ;;  %v1793_v23 = vperm.slane %v1777_v13, 0 }
 0xa49   : > { %v1795_v27 = vperm.slane %v1779_v48, 0  ;;  %v1794_v28 = vperm.slane %v1778_v17, 0  ;;  %v1796_v38 = vperm.slane %v1780_v32, 0  ;;  %v1797_v41 = vperm.slane %v1781_v2, 0 }
 0xa4a   : > { %v1814_v18 = vsel %vm867_vm2, %v1806_v52, 0.0  ;;  %v1808_v19 = vmul.f32 %v1792_v14, %v3849_v4  ;;  %v1807_v20 = vmul.f32 %v1791_v16, %v3858_v15  ;;  %v1809_v30 = vmul.f32 %v1793_v23, %v3870_v22  ;;  %v3183_v14 = vld [vmem:[%s4523_s8 + $0xc] sm:$0xf]  ;;  %s4525_s8 = sld [smem:[#allocation15_spill]] }
 0xa4b   : > { %1815 = vadd.xlane.f32.xlu2 %v1814_v18  ;;  %v1811_v34 = vmul.f32 %v1795_v27, %v3879_v31  ;;  %v1810_v4 = vmul.f32 %v1794_v28, %v3844_v3  ;;  %v1812_v42 = vmul.f32 %v1796_v38, %v3888_v36  ;;  %v1813_v22 = vmul.f32 %v1797_v41, %v3865_v21  ;;  %v1943_v28 = vld [vmem:[#allocation2] sm:$0xff]  ;;  %v3405_v41 = vld [vmem:[%s4474_s14 + $0x8] sm:$0xff] }
 0xa4c   : > { %v1820_v24 = vsel %vm867_vm2, %v1808_v19, 0.0  ;;  %v1817_v26 = vsel %vm867_vm2, %v1807_v20, 0.0  ;;  %v1823_v15 = vsel %vm867_vm2, %v1809_v30, 0.0  ;;  %2039 = vmatpush.bf16.msrb.mxu1 %v3405_v41 }
 0xa4d   : > { %1821 = vadd.xlane.f32.xlu1 %v1820_v24  ;;  %1818 = vadd.xlane.f32.xlu0 %v1817_v26  ;;  %v1772_v61 = vpop.f32.mrf.mxu0  ;;  %v1829_v39 = vsel %vm867_vm2, %v1811_v34, 0.0  ;;  %v1826_v40 = vsel %vm867_vm2, %v1810_v4, 0.0  ;;  %v1832_v31 = vsel %vm867_vm2, %v1812_v42, 0.0  ;;  %v1835_v3 = vsel %vm867_vm2, %v1813_v22, 0.0  ;;  %v1897_v24 = vld [vmem:[#allocation4] sm:$0xff]  ;;  %v3404_v22 = vld [vmem:[%s4474_s14] sm:$0xff] }
 0xa4e   : > { %v3407_v42 = vld [vmem:[%s4475_s15 + $0x8] sm:$0xff] }
 0xa4f   : > { %2068 = vmatpush.bf16.msrb.mxu2 %v3407_v42 }
 0xa50   : > { %s713_s21 = scalar_lea.vmem %s4525_s8, %s4524_s23  ;;  %2040 = vmatpush.bf16.msrb.mxu1 %v3404_v22  ;;  %s3543_s23 = sshra.s32 %s2898_s27, 4  ;;  %s3544_s23 = int_to_ptr.hbm [resolvable:$true] %s3543_s23 }
 0xa51   : > { %p3550_p0 = scmp.lt.s32.totalorder %s3544_s23, %s4482_s22 }
 0xa53   : > { %1824 = vadd.xlane.f32.xlu2 %v1823_v15 }
 0xa55   : > { %1830 = vadd.xlane.f32.xlu1 %v1829_v39  ;;  %1827 = vadd.xlane.f32.xlu0 %v1826_v40 }
 0xa5b   : > { %1833 = vadd.xlane.f32.xlu2 %v1832_v31  ;;  %v3406_v31 = vld [vmem:[%s4475_s15] sm:$0xff] }
 0xa5c   : > { %2069 = vmatpush.bf16.msrb.mxu2 %v3406_v31 }
 0xa5d   : > { %1836 = vadd.xlane.f32.xlu0 %v1835_v3  ;;  %v4206_v3 = vld [vmem:[%s713_s21] sm:$0xf]  ;;  %s3545_s21 = scalar_lea.hbm %s3544_s23, 16 }
 0xa5e   : > { %3202 = vmatmul.msk.bf16.vlgmr.msrb.gmra.mxu1 %vm724_vm0, %v4206_v3  ;;  %p3546_p11 = scmp.ne.s32.totalorder %s3544_s23, %s3545_s21  ;;  %p3551_p1 = scmp.lt.s32.totalorder %s3549_s4, %s3545_s21 }
 0xa60   : > { %p3547_p12 = pnand %p3546_p11, %p3750_p5  ;;  %p3552_p2 = por %p3551_p1, %p3550_p0 }
 0xa62   : > { %p3548_p13 = pneg %p3547_p12 }
 0xa64   : > { %p3553_p3 = pnand %p3552_p2, %p3548_p13 }
 0xabe   : > { %v1816_v43 = vpop.xlane.xlu2 %1815 }
 0xabf   : > { %v1846_v45 = vperm.slane %v1816_v43, %v3910_v55  ;;  %v3403_v43 = vld [vmem:[%s4473_s13 + $0x8] sm:$0xff] }
 0xac0   : > { %v1822_v44 = vpop.xlane.xlu1 %1821  ;;  %v1819_v37 = vpop.xlane.xlu0 %1818  ;;  %2007 = vmatpush.bf16.msrb.mxu0 %v3403_v43 }
 0xac1   : > { %v1847_v29 = vperm.slane %v1819_v37, %v3910_v55  ;;  %v1848_v46 = vperm.slane %v1822_v44, %v3910_v55  ;;  %v3409_v44 = vld [vmem:[%s4473_s13 + $0x18] sm:$0xff] }
 0xac3   : > { %v1854_v47 = vsel %vm969_vm8, %v1847_v29, %v1846_v45  ;;  %v3402_v45 = vld [vmem:[%s4473_s13] sm:$0xff] }
 0xac4   : > { %v1855_v50 = vsel %vm971_vm9, %v1848_v46, %v1854_v47  ;;  %v3408_v46 = vld [vmem:[%s4473_s13 + $0x10] sm:$0xff]  ;;  %2008 = vmatpush.bf16.msrb.mxu0 %v3402_v45  ;;  %v2149_v45 = vld [vmem:[%s4476_s16] sm:$0xf] }
 0xac6   : > { %v1825_v36 = vpop.xlane.xlu2 %1824 }
 0xac7   : > { %v1849_v21 = vperm.slane %v1825_v36, %v3910_v55 }
 0xac8   : > { %v1828_v49 = vpop.xlane.xlu0 %1827  ;;  %v1831_v53 = vpop.xlane.xlu1 %1830 }
 0xac9   : > { %v1850_v59 = vperm.slane %v1828_v49, %v3910_v55  ;;  %v1856_v56 = vsel %vm973_vm10, %v1849_v21, %v1855_v50  ;;  %v1851_v57 = vperm.slane %v1831_v53, %v3910_v55  ;;  %vm2126_vm10 = vcmask 60416  }
 0xacb   : > { %v1857_v60 = vsel %vm975_vm11, %v1850_v59, %v1856_v56  ;;  %v3482_v56 = vld [vmem:[%s4520_s25 + $0x2] ss:$0 sm:$0xff] }
 0xacc   : > { %v1858_v63 = vsel %vm977_vm12, %v1851_v57, %v1857_v60  ;;  %v3483_v60 = vld [vmem:[%s4520_s25 + $0x3] ss:$0 sm:$0xff] }
 0xace   : > { %v1834_v62 = vpop.xlane.xlu2 %1833 }
 0xacf   : > { %v1852_v51 = vperm.slane %v1834_v62, %v3910_v55 }
 0xad0   : > { %v1837_v0 = vpop.xlane.xlu0 %1836 }
 0xad1   : > { %v1859_v1 = vsel %vm979_vm13, %v1852_v51, %v1858_v63  ;;  %v1853_v58 = vperm.slane %v1837_v0, %v3910_v55 }
 0xad3   : > { %v1860_v5 = vsel %vm981_vm14, %v1853_v58, %v1859_v1 }
 0xad4   : > { %v1878_v7 = vadd.f32 %v4106_v33, %v1860_v5  ;;  %v1926_v33 = vsel %vm1024_vm7, %v3183_v14, 0 }
 0xad5   : > { %1935 = vmatpush.bf16.msra.mxu3 %v1926_v33  ;;  %v4243_v33 = vld [vmem:[%s716_s5] ss:$0 sm:$0xff] }
 0xad6   : > { %v1883_v8 = vadd.f32 %v3181_v6, %v1878_v7 }
 0xad8   : > { %v1884_v35 = vmul.f32 0.35355338, %v1883_v8 }
 0xada   : > { %v1885_v9 = vadd.f32 %v1884_v35, %v3934_v25 }
 0xadb   : > { %v2042_v5 = vpop.f32.mrf.mxu1 }
 0xadc   : > { %v1886_v11 = vsel %vm867_vm2, %v1885_v9, -inf  ;;  %v2076_v6 = vpack.c.bf16 %v2042_v5, %v2042_v5 }
 0xadd   : > { %1887 = vmax.xlane.f32.xlu1 %v1886_v11 }
 0xade   : > { %v2081_v7 = vsel %vm867_vm2, %v2076_v6, 0 }
 0xadf   : > { %2090 = vmatpush.bf16.xpose.msrb.mxu3 %v2081_v7 }
 0xb50   : > { %v1888_v12 = vpop.xlane.xlu1 %1887 }
 0xb51   : > { %v1889_v13 = vsub.f32 %v1885_v9, %v1888_v12  ;;  %v2044_v9 = vpop.f32.mrf.mxu1 }
 0xb53   : > { %v1890_v48 = vmul.f32 1.442695, %v1889_v13 }
 0xb55   : > { %3505 = vpow2.f32 %v1890_v48 }
 0xb5b   : > { %v3506_v55 = vpop.eup %3505 }
 0xb5c   : > { %v1892_v52 = vsel %vm867_vm2, %v3506_v55, 0.0 }
 0xb5d   : > { %1893 = vadd.xlane.f32.xlu2 %v1892_v52 }
 0xbd0   : > { %v1894_v16 = vpop.xlane.xlu2 %1893 }
 0xbd1   : > { %3507 = vrcp.f32 %v1894_v16 }
 0xbd7   : > { %v3508_v25 = vpop.eup %3507 }
 0xbd8   : > { %v1896_v17 = vmul.f32 %v3508_v25, %v3506_v55 }
 0xbda   : > { %v1898_v18 = vpack.c.bf16 %v1896_v17, %v1896_v17 }
 0xbdc   : > { %3182 = vmatmul.msk.bf16.vlgmr.msra.gmra.mxu2 %vm867_vm2, %v1898_v18 }
 0xbdd   : > { %2199 = vmatpush.bf16.msra.mxu2 %v3409_v44 }
 0xbe1   : > { %2200 = vmatpush.bf16.msra.mxu2 %v3408_v46  ;;  %v3414_v46 = vld [vmem:[%s4473_s13 + $0x20] sm:$0xff] }
 0xbec   : > { %3211 = vmatmul.msk.bf16.vlgmr.msrb.gmra.mxu2 %vm724_vm0, %v4206_v3 }
 0xc5f   : > { %v1915_v19 = vpop.f32.mrf.mxu2 }
 0xc60   : > { %v1921_v20 = vpack.c.bf16 %v1915_v19, %v1915_v19 }
 0xc62   : > { %3184 = vmatmul.msk.bf16.vlgmr.msra.gmra.mxu3 %vm867_vm2, %v1921_v20  ;;  %v3411_v20 = vld [vmem:[%s4474_s14 + $0x18] sm:$0xff] }
 0xc63   : > { %2229 = vmatpush.bf16.msra.mxu3 %v3411_v20 }
 0xc67   : > { %v1917_v23 = vpop.f32.mrf.mxu2 }
 0xc6f   : > { %v2071_v8 = vpop.f32.mrf.mxu2 }
 0xc70   : > { %v2129_v35 = vpack.c.bf16 %v2071_v8, %v2071_v8 }
 0xc72   : > { %v2134_v11 = vsel %vm1024_vm7, %v2129_v35, 0 }
 0xc73   : > { %2143 = vmatpush.bf16.msra.mxu0 %v2134_v11 }
 0xc77   : > { %v2073_v12 = vpop.f32.mrf.mxu2 }
 0xce5   : > { %v1937_v26 = vpop.f32.mrf.mxu3 }
 0xce6   : > { %v1941_v27 = vadd.f32 %v1937_v26, %v1897_v24 }
 0xce8   : > { %1942 = vst.msk [vmem:[#allocation4] sm:$0xff] %vm724_vm0, %v1941_v27 }
 0xced   : > { %v1939_v61 = vpop.f32.mrf.mxu3 }
 0xcee   : > { %v3410_v61 = vld [vmem:[%s4474_s14 + $0x10] sm:$0xff] }
 0xcef   : > { %v1944_v30 = vld [vmem:[#allocation4] sm:$0xff]  ;;  %2230 = vmatpush.bf16.msra.mxu3 %v3410_v61 }
 0xcf0   : > { %v1945_v32 = vadd.f32 %v1944_v30, %v1943_v28  ;;  %1978 = vst.msk [vmem:[#allocation4] sm:$0xff] %vm724_vm0, %v3594_v54  ;;  %v3413_v30 = vld [vmem:[%s4475_s15 + $0x18] sm:$0xff] }
 0xcf2   : > { %1946 = vst.msk [vmem:[#allocation2] sm:$0xff] %vm724_vm0, %v1945_v32  ;;  %v3412_v32 = vld [vmem:[%s4475_s15 + $0x10] sm:$0xff] }
 0xcf7   : > { %v2128_v5 = vld [vmem:[#allocation4] sm:$0xff] }
 0xcf9   : > { %v4182_v34 = vld [vmem:[#allocation2] sm:$0xff] }
 0xcfa   : > { %v1950_v4 = vsel %vm724_vm0, %v4182_v34, 0.0 }
 0xcfb   : > { %1951 = vadd.xlane.f32.xlu0 %v1950_v4 }
 0xd6e   : > { %v1952_v2 = vpop.xlane.xlu0 %1951 }
 0xd6f   : > { %v1953_v15 = vmul.f32 %v1952_v2, %v3772_v10 }
 0xd71   : > { %v1954_v38 = vsub.f32 %v4182_v34, %v1953_v15 }
 0xd73   : > { %v1955_v39 = vmul.f32 %v1954_v38, %v1954_v38 }
 0xd75   : > { %v1956_v40 = vsel %vm724_vm0, %v1955_v39, 0.0 }
 0xd76   : > { %1957 = vadd.xlane.f32.xlu1 %v1956_v40 }
 0xde9   : > { %v1958_v37 = vpop.xlane.xlu1 %1957 }
 0xdea   : > { %v1959_v29 = vmul.f32 %v1958_v37, %v3772_v10  ;;  %v3415_v37 = vld [vmem:[%s4473_s13 + $0x28] sm:$0xff] }
 0xdec   : > { %v1960_v47 = vadd.f32 1e-05, %v1959_v29 }
 0xdee   : > { %3509 = vrsqrt.f32 %v1960_v47  ;;  %vm1967_vm1 = vweird.f32 %v1960_v47 }
 0xdf4   : > { %v3510_v36 = vpop.eup %3509 }
 0xdf5   : > { %v1962_v21 = vmul.f32 %v3510_v36, %v1960_v47  ;;  %vm1968_vm15 = vweird.f32 %v3510_v36  ;;  %v2155_v47 = vsel %vm1024_vm7, %v2149_v45, 0 }
 0xdf6   : > { %vm1969_vm3 = vmor %vm1967_vm1, %vm1968_vm15  ;;  %2164 = vmatpush.bf16.msra.mxu1 %v2155_v47 }
 0xdf7   : > { %v1963_v49 = vmul.f32 %v3510_v36, %v1962_v21 }
 0xdf9   : > { %v1964_v50 = vmul.f32 0.5, %v1963_v49 }
 0xdfb   : > { %v1965_v53 = vsub.f32 1.5, %v1964_v50 }
 0xdfd   : > { %v1966_v59 = vmul.f32 %v3510_v36, %v1965_v53 }
 0xdff   : > { %v1970_v57 = vsel %vm1969_vm3, %v3510_v36, %v1966_v59 }
 0xe00   : > { %v1971_v62 = vmul.f32 %v1970_v57, %v1954_v38 }
 0xe02   : > { %v1973_v51 = vmul.f32 %v3482_v56, %v1971_v62 }
 0xe04   : > { %v1975_v63 = vadd.f32 %v3483_v60, %v1973_v51 }
 0xe06   : > { %v1976_v0 = vpack.c.bf16 %v1975_v63, %v1975_v63 }
 0xe08   : > { %1977 = vst.msk [vmem:[#allocation3] sm:$0xf] %vm763_vm6, %v1976_v0 }
 0xe0f   : > { %v1981_v1 = vld [vmem:[#allocation3] sm:$0xf] }
 0xe10   : > { %v2172_v58 = vld [vmem:[#allocation3] sm:$0xf]  ;;  %3193 = vmatmul.msk.bf16.vlgmr.msrb.gmra.mxu0 %vm724_vm0, %v1981_v1 }
 0xe11   : > { %3227 = vmatmul.msk.bf16.vlgmr.msra.gmra.mxu2 %vm724_vm0, %v2172_v58  ;;  %2259 = vmatpush.bf16.msrb.mxu0 %v3413_v30  ;;  %v2361_v36 = vld [vmem:[#allocation3] sm:$0xf] }
 0xe15   : > { %2260 = vmatpush.bf16.msrb.mxu0 %v3412_v32 }
 0xe8d   : > { %v2010_v13 = vpop.f32.mrf.mxu0 }
 0xe8e   : > { %v2075_v48 = vpack.c.bf16 %v2010_v13, %v2010_v13 }
 0xe90   : > { %3212 = vmatmul.msk.bf16.vlgmr.msrb.gmra.mxu3 %vm867_vm2, %v2075_v48 }
 0xe94   : > { %v4237_v55 = vpop.f32.mrf.mxu2 }
 0xe95   : > { %v2012_v52 = vpop.f32.mrf.mxu0  ;;  %v2266_v62 = vpack.c.bf16 %v4237_v55, %v4237_v55 }
 0xe9c   : > { %v2204_v14 = vpop.f32.mrf.mxu2 }
 0xea0   : > { %3240 = vmatmul.msk.bf16.vlgmr.msra.gmra.mxu3 %vm724_vm0, %v4206_v3 }
 0xf13   : > { %v2092_v16 = vpop.f32.mrf.mxu3 }
 0xf14   : > { %v2096_v25 = vmul.f32 0.35355338, %v2092_v16 }
 0xf16   : > { %v2100_v17 = vadd.f32 %v4243_v33, %v2096_v25  ;;  %v3417_v25 = vld [vmem:[%s4474_s14 + $0x28] sm:$0xff] }
 0xf18   : > { %v2101_v18 = vsel %vm867_vm2, %v2100_v17, -inf }
 0xf19   : > { %2102 = vmax.xlane.f32.xlu2 %v2101_v18  ;;  %v3419_v18 = vld [vmem:[%s4475_s15 + $0x28] sm:$0xff] }
 0xf1b   : > { %v2094_v19 = vpop.f32.mrf.mxu3 }
 0xf1c   : > { %v3418_v19 = vld [vmem:[%s4475_s15 + $0x20] sm:$0xff] }
 0xf23   : > { %v2232_v21 = vpop.f32.mrf.mxu3 }
 0xf24   : > { %v2267_v49 = vpack.c.bf16 %v2232_v21, %v2232_v21 }
 0xf26   : > { %v2272_v50 = vsel %vm867_vm2, %v2267_v49, 0 }
 0xf27   : > { %2281 = vmatpush.bf16.xpose.msrb.mxu1 %v2272_v50 }
 0xf2b   : > { %v2234_v53 = vpop.f32.mrf.mxu3 }
 0xf8c   : > { %v2103_v23 = vpop.xlane.xlu2 %2102 }
 0xf8d   : > { %v2104_v24 = vsub.f32 %v2100_v17, %v2103_v23  ;;  %v3416_v17 = vld [vmem:[%s4474_s14 + $0x20] sm:$0xff] }
 0xf8f   : > { %v2105_v26 = vmul.f32 1.442695, %v2104_v24 }
 0xf91   : > { %3511 = vpow2.f32 %v2105_v26 }
 0xf97   : > { %v3512_v27 = vpop.eup %3511 }
 0xf98   : > { %v2107_v28 = vsel %vm867_vm2, %v3512_v27, 0.0 }
 0xf99   : > { %2108 = vadd.xlane.f32.xlu0 %v2107_v28 }
0x100c   : > { %v2109_v4 = vpop.xlane.xlu0 %2108 }
0x100d   : > { %3513 = vrcp.f32 %v2109_v4  ;;  %v2121_v39 = vand.u32 2147483648, %v2109_v4  ;;  %v2119_v41 = vand.u32 2147483647, %v2109_v4  ;;  %vm2115_vm5 = vweird.f32 %v2109_v4 }
0x100f   : > { %v2122_v22 = vor.u32 1.1754944e-38, %v2121_v39  ;;  %vm2120_vm9 = vcmp.eq.f32.partialorder %v2119_v41, 8.507059e+37  ;;  %v3420_v41 = vld [vmem:[%s4473_s13 + $0x30] sm:$0xff] }
0x1013   : > { %v3514_v2 = vpop.eup %3513 }
0x1014   : > { %v2111_v15 = vmul.f32 %v3514_v2, %v2109_v4  ;;  %vm2116_vm4 = vweird.f32 %v3514_v2 }
0x1015   : > { %vm2117_vm8 = vmor %vm2115_vm5, %vm2116_vm4 }
0x1016   : > { %v2112_v38 = vsub.f32 1.0, %v2111_v15 }
0x1018   : > { %v2113_v40 = vmul.f32 %v3514_v2, %v2112_v38  ;;  %v3421_v38 = vld [vmem:[%s4473_s13 + $0x38] sm:$0xff] }
0x101a   : > { %v2114_v42 = vadd.f32 %v3514_v2, %v2113_v40  ;;  %v3257_v40 = vld [vmem:[%s4476_s16 + $0x4] sm:$0xf] }
0x101c   : > { %v2118_v31 = vsel %vm2117_vm8, %v3514_v2, %v2114_v42  ;;  %v2344_v42 = vsel %vm1024_vm7, %v3257_v40, 0 }
0x101d   : > { %v2123_v43 = vsel %vm2120_vm9, %v2122_v22, %v2118_v31  ;;  %2353 = vmatpush.bf16.msrb.mxu3 %v2344_v42  ;;  %v2550_v22 = vld [vmem:[#allocation3] sm:$0xf] }
0x101e   : > { %v2124_v44 = vmul.f32 %v3512_v27, %v2123_v43 }
0x1020   : > { %v2125_v29 = vpack.c.bf16 %v2124_v44, %v2124_v44 }
0x1022   : > { %2127 = vst.msk [vmem:[%s4268_s7] sm:$0xf] %vm2126_vm10, %v2125_v29  ;;  %3213 = vmatmul.msk.bf16.vlgmr.msra.gmra.mxu0 %vm867_vm2, %v2125_v29 }
0x1023   : > { %2388 = vmatpush.bf16.msra.mxu0 %v3415_v37 }
0x1027   : > { %2389 = vmatpush.bf16.msra.mxu0 %v3414_v46 }
0x1032   : > { %3253 = vmatmul.msk.bf16.vlgmr.msrb.gmra.mxu0 %vm724_vm0, %v4206_v3 }
0x1042   : > { %3271 = vmatmul.msk.bf16.vlgmr.msra.gmra.mxu0 %vm724_vm0, %v2361_v36 }
0x109f   : > { %v2145_v59 = vpop.f32.mrf.mxu0 }
0x10a0   : > { %v2150_v56 = vpack.c.bf16 %v2145_v59, %v2145_v59 }
0x10a2   : > { %3214 = vmatmul.msk.bf16.vlgmr.msra.gmra.mxu1 %vm867_vm2, %v2150_v56 }
0x10a3   : > { %2418 = vmatpush.bf16.msra.mxu1 %v3417_v25 }
0x10a7   : > { %v2147_v57 = vpop.f32.mrf.mxu0  ;;  %2419 = vmatpush.bf16.msra.mxu1 %v3416_v17 }
0x10af   : > { %v2262_v60 = vpop.f32.mrf.mxu0 }
0x10b0   : > { %v2317_v51 = vpack.c.bf16 %v2262_v60, %v2262_v60 }
0x10b2   : > { %v2322_v63 = vsel %vm1024_vm7, %v2317_v51, 0  ;;  %3254 = vmatmul.msk.bf16.vlgmr.msrb.gmra.mxu1 %vm867_vm2, %v2266_v62 }
0x10b3   : > { %2331 = vmatpush.bf16.msrb.mxu2 %v2322_v63 }
0x10b7   : > { %v2264_v0 = vpop.f32.mrf.mxu0  ;;  %2448 = vmatpush.bf16.msra.mxu2 %v3419_v18 }
0x10bb   : > { %2449 = vmatpush.bf16.msra.mxu2 %v3418_v19 }
0x10bf   : > { %v4289_v1 = vpop.f32.mrf.mxu0 }
0x10c0   : > { %v2455_v36 = vpack.c.bf16 %v4289_v1, %v4289_v1 }
0x10c2   : > { %3284 = vmatmul.msk.bf16.vlgmr.msra.gmra.mxu1 %vm724_vm0, %v4206_v3 }
0x10c7   : > { %v2393_v58 = vpop.f32.mrf.mxu0 }
0x111f   : > { %v2166_v6 = vpop.f32.mrf.mxu1 }
0x1120   : > { %v2170_v7 = vadd.f32 %v2166_v6, %v2128_v5  ;;  %v3423_v5 = vld [vmem:[%s4474_s14 + $0x38] sm:$0xff] }
0x1122   : > { %2171 = vst.msk [vmem:[#allocation4] sm:$0xff] %vm724_vm0, %v2170_v7 }
0x1127   : > { %v2168_v8 = vpop.f32.mrf.mxu1 }
0x1129   : > { %v2316_v56 = vld [vmem:[#allocation4] sm:$0xff] }
0x112f   : > { %v2283_v35 = vpop.f32.mrf.mxu1 }
0x1130   : > { %v2287_v9 = vmul.f32 0.35355338, %v2283_v35 }
0x1132   : > { %v2288_v11 = vadd.f32 %v4243_v33, %v2287_v9 }
0x1134   : > { %v2289_v12 = vsel %vm867_vm2, %v2288_v11, -inf }
0x1135   : > { %2290 = vmax.xlane.f32.xlu1 %v2289_v12  ;;  %v3301_v12 = vld [vmem:[%s4476_s16 + $0x8] sm:$0xf] }
0x1137   : > { %v2285_v13 = vpop.f32.mrf.mxu1 }
0x1138   : > { %v2533_v13 = vsel %vm1024_vm7, %v3301_v12, 0 }
0x1139   : > { %2542 = vmatpush.bf16.msrb.mxu1 %v2533_v13 }
0x113f   : > { %v2421_v31 = vpop.f32.mrf.mxu1 }
0x1140   : > { %v2456_v43 = vpack.c.bf16 %v2421_v31, %v2421_v31 }
0x1142   : > { %v2461_v44 = vsel %vm867_vm2, %v2456_v43, 0 }
0x1143   : > { %2470 = vmatpush.bf16.xpose.msra.mxu3 %v2461_v44 }
0x1147   : > { %v2423_v37 = vpop.f32.mrf.mxu1 }
0x11a8   : > { %v2291_v48 = vpop.xlane.xlu1 %2290 }
0x11a9   : > { %v2292_v55 = vsub.f32 %v2288_v11, %v2291_v48  ;;  %v3422_v11 = vld [vmem:[%s4474_s14 + $0x30] sm:$0xff] }
0x11ab   : > { %v2293_v52 = vmul.f32 1.442695, %v2292_v55 }
0x11ad   : > { %3515 = vpow2.f32 %v2293_v52 }
0x11b3   : > { %v3516_v14 = vpop.eup %3515 }
0x11b4   : > { %v2295_v16 = vsel %vm867_vm2, %v3516_v14, 0.0 }
0x11b5   : > { %2296 = vadd.xlane.f32.xlu2 %v2295_v16 }
0x1228   : > { %v2297_v20 = vpop.xlane.xlu2 %2296 }
0x1229   : > { %3517 = vrcp.f32 %v2297_v20  ;;  %v2309_v27 = vand.u32 2147483648, %v2297_v20  ;;  %v2307_v61 = vand.u32 2147483647, %v2297_v20  ;;  %vm2303_vm12 = vweird.f32 %v2297_v20 }
0x122b   : > { %v2310_v32 = vor.u32 1.1754944e-38, %v2309_v27  ;;  %vm2308_vm14 = vcmp.eq.f32.partialorder %v2307_v61, 8.507059e+37 }
0x122f   : > { %v3518_v23 = vpop.eup %3517 }
0x1230   : > { %v2299_v24 = vmul.f32 %v3518_v23, %v2297_v20  ;;  %vm2304_vm11 = vweird.f32 %v3518_v23 }
0x1231   : > { %vm2305_vm13 = vmor %vm2303_vm12, %vm2304_vm11  ;;  %vm2847_vm12 = vcmask 523264  }
0x1232   : > { %v2300_v26 = vsub.f32 1.0, %v2299_v24 }
0x1234   : > { %v2301_v28 = vmul.f32 %v3518_v23, %v2300_v26 }
0x1236   : > { %v2302_v30 = vadd.f32 %v3518_v23, %v2301_v28 }
0x1238   : > { %v2306_v4 = vsel %vm2305_vm13, %v3518_v23, %v2302_v30 }
0x1239   : > { %v2311_v2 = vsel %vm2308_vm14, %v2310_v32, %v2306_v4 }
0x123a   : > { %v2312_v15 = vmul.f32 %v3516_v14, %v2311_v2 }
0x123c   : > { %v2313_v39 = vpack.c.bf16 %v2312_v15, %v2312_v15 }
0x123e   : > { %3255 = vst.msk [vmem:[%s4268_s7 + $0x4] sm:$0xf] %vm2126_vm10, %v2313_v39  ;;  %3256 = vmatmul.msk.bf16.vlgmr.msrb.gmra.mxu2 %vm867_vm2, %v2313_v39  ;;  %v3424_v39 = vld [vmem:[%s4475_s15 + $0x30] sm:$0xff] }
0x123f   : > { %2577 = vmatpush.bf16.msrb.mxu2 %v3421_v38  ;;  %v3425_v38 = vld [vmem:[%s4475_s15 + $0x38] sm:$0xff] }
0x1243   : > { %2578 = vmatpush.bf16.msrb.mxu2 %v3420_v41 }
0x124e   : > { %3297 = vmatmul.msk.bf16.vlgmr.msra.gmra.mxu2 %vm724_vm0, %v4206_v3 }
0x125e   : > { %3315 = vmatmul.msk.bf16.vlgmr.msrb.gmra.mxu2 %vm724_vm0, %v2550_v22 }
0x12c1   : > { %v2333_v29 = vpop.f32.mrf.mxu2 }
0x12c2   : > { %v2339_v45 = vpack.c.bf16 %v2333_v29, %v2333_v29 }
0x12c4   : > { %3258 = vmatmul.msk.bf16.vlgmr.msrb.gmra.mxu3 %vm867_vm2, %v2339_v45 }
0x12c5   : > { %2607 = vmatpush.bf16.msrb.mxu3 %v3423_v5 }
0x12c9   : > { %v2335_v46 = vpop.f32.mrf.mxu2  ;;  %2608 = vmatpush.bf16.msrb.mxu3 %v3422_v11 }
0x12d1   : > { %v2451_v47 = vpop.f32.mrf.mxu2 }
0x12d2   : > { %v2506_v21 = vpack.c.bf16 %v2451_v47, %v2451_v47 }
0x12d4   : > { %v2511_v49 = vsel %vm1024_vm7, %v2506_v21, 0  ;;  %3298 = vmatmul.msk.bf16.vlgmr.msra.gmra.mxu3 %vm867_vm2, %v2455_v36 }
0x12d5   : > { %2520 = vmatpush.bf16.msrb.mxu0 %v2511_v49 }
0x12d9   : > { %v2453_v50 = vpop.f32.mrf.mxu2  ;;  %2637 = vmatpush.bf16.msra.mxu0 %v3425_v38 }
0x12dd   : > { %2638 = vmatpush.bf16.msra.mxu0 %v3424_v39  ;;  %v3485_v39 = vld [vmem:[%s4520_s25 + $0x4] ss:$0 sm:$0xff] }
0x12e1   : > { %v2580_v53 = vpop.f32.mrf.mxu2 }
0x12e2   : > { %v2644_v15 = vpack.c.bf16 %v2580_v53, %v2580_v53 }
0x12e4   : > { %3328 = vmatmul.msk.bf16.vlgmr.msrb.gmra.mxu3 %vm724_vm0, %v4206_v3 }
0x12e9   : > { %v2582_v59 = vpop.f32.mrf.mxu2 }
0x1347   : > { %v2355_v57 = vpop.f32.mrf.mxu3 }
0x1348   : > { %v2359_v60 = vadd.f32 %v2355_v57, %v2316_v56 }
0x134a   : > { %2360 = vst.msk [vmem:[#allocation4] sm:$0xff] %vm724_vm0, %v2359_v60 }
0x134f   : > { %v2357_v62 = vpop.f32.mrf.mxu3 }
0x1351   : > { %v2505_v40 = vld [vmem:[#allocation4] sm:$0xff] }
0x1357   : > { %v2472_v51 = vpop.f32.mrf.mxu3 }
0x1358   : > { %v2476_v63 = vmul.f32 0.35355338, %v2472_v51 }
0x135a   : > { %v2477_v0 = vadd.f32 %v4243_v33, %v2476_v63 }
0x135c   : > { %v2478_v1 = vsel %vm867_vm2, %v2477_v0, -inf }
0x135d   : > { %2479 = vmax.xlane.f32.xlu0 %v2478_v1 }
0x135f   : > { %v2474_v58 = vpop.f32.mrf.mxu3 }
0x1367   : > { %v2610_v27 = vpop.f32.mrf.mxu3 }
0x1368   : > { %v2645_v28 = vpack.c.bf16 %v2610_v27, %v2610_v27 }
0x136a   : > { %v2650_v61 = vsel %vm867_vm2, %v2645_v28, 0  ;;  %v3431_v28 = vld [vmem:[%s4479_s19 + $0x18] sm:$0xff] }
0x136b   : > { %2659 = vmatpush.bf16.xpose.msra.mxu1 %v2650_v61  ;;  %v3430_v61 = vld [vmem:[%s4479_s19 + $0x10] sm:$0xff] }
0x136f   : > { %v2612_v30 = vpop.f32.mrf.mxu3 }
0x13d0   : > { %v2480_v6 = vpop.xlane.xlu0 %2479 }
0x13d1   : > { %v2481_v7 = vsub.f32 %v2477_v0, %v2480_v6 }
0x13d3   : > { %v2482_v8 = vmul.f32 1.442695, %v2481_v7 }
0x13d5   : > { %3519 = vpow2.f32 %v2482_v8 }
0x13db   : > { %v3520_v35 = vpop.eup %3519 }
0x13dc   : > { %v2484_v9 = vsel %vm867_vm2, %v3520_v35, 0.0 }
0x13dd   : > { %2485 = vadd.xlane.f32.xlu1 %v2484_v9 }
0x1450   : > { %v2486_v48 = vpop.xlane.xlu1 %2485 }
0x1451   : > { %3521 = vrcp.f32 %v2486_v48  ;;  %v2498_v16 = vand.u32 2147483648, %v2486_v48  ;;  %v2496_v17 = vand.u32 2147483647, %v2486_v48  ;;  %vm2492_vm1 = vweird.f32 %v2486_v48 }
0x1453   : > { %v2499_v19 = vor.u32 1.1754944e-38, %v2498_v16  ;;  %vm2497_vm4 = vcmp.eq.f32.partialorder %v2496_v17, 8.507059e+37 }
0x1457   : > { %v3522_v55 = vpop.eup %3521 }
0x1458   : > { %v2488_v52 = vmul.f32 %v3522_v55, %v2486_v48  ;;  %vm2493_vm15 = vweird.f32 %v3522_v55 }
0x1459   : > { %vm2494_vm3 = vmor %vm2492_vm1, %vm2493_vm15 }
0x145a   : > { %v2489_v14 = vsub.f32 1.0, %v2488_v52 }
0x145c   : > { %v2490_v25 = vmul.f32 %v3522_v55, %v2489_v14 }
0x145e   : > { %v2491_v18 = vadd.f32 %v3522_v55, %v2490_v25 }
0x1460   : > { %v2495_v20 = vsel %vm2494_vm3, %v3522_v55, %v2491_v18 }
0x1461   : > { %v2500_v23 = vsel %vm2497_vm4, %v2499_v19, %v2495_v20 }
0x1462   : > { %v2501_v24 = vmul.f32 %v3520_v35, %v2500_v23 }
0x1464   : > { %v2502_v26 = vpack.c.bf16 %v2501_v24, %v2501_v24 }
0x1466   : > { %3299 = vst.msk [vmem:[%s4268_s7 + $0x8] sm:$0xf] %vm2126_vm10, %v2502_v26  ;;  %3300 = vmatmul.msk.bf16.vlgmr.msrb.gmra.mxu0 %vm867_vm2, %v2502_v26  ;;  %v3426_v26 = vld [vmem:[%s4477_s17] sm:$0xff] }
0x1476   : > { %3341 = vmatmul.msk.bf16.vlgmr.msra.gmra.mxu0 %vm724_vm0, %v4206_v3 }
0x14e3   : > { %v2522_v32 = vpop.f32.mrf.mxu0 }
0x14e4   : > { %v2528_v4 = vpack.c.bf16 %v2522_v32, %v2522_v32 }
0x14e6   : > { %3302 = vmatmul.msk.bf16.vlgmr.msrb.gmra.mxu1 %vm867_vm2, %v2528_v4 }
0x14e7   : > { %2855 = vmatpush.bf16.msrb.mxu1 %v3431_v28 }
0x14eb   : > { %v2524_v2 = vpop.f32.mrf.mxu0  ;;  %2856 = vmatpush.bf16.msrb.mxu1 %v3430_v61 }
0x14f3   : > { %v2640_v45 = vpop.f32.mrf.mxu0 }
0x14f4   : > { %v2695_v46 = vpack.c.bf16 %v2640_v45, %v2640_v45 }
0x14f6   : > { %3342 = vmatmul.msk.bf16.vlgmr.msra.gmra.mxu1 %vm867_vm2, %v2644_v15  ;;  %v2700_v47 = vsel %vm1024_vm7, %v2695_v46, 0 }
0x14f7   : > { %2709 = vmatpush.bf16.msra.mxu2 %v2700_v47 }
0x14fb   : > { %v2642_v36 = vpop.f32.mrf.mxu0 }
0x1563   : > { %v2544_v41 = vpop.f32.mrf.mxu1 }
0x1564   : > { %v2548_v42 = vadd.f32 %v2544_v41, %v2505_v40  ;;  %v3486_v41 = vld [vmem:[%s4520_s25 + $0x5] ss:$0 sm:$0xff] }
0x1566   : > { %2549 = vst.msk [vmem:[#allocation4] sm:$0xff] %vm724_vm0, %v2548_v42 }
0x156b   : > { %v2546_v22 = vpop.f32.mrf.mxu1 }
0x156d   : > { %v2694_v12 = vld [vmem:[#allocation4] sm:$0xff] }
0x1573   : > { %v2661_v31 = vpop.f32.mrf.mxu1 }
0x1574   : > { %v2665_v43 = vmul.f32 0.35355338, %v2661_v31 }
0x1576   : > { %v2666_v44 = vadd.f32 %v4243_v33, %v2665_v43  ;;  %v3345_v33 = vld [vmem:[%s4476_s16 + $0xc] sm:$0xf] }
0x1577   : > { %v2722_v59 = vsel %vm1024_vm7, %v3345_v33, 0 }
0x1578   : > { %v2667_v37 = vsel %vm867_vm2, %v2666_v44, -inf  ;;  %2731 = vmatpush.bf16.msra.mxu3 %v2722_v59 }
0x1579   : > { %2668 = vmax.xlane.f32.xlu2 %v2667_v37  ;;  %v3428_v37 = vld [vmem:[%s4479_s19] sm:$0xff] }
0x157b   : > { %v2663_v29 = vpop.f32.mrf.mxu1 }
0x157c   : > { %v3487_v29 = vld [vmem:[%s4478_s18] ss:$0 sm:$0xff] }
0x15ec   : > { %v2669_v21 = vpop.xlane.xlu2 %2668 }
0x15ed   : > { %v2670_v49 = vsub.f32 %v2666_v44, %v2669_v21 }
0x15ef   : > { %v2671_v3 = vmul.f32 1.442695, %v2670_v49 }
0x15f1   : > { %3523 = vpow2.f32 %v2671_v3 }
0x15f7   : > { %v3524_v50 = vpop.eup %3523 }
0x15f8   : > { %v2673_v53 = vsel %vm867_vm2, %v3524_v50, 0.0 }
0x15f9   : > { %2674 = vadd.xlane.f32.xlu0 %v2673_v53 }
0x166c   : > { %v2675_v56 = vpop.xlane.xlu0 %2674 }
0x166d   : > { %3525 = vrcp.f32 %v2675_v56  ;;  %v2687_v51 = vand.u32 2147483648, %v2675_v56  ;;  %v2685_v0 = vand.u32 2147483647, %v2675_v56  ;;  %vm2681_vm8 = vweird.f32 %v2675_v56 }
0x166f   : > { %v2688_v58 = vor.u32 1.1754944e-38, %v2687_v51  ;;  %vm2686_vm11 = vcmp.eq.f32.partialorder %v2685_v0, 8.507059e+37 }
0x1673   : > { %v3526_v57 = vpop.eup %3525 }
0x1674   : > { %v2677_v60 = vmul.f32 %v3526_v57, %v2675_v56  ;;  %vm2682_vm5 = vweird.f32 %v3526_v57 }
0x1675   : > { %vm2683_vm9 = vmor %vm2681_vm8, %vm2682_vm5 }
0x1676   : > { %v2678_v62 = vsub.f32 1.0, %v2677_v60 }
0x1678   : > { %v2679_v63 = vmul.f32 %v3526_v57, %v2678_v62 }
0x167a   : > { %v2680_v1 = vadd.f32 %v3526_v57, %v2679_v63 }
0x167c   : > { %v2684_v5 = vsel %vm2683_vm9, %v3526_v57, %v2680_v1 }
0x167d   : > { %v2689_v6 = vsel %vm2686_vm11, %v2688_v58, %v2684_v5 }
0x167e   : > { %v2690_v7 = vmul.f32 %v3524_v50, %v2689_v6 }
0x1680   : > { %v2691_v8 = vpack.c.bf16 %v2690_v7, %v2690_v7 }
0x1682   : > { %3343 = vst.msk [vmem:[%s4268_s7 + $0xc] sm:$0xf] %vm2126_vm10, %v2691_v8  ;;  %3344 = vmatmul.msk.bf16.vlgmr.msra.gmra.mxu2 %vm867_vm2, %v2691_v8 }
0x1705   : > { %v2711_v35 = vpop.f32.mrf.mxu2 }
0x1706   : > { %v2717_v9 = vpack.c.bf16 %v2711_v35, %v2711_v35 }
0x1708   : > { %3346 = vmatmul.msk.bf16.vlgmr.msra.gmra.mxu3 %vm867_vm2, %v2717_v9 }
0x170d   : > { %v2713_v11 = vpop.f32.mrf.mxu2 }
0x178b   : > { %v2733_v13 = vpop.f32.mrf.mxu3 }
0x178c   : > { %v2737_v48 = vadd.f32 %v2733_v13, %v2694_v12 }
0x178e   : > { %2738 = vst.msk [vmem:[#allocation4] sm:$0xff] %vm724_vm0, %v2737_v48 }
0x1793   : > { %v2735_v55 = vpop.f32.mrf.mxu3 }
0x1795   : > { %v2740_v52 = vld [vmem:[#allocation4] sm:$0xff] }
0x1796   : > { %v2741_v14 = vadd.f32 %v2740_v52, %v4182_v34  ;;  %2774 = vst.msk [vmem:[#allocation4] sm:$0xff] %vm724_vm0, %v3594_v54  ;;  %v3427_v54 = vld [vmem:[%s4477_s17 + $0x8] sm:$0xff] }
0x1797   : > { %2805 = vmatpush.bf16.msrb.mxu0 %v3427_v54 }
0x1798   : > { %2742 = vst.msk [vmem:[#allocation2] sm:$0xff] %vm724_vm0, %v2741_v14 }
0x179b   : > { %2806 = vmatpush.bf16.msrb.mxu0 %v3426_v26 }
0x179f   : > { %v4379_v16 = vld [vmem:[#allocation2] sm:$0xff] }
0x17a0   : > { %v2746_v25 = vsel %vm724_vm0, %v4379_v16, 0.0 }
0x17a1   : > { %2747 = vadd.xlane.f32.xlu1 %v2746_v25 }
0x1814   : > { %v2748_v17 = vpop.xlane.xlu1 %2747 }
0x1815   : > { %v2749_v18 = vmul.f32 %v2748_v17, %v3772_v10 }
0x1817   : > { %v2750_v19 = vsub.f32 %v4379_v16, %v2749_v18 }
0x1819   : > { %v2751_v20 = vmul.f32 %v2750_v19, %v2750_v19 }
0x181b   : > { %v2752_v23 = vsel %vm724_vm0, %v2751_v20, 0.0 }
0x181c   : > { %2753 = vadd.xlane.f32.xlu2 %v2752_v23 }
0x188f   : > { %v2754_v34 = vpop.xlane.xlu2 %2753 }
0x1890   : > { %v2755_v24 = vmul.f32 %v2754_v34, %v3772_v10  ;;  %v3429_v10 = vld [vmem:[%s4479_s19 + $0x8] sm:$0xff] }
0x1891   : > { %2857 = vmatpush.bf16.msrb.mxu1 %v3429_v10 }
0x1892   : > { %v2756_v27 = vadd.f32 1e-05, %v2755_v24 }
0x1894   : > { %3527 = vrsqrt.f32 %v2756_v27  ;;  %vm2763_vm7 = vweird.f32 %v2756_v27 }
0x1895   : > { %2858 = vmatpush.bf16.msrb.mxu1 %v3428_v37 }
0x189a   : > { %v3528_v30 = vpop.eup %3527 }
0x189b   : > { %v2758_v32 = vmul.f32 %v3528_v30, %v2756_v27  ;;  %vm2764_vm2 = vweird.f32 %v3528_v30 }
0x189c   : > { %vm2765_vm10 = vmor %vm2763_vm7, %vm2764_vm2 }
0x189d   : > { %v2759_v4 = vmul.f32 %v3528_v30, %v2758_v32 }
0x189f   : > { %v2760_v2 = vmul.f32 0.5, %v2759_v4 }
0x18a1   : > { %v2761_v15 = vsub.f32 1.5, %v2760_v2 }
0x18a3   : > { %v2762_v38 = vmul.f32 %v3528_v30, %v2761_v15 }
0x18a5   : > { %v2766_v40 = vsel %vm2765_vm10, %v3528_v30, %v2762_v38 }
0x18a6   : > { %v2767_v42 = vmul.f32 %v2766_v40, %v2750_v19 }
0x18a8   : > { %v2769_v22 = vmul.f32 %v3485_v39, %v2767_v42 }
0x18aa   : > { %v2771_v31 = vadd.f32 %v3486_v41, %v2769_v22 }
0x18ac   : > { %v2772_v43 = vpack.c.bf16 %v2771_v31, %v2771_v31 }
0x18ae   : > { %2773 = vst.msk [vmem:[#allocation3] sm:$0xf] %vm763_vm6, %v2772_v43 }
0x18b5   : > { %v2775_v44 = vld [vmem:[#allocation3] sm:$0xf] }
0x18b6   : > { %3355 = vmatmul.msk.bf16.vlgmr.msrb.gmra.mxu0 %vm724_vm0, %v2775_v44 }
0x1933   : > { %v2808_v45 = vpop.f32.mrf.mxu0 }
0x1934   : > { %v2809_v46 = vadd.f32 %v3487_v29, %v2808_v45 }
0x1936   : > { %v2812_v47 = vmax.f32 %v2809_v46, 0.0 }
0x1938   : > { %v2822_v36 = vpack.c.bf16 %v2812_v47, %v2812_v47 }
0x193a   : > { %3372 = vmatmul.msk.bf16.vlgmr.msrb.gmra.mxu1 %vm2847_vm12, %v2822_v36 }
0x193b   : > { %v2810_v21 = vpop.f32.mrf.mxu0 }
0x193c   : > { %3556 = shalt.err (!%p3553_p3)
}
0x193d   : > { %s3595_s3 = smov 64   ;;  %s3596_s7 = smov 4   ;;  %v2813_v49 = vld [vmem:[#allocation4] sm:$0xff]  ;;  %v3488_v33 = vld [vmem:[%s4480_s20] ss:$0 sm:$0xff] }
0x193e   : > { %3433 = dma.vmem_to_hbm [thread:$0]  (%p3750_p5), %s2896_s2, 256, %s2898_s27, %s2880_s29, %s3595_s3, %s3595_s3, %s3596_s7  }
0x193f   : > { %s3012_s9 = sshll.u32 %s3762_s26, 3  ;;  %s4527_s23 = sld [smem:[#allocation25_spill]] }
0x1945   : > { %s720_s21 = scalar_lea.vmem %s4527_s23, %s3012_s9 }
0x19b7   : > { %v2860_v3 = vpop.f32.mrf.mxu1 }
0x19b8   : > { %v2864_v50 = vadd.f32 %v2860_v3, %v2813_v49 }
0x19ba   : > { %2865 = vst.msk [vmem:[#allocation4] sm:$0xff] %vm724_vm0, %v2864_v50 }
0x19bf   : > { %v2862_v53 = vpop.f32.mrf.mxu1 }
0x19c1   : > { %v2867_v59 = vld [vmem:[#allocation4] sm:$0xff] }
0x19c2   : > { %v2868_v56 = vadd.f32 %v2867_v59, %v4379_v16 }
0x19c4   : > { %v2873_v57 = vadd.f32 %v3488_v33, %v2868_v56 }
0x19c6   : > { %2874 = vst.msk [vmem:[%s720_s21] sm:$0xff] %vm724_vm0, %v2873_v57 }
0x19c7 PF: > { %s4528_s6 = sld [smem:[#allocation10_spill]] }
0x19c8   : > { %s4529_s2 = sld [smem:[#allocation8_spill]] }
0x19cd   : > { %p3439_p4 = scmp.ge.s32.totalorder %s4528_s6, 2 }
0x19ce   : > { %s2919_s26 = sand.u32 1, %s4529_s2  }
0x19cf   : > { %p3436_p5 = pnand %p3439_p4, %p3754_p6  ;;  %s2920_s29 = scalar_lea.sflag [#allocation6], %s2919_s26 }
0x19d1   : > { %p3437_p7 = pneg %p3436_p5 }
0x19d3   : > { %3574 = dma.done.wait (%p3437_p7), %s2920_s29, 256  }
0x19d4   : > { %3576 = vsyncadd (%p3437_p7), %s2920_s29, 4294967040  ;;  %s4531_s30 = sld [smem:[#allocation11_spill]]  ;;  %s4534_s3 = smov %s3583_s28 }
0x19d5   : > { %s4532_s4 = sld [smem:[#allocation9_spill]] }
0x19d6   : > { %s4533_s29 = sld [smem:[#allocation12_spill]] }
0x19da   : > { %p33_p8 = scmp.ge.s32.totalorder %s4531_s30, 4  }
0x19db   : > { %s4535_s28 = smov %s4532_s4 }
0x19dc   :  { %35 = sbr.rel (!%p33_p8) target bundleno = 16 (0x10), region = 193 }
0x19e1   :  { %2926 = vsyncpa [#allocation6], 1 }
0x19e2   :  { %2928 = vsyncpa [#allocation6 + $0x1], 1 }

// kernel: decoder_layer_forward.1
= control target key start
LH: loop header
LB: loop body
LE: loop exit
PB: predicated region body
PF: predicated region fallthrough
CT: control target
= control target key end

     0   :  { %s4460_s0 = inlined_call_operand.vmem [shape: bf16[2,8,32], index: 0, kind: input, shape index: {}]   ;;  %s4461_s1 = inlined_call_operand.vmem [shape: bf16[2,8,32], index: 1, kind: input, shape index: {}]   ;;  %s4462_s2 = inlined_call_operand.vmem [shape: f32[8,8], index: 2, kind: input, shape index: {}]   ;;  %s4463_s3 = inlined_call_operand.vmem [shape: f32[2,1,8], index: 3, kind: input, shape index: {}]   ;;  %s4464_s4 = inlined_call_operand.vmem [shape: f32[6,32], index: 4, kind: input, shape index: {}]   ;;  %s4465_s5 = inlined_call_operand.vmem [shape: bf16[4,32,8], index: 5, kind: input, shape index: {}]   ;;  %s4466_s6 = inlined_call_operand.vmem [shape: bf16[4,32,8], index: 6, kind: input, shape index: {}]   ;;  %s4467_s7 = inlined_call_operand.vmem [shape: bf16[4,32,8], index: 7, kind: input, shape index: {}]   ;;  %s4468_s8 = inlined_call_operand.vmem [shape: bf16[4,8,32], index: 8, kind: input, shape index: {}]   ;;  %s4469_s9 = inlined_call_operand.vmem [shape: f32[4,1,8], index: 9, kind: input, shape index: {}]   ;;  %s4470_s10 = inlined_call_operand.vmem [shape: bf16[4,8,8], index: 10, kind: input, shape index: {}]   ;;  %s4471_s11 = inlined_call_operand.vmem [shape: f32[4,8,8], index: 11, kind: input, shape index: {}]   ;;  %s4472_s12 = inlined_call_operand.vmem [shape: f32[8,8,8], index: 12, kind: input, shape index: {}]   ;;  %s4473_s13 = inlined_call_operand.vmem [shape: bf16[4,32,8], index: 13, kind: input, shape index: {}]   ;;  %s4474_s14 = inlined_call_operand.vmem [shape: bf16[4,32,8], index: 14, kind: input, shape index: {}]   ;;  %s4475_s15 = inlined_call_operand.vmem [shape: bf16[4,32,8], index: 15, kind: input, shape index: {}]   ;;  %s4476_s16 = inlined_call_operand.vmem [shape: bf16[4,8,32], index: 16, kind: input, shape index: {}]   ;;  %s4477_s17 = inlined_call_operand.vmem [shape: bf16[32,64], index: 17, kind: input, shape index: {}]   ;;  %s4478_s18 = inlined_call_operand.vmem [shape: f32[1,64], index: 18, kind: input, shape index: {}]   ;;  %s4479_s19 = inlined_call_operand.vmem [shape: bf16[64,32], index: 19, kind: input, shape index: {}]   ;;  %s4480_s20 = inlined_call_operand.vmem [shape: f32[1,32], index: 20, kind: input, shape index: {}]   ;;  %s4481_s21 = inlined_call_operand.vmem [shape: f32[2,8,32], index: 21, kind: output, shape index: {0}]   ;;  %s4482_s22 = inlined_call_operand.hbm [shape: bf16[2,4,8,8], index: 22, kind: output, shape index: {1}]  }
   0x1   :  { %4494 = sst [smem:[#allocation14_spill]] %s4460_s0 }
   0x2   :  { %4495 = sst [smem:[#allocation15_spill]] %s4461_s1 }
   0x3   :  { %4496 = sst [smem:[#allocation16_spill]] %s4462_s2 }
   0x4   :  { %4497 = sst [smem:[#allocation17_spill]] %s4463_s3 }
   0x5   :  { %4498 = sst [smem:[#allocation18_spill]] %s4464_s4 }
   0x6   :  { %4499 = sst [smem:[#allocation19_spill]] %s4465_s5 }
   0x7   :  { %4500 = sst [smem:[#allocation20_spill]] %s4466_s6 }
   0x8   :  { %4501 = sst [smem:[#allocation21_spill]] %s4467_s7 }
   0x9   :  { %4502 = sst [smem:[#allocation22_spill]] %s4468_s8 }
   0xa   :  { %4503 = sst [smem:[#allocation23_spill]] %s4469_s9 }
   0xb   :  { %4504 = sst [smem:[#allocation24_spill]] %s4470_s10 }
   0xc   :  { %4505 = sst [smem:[#allocation25_spill]] %s4481_s21 }
   0xd   :  { %28 = vsyncpa [#allocation6], 0 }
   0xe   :  { %30 = vsyncpa [#allocation6 + $0x1], 0  ;;  %s3712_s3 = smov 0   ;;  %s3714_s28 = smov 0  }
   0xf   :  { %s3716_s29 = smov 0   ;;  %s3718_s30 = smov 0  }
  0x10 LB: > { %4506 = sst [smem:[#allocation8_spill]] %s3579_s3  ;;  %s3733_s4 = sadd.s32 4294967295, %s3591_s30   ;;  %s3591_s30 = sphi %s3718_s30, %s4531_s30   ;;  %s3587_s29 = sphi %s3716_s29, %s4533_s29   ;;  %s3583_s28 = sphi %s3714_s28, %s4535_s28   ;;  %s3579_s3 = sphi %s3712_s3, %s4534_s3  }
  0x11   : > { %4507 = sst [smem:[#allocation9_spill]] %s3587_s29  ;;  %s3005_s0 = sadd.s32 4294967294, %s3591_s30  }
  0x12   : > { %4508 = sst [smem:[#allocation10_spill]] %s3591_s30  ;;  %s3737_s23 = sadd.s32 1, %s3591_s30  }
  0x13   : > { %4509 = sst [smem:[#allocation11_spill]] %s3737_s23  ;;  %s525_s1 = sadd.s32 1, %s3587_s29 }
  0x14   : > { %s522_s5 = ssub.s32 %s3591_s30, %s3737_s23  ;;  %p535_p0 = scmp.ne.s32.totalorder %s3587_s29, %s3583_s28 }
  0x15   : > { %p523_p1 = scmp.eq.s32.totalorder %s522_s5, 0  ;;  %p536_p2 = scmp.eq.s32.totalorder %s3733_s4, 1 }
  0x16   : > { %p541_p3 = scmp.ne.s32.totalorder %s3583_s28, %s3579_s3  ;;  %p542_p4 = scmp.eq.s32.totalorder %s3005_s0, 1 }
  0x17   : > { %s3748_s24 = scalar_select %p523_p1, %s3587_s29, %s525_s1  }
  0x18   : > { %p3750_p5 = por %p536_p2, %p535_p0  ;;  %p3754_p6 = por %p542_p4, %p541_p3 }
  0x19   : > { %4510 = sst [smem:[#allocation12_spill]] %s3748_s24  ;;  %p3008_p7 = scmp.ge.s32.totalorder %s3591_s30, 1 }
  0x1a   : > { %s4512_s25 = scalar_select %p3754_p6, 1, 0 }
  0x1b   : > { %p634_p8 = scmp.lt.s32.totalorder %s3591_s30, 3 }
  0x1c   : > { %4513 = sst [smem:[#allocation13_spill]] %s4512_s25 }
  0x1d   : > { %p635_p9 = pnand %p3008_p7, %p634_p8 }
  0x1e   : > { %p706_p10 = scmp.lt.s32.totalorder (!%p635_p9), %s3733_s4, 1  ;;  %s4514_s1 = sld [smem:[#allocation14_spill]] (!%p635_p9) }
  0x1f   : > { %638 = sbr.rel (%p635_p9) target bundleno = 6599 (0x19c7), region = 104  ;;  %s4516_s24 = sld [smem:[#allocation20_spill]] (!%p635_p9) }
  0x20   : > { %s4517_s7 = sld [smem:[#allocation21_spill]] (!%p635_p9)  ;;  %s703_s3 = sand.u32 (!%p635_p9), 1, %s3583_s28  }
  0x21   : > { %s4518_s10 = sld [smem:[#allocation24_spill]] (!%p635_p9)  ;;  %s2880_s29 = scalar_lea.sflag (!%p635_p9), [#allocation6], %s703_s3 }
  0x22   : > { %s4519_s30 = sld [smem:[#allocation18_spill]] (!%p635_p9) }
  0x23   : > { %s4521_s9 = sld [smem:[#allocation23_spill]] (!%p635_p9) }
  0x24   : > { %s3762_s26 = scalar_select %p706_p10, %s3733_s4, 1  ;;  %vm724_vm0 = vcmask 261120   ;;  %v3593_v4 = vmov 32.0   ;;  %vm867_vm2 = vcmask 64512   ;;  %vm763_vm6 = vcmask 257024   ;;  %v3837_v61 = vld [vmem:[%s4472_s12] sm:$0xff] }
  0x25   : > { %3489 = vrcp.f32 %v3593_v4  ;;  %v3381_v17 = vld [vmem:[%s4516_s24 + $0x8] sm:$0xff]  ;;  %v3380_v21 = vld [vmem:[%s4516_s24] sm:$0xff]  ;;  %v3387_v48 = vld [vmem:[%s4516_s24 + $0x18] sm:$0xff]  ;;  %vm1024_vm7 = vcmask 1043456   ;;  %vm969_vm8 = vcmask 1041409   ;;  %vm971_vm9 = vcmask 1042434  }
  0x26   : > { %s4486_s2 = sshll.u32 %s3762_s26, 2  ;;  %v3383_v18 = vld [vmem:[%s4517_s7 + $0x8] sm:$0xff]  ;;  %822 = vmatpush.bf16.msra.mxu1 %v3381_v17  ;;  %v3382_v23 = vld [vmem:[%s4517_s7] sm:$0xff]  ;;  %v3386_v51 = vld [vmem:[%s4516_s24 + $0x10] sm:$0xff]  ;;  %vm973_vm10 = vcmask 1043459   ;;  %vm975_vm11 = vcmask 1044484  }
  0x27   : > { %s709_s5 = scalar_lea.vmem %s4514_s1, %s4486_s2  ;;  %s4515_s1 = sld [smem:[#allocation19_spill]]  ;;  %851 = vmatpush.bf16.msra.mxu2 %v3383_v18  ;;  %v865_v25 = vld [vmem:[%s4518_s10] sm:$0xf]  ;;  %v3849_v4 = vld [vmem:[%s4472_s12 + $0x10] sm:$0xff]  ;;  %vm977_vm12 = vcmask 1045509   ;;  %vm979_vm13 = vcmask 1046534  }
  0x28   : > { %v722_v0 = vld [vmem:[%s709_s5] sm:$0xf]  ;;  %v872_v26 = vsel %vm867_vm2, %v865_v25, 0  ;;  %s4520_s25 = smov %s4519_s30  ;;  %vm981_vm14 = vcmask 1047559   ;;  %s4522_s2 = sld [smem:[#allocation16_spill]] }
  0x29   : > { %v723_v1 = vunpack.c.l.bf16 %v722_v0  ;;  %881 = vmatpush.bf16.xpose.msra.mxu3 %v872_v26  ;;  %v3476_v33 = vld [vmem:[%s4519_s30] ss:$0 sm:$0xff]  ;;  %v3477_v35 = vld [vmem:[%s4520_s25 + $0x1] ss:$0 sm:$0xff]  ;;  %s4523_s8 = sld [smem:[#allocation22_spill]]  ;;  %s4524_s23 = sshll.u32 %s3762_s26, 2 }
  0x2a   : > { %823 = vmatpush.bf16.msra.mxu1 %v3380_v21  ;;  %v3478_v45 = vld [vmem:[%s4521_s9] ss:$0 sm:$0xff]  ;;  %v3865_v21 = vld [vmem:[%s4472_s12 + $0x38] sm:$0xff]  ;;  %s4526_s0 = sld [smem:[#allocation17_spill]]  ;;  %s3009_s30 = sshll.u32 %s703_s3, 4 }
  0x2b   : > { %725 = vst.msk [vmem:[#allocation2] sm:$0xff] %vm724_vm0, %v723_v1  ;;  %v3490_v5 = vpop.eup %3489  ;;  %852 = vmatpush.bf16.msra.mxu2 %v3382_v23 }
  0x2c   : > { %v733_v6 = vmul.f32 32.0, %v3490_v5  ;;  %vm737_vm1 = vweird.f32 %v3490_v5 }
  0x2d   : > { %v3379_v16 = vld [vmem:[%s4515_s1 + $0x8] sm:$0xff]  ;;  %v3378_v20 = vld [vmem:[%s4515_s1] sm:$0xff]  ;;  %v3385_v41 = vld [vmem:[%s4515_s1 + $0x18] sm:$0xff] }
  0x2e   : > { %v734_v7 = vsub.f32 1.0, %v733_v6  ;;  %793 = vmatpush.bf16.msra.mxu0 %v3379_v16  ;;  %v3384_v42 = vld [vmem:[%s4515_s1 + $0x10] sm:$0xff] }
  0x30   : > { %v735_v8 = vmul.f32 %v3490_v5, %v734_v7  ;;  %s716_s5 = scalar_lea.vmem %s4526_s0, %s3762_s26  ;;  %s3432_s0 = sshll.u32 %s3733_s4, 4 }
  0x31   : > { %1091 = vmatpush.bf16.msrb.mxu3 %v3385_v41  ;;  %s3549_s4 = scalar_lea.hbm %s4482_s22, 32 }
  0x32   : > { %v726_v2 = vld [vmem:[#allocation2] sm:$0xff]  ;;  %v736_v9 = vadd.f32 %v3490_v5, %v735_v8  ;;  %794 = vmatpush.bf16.msra.mxu0 %v3378_v20 }
  0x33   : > { %v729_v3 = vsel %vm724_vm0, %v726_v2, 0.0 }
  0x34   : > { %730 = vadd.xlane.f32.xlu0 %v729_v3  ;;  %v3772_v10 = vsel %vm737_vm1, %v3490_v5, %v736_v9  ;;  %v3844_v3 = vld [vmem:[%s4472_s12 + $0x20] sm:$0xff] }
  0x35   : > { %1092 = vmatpush.bf16.msrb.mxu3 %v3384_v42  ;;  %v3393_v42 = vld [vmem:[%s4516_s24 + $0x28] sm:$0xff] }
  0xa7   : > { %v731_v11 = vpop.xlane.xlu0 %730 }
  0xa8   : > { %v739_v12 = vmul.f32 %v3772_v10, %v731_v11 }
  0xaa   : > { %v740_v13 = vsub.f32 %v726_v2, %v739_v12 }
  0xac   : > { %v741_v14 = vmul.f32 %v740_v13, %v740_v13 }
  0xae   : > { %v742_v15 = vsel %vm724_vm0, %v741_v14, 0.0 }
  0xaf   : > { %743 = vadd.xlane.f32.xlu0 %v742_v15  ;;  %v3858_v15 = vld [vmem:[%s4472_s12 + $0x8] sm:$0xff] }
 0x122   : > { %v744_v19 = vpop.xlane.xlu0 %743 }
 0x123   : > { %v745_v22 = vmul.f32 %v744_v19, %v3772_v10 }
 0x125   : > { %v746_v24 = vadd.f32 1e-05, %v745_v22  ;;  %v3870_v22 = vld [vmem:[%s4472_s12 + $0x18] sm:$0xff] }
 0x127   : > { %3491 = vrsqrt.f32 %v746_v24  ;;  %vm753_vm4 = vweird.f32 %v746_v24 }
 0x12d   : > { %v3492_v27 = vpop.eup %3491 }
 0x12e   : > { %v748_v28 = vmul.f32 %v3492_v27, %v746_v24  ;;  %vm754_vm3 = vweird.f32 %v3492_v27 }
 0x12f   : > { %vm755_vm5 = vmor %vm753_vm4, %vm754_vm3 }
 0x130   : > { %v749_v29 = vmul.f32 %v3492_v27, %v748_v28 }
 0x132   : > { %v750_v30 = vmul.f32 0.5, %v749_v29 }
 0x134   : > { %v751_v31 = vsub.f32 1.5, %v750_v30 }
 0x136   : > { %v752_v32 = vmul.f32 %v3492_v27, %v751_v31  ;;  %v3879_v31 = vld [vmem:[%s4472_s12 + $0x28] sm:$0xff] }
 0x138   : > { %v756_v34 = vsel %vm755_vm5, %v3492_v27, %v752_v32 }
 0x139   : > { %v757_v36 = vmul.f32 %v756_v34, %v740_v13 }
 0x13b   : > { %v759_v37 = vmul.f32 %v3476_v33, %v757_v36  ;;  %v3888_v36 = vld [vmem:[%s4472_s12 + $0x30] sm:$0xff] }
 0x13d   : > { %v761_v38 = vadd.f32 %v3477_v35, %v759_v37 }
 0x13f   : > { %v762_v39 = vpack.c.bf16 %v761_v38, %v761_v38 }
 0x141   : > { %764 = vst.msk [vmem:[#allocation3] sm:$0xf] %vm763_vm6, %v762_v39  ;;  %v3479_v39 = vld [vmem:[%s4521_s9 + $0x1] ss:$0 sm:$0xff] }
 0x148   : > { %v767_v40 = vld [vmem:[#allocation3] sm:$0xf] }
 0x149   : > { %3021 = vmatmul.msk.bf16.vlgmr.msra.gmra.mxu0 %vm724_vm0, %v767_v40  ;;  %3030 = vmatmul.msk.bf16.vlgmr.msra.gmra.mxu1 %vm724_vm0, %v767_v40  ;;  %v3828_v59 = vld [vmem:[#allocation3] sm:$0xf] }
 0x14a   : > { %3039 = vmatmul.msk.bf16.vlgmr.msra.gmra.mxu2 %vm724_vm0, %v767_v40 }
 0x1c6   : > { %v796_v43 = vpop.f32.mrf.mxu0  ;;  %v825_v44 = vpop.f32.mrf.mxu1 }
 0x1c7   : > { %v866_v46 = vpack.c.bf16 %v796_v43, %v796_v43  ;;  %v864_v47 = vpack.c.bf16 %v825_v44, %v825_v44  ;;  %v862_v50 = vadd.f32 %v3478_v45, %v796_v43 }
 0x1c9   : > { %3040 = vmatmul.msk.bf16.vlgmr.msra.gmra.mxu3 %vm867_vm2, %v866_v46  ;;  %v988_v49 = vsel %vm867_vm2, %v864_v47, 0  ;;  %v863_v56 = vpack.c.bf16 %v862_v50, %v862_v50  ;;  %v3392_v47 = vld [vmem:[%s4516_s24 + $0x20] sm:$0xff] }
 0x1ca   : > { %997 = vmatpush.bf16.xpose.msrb.mxu0 %v988_v49 }
 0x1cd   : > { %v854_v52 = vpop.f32.mrf.mxu2 }
 0x1ce   : > { %v1020_v53 = vpack.c.bf16 %v854_v52, %v854_v52  ;;  %v798_v54 = vpop.f32.mrf.mxu0  ;;  %v827_v55 = vpop.f32.mrf.mxu1 }
 0x1d0   : > { %v1026_v57 = vsel %vm1024_vm7, %v1020_v53, 0  ;;  %v959_v53 = vlaneseq }
 0x1d1   : > { %1035 = vmatpush.bf16.msrb.mxu1 %v1026_v57  ;;  %3041 = vmatmul.msk.bf16.vlgmr.msrb.gmra.mxu0 %vm867_vm2, %v863_v56 }
 0x1d2   : > { %1121 = vmatpush.bf16.msra.mxu0 %v3387_v48  ;;  %v3910_v55 = vand.u32 127, %v959_v53 }
 0x1d5   : > { %v856_v58 = vpop.f32.mrf.mxu2 }
 0x1d6   : > { %1122 = vmatpush.bf16.msra.mxu0 %v3386_v51  ;;  %v3906_v51 = vld [vmem:[#allocation3] sm:$0xf] }
 0x1d9   : > { %3056 = vmatmul.msk.bf16.vlgmr.msrb.gmra.mxu3 %vm724_vm0, %v3828_v59 }
 0x1e1   : > { %3069 = vmatmul.msk.bf16.vlgmr.msra.gmra.mxu0 %vm724_vm0, %v3828_v59 }
 0x24c   : > { %v883_v60 = vpop.f32.mrf.mxu3 }
 0x24d   : > { %v903_v62 = vperm.slane %v883_v60, 0  ;;  %v891_v63 = vrot.slane %v883_v60, 4  ;;  %v889_v0 = vrot.slane %v883_v60, 2  ;;  %v888_v1 = vrot.slane %v883_v60, 1 }
 0x24e   : > { %v3839_v2 = vpop.f32.mrf.mxu0  ;;  %v894_v5 = vrot.slane %v883_v60, 7  ;;  %v890_v9 = vrot.slane %v883_v60, 3  ;;  %v892_v24 = vrot.slane %v883_v60, 5  ;;  %v893_v28 = vrot.slane %v883_v60, 6 }
 0x24f   : > { %v919_v6 = vmul.f32 %v903_v62, %v3837_v61  ;;  %v907_v7 = vperm.slane %v891_v63, 0  ;;  %v905_v8 = vperm.slane %v889_v0, 0  ;;  %v904_v14 = vperm.slane %v888_v1, 0 }
 0x250   : > { %v910_v18 = vperm.slane %v894_v5, 0  ;;  %v906_v19 = vperm.slane %v890_v9, 0  ;;  %v908_v30 = vperm.slane %v892_v24, 0  ;;  %v909_v34 = vperm.slane %v893_v28, 0 }
 0x251   : > { %v927_v11 = vsel %vm867_vm2, %v919_v6, 0.0  ;;  %v923_v12 = vmul.f32 %v907_v7, %v3844_v3  ;;  %v921_v13 = vmul.f32 %v905_v8, %v3849_v4  ;;  %v920_v23 = vmul.f32 %v904_v14, %v3858_v15 }
 0x252   : > { %928 = vadd.xlane.f32.xlu1 %v927_v11  ;;  %v926_v26 = vmul.f32 %v910_v18, %v3865_v21  ;;  %v922_v27 = vmul.f32 %v906_v19, %v3870_v22  ;;  %v924_v37 = vmul.f32 %v908_v30, %v3879_v31  ;;  %v925_v41 = vmul.f32 %v909_v34, %v3888_v36 }
 0x253   : > { %v939_v16 = vsel %vm867_vm2, %v923_v12, 0.0  ;;  %v933_v17 = vsel %vm867_vm2, %v921_v13, 0.0  ;;  %v930_v29 = vsel %vm867_vm2, %v920_v23, 0.0 }
 0x254   : > { %940 = vadd.xlane.f32.xlu0 %v939_v16  ;;  %934 = vadd.xlane.f32.xlu2 %v933_v17  ;;  %v885_v20 = vpop.f32.mrf.mxu3  ;;  %v948_v32 = vsel %vm867_vm2, %v926_v26, 0.0  ;;  %v936_v33 = vsel %vm867_vm2, %v922_v27, 0.0  ;;  %v942_v44 = vsel %vm867_vm2, %v924_v37, 0.0  ;;  %v945_v46 = vsel %vm867_vm2, %v925_v41, 0.0  ;;  %v3388_v41 = vld [vmem:[%s4517_s7 + $0x10] sm:$0xff] }
 0x255   : > { %v1003_v20 = vld [vmem:[%s4471_s11] sm:$0xff] }
 0x256   : > { %v1001_v25 = vpop.f32.mrf.mxu0 }
 0x257   : > { %v3934_v25 = vld [vmem:[%s4522_s2] sm:$0xff] }
 0x25a   : > { %931 = vadd.xlane.f32.xlu1 %v930_v29 }
 0x25c   : > { %949 = vadd.xlane.f32.xlu0 %v948_v32  ;;  %937 = vadd.xlane.f32.xlu2 %v936_v33  ;;  %v3883_v35 = vpop.f32.mrf.mxu3 }
 0x25d   : > { %v1163_v45 = vadd.f32 %v3479_v39, %v3883_v35 }
 0x25e   : > { %v1124_v38 = vpop.f32.mrf.mxu0 }
 0x25f   : > { %v1165_v40 = vpack.c.bf16 %v1124_v38, %v1124_v38  ;;  %v1164_v50 = vpack.c.bf16 %v1163_v45, %v1163_v45 }
 0x261   : > { %v1280_v43 = vsel %vm867_vm2, %v1165_v40, 0  ;;  %v3389_v40 = vld [vmem:[%s4517_s7 + $0x18] sm:$0xff] }
 0x262   : > { %943 = vadd.xlane.f32.xlu1 %v942_v44  ;;  %1289 = vmatpush.bf16.xpose.msra.mxu3 %v1280_v43 }
 0x263   : > { %1151 = vmatpush.bf16.msra.mxu1 %v3389_v40 }
 0x264   : > { %946 = vadd.xlane.f32.xlu2 %v945_v46  ;;  %v1096_v48 = vpop.f32.mrf.mxu3 }
 0x265   : > { %v3084_v48 = vld [vmem:[%s4518_s10 + $0x4] sm:$0xf] }
 0x266   : > { %v1126_v49 = vpop.f32.mrf.mxu0 }
 0x267   : > { %1152 = vmatpush.bf16.msra.mxu1 %v3388_v41  ;;  %v1173_v49 = vsel %vm867_vm2, %v3084_v48, 0 }
 0x269   : > { %3086 = vmatmul.msk.bf16.vlgmr.msra.gmra.mxu3 %vm867_vm2, %v1164_v50 }
 0x26a   : > { %1414 = vmatpush.bf16.msrb.mxu3 %v3393_v42  ;;  %v1041_v42 = vld [vmem:[%s4523_s8] sm:$0xf] }
 0x26b   : > { %v1047_v43 = vsel %vm1024_vm7, %v1041_v42, 0 }
 0x26c   : > { %1056 = vmatpush.bf16.msrb.mxu2 %v1047_v43  ;;  %v3480_v43 = vld [vmem:[%s4521_s9 + $0x2] ss:$0 sm:$0xff] }
 0x26e   : > { %1415 = vmatpush.bf16.msrb.mxu3 %v3392_v47 }
 0x270   : > { %1182 = vmatpush.bf16.xpose.msra.mxu2 %v1173_v49 }
 0x279   : > { %3116 = vmatmul.msk.bf16.vlgmr.msrb.gmra.mxu3 %vm724_vm0, %v3906_v51 }
 0x2c5   : > { %v929_v52 = vpop.xlane.xlu1 %928 }
 0x2c6   : > { %v961_v58 = vperm.slane %v929_v52, %v3910_v55  ;;  %v3391_v52 = vld [vmem:[%s4515_s1 + $0x28] sm:$0xff] }
 0x2c7   : > { %v935_v54 = vpop.xlane.xlu2 %934  ;;  %v941_v56 = vpop.xlane.xlu0 %940 }
 0x2c8   : > { %v963_v62 = vperm.slane %v935_v54, %v3910_v55  ;;  %v965_v7 = vperm.slane %v941_v56, %v3910_v55  ;;  %v3594_v54 = vmov 0.0  }
 0x2c9   : > { %765 = vst.msk [vmem:[#allocation4] sm:$0xff] %vm724_vm0, %v3594_v54 }
 0x2cd   : > { %v932_v57 = vpop.xlane.xlu1 %931 }
 0x2ce   : > { %v962_v60 = vperm.slane %v932_v57, %v3910_v55 }
 0x2cf   : > { %v938_v63 = vpop.xlane.xlu2 %937  ;;  %v950_v9 = vpop.xlane.xlu0 %949 }
 0x2d0   : > { %v970_v0 = vsel %vm969_vm8, %v962_v60, %v961_v58  ;;  %v964_v1 = vperm.slane %v938_v63, %v3910_v55  ;;  %v968_v17 = vperm.slane %v950_v9, %v3910_v55  ;;  %v1168_v60 = vpack.c.bf16 %v3883_v35, %v3883_v35  ;;  %v3399_v35 = vld [vmem:[%s4516_s24 + $0x38] sm:$0xff]  ;;  %v3398_v9 = vld [vmem:[%s4516_s24 + $0x30] sm:$0xff] }
 0x2d1   : > { %v972_v5 = vsel %vm971_vm9, %v963_v62, %v970_v0 }
 0x2d2   : > { %v974_v6 = vsel %vm973_vm10, %v964_v1, %v972_v5  ;;  %v1018_v5 = vld [vmem:[#allocation4] sm:$0xff] }
 0x2d3   : > { %v976_v12 = vsel %vm975_vm11, %v965_v7, %v974_v6 }
 0x2d5   : > { %v944_v8 = vpop.xlane.xlu1 %943 }
 0x2d6   : > { %v966_v11 = vperm.slane %v944_v8, %v3910_v55 }
 0x2d7   : > { %v947_v13 = vpop.xlane.xlu2 %946 }
 0x2d8   : > { %v978_v14 = vsel %vm977_vm12, %v966_v11, %v976_v12  ;;  %v967_v16 = vperm.slane %v947_v13, %v3910_v55 }
 0x2da   : > { %v980_v18 = vsel %vm979_vm13, %v967_v16, %v978_v14 }
 0x2db   : > { %v982_v19 = vsel %vm981_vm14, %v968_v17, %v980_v18 }
 0x2dc   : > { %v1000_v23 = vadd.f32 %v3839_v2, %v982_v19 }
 0x2de   : > { %v1004_v24 = vadd.f32 %v1003_v20, %v1000_v23 }
 0x2e0   : > { %v1005_v26 = vmul.f32 0.35355338, %v1004_v24 }
 0x2e2   : > { %v1006_v27 = vadd.f32 %v1005_v26, %v3934_v25 }
 0x2e4   : > { %v1007_v28 = vsel %vm867_vm2, %v1006_v27, -inf }
 0x2e5   : > { %1008 = vmax.xlane.f32.xlu1 %v1007_v28 }
 0x2ec   : > { %v3938_v29 = vpop.f32.mrf.mxu3 }
 0x2f4   : > { %v1293_v30 = vpop.f32.mrf.mxu3 }
 0x2fc   : > { %v1417_v32 = vpop.f32.mrf.mxu3 }
 0x2fd   : > { %v1458_v57 = vpack.c.bf16 %v1417_v32, %v1417_v32 }
 0x2ff   : > { %v1573_v63 = vsel %vm867_vm2, %v1458_v57, 0 }
 0x304   : > { %v1419_v33 = vpop.f32.mrf.mxu3 }
 0x358   : > { %v1009_v34 = vpop.xlane.xlu1 %1008 }
 0x359   : > { %v1010_v37 = vsub.f32 %v1006_v27, %v1009_v34 }
 0x35b   : > { %v1011_v2 = vmul.f32 1.442695, %v1010_v37 }
 0x35d   : > { %3493 = vpow2.f32 %v1011_v2 }
 0x363   : > { %v3494_v38 = vpop.eup %3493 }
 0x364   : > { %v1013_v39 = vsel %vm867_vm2, %v3494_v38, 0.0 }
 0x365   : > { %1014 = vadd.xlane.f32.xlu2 %v1013_v39 }
 0x3d8   : > { %v1015_v44 = vpop.xlane.xlu2 %1014 }
 0x3d9   : > { %3495 = vrcp.f32 %v1015_v44 }
 0x3df   : > { %v3496_v45 = vpop.eup %3495 }
 0x3e0   : > { %v1017_v46 = vmul.f32 %v3496_v45, %v3494_v38 }
 0x3e2   : > { %v1019_v47 = vpack.c.bf16 %v1017_v46, %v1017_v46 }
 0x3e4   : > { %3042 = vmatmul.msk.bf16.vlgmr.msrb.gmra.mxu1 %vm867_vm2, %v1019_v47 }
 0x3f4   : > { %3082 = vmatmul.msk.bf16.vlgmr.msra.gmra.mxu1 %vm724_vm0, %v3828_v59  ;;  %v3390_v59 = vld [vmem:[%s4515_s1 + $0x20] sm:$0xff] }
 0x461   : > { %v1037_v50 = vpop.f32.mrf.mxu1 }
 0x462   : > { %v1042_v53 = vpack.c.bf16 %v1037_v50, %v1037_v50 }
 0x464   : > { %3043 = vmatmul.msk.bf16.vlgmr.msrb.gmra.mxu2 %vm867_vm2, %v1042_v53 }
 0x465   : > { %1384 = vmatpush.bf16.msrb.mxu2 %v3391_v52 }
 0x469   : > { %v1039_v56 = vpop.f32.mrf.mxu1  ;;  %1385 = vmatpush.bf16.msrb.mxu2 %v3390_v59 }
 0x471   : > { %v1154_v58 = vpop.f32.mrf.mxu1 }
 0x472   : > { %v1313_v62 = vpack.c.bf16 %v1154_v58, %v1154_v58  ;;  %v4004_v58 = vld [vmem:[#allocation3] sm:$0xf] }
 0x474   : > { %v1318_v0 = vsel %vm1024_vm7, %v1313_v62, 0  ;;  %3085 = vmatmul.msk.bf16.vlgmr.msra.gmra.mxu2 %vm867_vm2, %v1168_v60 }
 0x475   : > { %1582 = vmatpush.bf16.xpose.msra.mxu2 %v1573_v63  ;;  %1327 = vmatpush.bf16.msrb.mxu0 %v1318_v0 }
 0x479   : > { %v1156_v1 = vpop.f32.mrf.mxu1 }
 0x484   : > { %3103 = vmatmul.msk.bf16.vlgmr.msrb.gmra.mxu2 %vm724_vm0, %v3906_v51 }
 0x485   : > { %1707 = vmatpush.bf16.msrb.mxu2 %v3399_v35 }
 0x489   : > { %1708 = vmatpush.bf16.msrb.mxu2 %v3398_v9 }
 0x4e7   : > { %v1058_v6 = vpop.f32.mrf.mxu2 }
 0x4e8   : > { %v1062_v7 = vadd.f32 %v1058_v6, %v1018_v5 }
 0x4ea   : > { %1063 = vst.msk [vmem:[#allocation4] sm:$0xff] %vm724_vm0, %v1062_v7 }
 0x4ef   : > { %v1060_v8 = vpop.f32.mrf.mxu2 }
 0x4f7   : > { %v1184_v11 = vpop.f32.mrf.mxu2 }
 0x4f8   : > { %v1204_v12 = vperm.slane %v1184_v11, 0  ;;  %v1190_v13 = vrot.slane %v1184_v11, 2  ;;  %v1189_v14 = vrot.slane %v1184_v11, 1  ;;  %v1191_v16 = vrot.slane %v1184_v11, 3 }
 0x4f9   : > { %v1193_v17 = vrot.slane %v1184_v11, 5  ;;  %v1192_v23 = vrot.slane %v1184_v11, 4  ;;  %v1194_v38 = vrot.slane %v1184_v11, 6  ;;  %v1195_v41 = vrot.slane %v1184_v11, 7 }
 0x4fa   : > { %v1220_v18 = vmul.f32 %v1204_v12, %v3837_v61  ;;  %v1206_v19 = vperm.slane %v1190_v13, 0  ;;  %v1205_v20 = vperm.slane %v1189_v14, 0  ;;  %v1207_v28 = vperm.slane %v1191_v16, 0 }
 0x4fb   : > { %v1209_v33 = vperm.slane %v1193_v17, 0  ;;  %v1208_v34 = vperm.slane %v1192_v23, 0  ;;  %v1210_v44 = vperm.slane %v1194_v38, 0  ;;  %v1211_v47 = vperm.slane %v1195_v41, 0 }
 0x4fc   : > { %v1228_v24 = vsel %vm867_vm2, %v1220_v18, 0.0  ;;  %v1222_v26 = vmul.f32 %v1206_v19, %v3849_v4  ;;  %v1221_v27 = vmul.f32 %v1205_v20, %v3858_v15  ;;  %v1223_v2 = vmul.f32 %v1207_v28, %v3870_v22 }
 0x4fd   : > { %1229 = vadd.xlane.f32.xlu0 %v1228_v24  ;;  %v1225_v39 = vmul.f32 %v1209_v33, %v3879_v31  ;;  %v1224_v40 = vmul.f32 %v1208_v34, %v3844_v3  ;;  %v1226_v50 = vmul.f32 %v1210_v44, %v3888_v36  ;;  %v1227_v53 = vmul.f32 %v1211_v47, %v3865_v21 }
 0x4fe   : > { %v1234_v30 = vsel %vm867_vm2, %v1222_v26, 0.0  ;;  %v1231_v32 = vsel %vm867_vm2, %v1221_v27, 0.0  ;;  %v1237_v42 = vsel %vm867_vm2, %v1223_v2, 0.0  ;;  %v3087_v27 = vld [vmem:[%s4471_s11 + $0x8] sm:$0xff] }
 0x4ff   : > { %1235 = vadd.xlane.f32.xlu2 %v1234_v30  ;;  %1232 = vadd.xlane.f32.xlu1 %v1231_v32  ;;  %v1186_v37 = vpop.f32.mrf.mxu2  ;;  %v1243_v45 = vsel %vm867_vm2, %v1225_v39, 0.0  ;;  %v1240_v46 = vsel %vm867_vm2, %v1224_v40, 0.0  ;;  %v1246_v59 = vsel %vm867_vm2, %v1226_v50, 0.0  ;;  %v1249_v56 = vsel %vm867_vm2, %v1227_v53, 0.0 }
 0x505   : > { %1238 = vadd.xlane.f32.xlu0 %v1237_v42 }
 0x507   : > { %1244 = vadd.xlane.f32.xlu2 %v1243_v45  ;;  %1241 = vadd.xlane.f32.xlu1 %v1240_v46  ;;  %v3996_v48 = vpop.f32.mrf.mxu2  ;;  %v3394_v45 = vld [vmem:[%s4517_s7 + $0x20] sm:$0xff] }
 0x508   : > { %v1456_v49 = vadd.f32 %v3480_v43, %v3996_v48  ;;  %v3089_v46 = vld [vmem:[%s4523_s8 + $0x4] sm:$0xf] }
 0x509   : > { %v1340_v47 = vsel %vm1024_vm7, %v3089_v46, 0 }
 0x50a   : > { %v1457_v52 = vpack.c.bf16 %v1456_v49, %v1456_v49  ;;  %1349 = vmatpush.bf16.msrb.mxu1 %v1340_v47 }
 0x50c   : > { %3133 = vmatmul.msk.bf16.vlgmr.msra.gmra.mxu2 %vm867_vm2, %v1457_v52 }
 0x50d   : > { %1247 = vadd.xlane.f32.xlu0 %v1246_v59  ;;  %v3131_v59 = vld [vmem:[%s4518_s10 + $0x8] sm:$0xf] }
 0x50f   : > { %1250 = vadd.xlane.f32.xlu1 %v1249_v56  ;;  %v1389_v57 = vpop.f32.mrf.mxu2  ;;  %v1466_v56 = vsel %vm867_vm2, %v3131_v59, 0 }
 0x510   : > { %1475 = vmatpush.bf16.xpose.msra.mxu1 %v1466_v56 }
 0x51c   : > { %3163 = vmatmul.msk.bf16.vlgmr.msrb.gmra.mxu2 %vm724_vm0, %v4004_v58 }
 0x570   : > { %v1230_v60 = vpop.xlane.xlu0 %1229 }
 0x571   : > { %v1260_v1 = vperm.slane %v1230_v60, %v3910_v55  ;;  %v3397_v60 = vld [vmem:[%s4515_s1 + $0x38] sm:$0xff] }
 0x572   : > { %v1236_v62 = vpop.xlane.xlu2 %1235  ;;  %v1233_v63 = vpop.xlane.xlu1 %1232 }
 0x573   : > { %v1261_v0 = vperm.slane %v1233_v63, %v3910_v55  ;;  %v1262_v5 = vperm.slane %v1236_v62, %v3910_v55 }
 0x575   : > { %v1268_v6 = vsel %vm969_vm8, %v1261_v0, %v1260_v1 }
 0x576   : > { %v1269_v9 = vsel %vm971_vm9, %v1262_v5, %v1268_v6  ;;  %v1461_v5 = vpack.c.bf16 %v3996_v48, %v3996_v48 }
 0x578   : > { %v1239_v7 = vpop.xlane.xlu0 %1238 }
 0x579   : > { %v1263_v8 = vperm.slane %v1239_v7, %v3910_v55 }
 0x57a   : > { %v1242_v35 = vpop.xlane.xlu1 %1241  ;;  %v1245_v11 = vpop.xlane.xlu2 %1244 }
 0x57b   : > { %v1264_v12 = vperm.slane %v1242_v35, %v3910_v55  ;;  %v1270_v13 = vsel %vm973_vm10, %v1263_v8, %v1269_v9  ;;  %v1265_v14 = vperm.slane %v1245_v11, %v3910_v55  ;;  %v1311_v9 = vld [vmem:[#allocation4] sm:$0xff] }
 0x57d   : > { %v1271_v16 = vsel %vm975_vm11, %v1264_v12, %v1270_v13 }
 0x57e   : > { %v1272_v19 = vsel %vm977_vm12, %v1265_v14, %v1271_v16 }
 0x580   : > { %v1248_v17 = vpop.xlane.xlu0 %1247 }
 0x581   : > { %v1266_v18 = vperm.slane %v1248_v17, %v3910_v55 }
 0x582   : > { %v1251_v20 = vpop.xlane.xlu1 %1250 }
 0x583   : > { %v1273_v23 = vsel %vm979_vm13, %v1266_v18, %v1272_v19  ;;  %v1267_v24 = vperm.slane %v1251_v20, %v3910_v55 }
 0x585   : > { %v1274_v26 = vsel %vm981_vm14, %v1267_v24, %v1273_v23 }
 0x586   : > { %v1292_v28 = vadd.f32 %v3938_v29, %v1274_v26  ;;  %v3395_v29 = vld [vmem:[%s4517_s7 + $0x28] sm:$0xff] }
 0x587   : > { %1444 = vmatpush.bf16.msra.mxu0 %v3395_v29 }
 0x588   : > { %v1297_v30 = vadd.f32 %v3087_v27, %v1292_v28 }
 0x58a   : > { %v1298_v32 = vmul.f32 0.35355338, %v1297_v30 }
 0x58b   : > { %1445 = vmatpush.bf16.msra.mxu0 %v3394_v45  ;;  %v3481_v45 = vld [vmem:[%s4521_s9 + $0x3] ss:$0 sm:$0xff] }
 0x58c   : > { %v1299_v33 = vadd.f32 %v1298_v32, %v3934_v25 }
 0x58e   : > { %v1300_v34 = vsel %vm867_vm2, %v1299_v33, -inf }
 0x58f   : > { %1301 = vmax.xlane.f32.xlu2 %v1300_v34  ;;  %v4029_v37 = vpop.f32.mrf.mxu2 }
 0x597   : > { %v1586_v2 = vpop.f32.mrf.mxu2 }
 0x59f   : > { %v1710_v38 = vpop.f32.mrf.mxu2 }
 0x5a0   : > { %v1751_v0 = vpack.c.bf16 %v1710_v38, %v1710_v38 }
 0x5a2   : > { %v1866_v7 = vsel %vm867_vm2, %v1751_v0, 0 }
 0x5a7   : > { %v1712_v39 = vpop.f32.mrf.mxu2 }
 0x602   : > { %v1302_v40 = vpop.xlane.xlu2 %1301 }
 0x603   : > { %v1303_v41 = vsub.f32 %v1299_v33, %v1302_v40 }
 0x605   : > { %v1304_v42 = vmul.f32 1.442695, %v1303_v41 }
 0x607   : > { %3497 = vpow2.f32 %v1304_v42 }
 0x60d   : > { %v3498_v43 = vpop.eup %3497 }
 0x60e   : > { %v1306_v44 = vsel %vm867_vm2, %v3498_v43, 0.0 }
 0x60f   : > { %1307 = vadd.xlane.f32.xlu0 %v1306_v44 }
 0x682   : > { %v1308_v49 = vpop.xlane.xlu0 %1307 }
 0x683   : > { %3499 = vrcp.f32 %v1308_v49 }
 0x689   : > { %v3500_v50 = vpop.eup %3499 }
 0x68a   : > { %v1310_v52 = vmul.f32 %v3500_v50, %v3498_v43 }
 0x68c   : > { %v1312_v53 = vpack.c.bf16 %v1310_v52, %v1310_v52 }
 0x68e   : > { %3088 = vmatmul.msk.bf16.vlgmr.msrb.gmra.mxu0 %vm867_vm2, %v1312_v53 }
 0x69e   : > { %3129 = vmatmul.msk.bf16.vlgmr.msra.gmra.mxu0 %vm724_vm0, %v3906_v51  ;;  %v3396_v51 = vld [vmem:[%s4515_s1 + $0x30] sm:$0xff]  ;;  %s2894_s1 = scalar_lea.hbm %s4482_s22, %s3432_s0 }
 0x69f   : > { %s2897_s27 = sshll.u32 %s2894_s1, 4  ;;  %s2898_s27 = int_to_ptr.hbm [resolvable:$true] %s2897_s27 }
 0x70b   : > { %v1329_v57 = vpop.f32.mrf.mxu0 }
 0x70c   : > { %v1335_v62 = vpack.c.bf16 %v1329_v57, %v1329_v57 }
 0x70e   : > { %3090 = vmatmul.msk.bf16.vlgmr.msrb.gmra.mxu1 %vm867_vm2, %v1335_v62 }
 0x70f   : > { %1677 = vmatpush.bf16.msrb.mxu1 %v3397_v60 }
 0x713   : > { %v1331_v63 = vpop.f32.mrf.mxu0  ;;  %1678 = vmatpush.bf16.msrb.mxu1 %v3396_v51 }
 0x71b   : > { %v1447_v1 = vpop.f32.mrf.mxu0 }
 0x71c   : > { %v1606_v6 = vpack.c.bf16 %v1447_v1, %v1447_v1 }
 0x71e   : > { %v1611_v8 = vsel %vm1024_vm7, %v1606_v6, 0  ;;  %3132 = vmatmul.msk.bf16.vlgmr.msra.gmra.mxu1 %vm867_vm2, %v1461_v5 }
 0x71f   : > { %1875 = vmatpush.bf16.xpose.msra.mxu1 %v1866_v7  ;;  %1620 = vmatpush.bf16.msra.mxu3 %v1611_v8 }
 0x723   : > { %v1449_v35 = vpop.f32.mrf.mxu0 }
 0x72e   : > { %3150 = vmatmul.msk.bf16.vlgmr.msrb.gmra.mxu1 %vm724_vm0, %v4004_v58 }
 0x78b   : > { %v1351_v11 = vpop.f32.mrf.mxu1 }
 0x78c   : > { %v1355_v12 = vadd.f32 %v1351_v11, %v1311_v9 }
 0x78e   : > { %1356 = vst.msk [vmem:[#allocation4] sm:$0xff] %vm724_vm0, %v1355_v12 }
 0x793   : > { %v1353_v13 = vpop.f32.mrf.mxu1 }
 0x79b   : > { %v1477_v48 = vpop.f32.mrf.mxu1 }
 0x79c   : > { %v1497_v14 = vperm.slane %v1477_v48, 0  ;;  %v1483_v16 = vrot.slane %v1477_v48, 2  ;;  %v1482_v17 = vrot.slane %v1477_v48, 1  ;;  %v1484_v18 = vrot.slane %v1477_v48, 3 }
 0x79d   : > { %v1486_v19 = vrot.slane %v1477_v48, 5  ;;  %v1485_v26 = vrot.slane %v1477_v48, 4  ;;  %v1487_v41 = vrot.slane %v1477_v48, 6  ;;  %v1488_v44 = vrot.slane %v1477_v48, 7 }
 0x79e   : > { %v1513_v20 = vmul.f32 %v1497_v14, %v3837_v61  ;;  %v1499_v23 = vperm.slane %v1483_v16, 0  ;;  %v1498_v24 = vperm.slane %v1482_v17, 0  ;;  %v1500_v32 = vperm.slane %v1484_v18, 0 }
 0x79f   : > { %v1502_v2 = vperm.slane %v1486_v19, 0  ;;  %v1501_v38 = vperm.slane %v1485_v26, 0  ;;  %v1503_v46 = vperm.slane %v1487_v41, 0  ;;  %v1504_v50 = vperm.slane %v1488_v44, 0 }
 0x7a0   : > { %v1521_v27 = vsel %vm867_vm2, %v1513_v20, 0.0  ;;  %v1515_v28 = vmul.f32 %v1499_v23, %v3849_v4  ;;  %v1514_v30 = vmul.f32 %v1498_v24, %v3858_v15  ;;  %v1516_v40 = vmul.f32 %v1500_v32, %v3870_v22 }
 0x7a1   : > { %1522 = vadd.xlane.f32.xlu1 %v1521_v27  ;;  %v1518_v42 = vmul.f32 %v1502_v2, %v3879_v31  ;;  %v1517_v43 = vmul.f32 %v1501_v38, %v3844_v3  ;;  %v1519_v59 = vmul.f32 %v1503_v46, %v3888_v36  ;;  %v1520_v57 = vmul.f32 %v1504_v50, %v3865_v21 }
 0x7a2   : > { %v1527_v33 = vsel %vm867_vm2, %v1515_v28, 0.0  ;;  %v1524_v34 = vsel %vm867_vm2, %v1514_v30, 0.0  ;;  %v1530_v29 = vsel %vm867_vm2, %v1516_v40, 0.0  ;;  %v3134_v28 = vld [vmem:[%s4471_s11 + $0x10] sm:$0xff] }
 0x7a3   : > { %1528 = vadd.xlane.f32.xlu0 %v1527_v33  ;;  %1525 = vadd.xlane.f32.xlu2 %v1524_v34  ;;  %v1479_v39 = vpop.f32.mrf.mxu1  ;;  %v1536_v47 = vsel %vm867_vm2, %v1518_v42, 0.0  ;;  %v1533_v49 = vsel %vm867_vm2, %v1517_v43, 0.0  ;;  %v1539_v60 = vsel %vm867_vm2, %v1519_v59, 0.0  ;;  %v1542_v62 = vsel %vm867_vm2, %v1520_v57, 0.0  ;;  %v3178_v59 = vld [vmem:[%s4518_s10 + $0xc] sm:$0xf] }
 0x7a9   : > { %1531 = vadd.xlane.f32.xlu1 %v1530_v29  ;;  %v3400_v29 = vld [vmem:[%s4517_s7 + $0x30] sm:$0xff] }
 0x7ab   : > { %1537 = vadd.xlane.f32.xlu0 %v1536_v47  ;;  %1534 = vadd.xlane.f32.xlu2 %v1533_v49  ;;  %v4079_v52 = vpop.f32.mrf.mxu1 }
 0x7ac   : > { %v1749_v53 = vadd.f32 %v3481_v45, %v4079_v52  ;;  %v3136_v45 = vld [vmem:[%s4523_s8 + $0x8] sm:$0xf] }
 0x7ad   : > { %v1633_v46 = vsel %vm1024_vm7, %v3136_v45, 0 }
 0x7ae   : > { %v1750_v56 = vpack.c.bf16 %v1749_v53, %v1749_v53  ;;  %1642 = vmatpush.bf16.msrb.mxu0 %v1633_v46 }
 0x7b0   : > { %3180 = vmatmul.msk.bf16.vlgmr.msra.gmra.mxu1 %vm867_vm2, %v1750_v56  ;;  %v1759_v56 = vsel %vm867_vm2, %v3178_v59, 0 }
 0x7b1   : > { %1540 = vadd.xlane.f32.xlu1 %v1539_v60 }
 0x7b2   : > { %1768 = vmatpush.bf16.xpose.msra.mxu0 %v1759_v56 }
 0x7b3   : > { %1543 = vadd.xlane.f32.xlu2 %v1542_v62  ;;  %v1682_v51 = vpop.f32.mrf.mxu1 }
 0x814   : > { %v1523_v63 = vpop.xlane.xlu1 %1522 }
 0x815   : > { %v1553_v6 = vperm.slane %v1523_v63, %v3910_v55  ;;  %v1754_v63 = vpack.c.bf16 %v4079_v52, %v4079_v52 }
 0x816   : > { %v1529_v0 = vpop.xlane.xlu0 %1528  ;;  %v1526_v1 = vpop.xlane.xlu2 %1525 }
 0x817   : > { %v1554_v5 = vperm.slane %v1526_v1, %v3910_v55  ;;  %v1555_v7 = vperm.slane %v1529_v0, %v3910_v55 }
 0x819   : > { %v1561_v8 = vsel %vm969_vm8, %v1554_v5, %v1553_v6  ;;  %v1604_v5 = vld [vmem:[#allocation4] sm:$0xff] }
 0x81a   : > { %v1562_v12 = vsel %vm971_vm9, %v1555_v7, %v1561_v8 }
 0x81c   : > { %v1532_v35 = vpop.xlane.xlu1 %1531 }
 0x81d   : > { %v1556_v9 = vperm.slane %v1532_v35, %v3910_v55 }
 0x81e   : > { %v1535_v11 = vpop.xlane.xlu2 %1534  ;;  %v1538_v13 = vpop.xlane.xlu0 %1537 }
 0x81f   : > { %v1557_v48 = vperm.slane %v1535_v11, %v3910_v55  ;;  %v1563_v14 = vsel %vm973_vm10, %v1556_v9, %v1562_v12  ;;  %v1558_v16 = vperm.slane %v1538_v13, %v3910_v55 }
 0x821   : > { %v1564_v17 = vsel %vm975_vm11, %v1557_v48, %v1563_v14 }
 0x822   : > { %v1565_v20 = vsel %vm977_vm12, %v1558_v16, %v1564_v17 }
 0x824   : > { %v1541_v18 = vpop.xlane.xlu1 %1540 }
 0x825   : > { %v1559_v19 = vperm.slane %v1541_v18, %v3910_v55 }
 0x826   : > { %v1544_v23 = vpop.xlane.xlu2 %1543 }
 0x827   : > { %v1566_v24 = vsel %vm979_vm13, %v1559_v19, %v1565_v20  ;;  %v1560_v26 = vperm.slane %v1544_v23, %v3910_v55 }
 0x829   : > { %v1567_v27 = vsel %vm981_vm14, %v1560_v26, %v1566_v24 }
 0x82a   : > { %v1585_v30 = vadd.f32 %v4029_v37, %v1567_v27  ;;  %v3401_v37 = vld [vmem:[%s4517_s7 + $0x38] sm:$0xff]  ;;  %s4268_s7 = scalar_lea.vmem [#allocation5], %s3009_s30 }
 0x82b   : > { %1737 = vmatpush.bf16.msrb.mxu3 %v3401_v37  ;;  %s2895_s2 = sshll.u32 %s4268_s7, 4  ;;  %s2896_s2 = int_to_ptr.vmem [resolvable:$true] %s2895_s2 }
 0x82c   : > { %v1590_v32 = vadd.f32 %v3134_v28, %v1585_v30 }
 0x82d   : > { %v4106_v33 = vpop.f32.mrf.mxu1 }
 0x82e   : > { %v1591_v34 = vmul.f32 0.35355338, %v1590_v32 }
 0x82f   : > { %1738 = vmatpush.bf16.msrb.mxu3 %v3400_v29 }
 0x830   : > { %v1592_v2 = vadd.f32 %v1591_v34, %v3934_v25 }
 0x832   : > { %v1593_v38 = vsel %vm867_vm2, %v1592_v2, -inf }
 0x833   : > { %1594 = vmax.xlane.f32.xlu0 %v1593_v38 }
 0x835   : > { %v1879_v39 = vpop.f32.mrf.mxu1 }
 0x8a6   : > { %v1595_v40 = vpop.xlane.xlu0 %1594 }
 0x8a7   : > { %v1596_v41 = vsub.f32 %v1592_v2, %v1595_v40 }
 0x8a9   : > { %v1597_v42 = vmul.f32 1.442695, %v1596_v41 }
 0x8ab   : > { %3501 = vpow2.f32 %v1597_v42 }
 0x8b1   : > { %v3502_v43 = vpop.eup %3501 }
 0x8b2   : > { %v1599_v44 = vsel %vm867_vm2, %v3502_v43, 0.0 }
 0x8b3   : > { %1600 = vadd.xlane.f32.xlu1 %v1599_v44 }
 0x926   : > { %v1601_v47 = vpop.xlane.xlu1 %1600 }
 0x927   : > { %3503 = vrcp.f32 %v1601_v47 }
 0x92d   : > { %v3504_v49 = vpop.eup %3503 }
 0x92e   : > { %v1603_v50 = vmul.f32 %v3504_v49, %v3502_v43 }
 0x930   : > { %v1605_v53 = vpack.c.bf16 %v1603_v50, %v1603_v50 }
 0x932   : > { %3135 = vmatmul.msk.bf16.vlgmr.msra.gmra.mxu3 %vm867_vm2, %v1605_v53 }
 0x942   : > { %3176 = vmatmul.msk.bf16.vlgmr.msrb.gmra.mxu3 %vm724_vm0, %v4004_v58 }
 0x9b5   : > { %v1622_v57 = vpop.f32.mrf.mxu3 }
 0x9b6   : > { %v1628_v60 = vpack.c.bf16 %v1622_v57, %v1622_v57 }
 0x9b8   : > { %3137 = vmatmul.msk.bf16.vlgmr.msrb.gmra.mxu0 %vm867_vm2, %v1628_v60 }
 0x9bd   : > { %v1624_v62 = vpop.f32.mrf.mxu3 }
 0x9c5   : > { %v1740_v51 = vpop.f32.mrf.mxu3 }
 0x9c6   : > { %v1899_v0 = vpack.c.bf16 %v1740_v51, %v1740_v51 }
 0x9c8   : > { %v1904_v1 = vsel %vm1024_vm7, %v1899_v0, 0  ;;  %3179 = vmatmul.msk.bf16.vlgmr.msra.gmra.mxu0 %vm867_vm2, %v1754_v63 }
 0x9c9   : > { %1913 = vmatpush.bf16.msra.mxu2 %v1904_v1 }
 0x9cd   : > { %v1742_v58 = vpop.f32.mrf.mxu3 }
 0xa35   : > { %v1644_v6 = vpop.f32.mrf.mxu0 }
 0xa36   : > { %v1648_v7 = vadd.f32 %v1644_v6, %v1604_v5  ;;  %v3181_v6 = vld [vmem:[%s4471_s11 + $0x18] sm:$0xff] }
 0xa38   : > { %1649 = vst.msk [vmem:[#allocation4] sm:$0xff] %vm724_vm0, %v1648_v7 }
 0xa3d   : > { %v1646_v8 = vpop.f32.mrf.mxu0 }
 0xa45   : > { %v1770_v35 = vpop.f32.mrf.mxu0 }
 0xa46   : > { %v1790_v9 = vperm.slane %v1770_v35, 0  ;;  %v1776_v11 = vrot.slane %v1770_v35, 2  ;;  %v1775_v12 = vrot.slane %v1770_v35, 1  ;;  %v1777_v13 = vrot.slane %v1770_v35, 3 }
 0xa47   : > { %v1779_v48 = vrot.slane %v1770_v35, 5  ;;  %v1778_v17 = vrot.slane %v1770_v35, 4  ;;  %v1780_v32 = vrot.slane %v1770_v35, 6  ;;  %v1781_v2 = vrot.slane %v1770_v35, 7 }
 0xa48   : > { %v1806_v52 = vmul.f32 %v1790_v9, %v3837_v61  ;;  %v1792_v14 = vperm.slane %v1776_v11, 0  ;;  %v1791_v16 = vperm.slane %v1775_v12, 0  ;;  %v1793_v23 = vperm.slane %v1777_v13, 0 }
 0xa49   : > { %v1795_v27 = vperm.slane %v1779_v48, 0  ;;  %v1794_v28 = vperm.slane %v1778_v17, 0  ;;  %v1796_v38 = vperm.slane %v1780_v32, 0  ;;  %v1797_v41 = vperm.slane %v1781_v2, 0 }
 0xa4a   : > { %v1814_v18 = vsel %vm867_vm2, %v1806_v52, 0.0  ;;  %v1808_v19 = vmul.f32 %v1792_v14, %v3849_v4  ;;  %v1807_v20 = vmul.f32 %v1791_v16, %v3858_v15  ;;  %v1809_v30 = vmul.f32 %v1793_v23, %v3870_v22  ;;  %v3183_v14 = vld [vmem:[%s4523_s8 + $0xc] sm:$0xf]  ;;  %s4525_s8 = sld [smem:[#allocation15_spill]] }
 0xa4b   : > { %1815 = vadd.xlane.f32.xlu2 %v1814_v18  ;;  %v1811_v34 = vmul.f32 %v1795_v27, %v3879_v31  ;;  %v1810_v4 = vmul.f32 %v1794_v28, %v3844_v3  ;;  %v1812_v42 = vmul.f32 %v1796_v38, %v3888_v36  ;;  %v1813_v22 = vmul.f32 %v1797_v41, %v3865_v21  ;;  %v1943_v28 = vld [vmem:[#allocation2] sm:$0xff]  ;;  %v3405_v41 = vld [vmem:[%s4474_s14 + $0x8] sm:$0xff] }
 0xa4c   : > { %v1820_v24 = vsel %vm867_vm2, %v1808_v19, 0.0  ;;  %v1817_v26 = vsel %vm867_vm2, %v1807_v20, 0.0  ;;  %v1823_v15 = vsel %vm867_vm2, %v1809_v30, 0.0  ;;  %2039 = vmatpush.bf16.msrb.mxu1 %v3405_v41 }
 0xa4d   : > { %1821 = vadd.xlane.f32.xlu1 %v1820_v24  ;;  %1818 = vadd.xlane.f32.xlu0 %v1817_v26  ;;  %v1772_v61 = vpop.f32.mrf.mxu0  ;;  %v1829_v39 = vsel %vm867_vm2, %v1811_v34, 0.0  ;;  %v1826_v40 = vsel %vm867_vm2, %v1810_v4, 0.0  ;;  %v1832_v31 = vsel %vm867_vm2, %v1812_v42, 0.0  ;;  %v1835_v3 = vsel %vm867_vm2, %v1813_v22, 0.0  ;;  %v1897_v24 = vld [vmem:[#allocation4] sm:$0xff]  ;;  %v3404_v22 = vld [vmem:[%s4474_s14] sm:$0xff] }
 0xa4e   : > { %v3407_v42 = vld [vmem:[%s4475_s15 + $0x8] sm:$0xff] }
 0xa4f   : > { %2068 = vmatpush.bf16.msrb.mxu2 %v3407_v42 }
 0xa50   : > { %s713_s21 = scalar_lea.vmem %s4525_s8, %s4524_s23  ;;  %2040 = vmatpush.bf16.msrb.mxu1 %v3404_v22  ;;  %s3543_s23 = sshra.s32 %s2898_s27, 4  ;;  %s3544_s23 = int_to_ptr.hbm [resolvable:$true] %s3543_s23 }
 0xa51   : > { %p3550_p0 = scmp.lt.s32.totalorder %s3544_s23, %s4482_s22 }
 0xa53   : > { %1824 = vadd.xlane.f32.xlu2 %v1823_v15 }
 0xa55   : > { %1830 = vadd.xlane.f32.xlu1 %v1829_v39  ;;  %1827 = vadd.xlane.f32.xlu0 %v1826_v40 }
 0xa5b   : > { %1833 = vadd.xlane.f32.xlu2 %v1832_v31  ;;  %v3406_v31 = vld [vmem:[%s4475_s15] sm:$0xff] }
 0xa5c   : > { %2069 = vmatpush.bf16.msrb.mxu2 %v3406_v31 }
 0xa5d   : > { %1836 = vadd.xlane.f32.xlu0 %v1835_v3  ;;  %v4206_v3 = vld [vmem:[%s713_s21] sm:$0xf]  ;;  %s3545_s21 = scalar_lea.hbm %s3544_s23, 16 }
 0xa5e   : > { %3202 = vmatmul.msk.bf16.vlgmr.msrb.gmra.mxu1 %vm724_vm0, %v4206_v3  ;;  %p3546_p11 = scmp.ne.s32.totalorder %s3544_s23, %s3545_s21  ;;  %p3551_p1 = scmp.lt.s32.totalorder %s3549_s4, %s3545_s21 }
 0xa60   : > { %p3547_p12 = pnand %p3546_p11, %p3750_p5  ;;  %p3552_p2 = por %p3551_p1, %p3550_p0 }
 0xa62   : > { %p3548_p13 = pneg %p3547_p12 }
 0xa64   : > { %p3553_p3 = pnand %p3552_p2, %p3548_p13 }
 0xabe   : > { %v1816_v43 = vpop.xlane.xlu2 %1815 }
 0xabf   : > { %v1846_v45 = vperm.slane %v1816_v43, %v3910_v55  ;;  %v3403_v43 = vld [vmem:[%s4473_s13 + $0x8] sm:$0xff] }
 0xac0   : > { %v1822_v44 = vpop.xlane.xlu1 %1821  ;;  %v1819_v37 = vpop.xlane.xlu0 %1818  ;;  %2007 = vmatpush.bf16.msrb.mxu0 %v3403_v43 }
 0xac1   : > { %v1847_v29 = vperm.slane %v1819_v37, %v3910_v55  ;;  %v1848_v46 = vperm.slane %v1822_v44, %v3910_v55  ;;  %v3409_v44 = vld [vmem:[%s4473_s13 + $0x18] sm:$0xff] }
 0xac3   : > { %v1854_v47 = vsel %vm969_vm8, %v1847_v29, %v1846_v45  ;;  %v3402_v45 = vld [vmem:[%s4473_s13] sm:$0xff] }
 0xac4   : > { %v1855_v50 = vsel %vm971_vm9, %v1848_v46, %v1854_v47  ;;  %v3408_v46 = vld [vmem:[%s4473_s13 + $0x10] sm:$0xff]  ;;  %2008 = vmatpush.bf16.msrb.mxu0 %v3402_v45  ;;  %v2149_v45 = vld [vmem:[%s4476_s16] sm:$0xf] }
 0xac6   : > { %v1825_v36 = vpop.xlane.xlu2 %1824 }
 0xac7   : > { %v1849_v21 = vperm.slane %v1825_v36, %v3910_v55 }
 0xac8   : > { %v1828_v49 = vpop.xlane.xlu0 %1827  ;;  %v1831_v53 = vpop.xlane.xlu1 %1830 }
 0xac9   : > { %v1850_v59 = vperm.slane %v1828_v49, %v3910_v55  ;;  %v1856_v56 = vsel %vm973_vm10, %v1849_v21, %v1855_v50  ;;  %v1851_v57 = vperm.slane %v1831_v53, %v3910_v55  ;;  %vm2126_vm10 = vcmask 60416  }
 0xacb   : > { %v1857_v60 = vsel %vm975_vm11, %v1850_v59, %v1856_v56  ;;  %v3482_v56 = vld [vmem:[%s4520_s25 + $0x2] ss:$0 sm:$0xff] }
 0xacc   : > { %v1858_v63 = vsel %vm977_vm12, %v1851_v57, %v1857_v60  ;;  %v3483_v60 = vld [vmem:[%s4520_s25 + $0x3] ss:$0 sm:$0xff] }
 0xace   : > { %v1834_v62 = vpop.xlane.xlu2 %1833 }
 0xacf   : > { %v1852_v51 = vperm.slane %v1834_v62, %v3910_v55 }
 0xad0   : > { %v1837_v0 = vpop.xlane.xlu0 %1836 }
 0xad1   : > { %v1859_v1 = vsel %vm979_vm13, %v1852_v51, %v1858_v63  ;;  %v1853_v58 = vperm.slane %v1837_v0, %v3910_v55 }
 0xad3   : > { %v1860_v5 = vsel %vm981_vm14, %v1853_v58, %v1859_v1 }
 0xad4   : > { %v1878_v7 = vadd.f32 %v4106_v33, %v1860_v5  ;;  %v1926_v33 = vsel %vm1024_vm7, %v3183_v14, 0 }
 0xad5   : > { %1935 = vmatpush.bf16.msra.mxu3 %v1926_v33  ;;  %v4243_v33 = vld [vmem:[%s716_s5] ss:$0 sm:$0xff] }
 0xad6   : > { %v1883_v8 = vadd.f32 %v3181_v6, %v1878_v7 }
 0xad8   : > { %v1884_v35 = vmul.f32 0.35355338, %v1883_v8 }
 0xada   : > { %v1885_v9 = vadd.f32 %v1884_v35, %v3934_v25 }
 0xadb   : > { %v2042_v5 = vpop.f32.mrf.mxu1 }
 0xadc   : > { %v1886_v11 = vsel %vm867_vm2, %v1885_v9, -inf  ;;  %v2076_v6 = vpack.c.bf16 %v2042_v5, %v2042_v5 }
 0xadd   : > { %1887 = vmax.xlane.f32.xlu1 %v1886_v11 }
 0xade   : > { %v2081_v7 = vsel %vm867_vm2, %v2076_v6, 0 }
 0xadf   : > { %2090 = vmatpush.bf16.xpose.msrb.mxu3 %v2081_v7 }
 0xb50   : > { %v1888_v12 = vpop.xlane.xlu1 %1887 }
 0xb51   : > { %v1889_v13 = vsub.f32 %v1885_v9, %v1888_v12  ;;  %v2044_v9 = vpop.f32.mrf.mxu1 }
 0xb53   : > { %v1890_v48 = vmul.f32 1.442695, %v1889_v13 }
 0xb55   : > { %3505 = vpow2.f32 %v1890_v48 }
 0xb5b   : > { %v3506_v55 = vpop.eup %3505 }
 0xb5c   : > { %v1892_v52 = vsel %vm867_vm2, %v3506_v55, 0.0 }
 0xb5d   : > { %1893 = vadd.xlane.f32.xlu2 %v1892_v52 }
 0xbd0   : > { %v1894_v16 = vpop.xlane.xlu2 %1893 }
 0xbd1   : > { %3507 = vrcp.f32 %v1894_v16 }
 0xbd7   : > { %v3508_v25 = vpop.eup %3507 }
 0xbd8   : > { %v1896_v17 = vmul.f32 %v3508_v25, %v3506_v55 }
 0xbda   : > { %v1898_v18 = vpack.c.bf16 %v1896_v17, %v1896_v17 }
 0xbdc   : > { %3182 = vmatmul.msk.bf16.vlgmr.msra.gmra.mxu2 %vm867_vm2, %v1898_v18 }
 0xbdd   : > { %2199 = vmatpush.bf16.msra.mxu2 %v3409_v44 }
 0xbe1   : > { %2200 = vmatpush.bf16.msra.mxu2 %v3408_v46  ;;  %v3414_v46 = vld [vmem:[%s4473_s13 + $0x20] sm:$0xff] }
 0xbec   : > { %3211 = vmatmul.msk.bf16.vlgmr.msrb.gmra.mxu2 %vm724_vm0, %v4206_v3 }
 0xc5f   : > { %v1915_v19 = vpop.f32.mrf.mxu2 }
 0xc60   : > { %v1921_v20 = vpack.c.bf16 %v1915_v19, %v1915_v19 }
 0xc62   : > { %3184 = vmatmul.msk.bf16.vlgmr.msra.gmra.mxu3 %vm867_vm2, %v1921_v20  ;;  %v3411_v20 = vld [vmem:[%s4474_s14 + $0x18] sm:$0xff] }
 0xc63   : > { %2229 = vmatpush.bf16.msra.mxu3 %v3411_v20 }
 0xc67   : > { %v1917_v23 = vpop.f32.mrf.mxu2 }
 0xc6f   : > { %v2071_v8 = vpop.f32.mrf.mxu2 }
 0xc70   : > { %v2129_v35 = vpack.c.bf16 %v2071_v8, %v2071_v8 }
 0xc72   : > { %v2134_v11 = vsel %vm1024_vm7, %v2129_v35, 0 }
 0xc73   : > { %2143 = vmatpush.bf16.msra.mxu0 %v2134_v11 }
 0xc77   : > { %v2073_v12 = vpop.f32.mrf.mxu2 }
 0xce5   : > { %v1937_v26 = vpop.f32.mrf.mxu3 }
 0xce6   : > { %v1941_v27 = vadd.f32 %v1937_v26, %v1897_v24 }
 0xce8   : > { %1942 = vst.msk [vmem:[#allocation4] sm:$0xff] %vm724_vm0, %v1941_v27 }
 0xced   : > { %v1939_v61 = vpop.f32.mrf.mxu3 }
 0xcee   : > { %v3410_v61 = vld [vmem:[%s4474_s14 + $0x10] sm:$0xff] }
 0xcef   : > { %v1944_v30 = vld [vmem:[#allocation4] sm:$0xff]  ;;  %2230 = vmatpush.bf16.msra.mxu3 %v3410_v61 }
 0xcf0   : > { %v1945_v32 = vadd.f32 %v1944_v30, %v1943_v28  ;;  %1978 = vst.msk [vmem:[#allocation4] sm:$0xff] %vm724_vm0, %v3594_v54  ;;  %v3413_v30 = vld [vmem:[%s4475_s15 + $0x18] sm:$0xff] }
 0xcf2   : > { %1946 = vst.msk [vmem:[#allocation2] sm:$0xff] %vm724_vm0, %v1945_v32  ;;  %v3412_v32 = vld [vmem:[%s4475_s15 + $0x10] sm:$0xff] }
 0xcf7   : > { %v2128_v5 = vld [vmem:[#allocation4] sm:$0xff] }
 0xcf9   : > { %v4182_v34 = vld [vmem:[#allocation2] sm:$0xff] }
 0xcfa   : > { %v1950_v4 = vsel %vm724_vm0, %v4182_v34, 0.0 }
 0xcfb   : > { %1951 = vadd.xlane.f32.xlu0 %v1950_v4 }
 0xd6e   : > { %v1952_v2 = vpop.xlane.xlu0 %1951 }
 0xd6f   : > { %v1953_v15 = vmul.f32 %v1952_v2, %v3772_v10 }
 0xd71   : > { %v1954_v38 = vsub.f32 %v4182_v34, %v1953_v15 }
 0xd73   : > { %v1955_v39 = vmul.f32 %v1954_v38, %v1954_v38 }
 0xd75   : > { %v1956_v40 = vsel %vm724_vm0, %v1955_v39, 0.0 }
 0xd76   : > { %1957 = vadd.xlane.f32.xlu1 %v1956_v40 }
 0xde9   : > { %v1958_v37 = vpop.xlane.xlu1 %1957 }
 0xdea   : > { %v1959_v29 = vmul.f32 %v1958_v37, %v3772_v10  ;;  %v3415_v37 = vld [vmem:[%s4473_s13 + $0x28] sm:$0xff] }
 0xdec   : > { %v1960_v47 = vadd.f32 1e-05, %v1959_v29 }
 0xdee   : > { %3509 = vrsqrt.f32 %v1960_v47  ;;  %vm1967_vm1 = vweird.f32 %v1960_v47 }
 0xdf4   : > { %v3510_v36 = vpop.eup %3509 }
 0xdf5   : > { %v1962_v21 = vmul.f32 %v3510_v36, %v1960_v47  ;;  %vm1968_vm15 = vweird.f32 %v3510_v36  ;;  %v2155_v47 = vsel %vm1024_vm7, %v2149_v45, 0 }
 0xdf6   : > { %vm1969_vm3 = vmor %vm1967_vm1, %vm1968_vm15  ;;  %2164 = vmatpush.bf16.msra.mxu1 %v2155_v47 }
 0xdf7   : > { %v1963_v49 = vmul.f32 %v3510_v36, %v1962_v21 }
 0xdf9   : > { %v1964_v50 = vmul.f32 0.5, %v1963_v49 }
 0xdfb   : > { %v1965_v53 = vsub.f32 1.5, %v1964_v50 }
 0xdfd   : > { %v1966_v59 = vmul.f32 %v3510_v36, %v1965_v53 }
 0xdff   : > { %v1970_v57 = vsel %vm1969_vm3, %v3510_v36, %v1966_v59 }
 0xe00   : > { %v1971_v62 = vmul.f32 %v1970_v57, %v1954_v38 }
 0xe02   : > { %v1973_v51 = vmul.f32 %v3482_v56, %v1971_v62 }
 0xe04   : > { %v1975_v63 = vadd.f32 %v3483_v60, %v1973_v51 }
 0xe06   : > { %v1976_v0 = vpack.c.bf16 %v1975_v63, %v1975_v63 }
 0xe08   : > { %1977 = vst.msk [vmem:[#allocation3] sm:$0xf] %vm763_vm6, %v1976_v0 }
 0xe0f   : > { %v1981_v1 = vld [vmem:[#allocation3] sm:$0xf] }
 0xe10   : > { %v2172_v58 = vld [vmem:[#allocation3] sm:$0xf]  ;;  %3193 = vmatmul.msk.bf16.vlgmr.msrb.gmra.mxu0 %vm724_vm0, %v1981_v1 }
 0xe11   : > { %3227 = vmatmul.msk.bf16.vlgmr.msra.gmra.mxu2 %vm724_vm0, %v2172_v58  ;;  %2259 = vmatpush.bf16.msrb.mxu0 %v3413_v30  ;;  %v2361_v36 = vld [vmem:[#allocation3] sm:$0xf] }
 0xe15   : > { %2260 = vmatpush.bf16.msrb.mxu0 %v3412_v32 }
 0xe8d   : > { %v2010_v13 = vpop.f32.mrf.mxu0 }
 0xe8e   : > { %v2075_v48 = vpack.c.bf16 %v2010_v13, %v2010_v13 }
 0xe90   : > { %3212 = vmatmul.msk.bf16.vlgmr.msrb.gmra.mxu3 %vm867_vm2, %v2075_v48 }
 0xe94   : > { %v4237_v55 = vpop.f32.mrf.mxu2 }
 0xe95   : > { %v2012_v52 = vpop.f32.mrf.mxu0  ;;  %v2266_v62 = vpack.c.bf16 %v4237_v55, %v4237_v55 }
 0xe9c   : > { %v2204_v14 = vpop.f32.mrf.mxu2 }
 0xea0   : > { %3240 = vmatmul.msk.bf16.vlgmr.msra.gmra.mxu3 %vm724_vm0, %v4206_v3 }
 0xf13   : > { %v2092_v16 = vpop.f32.mrf.mxu3 }
 0xf14   : > { %v2096_v25 = vmul.f32 0.35355338, %v2092_v16 }
 0xf16   : > { %v2100_v17 = vadd.f32 %v4243_v33, %v2096_v25  ;;  %v3417_v25 = vld [vmem:[%s4474_s14 + $0x28] sm:$0xff] }
 0xf18   : > { %v2101_v18 = vsel %vm867_vm2, %v2100_v17, -inf }
 0xf19   : > { %2102 = vmax.xlane.f32.xlu2 %v2101_v18  ;;  %v3419_v18 = vld [vmem:[%s4475_s15 + $0x28] sm:$0xff] }
 0xf1b   : > { %v2094_v19 = vpop.f32.mrf.mxu3 }
 0xf1c   : > { %v3418_v19 = vld [vmem:[%s4475_s15 + $0x20] sm:$0xff] }
 0xf23   : > { %v2232_v21 = vpop.f32.mrf.mxu3 }
 0xf24   : > { %v2267_v49 = vpack.c.bf16 %v2232_v21, %v2232_v21 }
 0xf26   : > { %v2272_v50 = vsel %vm867_vm2, %v2267_v49, 0 }
 0xf27   : > { %2281 = vmatpush.bf16.xpose.msrb.mxu1 %v2272_v50 }
 0xf2b   : > { %v2234_v53 = vpop.f32.mrf.mxu3 }
 0xf8c   : > { %v2103_v23 = vpop.xlane.xlu2 %2102 }
 0xf8d   : > { %v2104_v24 = vsub.f32 %v2100_v17, %v2103_v23  ;;  %v3416_v17 = vld [vmem:[%s4474_s14 + $0x20] sm:$0xff] }
 0xf8f   : > { %v2105_v26 = vmul.f32 1.442695, %v2104_v24 }
 0xf91   : > { %3511 = vpow2.f32 %v2105_v26 }
 0xf97   : > { %v3512_v27 = vpop.eup %3511 }
 0xf98   : > { %v2107_v28 = vsel %vm867_vm2, %v3512_v27, 0.0 }
 0xf99   : > { %2108 = vadd.xlane.f32.xlu0 %v2107_v28 }
0x100c   : > { %v2109_v4 = vpop.xlane.xlu0 %2108 }
0x100d   : > { %3513 = vrcp.f32 %v2109_v4  ;;  %v2121_v39 = vand.u32 2147483648, %v2109_v4  ;;  %v2119_v41 = vand.u32 2147483647, %v2109_v4  ;;  %vm2115_vm5 = vweird.f32 %v2109_v4 }
0x100f   : > { %v2122_v22 = vor.u32 1.1754944e-38, %v2121_v39  ;;  %vm2120_vm9 = vcmp.eq.f32.partialorder %v2119_v41, 8.507059e+37  ;;  %v3420_v41 = vld [vmem:[%s4473_s13 + $0x30] sm:$0xff] }
0x1013   : > { %v3514_v2 = vpop.eup %3513 }
0x1014   : > { %v2111_v15 = vmul.f32 %v3514_v2, %v2109_v4  ;;  %vm2116_vm4 = vweird.f32 %v3514_v2 }
0x1015   : > { %vm2117_vm8 = vmor %vm2115_vm5, %vm2116_vm4 }
0x1016   : > { %v2112_v38 = vsub.f32 1.0, %v2111_v15 }
0x1018   : > { %v2113_v40 = vmul.f32 %v3514_v2, %v2112_v38  ;;  %v3421_v38 = vld [vmem:[%s4473_s13 + $0x38] sm:$0xff] }
0x101a   : > { %v2114_v42 = vadd.f32 %v3514_v2, %v2113_v40  ;;  %v3257_v40 = vld [vmem:[%s4476_s16 + $0x4] sm:$0xf] }
0x101c   : > { %v2118_v31 = vsel %vm2117_vm8, %v3514_v2, %v2114_v42  ;;  %v2344_v42 = vsel %vm1024_vm7, %v3257_v40, 0 }
0x101d   : > { %v2123_v43 = vsel %vm2120_vm9, %v2122_v22, %v2118_v31  ;;  %2353 = vmatpush.bf16.msrb.mxu3 %v2344_v42  ;;  %v2550_v22 = vld [vmem:[#allocation3] sm:$0xf] }
0x101e   : > { %v2124_v44 = vmul.f32 %v3512_v27, %v2123_v43 }
0x1020   : > { %v2125_v29 = vpack.c.bf16 %v2124_v44, %v2124_v44 }
0x1022   : > { %2127 = vst.msk [vmem:[%s4268_s7] sm:$0xf] %vm2126_vm10, %v2125_v29  ;;  %3213 = vmatmul.msk.bf16.vlgmr.msra.gmra.mxu0 %vm867_vm2, %v2125_v29 }
0x1023   : > { %2388 = vmatpush.bf16.msra.mxu0 %v3415_v37 }
0x1027   : > { %2389 = vmatpush.bf16.msra.mxu0 %v3414_v46 }
0x1032   : > { %3253 = vmatmul.msk.bf16.vlgmr.msrb.gmra.mxu0 %vm724_vm0, %v4206_v3 }
0x1042   : > { %3271 = vmatmul.msk.bf16.vlgmr.msra.gmra.mxu0 %vm724_vm0, %v2361_v36 }
0x109f   : > { %v2145_v59 = vpop.f32.mrf.mxu0 }
0x10a0   : > { %v2150_v56 = vpack.c.bf16 %v2145_v59, %v2145_v59 }
0x10a2   : > { %3214 = vmatmul.msk.bf16.vlgmr.msra.gmra.mxu1 %vm867_vm2, %v2150_v56 }
0x10a3   : > { %2418 = vmatpush.bf16.msra.mxu1 %v3417_v25 }
0x10a7   : > { %v2147_v57 = vpop.f32.mrf.mxu0  ;;  %2419 = vmatpush.bf16.msra.mxu1 %v3416_v17 }
0x10af   : > { %v2262_v60 = vpop.f32.mrf.mxu0 }
0x10b0   : > { %v2317_v51 = vpack.c.bf16 %v2262_v60, %v2262_v60 }
0x10b2   : > { %v2322_v63 = vsel %vm1024_vm7, %v2317_v51, 0  ;;  %3254 = vmatmul.msk.bf16.vlgmr.msrb.gmra.mxu1 %vm867_vm2, %v2266_v62 }
0x10b3   : > { %2331 = vmatpush.bf16.msrb.mxu2 %v2322_v63 }
0x10b7   : > { %v2264_v0 = vpop.f32.mrf.mxu0  ;;  %2448 = vmatpush.bf16.msra.mxu2 %v3419_v18 }
0x10bb   : > { %2449 = vmatpush.bf16.msra.mxu2 %v3418_v19 }
0x10bf   : > { %v4289_v1 = vpop.f32.mrf.mxu0 }
0x10c0   : > { %v2455_v36 = vpack.c.bf16 %v4289_v1, %v4289_v1 }
0x10c2   : > { %3284 = vmatmul.msk.bf16.vlgmr.msra.gmra.mxu1 %vm724_vm0, %v4206_v3 }
0x10c7   : > { %v2393_v58 = vpop.f32.mrf.mxu0 }
0x111f   : > { %v2166_v6 = vpop.f32.mrf.mxu1 }
0x1120   : > { %v2170_v7 = vadd.f32 %v2166_v6, %v2128_v5  ;;  %v3423_v5 = vld [vmem:[%s4474_s14 + $0x38] sm:$0xff] }
0x1122   : > { %2171 = vst.msk [vmem:[#allocation4] sm:$0xff] %vm724_vm0, %v2170_v7 }
0x1127   : > { %v2168_v8 = vpop.f32.mrf.mxu1 }
0x1129   : > { %v2316_v56 = vld [vmem:[#allocation4] sm:$0xff] }
0x112f   : > { %v2283_v35 = vpop.f32.mrf.mxu1 }
0x1130   : > { %v2287_v9 = vmul.f32 0.35355338, %v2283_v35 }
0x1132   : > { %v2288_v11 = vadd.f32 %v4243_v33, %v2287_v9 }
0x1134   : > { %v2289_v12 = vsel %vm867_vm2, %v2288_v11, -inf }
0x1135   : > { %2290 = vmax.xlane.f32.xlu1 %v2289_v12  ;;  %v3301_v12 = vld [vmem:[%s4476_s16 + $0x8] sm:$0xf] }
0x1137   : > { %v2285_v13 = vpop.f32.mrf.mxu1 }
0x1138   : > { %v2533_v13 = vsel %vm1024_vm7, %v3301_v12, 0 }
0x1139   : > { %2542 = vmatpush.bf16.msrb.mxu1 %v2533_v13 }
0x113f   : > { %v2421_v31 = vpop.f32.mrf.mxu1 }
0x1140   : > { %v2456_v43 = vpack.c.bf16 %v2421_v31, %v2421_v31 }
0x1142   : > { %v2461_v44 = vsel %vm867_vm2, %v2456_v43, 0 }
0x1143   : > { %2470 = vmatpush.bf16.xpose.msra.mxu3 %v2461_v44 }
0x1147   : > { %v2423_v37 = vpop.f32.mrf.mxu1 }
0x11a8   : > { %v2291_v48 = vpop.xlane.xlu1 %2290 }
0x11a9   : > { %v2292_v55 = vsub.f32 %v2288_v11, %v2291_v48  ;;  %v3422_v11 = vld [vmem:[%s4474_s14 + $0x30] sm:$0xff] }
0x11ab   : > { %v2293_v52 = vmul.f32 1.442695, %v2292_v55 }
0x11ad   : > { %3515 = vpow2.f32 %v2293_v52 }
0x11b3   : > { %v3516_v14 = vpop.eup %3515 }
0x11b4   : > { %v2295_v16 = vsel %vm867_vm2, %v3516_v14, 0.0 }
0x11b5   : > { %2296 = vadd.xlane.f32.xlu2 %v2295_v16 }
0x1228   : > { %v2297_v20 = vpop.xlane.xlu2 %2296 }
0x1229   : > { %3517 = vrcp.f32 %v2297_v20  ;;  %v2309_v27 = vand.u32 2147483648, %v2297_v20  ;;  %v2307_v61 = vand.u32 2147483647, %v2297_v20  ;;  %vm2303_vm12 = vweird.f32 %v2297_v20 }
0x122b   : > { %v2310_v32 = vor.u32 1.1754944e-38, %v2309_v27  ;;  %vm2308_vm14 = vcmp.eq.f32.partialorder %v2307_v61, 8.507059e+37 }
0x122f   : > { %v3518_v23 = vpop.eup %3517 }
0x1230   : > { %v2299_v24 = vmul.f32 %v3518_v23, %v2297_v20  ;;  %vm2304_vm11 = vweird.f32 %v3518_v23 }
0x1231   : > { %vm2305_vm13 = vmor %vm2303_vm12, %vm2304_vm11  ;;  %vm2847_vm12 = vcmask 523264  }
0x1232   : > { %v2300_v26 = vsub.f32 1.0, %v2299_v24 }
0x1234   : > { %v2301_v28 = vmul.f32 %v3518_v23, %v2300_v26 }
0x1236   : > { %v2302_v30 = vadd.f32 %v3518_v23, %v2301_v28 }
0x1238   : > { %v2306_v4 = vsel %vm2305_vm13, %v3518_v23, %v2302_v30 }
0x1239   : > { %v2311_v2 = vsel %vm2308_vm14, %v2310_v32, %v2306_v4 }
0x123a   : > { %v2312_v15 = vmul.f32 %v3516_v14, %v2311_v2 }
0x123c   : > { %v2313_v39 = vpack.c.bf16 %v2312_v15, %v2312_v15 }
0x123e   : > { %3255 = vst.msk [vmem:[%s4268_s7 + $0x4] sm:$0xf] %vm2126_vm10, %v2313_v39  ;;  %3256 = vmatmul.msk.bf16.vlgmr.msrb.gmra.mxu2 %vm867_vm2, %v2313_v39  ;;  %v3424_v39 = vld [vmem:[%s4475_s15 + $0x30] sm:$0xff] }
0x123f   : > { %2577 = vmatpush.bf16.msrb.mxu2 %v3421_v38  ;;  %v3425_v38 = vld [vmem:[%s4475_s15 + $0x38] sm:$0xff] }
0x1243   : > { %2578 = vmatpush.bf16.msrb.mxu2 %v3420_v41 }
0x124e   : > { %3297 = vmatmul.msk.bf16.vlgmr.msra.gmra.mxu2 %vm724_vm0, %v4206_v3 }
0x125e   : > { %3315 = vmatmul.msk.bf16.vlgmr.msrb.gmra.mxu2 %vm724_vm0, %v2550_v22 }
0x12c1   : > { %v2333_v29 = vpop.f32.mrf.mxu2 }
0x12c2   : > { %v2339_v45 = vpack.c.bf16 %v2333_v29, %v2333_v29 }
0x12c4   : > { %3258 = vmatmul.msk.bf16.vlgmr.msrb.gmra.mxu3 %vm867_vm2, %v2339_v45 }
0x12c5   : > { %2607 = vmatpush.bf16.msrb.mxu3 %v3423_v5 }
0x12c9   : > { %v2335_v46 = vpop.f32.mrf.mxu2  ;;  %2608 = vmatpush.bf16.msrb.mxu3 %v3422_v11 }
0x12d1   : > { %v2451_v47 = vpop.f32.mrf.mxu2 }
0x12d2   : > { %v2506_v21 = vpack.c.bf16 %v2451_v47, %v2451_v47 }
0x12d4   : > { %v2511_v49 = vsel %vm1024_vm7, %v2506_v21, 0  ;;  %3298 = vmatmul.msk.bf16.vlgmr.msra.gmra.mxu3 %vm867_vm2, %v2455_v36 }
0x12d5   : > { %2520 = vmatpush.bf16.msrb.mxu0 %v2511_v49 }
0x12d9   : > { %v2453_v50 = vpop.f32.mrf.mxu2  ;;  %2637 = vmatpush.bf16.msra.mxu0 %v3425_v38 }
0x12dd   : > { %2638 = vmatpush.bf16.msra.mxu0 %v3424_v39  ;;  %v3485_v39 = vld [vmem:[%s4520_s25 + $0x4] ss:$0 sm:$0xff] }
0x12e1   : > { %v2580_v53 = vpop.f32.mrf.mxu2 }
0x12e2   : > { %v2644_v15 = vpack.c.bf16 %v2580_v53, %v2580_v53 }
0x12e4   : > { %3328 = vmatmul.msk.bf16.vlgmr.msrb.gmra.mxu3 %vm724_vm0, %v4206_v3 }
0x12e9   : > { %v2582_v59 = vpop.f32.mrf.mxu2 }
0x1347   : > { %v2355_v57 = vpop.f32.mrf.mxu3 }
0x1348   : > { %v2359_v60 = vadd.f32 %v2355_v57, %v2316_v56 }
0x134a   : > { %2360 = vst.msk [vmem:[#allocation4] sm:$0xff] %vm724_vm0, %v2359_v60 }
0x134f   : > { %v2357_v62 = vpop.f32.mrf.mxu3 }
0x1351   : > { %v2505_v40 = vld [vmem:[#allocation4] sm:$0xff] }
0x1357   : > { %v2472_v51 = vpop.f32.mrf.mxu3 }
0x1358   : > { %v2476_v63 = vmul.f32 0.35355338, %v2472_v51 }
0x135a   : > { %v2477_v0 = vadd.f32 %v4243_v33, %v2476_v63 }
0x135c   : > { %v2478_v1 = vsel %vm867_vm2, %v2477_v0, -inf }
0x135d   : > { %2479 = vmax.xlane.f32.xlu0 %v2478_v1 }
0x135f   : > { %v2474_v58 = vpop.f32.mrf.mxu3 }
0x1367   : > { %v2610_v27 = vpop.f32.mrf.mxu3 }
0x1368   : > { %v2645_v28 = vpack.c.bf16 %v2610_v27, %v2610_v27 }
0x136a   : > { %v2650_v61 = vsel %vm867_vm2, %v2645_v28, 0  ;;  %v3431_v28 = vld [vmem:[%s4479_s19 + $0x18] sm:$0xff] }
0x136b   : > { %2659 = vmatpush.bf16.xpose.msra.mxu1 %v2650_v61  ;;  %v3430_v61 = vld [vmem:[%s4479_s19 + $0x10] sm:$0xff] }
0x136f   : > { %v2612_v30 = vpop.f32.mrf.mxu3 }
0x13d0   : > { %v2480_v6 = vpop.xlane.xlu0 %2479 }
0x13d1   : > { %v2481_v7 = vsub.f32 %v2477_v0, %v2480_v6 }
0x13d3   : > { %v2482_v8 = vmul.f32 1.442695, %v2481_v7 }
0x13d5   : > { %3519 = vpow2.f32 %v2482_v8 }
0x13db   : > { %v3520_v35 = vpop.eup %3519 }
0x13dc   : > { %v2484_v9 = vsel %vm867_vm2, %v3520_v35, 0.0 }
0x13dd   : > { %2485 = vadd.xlane.f32.xlu1 %v2484_v9 }
0x1450   : > { %v2486_v48 = vpop.xlane.xlu1 %2485 }
0x1451   : > { %3521 = vrcp.f32 %v2486_v48  ;;  %v2498_v16 = vand.u32 2147483648, %v2486_v48  ;;  %v2496_v17 = vand.u32 2147483647, %v2486_v48  ;;  %vm2492_vm1 = vweird.f32 %v2486_v48 }
0x1453   : > { %v2499_v19 = vor.u32 1.1754944e-38, %v2498_v16  ;;  %vm2497_vm4 = vcmp.eq.f32.partialorder %v2496_v17, 8.507059e+37 }
0x1457   : > { %v3522_v55 = vpop.eup %3521 }
0x1458   : > { %v2488_v52 = vmul.f32 %v3522_v55, %v2486_v48  ;;  %vm2493_vm15 = vweird.f32 %v3522_v55 }
0x1459   : > { %vm2494_vm3 = vmor %vm2492_vm1, %vm2493_vm15 }
0x145a   : > { %v2489_v14 = vsub.f32 1.0, %v2488_v52 }
0x145c   : > { %v2490_v25 = vmul.f32 %v3522_v55, %v2489_v14 }
0x145e   : > { %v2491_v18 = vadd.f32 %v3522_v55, %v2490_v25 }
0x1460   : > { %v2495_v20 = vsel %vm2494_vm3, %v3522_v55, %v2491_v18 }
0x1461   : > { %v2500_v23 = vsel %vm2497_vm4, %v2499_v19, %v2495_v20 }
0x1462   : > { %v2501_v24 = vmul.f32 %v3520_v35, %v2500_v23 }
0x1464   : > { %v2502_v26 = vpack.c.bf16 %v2501_v24, %v2501_v24 }
0x1466   : > { %3299 = vst.msk [vmem:[%s4268_s7 + $0x8] sm:$0xf] %vm2126_vm10, %v2502_v26  ;;  %3300 = vmatmul.msk.bf16.vlgmr.msrb.gmra.mxu0 %vm867_vm2, %v2502_v26  ;;  %v3426_v26 = vld [vmem:[%s4477_s17] sm:$0xff] }
0x1476   : > { %3341 = vmatmul.msk.bf16.vlgmr.msra.gmra.mxu0 %vm724_vm0, %v4206_v3 }
0x14e3   : > { %v2522_v32 = vpop.f32.mrf.mxu0 }
0x14e4   : > { %v2528_v4 = vpack.c.bf16 %v2522_v32, %v2522_v32 }
0x14e6   : > { %3302 = vmatmul.msk.bf16.vlgmr.msrb.gmra.mxu1 %vm867_vm2, %v2528_v4 }
0x14e7   : > { %2855 = vmatpush.bf16.msrb.mxu1 %v3431_v28 }
0x14eb   : > { %v2524_v2 = vpop.f32.mrf.mxu0  ;;  %2856 = vmatpush.bf16.msrb.mxu1 %v3430_v61 }
0x14f3   : > { %v2640_v45 = vpop.f32.mrf.mxu0 }
0x14f4   : > { %v2695_v46 = vpack.c.bf16 %v2640_v45, %v2640_v45 }
0x14f6   : > { %3342 = vmatmul.msk.bf16.vlgmr.msra.gmra.mxu1 %vm867_vm2, %v2644_v15  ;;  %v2700_v47 = vsel %vm1024_vm7, %v2695_v46, 0 }
0x14f7   : > { %2709 = vmatpush.bf16.msra.mxu2 %v2700_v47 }
0x14fb   : > { %v2642_v36 = vpop.f32.mrf.mxu0 }
0x1563   : > { %v2544_v41 = vpop.f32.mrf.mxu1 }
0x1564   : > { %v2548_v42 = vadd.f32 %v2544_v41, %v2505_v40  ;;  %v3486_v41 = vld [vmem:[%s4520_s25 + $0x5] ss:$0 sm:$0xff] }
0x1566   : > { %2549 = vst.msk [vmem:[#allocation4] sm:$0xff] %vm724_vm0, %v2548_v42 }
0x156b   : > { %v2546_v22 = vpop.f32.mrf.mxu1 }
0x156d   : > { %v2694_v12 = vld [vmem:[#allocation4] sm:$0xff] }
0x1573   : > { %v2661_v31 = vpop.f32.mrf.mxu1 }
0x1574   : > { %v2665_v43 = vmul.f32 0.35355338, %v2661_v31 }
0x1576   : > { %v2666_v44 = vadd.f32 %v4243_v33, %v2665_v43  ;;  %v3345_v33 = vld [vmem:[%s4476_s16 + $0xc] sm:$0xf] }
0x1577   : > { %v2722_v59 = vsel %vm1024_vm7, %v3345_v33, 0 }
0x1578   : > { %v2667_v37 = vsel %vm867_vm2, %v2666_v44, -inf  ;;  %2731 = vmatpush.bf16.msra.mxu3 %v2722_v59 }
0x1579   : > { %2668 = vmax.xlane.f32.xlu2 %v2667_v37  ;;  %v3428_v37 = vld [vmem:[%s4479_s19] sm:$0xff] }
0x157b   : > { %v2663_v29 = vpop.f32.mrf.mxu1 }
0x157c   : > { %v3487_v29 = vld [vmem:[%s4478_s18] ss:$0 sm:$0xff] }
0x15ec   : > { %v2669_v21 = vpop.xlane.xlu2 %2668 }
0x15ed   : > { %v2670_v49 = vsub.f32 %v2666_v44, %v2669_v21 }
0x15ef   : > { %v2671_v3 = vmul.f32 1.442695, %v2670_v49 }
0x15f1   : > { %3523 = vpow2.f32 %v2671_v3 }
0x15f7   : > { %v3524_v50 = vpop.eup %3523 }
0x15f8   : > { %v2673_v53 = vsel %vm867_vm2, %v3524_v50, 0.0 }
0x15f9   : > { %2674 = vadd.xlane.f32.xlu0 %v2673_v53 }
0x166c   : > { %v2675_v56 = vpop.xlane.xlu0 %2674 }
0x166d   : > { %3525 = vrcp.f32 %v2675_v56  ;;  %v2687_v51 = vand.u32 2147483648, %v2675_v56  ;;  %v2685_v0 = vand.u32 2147483647, %v2675_v56  ;;  %vm2681_vm8 = vweird.f32 %v2675_v56 }
0x166f   : > { %v2688_v58 = vor.u32 1.1754944e-38, %v2687_v51  ;;  %vm2686_vm11 = vcmp.eq.f32.partialorder %v2685_v0, 8.507059e+37 }
0x1673   : > { %v3526_v57 = vpop.eup %3525 }
0x1674   : > { %v2677_v60 = vmul.f32 %v3526_v57, %v2675_v56  ;;  %vm2682_vm5 = vweird.f32 %v3526_v57 }
0x1675   : > { %vm2683_vm9 = vmor %vm2681_vm8, %vm2682_vm5 }
0x1676   : > { %v2678_v62 = vsub.f32 1.0, %v2677_v60 }
0x1678   : > { %v2679_v63 = vmul.f32 %v3526_v57, %v2678_v62 }
0x167a   : > { %v2680_v1 = vadd.f32 %v3526_v57, %v2679_v63 }
0x167c   : > { %v2684_v5 = vsel %vm2683_vm9, %v3526_v57, %v2680_v1 }
0x167d   : > { %v2689_v6 = vsel %vm2686_vm11, %v2688_v58, %v2684_v5 }
0x167e   : > { %v2690_v7 = vmul.f32 %v3524_v50, %v2689_v6 }
0x1680   : > { %v2691_v8 = vpack.c.bf16 %v2690_v7, %v2690_v7 }
0x1682   : > { %3343 = vst.msk [vmem:[%s4268_s7 + $0xc] sm:$0xf] %vm2126_vm10, %v2691_v8  ;;  %3344 = vmatmul.msk.bf16.vlgmr.msra.gmra.mxu2 %vm867_vm2, %v2691_v8 }
0x1705   : > { %v2711_v35 = vpop.f32.mrf.mxu2 }
0x1706   : > { %v2717_v9 = vpack.c.bf16 %v2711_v35, %v2711_v35 }
0x1708   : > { %3346 = vmatmul.msk.bf16.vlgmr.msra.gmra.mxu3 %vm867_vm2, %v2717_v9 }
0x170d   : > { %v2713_v11 = vpop.f32.mrf.mxu2 }
0x178b   : > { %v2733_v13 = vpop.f32.mrf.mxu3 }
0x178c   : > { %v2737_v48 = vadd.f32 %v2733_v13, %v2694_v12 }
0x178e   : > { %2738 = vst.msk [vmem:[#allocation4] sm:$0xff] %vm724_vm0, %v2737_v48 }
0x1793   : > { %v2735_v55 = vpop.f32.mrf.mxu3 }
0x1795   : > { %v2740_v52 = vld [vmem:[#allocation4] sm:$0xff] }
0x1796   : > { %v2741_v14 = vadd.f32 %v2740_v52, %v4182_v34  ;;  %2774 = vst.msk [vmem:[#allocation4] sm:$0xff] %vm724_vm0, %v3594_v54  ;;  %v3427_v54 = vld [vmem:[%s4477_s17 + $0x8] sm:$0xff] }
0x1797   : > { %2805 = vmatpush.bf16.msrb.mxu0 %v3427_v54 }
0x1798   : > { %2742 = vst.msk [vmem:[#allocation2] sm:$0xff] %vm724_vm0, %v2741_v14 }
0x179b   : > { %2806 = vmatpush.bf16.msrb.mxu0 %v3426_v26 }
0x179f   : > { %v4379_v16 = vld [vmem:[#allocation2] sm:$0xff] }
0x17a0   : > { %v2746_v25 = vsel %vm724_vm0, %v4379_v16, 0.0 }
0x17a1   : > { %2747 = vadd.xlane.f32.xlu1 %v2746_v25 }
0x1814   : > { %v2748_v17 = vpop.xlane.xlu1 %2747 }
0x1815   : > { %v2749_v18 = vmul.f32 %v2748_v17, %v3772_v10 }
0x1817   : > { %v2750_v19 = vsub.f32 %v4379_v16, %v2749_v18 }
0x1819   : > { %v2751_v20 = vmul.f32 %v2750_v19, %v2750_v19 }
0x181b   : > { %v2752_v23 = vsel %vm724_vm0, %v2751_v20, 0.0 }
0x181c   : > { %2753 = vadd.xlane.f32.xlu2 %v2752_v23 }
0x188f   : > { %v2754_v34 = vpop.xlane.xlu2 %2753 }
0x1890   : > { %v2755_v24 = vmul.f32 %v2754_v34, %v3772_v10  ;;  %v3429_v10 = vld [vmem:[%s4479_s19 + $0x8] sm:$0xff] }
0x1891   : > { %2857 = vmatpush.bf16.msrb.mxu1 %v3429_v10 }
0x1892   : > { %v2756_v27 = vadd.f32 1e-05, %v2755_v24 }
0x1894   : > { %3527 = vrsqrt.f32 %v2756_v27  ;;  %vm2763_vm7 = vweird.f32 %v2756_v27 }
0x1895   : > { %2858 = vmatpush.bf16.msrb.mxu1 %v3428_v37 }
0x189a   : > { %v3528_v30 = vpop.eup %3527 }
0x189b   : > { %v2758_v32 = vmul.f32 %v3528_v30, %v2756_v27  ;;  %vm2764_vm2 = vweird.f32 %v3528_v30 }
0x189c   : > { %vm2765_vm10 = vmor %vm2763_vm7, %vm2764_vm2 }
0x189d   : > { %v2759_v4 = vmul.f32 %v3528_v30, %v2758_v32 }
0x189f   : > { %v2760_v2 = vmul.f32 0.5, %v2759_v4 }
0x18a1   : > { %v2761_v15 = vsub.f32 1.5, %v2760_v2 }
0x18a3   : > { %v2762_v38 = vmul.f32 %v3528_v30, %v2761_v15 }
0x18a5   : > { %v2766_v40 = vsel %vm2765_vm10, %v3528_v30, %v2762_v38 }
0x18a6   : > { %v2767_v42 = vmul.f32 %v2766_v40, %v2750_v19 }
0x18a8   : > { %v2769_v22 = vmul.f32 %v3485_v39, %v2767_v42 }
0x18aa   : > { %v2771_v31 = vadd.f32 %v3486_v41, %v2769_v22 }
0x18ac   : > { %v2772_v43 = vpack.c.bf16 %v2771_v31, %v2771_v31 }
0x18ae   : > { %2773 = vst.msk [vmem:[#allocation3] sm:$0xf] %vm763_vm6, %v2772_v43 }
0x18b5   : > { %v2775_v44 = vld [vmem:[#allocation3] sm:$0xf] }
0x18b6   : > { %3355 = vmatmul.msk.bf16.vlgmr.msrb.gmra.mxu0 %vm724_vm0, %v2775_v44 }
0x1933   : > { %v2808_v45 = vpop.f32.mrf.mxu0 }
0x1934   : > { %v2809_v46 = vadd.f32 %v3487_v29, %v2808_v45 }
0x1936   : > { %v2812_v47 = vmax.f32 %v2809_v46, 0.0 }
0x1938   : > { %v2822_v36 = vpack.c.bf16 %v2812_v47, %v2812_v47 }
0x193a   : > { %3372 = vmatmul.msk.bf16.vlgmr.msrb.gmra.mxu1 %vm2847_vm12, %v2822_v36 }
0x193b   : > { %v2810_v21 = vpop.f32.mrf.mxu0 }
0x193c   : > { %3556 = shalt.err (!%p3553_p3)
}
0x193d   : > { %s3595_s3 = smov 64   ;;  %s3596_s7 = smov 4   ;;  %v2813_v49 = vld [vmem:[#allocation4] sm:$0xff]  ;;  %v3488_v33 = vld [vmem:[%s4480_s20] ss:$0 sm:$0xff] }
0x193e   : > { %3433 = dma.vmem_to_hbm [thread:$0]  (%p3750_p5), %s2896_s2, 256, %s2898_s27, %s2880_s29, %s3595_s3, %s3595_s3, %s3596_s7  }
0x193f   : > { %s3012_s9 = sshll.u32 %s3762_s26, 3  ;;  %s4527_s23 = sld [smem:[#allocation25_spill]] }
0x1945   : > { %s720_s21 = scalar_lea.vmem %s4527_s23, %s3012_s9 }
0x19b7   : > { %v2860_v3 = vpop.f32.mrf.mxu1 }
0x19b8   : > { %v2864_v50 = vadd.f32 %v2860_v3, %v2813_v49 }
0x19ba   : > { %2865 = vst.msk [vmem:[#allocation4] sm:$0xff] %vm724_vm0, %v2864_v50 }
0x19bf   : > { %v2862_v53 = vpop.f32.mrf.mxu1 }
0x19c1   : > { %v2867_v59 = vld [vmem:[#allocation4] sm:$0xff] }
0x19c2   : > { %v2868_v56 = vadd.f32 %v2867_v59, %v4379_v16 }
0x19c4   : > { %v2873_v57 = vadd.f32 %v3488_v33, %v2868_v56 }
0x19c6   : > { %2874 = vst.msk [vmem:[%s720_s21] sm:$0xff] %vm724_vm0, %v2873_v57 }
0x19c7 PF: > { %s4528_s6 = sld [smem:[#allocation10_spill]] }
0x19c8   : > { %s4529_s2 = sld [smem:[#allocation8_spill]] }
0x19cd   : > { %p3439_p4 = scmp.ge.s32.totalorder %s4528_s6, 2 }
0x19ce   : > { %s2919_s26 = sand.u32 1, %s4529_s2  }
0x19cf   : > { %p3436_p5 = pnand %p3439_p4, %p3754_p6  ;;  %s2920_s29 = scalar_lea.sflag [#allocation6], %s2919_s26 }
0x19d1   : > { %p3437_p7 = pneg %p3436_p5 }
0x19d3   : > { %3574 = dma.done.wait (%p3437_p7), %s2920_s29, 256  }
0x19d4   : > { %3576 = vsyncadd (%p3437_p7), %s2920_s29, 4294967040  ;;  %s4531_s30 = sld [smem:[#allocation11_spill]]  ;;  %s4534_s3 = smov %s3583_s28 }
0x19d5   : > { %s4532_s4 = sld [smem:[#allocation9_spill]] }
0x19d6   : > { %s4533_s29 = sld [smem:[#allocation12_spill]] }
0x19da   : > { %p33_p8 = scmp.ge.s32.totalorder %s4531_s30, 4  }
0x19db   : > { %s4535_s28 = smov %s4532_s4 }
0x19dc   :  { %35 = sbr.rel (!%p33_p8) target bundleno = 16 (0x10), region = 193 }
0x19e1   :  { %2926 = vsyncpa [#allocation6], 1 }
0x19e2   :  { %2928 = vsyncpa [#allocation6 + $0x1], 1 }

</bundles_post_ra>
